<compile_context>
chip_gen: v5e
topology: v5e:2x2
jax: 0.10.0
libtpu: 0.0.40
codegen_flags: <defaults>
</compile_context>

<pallas_src>
import functools

import jax
import jax.numpy as jnp
from jax.experimental import pallas as pl
from jax.experimental.pallas import tpu as pltpu


NEG_SLOPE = 0.2        # GATConv default negative_slope
MASK_VAL = -1e30       # additive mask for non-edges
TILE = 128             # node tile (dst and src), multiple of 8/128


# ---------------------------------------------------------------------------
# Kernel 1: fused per-node projection + attention logits
# ---------------------------------------------------------------------------
def gat_project_kernel(x_ref, w_ref, csrc_t_ref, cdst_ref,
                       feat_ref, asrc_t_ref, adst_ref):
    """x tile -> lane-dense projected features + per-head attention logits.

    x_ref      [Tn, F_in]  f32   node features (tile)
    w_ref      [F_in, H*C] bf16  all heads stacked on lanes
    csrc_t_ref [H, F_in]   f32   c_src[h] = W_h @ a_src[h]
    cdst_ref   [F_in, H]   f32   c_dst[h] = W_h @ a_dst[h]
    feat_ref   [Tn, H*C]   bf16  projected features (lane dense)
    asrc_t_ref [H, Tn]     f32   source-side logits (node on lanes)
    adst_ref   [Tn, H]     f32   target-side logits (node on sublanes)
    """
    x = x_ref[...]
    xb = x.astype(jnp.bfloat16)

    # single fused matmul for all heads
    feat = jnp.dot(xb, w_ref[...], preferred_element_type=jnp.float32)
    feat_ref[...] = feat.astype(feat_ref.dtype)

    # attention logits (tiny matmuls, f32)
    asrc_t_ref[...] = jax.lax.dot_general(
        csrc_t_ref[...], x, (((1,), (1,)), ((), ())),
        preferred_element_type=jnp.float32)                      # [H, Tn]
    adst_ref[...] = jnp.dot(x, cdst_ref[...],
                            preferred_element_type=jnp.float32)  # [Tn, H]


# ---------------------------------------------------------------------------
# Kernel 2: masked softmax attention + aggregation (online softmax over src)
# ---------------------------------------------------------------------------
def gat_attn_kernel(feat_ref, asrc_ref, adst_ref, bias_ref, lbias_ref,
                    out_ref, m_sc, l_sc, acc_sc,
                    *, heads, channels, apply_elu):
    """One (dst_tile, src_tile) step of the attention softmax + aggregation.

    feat_ref  [Ts, H*C] bf16   projected features of the src tile
    asrc_ref  [H, Ts]   f32    src-side logits
    adst_ref  [Td, H]   f32    dst-side logits
    bias_ref  [Td, Ts]  bf16   additive mask: 0 edge / -1e30 non-edge
    lbias_ref [1, H*C]  f32    layer bias
    out_ref   [Td, H*C] f32    output (written at last src tile)
    scratch:  m_sc/l_sc [H, Td, 1] f32, acc_sc [H, Td, C] f32
    """
    j = pl.program_id(1)

    @pl.when(j == 0)
    def _init():
        m_sc[...] = jnp.full_like(m_sc, MASK_VAL)
        l_sc[...] = jnp.zeros_like(l_sc)
        acc_sc[...] = jnp.zeros_like(acc_sc)

    bias = bias_ref[...].astype(jnp.float32)      # [Td, Ts]
    feat = feat_ref[...]                          # [Ts, H*C] bf16
    asrc = asrc_ref[...]                          # [H, Ts]
    adst = adst_ref[...]                          # [Td, H]

    for h in range(heads):                        # static unroll (small H)
        e = adst[:, h:h + 1] + asrc[h:h + 1, :]   # [Td, Ts]
        e = jnp.where(e > 0, e, NEG_SLOPE * e)    # LeakyReLU(0.2)
        e = e + bias                              # non-edges -> ~ -1e30

        m_old = m_sc[h]                                           # [Td, 1]
        m_new = jnp.maximum(m_old, jnp.max(e, axis=-1, keepdims=True))
        scale = jnp.exp(m_old - m_new)
        p = jnp.exp(e - m_new)     # masked entries underflow to 0 (see header)
        l_sc[h] = scale * l_sc[h] + jnp.sum(p, axis=-1, keepdims=True)
        feat_h = feat[:, h * channels:(h + 1) * channels]         # [Ts, C]
        acc_sc[h] = scale * acc_sc[h] + jnp.dot(
            p.astype(jnp.bfloat16), feat_h,
            preferred_element_type=jnp.float32)
        m_sc[h] = m_new

    @pl.when(j == pl.num_programs(1) - 1)
    def _finalize():
        ys = []
        for h in range(heads):
            inv_l = pl.reciprocal(l_sc[h], approx=True)           # [Td, 1]
            ys.append(acc_sc[h] * inv_l)                          # [Td, C]
        y = ys[0] if heads == 1 else jnp.concatenate(ys, axis=-1)
        y = y + lbias_ref[...]                                    # [Td, H*C]
        if apply_elu:
            y = jnp.where(y > 0.0, y, jnp.exp(jnp.minimum(y, 0.0)) - 1.0)
        out_ref[...] = y.astype(out_ref.dtype)


# ---------------------------------------------------------------------------
# Layer wrapper
# ---------------------------------------------------------------------------
def gat_conv(x_p, bias_p, w, a_src, a_dst, b, *, heads, concat, apply_elu):
    """One GATConv layer (eval mode) on padded inputs.

    x_p    [Np, F_in] f32  (Np multiple of TILE)
    bias_p [Np, Np]   bf16 additive adjacency mask (self loops included)
    w      [F_in, H*C] f32 (PyG column order: head-major channels)
    a_src/a_dst [H, C], b [H*C] (or [C] when concat=False)
    """
    n_pad, f_in = x_p.shape
    c = w.shape[1] // heads
    hc = heads * c
    # TODO(synk): concat=False head-mean only needed for heads==1 in this GAT.
    assert concat or heads == 1

    # Fold attention vectors into the projection: c_src[h] = W_h a_src[h].
    w3 = w.reshape(f_in, heads, c)
    csrc_t = jnp.einsum("fhc,hc->hf", w3, a_src)      # [H, F_in]
    cdst = jnp.einsum("fhc,hc->fh", w3, a_dst)        # [F_in, H]
    w_bf16 = w.astype(jnp.bfloat16)
    lbias = b.reshape(1, hc)

    n_tiles = n_pad // TILE
    cparams = dict(vmem_limit_bytes=32 * 1024 * 1024)

    # --- projection kernel -------------------------------------------------
    feat, asrc_t, adst = pl.pallas_call(
        gat_project_kernel,
        out_shape=(jax.ShapeDtypeStruct((n_pad, hc), jnp.bfloat16),
                   jax.ShapeDtypeStruct((heads, n_pad), jnp.float32),
                   jax.ShapeDtypeStruct((n_pad, heads), jnp.float32)),
        grid_spec=pltpu.PrefetchScalarGridSpec(
            num_scalar_prefetch=0,
            grid=(n_tiles,),
            in_specs=[pl.BlockSpec((TILE, f_in), lambda i: (i, 0)),
                      pl.BlockSpec((f_in, hc), lambda i: (0, 0)),
                      pl.BlockSpec((heads, f_in), lambda i: (0, 0)),
                      pl.BlockSpec((f_in, heads), lambda i: (0, 0))],
            out_specs=[pl.BlockSpec((TILE, hc), lambda i: (i, 0)),
                       pl.BlockSpec((heads, TILE), lambda i: (0, i)),
                       pl.BlockSpec((TILE, heads), lambda i: (i, 0))]),
        compiler_params=pltpu.CompilerParams(
            dimension_semantics=("parallel",), **cparams),
        cost_estimate=pl.CostEstimate(
            flops=2 * n_pad * f_in * (hc + 2 * heads),
            transcendentals=0,
            bytes_accessed=4 * n_pad * f_in + 2 * f_in * hc + 2 * n_pad * hc),
    )(x_p, w_bf16, csrc_t, cdst)

    # --- attention / aggregation kernel -------------------------------------
    kernel = functools.partial(gat_attn_kernel, heads=heads, channels=c,
                               apply_elu=apply_elu)
    out = pl.pallas_call(
        kernel,
        out_shape=jax.ShapeDtypeStruct((n_pad, hc), jnp.float32),
        grid_spec=pltpu.PrefetchScalarGridSpec(
            num_scalar_prefetch=0,
            grid=(n_tiles, n_tiles),
            in_specs=[pl.BlockSpec((TILE, hc), lambda i, j: (j, 0)),
                      pl.BlockSpec((heads, TILE), lambda i, j: (0, j)),
                      pl.BlockSpec((TILE, heads), lambda i, j: (i, 0)),
                      pl.BlockSpec((TILE, TILE), lambda i, j: (i, j)),
                      pl.BlockSpec((1, hc), lambda i, j: (0, 0))],
            out_specs=pl.BlockSpec((TILE, hc), lambda i, j: (i, 0)),
            scratch_shapes=[pltpu.VMEM((heads, TILE, 1), jnp.float32),
                            pltpu.VMEM((heads, TILE, 1), jnp.float32),
                            pltpu.VMEM((heads, TILE, c), jnp.float32)]),
        compiler_params=pltpu.CompilerParams(
            dimension_semantics=("parallel", "arbitrary"), **cparams),
        cost_estimate=pl.CostEstimate(
            flops=2 * n_pad * n_pad * hc + 10 * n_pad * n_pad * heads,
            transcendentals=n_pad * n_pad * heads,
            bytes_accessed=2 * n_pad * n_pad + 2 * n_pad * hc * n_tiles
                           + 4 * n_pad * hc),
    )(feat, asrc_t, adst, bias_p, lbias)

    return out        # [Np, H*C] lane-dense (concat layout == PyG view)


# ---------------------------------------------------------------------------
# Full model forward (eval mode)
# ---------------------------------------------------------------------------
def gat_forward(params, x, edge_index, *, heads):
    # TODO(synk): F.dropout(p=0.6) and GATConv attention dropout are
    # training-only; eval-mode forward (dropout == identity) is implemented.
    n = x.shape[0]
    n_pad = -(-n // TILE) * TILE

    # Dense additive adjacency mask, adj[dst, src]; self loops added
    # (remove_self_loops + add_self_loops of GATConv); pad rows get a self
    # loop so padded-row softmax stays finite (pad rows are sliced off).
    adj = jnp.zeros((n_pad, n_pad), jnp.float32)
    adj = adj.at[edge_index[1], edge_index[0]].set(1.0)
    idx = jnp.arange(n_pad)
    adj = adj.at[idx, idx].set(1.0)
    bias_p = jnp.where(adj > 0, 0.0, MASK_VAL).astype(jnp.bfloat16)

    x_p = jnp.pad(x, ((0, n_pad - n), (0, 0)))

    h1 = gat_conv(x_p, bias_p, params["w1"], params["asrc1"], params["adst1"],
                  params["b1"], heads=heads, concat=True, apply_elu=True)
    out = gat_conv(h1, bias_p, params["w2"], params["asrc2"], params["adst2"],
                   params["b2"], heads=1, concat=False, apply_elu=False)
    return out[:n]


def init_gat_params(key, in_channels, hidden_channels, out_channels, heads):
    def glorot(k, shape):
        fan_in, fan_out = shape[-2], shape[-1]
        lim = (6.0 / (fan_in + fan_out)) ** 0.5
        return jax.random.uniform(k, shape, jnp.float32, -lim, lim)

    ks = jax.random.split(key, 6)
    return {
        "w1": glorot(ks[0], (in_channels, heads * hidden_channels)),
        "asrc1": glorot(ks[1], (heads, hidden_channels)),
        "adst1": glorot(ks[2], (heads, hidden_channels)),
        "b1": jnp.zeros((heads * hidden_channels,), jnp.float32),
        "w2": glorot(ks[3], (heads * hidden_channels, out_channels)),
        "asrc2": glorot(ks[4], (1, out_channels)),
        "adst2": glorot(ks[5], (1, out_channels)),
        "b2": jnp.zeros((out_channels,), jnp.float32),
    }


if __name__ == "__main__":
    key = jax.random.PRNGKey(0)
    k_x, k_p = jax.random.split(key)

    num_nodes = 256
    in_channels = 64
    hidden_channels = 32          # heads * hidden = 128 -> lane-dense conv1
    out_channels = 64
    heads = 4

    x = jax.random.normal(k_x, (num_nodes, in_channels), jnp.float32)

    # bidirectional ring + long-range chords; no duplicate edges / self loops
    src = jnp.arange(num_nodes, dtype=jnp.int32)
    nxt = (src + 1) % num_nodes
    far = (src + num_nodes // 2) % num_nodes
    edge_index = jnp.stack(
        [jnp.concatenate([src, nxt, src]),
         jnp.concatenate([nxt, src, far])], axis=0)

    params = init_gat_params(k_p, in_channels, hidden_channels,
                             out_channels, heads)

    fwd = jax.jit(functools.partial(gat_forward, heads=heads))
    out = fwd(params, x, edge_index)
    out = jax.block_until_ready(out)

    assert out.shape == (num_nodes, out_channels)
    assert bool(jnp.all(jnp.isfinite(out)))
    print("KERNEL_OK")
</pallas_src>

<mosaic_0001>
module attributes {stable_mosaic.version = 11 : i64} {
  func.func @gat_project_kernel(%arg0: i32, %arg1: memref<128x64xf32, #tpu.memory_space<vmem>>, %arg2: memref<64x128xbf16, #tpu.memory_space<vmem>>, %arg3: memref<4x64xf32, #tpu.memory_space<vmem>>, %arg4: memref<64x4xf32, #tpu.memory_space<vmem>>, %arg5: memref<128x128xbf16, #tpu.memory_space<vmem>>, %arg6: memref<4x128xf32, #tpu.memory_space<vmem>>, %arg7: memref<128x4xf32, #tpu.memory_space<vmem>>) attributes {dimension_semantics = [#tpu.dimension_semantics<parallel>], iteration_bounds = array<i64: 2>, scalar_prefetch = 0 : i64, scratch_operands = 0 : i64, tpu.core_type = #tpu.core_type<tc>, window_params = [{transform_indices = @transform_0, window_bounds = array<i64: 128, 64>}, {pipeline_mode = #tpu.pipeline_mode<synchronous>, transform_indices = @transform_1, window_bounds = array<i64: 64, 128>}, {pipeline_mode = #tpu.pipeline_mode<synchronous>, transform_indices = @transform_2, window_bounds = array<i64: 4, 64>}, {pipeline_mode = #tpu.pipeline_mode<synchronous>, transform_indices = @transform_3, window_bounds = array<i64: 64, 4>}, {transform_indices = @transform_4, window_bounds = array<i64: 128, 128>}, {transform_indices = @transform_5, window_bounds = array<i64: 4, 128>}, {transform_indices = @transform_6, window_bounds = array<i64: 128, 4>}]} {
    %c0 = arith.constant 0 : index
    %c0_0 = arith.constant 0 : index
    %0 = vector.load %arg1[%c0, %c0_0] : memref<128x64xf32, #tpu.memory_space<vmem>>, vector<128x64xf32>
    %1 = arith.truncf %0 : vector<128x64xf32> to vector<128x64xbf16>
    %c0_1 = arith.constant 0 : index
    %c0_2 = arith.constant 0 : index
    %2 = vector.load %arg2[%c0_1, %c0_2] : memref<64x128xbf16, #tpu.memory_space<vmem>>, vector<64x128xbf16>
    %cst = arith.constant dense<0.000000e+00> : vector<128x128xf32>
    %3 = tpu.matmul %1, %2, %cst {dimension_numbers = #tpu.dot_dimension_numbers<[1], [0], [0], [1], [0, 0, 1, 1], [], []>} : vector<128x64xbf16>, vector<64x128xbf16>, vector<128x128xf32> -> vector<128x128xf32>
    %4 = arith.truncf %3 : vector<128x128xf32> to vector<128x128xbf16>
    %c0_3 = arith.constant 0 : index
    %c0_4 = arith.constant 0 : index
    %5 = vector.load %arg5[%c0_3, %c0_4] : memref<128x128xbf16, #tpu.memory_space<vmem>>, vector<128x128xbf16>
    tpu.vector_store %arg5[%c0_3, %c0_4], %4 {strides = array<i32>} : memref<128x128xbf16, #tpu.memory_space<vmem>>, vector<128x128xbf16>,
    %c0_5 = arith.constant 0 : index
    %c0_6 = arith.constant 0 : index
    %6 = vector.load %arg3[%c0_5, %c0_6] : memref<4x64xf32, #tpu.memory_space<vmem>>, vector<4x64xf32>
    %cst_7 = arith.constant dense<0.000000e+00> : vector<4x128xf32>
    %7 = tpu.matmul %6, %0, %cst_7 {dimension_numbers = #tpu.dot_dimension_numbers<[1], [1], [0], [0], [0, 0, 1, 0], [], []>} : vector<4x64xf32>, vector<128x64xf32>, vector<4x128xf32> -> vector<4x128xf32>
    %c0_8 = arith.constant 0 : index
    %c0_9 = arith.constant 0 : index
    %8 = vector.load %arg6[%c0_8, %c0_9] : memref<4x128xf32, #tpu.memory_space<vmem>>, vector<4x128xf32>
    tpu.vector_store %arg6[%c0_8, %c0_9], %7 {strides = array<i32>} : memref<4x128xf32, #tpu.memory_space<vmem>>, vector<4x128xf32>,
    %c0_10 = arith.constant 0 : index
    %c0_11 = arith.constant 0 : index
    %9 = vector.load %arg4[%c0_10, %c0_11] : memref<64x4xf32, #tpu.memory_space<vmem>>, vector<64x4xf32>
    %cst_12 = arith.constant dense<0.000000e+00> : vector<128x4xf32>
    %10 = tpu.matmul %0, %9, %cst_12 {dimension_numbers = #tpu.dot_dimension_numbers<[1], [0], [0], [1], [0, 0, 1, 1], [], []>} : vector<128x64xf32>, vector<64x4xf32>, vector<128x4xf32> -> vector<128x4xf32>
    %c0_13 = arith.constant 0 : index
    %c0_14 = arith.constant 0 : index
    %11 = vector.load %arg7[%c0_13, %c0_14] : memref<128x4xf32, #tpu.memory_space<vmem>>, vector<128x4xf32>
    tpu.vector_store %arg7[%c0_13, %c0_14], %10 {strides = array<i32>} : memref<128x4xf32, #tpu.memory_space<vmem>>, vector<128x4xf32>,
    return
  }
  func.func @transform_0(%arg0: i32) -> (i32, i32) {
    %c0_i32 = arith.constant 0 : i32
    %c0_i32_0 = arith.constant 0 : i32
    return %arg0, %c0_i32 : i32, i32
  }
  func.func @transform_1(%arg0: i32) -> (i32, i32) {
    %c0_i32 = arith.constant 0 : i32
    %c0_i32_0 = arith.constant 0 : i32
    %c0_i32_1 = arith.constant 0 : i32
    return %c0_i32, %c0_i32_0 : i32, i32
  }
  func.func @transform_2(%arg0: i32) -> (i32, i32) {
    %c0_i32 = arith.constant 0 : i32
    %c0_i32_0 = arith.constant 0 : i32
    %c0_i32_1 = arith.constant 0 : i32
    return %c0_i32, %c0_i32_0 : i32, i32
  }
  func.func @transform_3(%arg0: i32) -> (i32, i32) {
    %c0_i32 = arith.constant 0 : i32
    %c0_i32_0 = arith.constant 0 : i32
    %c0_i32_1 = arith.constant 0 : i32
    return %c0_i32, %c0_i32_0 : i32, i32
  }
  func.func @transform_4(%arg0: i32) -> (i32, i32) {
    %c0_i32 = arith.constant 0 : i32
    %c0_i32_0 = arith.constant 0 : i32
    return %arg0, %c0_i32 : i32, i32
  }
  func.func @transform_5(%arg0: i32) -> (i32, i32) {
    %c0_i32 = arith.constant 0 : i32
    %c0_i32_0 = arith.constant 0 : i32
    return %c0_i32, %arg0 : i32, i32
  }
  func.func @transform_6(%arg0: i32) -> (i32, i32) {
    %c0_i32 = arith.constant 0 : i32
    %c0_i32_0 = arith.constant 0 : i32
    return %arg0, %c0_i32 : i32, i32
  }
}

module attributes {stable_mosaic.version = 11 : i64} {
  func.func @gat_attn_kernel(%arg0: i32, %arg1: i32, %arg2: memref<128x128xbf16, #tpu.memory_space<vmem>>, %arg3: memref<4x128xf32, #tpu.memory_space<vmem>>, %arg4: memref<128x4xf32, #tpu.memory_space<vmem>>, %arg5: memref<128x128xbf16, #tpu.memory_space<vmem>>, %arg6: memref<1x128xf32, #tpu.memory_space<vmem>>, %arg7: memref<128x128xf32, #tpu.memory_space<vmem>>, %arg8: memref<4x128x1xf32, #tpu.memory_space<vmem>>, %arg9: memref<4x128x1xf32, #tpu.memory_space<vmem>>, %arg10: memref<4x128x32xf32, #tpu.memory_space<vmem>>) attributes {dimension_semantics = [#tpu.dimension_semantics<parallel>, #tpu.dimension_semantics<arbitrary>], iteration_bounds = array<i64: 2, 2>, scalar_prefetch = 0 : i64, scratch_operands = 3 : i64, tpu.core_type = #tpu.core_type<tc>, window_params = [{transform_indices = @transform_0, window_bounds = array<i64: 128, 128>}, {transform_indices = @transform_1, window_bounds = array<i64: 4, 128>}, {transform_indices = @transform_2, window_bounds = array<i64: 128, 4>}, {transform_indices = @transform_3, window_bounds = array<i64: 128, 128>}, {pipeline_mode = #tpu.pipeline_mode<synchronous>, transform_indices = @transform_4, window_bounds = array<i64: 1, 128>}, {transform_indices = @transform_5, window_bounds = array<i64: 128, 128>}]} {
    %c0_i32 = arith.constant 0 : i32
    %0 = arith.cmpi eq, %arg1, %c0_i32 : i32
    %1 = arith.extui %0 : i1 to i32
    %c0_i32_0 = arith.constant 0 : i32
    %2 = arith.cmpi ne, %1, %c0_i32_0 : i32
    scf.if %2 {
      %cst_97 = arith.constant -1.000000e+30 : f32
      %187 = vector.broadcast %cst_97 : f32 to vector<4x128x1xf32>
      %c0_98 = arith.constant 0 : index
      %c0_99 = arith.constant 0 : index
      %c0_100 = arith.constant 0 : index
      %188 = vector.load %arg8[%c0_98, %c0_99, %c0_100] : memref<4x128x1xf32, #tpu.memory_space<vmem>>, vector<4x128x1xf32>
      tpu.vector_store %arg8[%c0_98, %c0_99, %c0_100], %187 {strides = array<i32>} : memref<4x128x1xf32, #tpu.memory_space<vmem>>, vector<4x128x1xf32>,
      %cst_101 = arith.constant 0.000000e+00 : f32
      %189 = vector.broadcast %cst_101 : f32 to vector<4x128x1xf32>
      %c0_102 = arith.constant 0 : index
      %c0_103 = arith.constant 0 : index
      %c0_104 = arith.constant 0 : index
      %190 = vector.load %arg9[%c0_102, %c0_103, %c0_104] : memref<4x128x1xf32, #tpu.memory_space<vmem>>, vector<4x128x1xf32>
      tpu.vector_store %arg9[%c0_102, %c0_103, %c0_104], %189 {strides = array<i32>} : memref<4x128x1xf32, #tpu.memory_space<vmem>>, vector<4x128x1xf32>,
      %cst_105 = arith.constant 0.000000e+00 : f32
      %191 = vector.broadcast %cst_105 : f32 to vector<4x128x32xf32>
      %c0_106 = arith.constant 0 : index
      %c0_107 = arith.constant 0 : index
      %c0_108 = arith.constant 0 : index
      %192 = vector.load %arg10[%c0_106, %c0_107, %c0_108] : memref<4x128x32xf32, #tpu.memory_space<vmem>>, vector<4x128x32xf32>
      tpu.vector_store %arg10[%c0_106, %c0_107, %c0_108], %191 {strides = array<i32>} : memref<4x128x32xf32, #tpu.memory_space<vmem>>, vector<4x128x32xf32>,
    } else {
    }
    %c0 = arith.constant 0 : index
    %c0_1 = arith.constant 0 : index
    %3 = vector.load %arg5[%c0, %c0_1] : memref<128x128xbf16, #tpu.memory_space<vmem>>, vector<128x128xbf16>
    %4 = arith.extf %3 : vector<128x128xbf16> to vector<128x128xf32>
    %c0_2 = arith.constant 0 : index
    %c0_3 = arith.constant 0 : index
    %5 = vector.load %arg2[%c0_2, %c0_3] : memref<128x128xbf16, #tpu.memory_space<vmem>>, vector<128x128xbf16>
    %c0_4 = arith.constant 0 : index
    %c0_5 = arith.constant 0 : index
    %6 = vector.load %arg3[%c0_4, %c0_5] : memref<4x128xf32, #tpu.memory_space<vmem>>, vector<4x128xf32>
    %c0_6 = arith.constant 0 : index
    %c0_7 = arith.constant 0 : index
    %7 = vector.load %arg4[%c0_6, %c0_7] : memref<128x4xf32, #tpu.memory_space<vmem>>, vector<128x4xf32>
    %8 = vector.extract_strided_slice %7 {offsets = [0, 0], sizes = [128, 1], strides = [1, 1]} : vector<128x4xf32> to vector<128x1xf32>
    %9 = vector.extract_strided_slice %6 {offsets = [0, 0], sizes = [1, 128], strides = [1, 1]} : vector<4x128xf32> to vector<1x128xf32>
    %10 = vector.broadcast %8 : vector<128x1xf32> to vector<128x128xf32>
    %11 = vector.broadcast %9 : vector<1x128xf32> to vector<128x128xf32>
    %12 = arith.addf %10, %11 : vector<128x128xf32>
    %cst = arith.constant 0.000000e+00 : f32
    %13 = vector.broadcast %cst : f32 to vector<128x128xf32>
    %14 = arith.cmpf ogt, %12, %13 : vector<128x128xf32>
    %cst_8 = arith.constant 2.000000e-01 : f32
    %15 = vector.broadcast %cst_8 : f32 to vector<128x128xf32>
    %16 = arith.mulf %15, %12 : vector<128x128xf32>
    %17 = arith.select %14, %12, %16 : vector<128x128xi1>, vector<128x128xf32>
    %18 = arith.addf %17, %4 : vector<128x128xf32>
    %c0_9 = arith.constant 0 : index
    %c0_10 = arith.constant 0 : index
    %c0_11 = arith.constant 0 : index
    %19 = vector.load %arg8[%c0_9, %c0_10, %c0_11] : memref<4x128x1xf32, #tpu.memory_space<vmem>>, vector<1x128x1xf32>
    %20 = vector.shape_cast %19 : vector<1x128x1xf32> to vector<128x1xf32>
    %cst_12 = arith.constant dense<0xFF800000> : vector<128xf32>
    %21 = vector.multi_reduction <maximumf>, %18, %cst_12 [1] : vector<128x128xf32> to vector<128xf32>
    %22 = vector.shape_cast %21 : vector<128xf32> to vector<128x1xf32>
    %23 = arith.maximumf %20, %22 : vector<128x1xf32>
    %24 = arith.subf %20, %23 : vector<128x1xf32>
    %25 = math.exp %24 : vector<128x1xf32>
    %26 = vector.broadcast %23 : vector<128x1xf32> to vector<128x128xf32>
    %27 = arith.subf %18, %26 : vector<128x128xf32>
    %28 = math.exp %27 : vector<128x128xf32>
    %c0_13 = arith.constant 0 : index
    %c0_14 = arith.constant 0 : index
    %c0_15 = arith.constant 0 : index
    %29 = vector.load %arg9[%c0_13, %c0_14, %c0_15] : memref<4x128x1xf32, #tpu.memory_space<vmem>>, vector<1x128x1xf32>
    %30 = vector.shape_cast %29 : vector<1x128x1xf32> to vector<128x1xf32>
    %31 = arith.mulf %25, %30 : vector<128x1xf32>
    %cst_16 = arith.constant dense<0.000000e+00> : vector<128xf32>
    %32 = vector.multi_reduction <add>, %28, %cst_16 [1] : vector<128x128xf32> to vector<128xf32>
    %33 = vector.shape_cast %32 : vector<128xf32> to vector<128x1xf32>
    %34 = arith.addf %31, %33 : vector<128x1xf32>
    %c0_17 = arith.constant 0 : index
    %c0_18 = arith.constant 0 : index
    %c0_19 = arith.constant 0 : index
    %35 = vector.load %arg9[%c0_17, %c0_18, %c0_19] : memref<4x128x1xf32, #tpu.memory_space<vmem>>, vector<1x128x1xf32>
    %36 = vector.shape_cast %35 : vector<1x128x1xf32> to vector<128x1xf32>
    %37 = vector.shape_cast %34 : vector<128x1xf32> to vector<1x128x1xf32>
    tpu.vector_store %arg9[%c0_17, %c0_18, %c0_19], %37 {strides = array<i32>} : memref<4x128x1xf32, #tpu.memory_space<vmem>>, vector<1x128x1xf32>,
    %38 = vector.extract_strided_slice %5 {offsets = [0, 0], sizes = [128, 32], strides = [1, 1]} : vector<128x128xbf16> to vector<128x32xbf16>
    %c0_20 = arith.constant 0 : index
    %c0_21 = arith.constant 0 : index
    %c0_22 = arith.constant 0 : index
    %39 = vector.load %arg10[%c0_20, %c0_21, %c0_22] : memref<4x128x32xf32, #tpu.memory_space<vmem>>, vector<1x128x32xf32>
    %40 = vector.shape_cast %39 : vector<1x128x32xf32> to vector<128x32xf32>
    %41 = vector.broadcast %25 : vector<128x1xf32> to vector<128x32xf32>
    %42 = arith.mulf %41, %40 : vector<128x32xf32>
    %43 = arith.truncf %28 : vector<128x128xf32> to vector<128x128xbf16>
    %cst_23 = arith.constant dense<0.000000e+00> : vector<128x32xf32>
    %44 = tpu.matmul %43, %38, %cst_23 {dimension_numbers = #tpu.dot_dimension_numbers<[1], [0], [0], [1], [0, 0, 1, 1], [], []>} : vector<128x128xbf16>, vector<128x32xbf16>, vector<128x32xf32> -> vector<128x32xf32>
    %45 = arith.addf %42, %44 : vector<128x32xf32>
    %c0_24 = arith.constant 0 : index
    %c0_25 = arith.constant 0 : index
    %c0_26 = arith.constant 0 : index
    %46 = vector.load %arg10[%c0_24, %c0_25, %c0_26] : memref<4x128x32xf32, #tpu.memory_space<vmem>>, vector<1x128x32xf32>
    %47 = vector.shape_cast %46 : vector<1x128x32xf32> to vector<128x32xf32>
    %48 = vector.shape_cast %45 : vector<128x32xf32> to vector<1x128x32xf32>
    tpu.vector_store %arg10[%c0_24, %c0_25, %c0_26], %48 {strides = array<i32>} : memref<4x128x32xf32, #tpu.memory_space<vmem>>, vector<1x128x32xf32>,
    %c0_27 = arith.constant 0 : index
    %c0_28 = arith.constant 0 : index
    %c0_29 = arith.constant 0 : index
    %49 = vector.load %arg8[%c0_27, %c0_28, %c0_29] : memref<4x128x1xf32, #tpu.memory_space<vmem>>, vector<1x128x1xf32>
    %50 = vector.shape_cast %49 : vector<1x128x1xf32> to vector<128x1xf32>
    %51 = vector.shape_cast %23 : vector<128x1xf32> to vector<1x128x1xf32>
    tpu.vector_store %arg8[%c0_27, %c0_28, %c0_29], %51 {strides = array<i32>} : memref<4x128x1xf32, #tpu.memory_space<vmem>>, vector<1x128x1xf32>,
    %52 = vector.extract_strided_slice %7 {offsets = [0, 1], sizes = [128, 1], strides = [1, 1]} : vector<128x4xf32> to vector<128x1xf32>
    %53 = vector.extract_strided_slice %6 {offsets = [1, 0], sizes = [1, 128], strides = [1, 1]} : vector<4x128xf32> to vector<1x128xf32>
    %54 = vector.broadcast %52 : vector<128x1xf32> to vector<128x128xf32>
    %55 = vector.broadcast %53 : vector<1x128xf32> to vector<128x128xf32>
    %56 = arith.addf %54, %55 : vector<128x128xf32>
    %cst_30 = arith.constant 0.000000e+00 : f32
    %57 = vector.broadcast %cst_30 : f32 to vector<128x128xf32>
    %58 = arith.cmpf ogt, %56, %57 : vector<128x128xf32>
    %cst_31 = arith.constant 2.000000e-01 : f32
    %59 = vector.broadcast %cst_31 : f32 to vector<128x128xf32>
    %60 = arith.mulf %59, %56 : vector<128x128xf32>
    %61 = arith.select %58, %56, %60 : vector<128x128xi1>, vector<128x128xf32>
    %62 = arith.addf %61, %4 : vector<128x128xf32>
    %c1 = arith.constant 1 : index
    %c0_32 = arith.constant 0 : index
    %c0_33 = arith.constant 0 : index
    %63 = vector.load %arg8[%c1, %c0_32, %c0_33] : memref<4x128x1xf32, #tpu.memory_space<vmem>>, vector<1x128x1xf32>
    %64 = vector.shape_cast %63 : vector<1x128x1xf32> to vector<128x1xf32>
    %cst_34 = arith.constant dense<0xFF800000> : vector<128xf32>
    %65 = vector.multi_reduction <maximumf>, %62, %cst_34 [1] : vector<128x128xf32> to vector<128xf32>
    %66 = vector.shape_cast %65 : vector<128xf32> to vector<128x1xf32>
    %67 = arith.maximumf %64, %66 : vector<128x1xf32>
    %68 = arith.subf %64, %67 : vector<128x1xf32>
    %69 = math.exp %68 : vector<128x1xf32>
    %70 = vector.broadcast %67 : vector<128x1xf32> to vector<128x128xf32>
    %71 = arith.subf %62, %70 : vector<128x128xf32>
    %72 = math.exp %71 : vector<128x128xf32>
    %c1_35 = arith.constant 1 : index
    %c0_36 = arith.constant 0 : index
    %c0_37 = arith.constant 0 : index
    %73 = vector.load %arg9[%c1_35, %c0_36, %c0_37] : memref<4x128x1xf32, #tpu.memory_space<vmem>>, vector<1x128x1xf32>
    %74 = vector.shape_cast %73 : vector<1x128x1xf32> to vector<128x1xf32>
    %75 = arith.mulf %69, %74 : vector<128x1xf32>
    %cst_38 = arith.constant dense<0.000000e+00> : vector<128xf32>
    %76 = vector.multi_reduction <add>, %72, %cst_38 [1] : vector<128x128xf32> to vector<128xf32>
    %77 = vector.shape_cast %76 : vector<128xf32> to vector<128x1xf32>
    %78 = arith.addf %75, %77 : vector<128x1xf32>
    %c1_39 = arith.constant 1 : index
    %c0_40 = arith.constant 0 : index
    %c0_41 = arith.constant 0 : index
    %79 = vector.load %arg9[%c1_39, %c0_40, %c0_41] : memref<4x128x1xf32, #tpu.memory_space<vmem>>, vector<1x128x1xf32>
    %80 = vector.shape_cast %79 : vector<1x128x1xf32> to vector<128x1xf32>
    %81 = vector.shape_cast %78 : vector<128x1xf32> to vector<1x128x1xf32>
    tpu.vector_store %arg9[%c1_39, %c0_40, %c0_41], %81 {strides = array<i32>} : memref<4x128x1xf32, #tpu.memory_space<vmem>>, vector<1x128x1xf32>,
    %82 = vector.extract_strided_slice %5 {offsets = [0, 32], sizes = [128, 32], strides = [1, 1]} : vector<128x128xbf16> to vector<128x32xbf16>
    %c1_42 = arith.constant 1 : index
    %c0_43 = arith.constant 0 : index
    %c0_44 = arith.constant 0 : index
    %83 = vector.load %arg10[%c1_42, %c0_43, %c0_44] : memref<4x128x32xf32, #tpu.memory_space<vmem>>, vector<1x128x32xf32>
    %84 = vector.shape_cast %83 : vector<1x128x32xf32> to vector<128x32xf32>
    %85 = vector.broadcast %69 : vector<128x1xf32> to vector<128x32xf32>
    %86 = arith.mulf %85, %84 : vector<128x32xf32>
    %87 = arith.truncf %72 : vector<128x128xf32> to vector<128x128xbf16>
    %cst_45 = arith.constant dense<0.000000e+00> : vector<128x32xf32>
    %88 = tpu.matmul %87, %82, %cst_45 {dimension_numbers = #tpu.dot_dimension_numbers<[1], [0], [0], [1], [0, 0, 1, 1], [], []>} : vector<128x128xbf16>, vector<128x32xbf16>, vector<128x32xf32> -> vector<128x32xf32>
    %89 = arith.addf %86, %88 : vector<128x32xf32>
    %c1_46 = arith.constant 1 : index
    %c0_47 = arith.constant 0 : index
    %c0_48 = arith.constant 0 : index
    %90 = vector.load %arg10[%c1_46, %c0_47, %c0_48] : memref<4x128x32xf32, #tpu.memory_space<vmem>>, vector<1x128x32xf32>
    %91 = vector.shape_cast %90 : vector<1x128x32xf32> to vector<128x32xf32>
    %92 = vector.shape_cast %89 : vector<128x32xf32> to vector<1x128x32xf32>
    tpu.vector_store %arg10[%c1_46, %c0_47, %c0_48], %92 {strides = array<i32>} : memref<4x128x32xf32, #tpu.memory_space<vmem>>, vector<1x128x32xf32>,
    %c1_49 = arith.constant 1 : index
    %c0_50 = arith.constant 0 : index
    %c0_51 = arith.constant 0 : index
    %93 = vector.load %arg8[%c1_49, %c0_50, %c0_51] : memref<4x128x1xf32, #tpu.memory_space<vmem>>, vector<1x128x1xf32>
    %94 = vector.shape_cast %93 : vector<1x128x1xf32> to vector<128x1xf32>
    %95 = vector.shape_cast %67 : vector<128x1xf32> to vector<1x128x1xf32>
    tpu.vector_store %arg8[%c1_49, %c0_50, %c0_51], %95 {strides = array<i32>} : memref<4x128x1xf32, #tpu.memory_space<vmem>>, vector<1x128x1xf32>,
    %96 = vector.extract_strided_slice %7 {offsets = [0, 2], sizes = [128, 1], strides = [1, 1]} : vector<128x4xf32> to vector<128x1xf32>
    %97 = vector.extract_strided_slice %6 {offsets = [2, 0], sizes = [1, 128], strides = [1, 1]} : vector<4x128xf32> to vector<1x128xf32>
    %98 = vector.broadcast %96 : vector<128x1xf32> to vector<128x128xf32>
    %99 = vector.broadcast %97 : vector<1x128xf32> to vector<128x128xf32>
    %100 = arith.addf %98, %99 : vector<128x128xf32>
    %cst_52 = arith.constant 0.000000e+00 : f32
    %101 = vector.broadcast %cst_52 : f32 to vector<128x128xf32>
    %102 = arith.cmpf ogt, %100, %101 : vector<128x128xf32>
    %cst_53 = arith.constant 2.000000e-01 : f32
    %103 = vector.broadcast %cst_53 : f32 to vector<128x128xf32>
    %104 = arith.mulf %103, %100 : vector<128x128xf32>
    %105 = arith.select %102, %100, %104 : vector<128x128xi1>, vector<128x128xf32>
    %106 = arith.addf %105, %4 : vector<128x128xf32>
    %c2 = arith.constant 2 : index
    %c0_54 = arith.constant 0 : index
    %c0_55 = arith.constant 0 : index
    %107 = vector.load %arg8[%c2, %c0_54, %c0_55] : memref<4x128x1xf32, #tpu.memory_space<vmem>>, vector<1x128x1xf32>
    %108 = vector.shape_cast %107 : vector<1x128x1xf32> to vector<128x1xf32>
    %cst_56 = arith.constant dense<0xFF800000> : vector<128xf32>
    %109 = vector.multi_reduction <maximumf>, %106, %cst_56 [1] : vector<128x128xf32> to vector<128xf32>
    %110 = vector.shape_cast %109 : vector<128xf32> to vector<128x1xf32>
    %111 = arith.maximumf %108, %110 : vector<128x1xf32>
    %112 = arith.subf %108, %111 : vector<128x1xf32>
    %113 = math.exp %112 : vector<128x1xf32>
    %114 = vector.broadcast %111 : vector<128x1xf32> to vector<128x128xf32>
    %115 = arith.subf %106, %114 : vector<128x128xf32>
    %116 = math.exp %115 : vector<128x128xf32>
    %c2_57 = arith.constant 2 : index
    %c0_58 = arith.constant 0 : index
    %c0_59 = arith.constant 0 : index
    %117 = vector.load %arg9[%c2_57, %c0_58, %c0_59] : memref<4x128x1xf32, #tpu.memory_space<vmem>>, vector<1x128x1xf32>
    %118 = vector.shape_cast %117 : vector<1x128x1xf32> to vector<128x1xf32>
    %119 = arith.mulf %113, %118 : vector<128x1xf32>
    %cst_60 = arith.constant dense<0.000000e+00> : vector<128xf32>
    %120 = vector.multi_reduction <add>, %116, %cst_60 [1] : vector<128x128xf32> to vector<128xf32>
    %121 = vector.shape_cast %120 : vector<128xf32> to vector<128x1xf32>
    %122 = arith.addf %119, %121 : vector<128x1xf32>
    %c2_61 = arith.constant 2 : index
    %c0_62 = arith.constant 0 : index
    %c0_63 = arith.constant 0 : index
    %123 = vector.load %arg9[%c2_61, %c0_62, %c0_63] : memref<4x128x1xf32, #tpu.memory_space<vmem>>, vector<1x128x1xf32>
    %124 = vector.shape_cast %123 : vector<1x128x1xf32> to vector<128x1xf32>
    %125 = vector.shape_cast %122 : vector<128x1xf32> to vector<1x128x1xf32>
    tpu.vector_store %arg9[%c2_61, %c0_62, %c0_63], %125 {strides = array<i32>} : memref<4x128x1xf32, #tpu.memory_space<vmem>>, vector<1x128x1xf32>,
    %126 = vector.extract_strided_slice %5 {offsets = [0, 64], sizes = [128, 32], strides = [1, 1]} : vector<128x128xbf16> to vector<128x32xbf16>
    %c2_64 = arith.constant 2 : index
    %c0_65 = arith.constant 0 : index
    %c0_66 = arith.constant 0 : index
    %127 = vector.load %arg10[%c2_64, %c0_65, %c0_66] : memref<4x128x32xf32, #tpu.memory_space<vmem>>, vector<1x128x32xf32>
    %128 = vector.shape_cast %127 : vector<1x128x32xf32> to vector<128x32xf32>
    %129 = vector.broadcast %113 : vector<128x1xf32> to vector<128x32xf32>
    %130 = arith.mulf %129, %128 : vector<128x32xf32>
    %131 = arith.truncf %116 : vector<128x128xf32> to vector<128x128xbf16>
    %cst_67 = arith.constant dense<0.000000e+00> : vector<128x32xf32>
    %132 = tpu.matmul %131, %126, %cst_67 {dimension_numbers = #tpu.dot_dimension_numbers<[1], [0], [0], [1], [0, 0, 1, 1], [], []>} : vector<128x128xbf16>, vector<128x32xbf16>, vector<128x32xf32> -> vector<128x32xf32>
    %133 = arith.addf %130, %132 : vector<128x32xf32>
    %c2_68 = arith.constant 2 : index
    %c0_69 = arith.constant 0 : index
    %c0_70 = arith.constant 0 : index
    %134 = vector.load %arg10[%c2_68, %c0_69, %c0_70] : memref<4x128x32xf32, #tpu.memory_space<vmem>>, vector<1x128x32xf32>
    %135 = vector.shape_cast %134 : vector<1x128x32xf32> to vector<128x32xf32>
    %136 = vector.shape_cast %133 : vector<128x32xf32> to vector<1x128x32xf32>
    tpu.vector_store %arg10[%c2_68, %c0_69, %c0_70], %136 {strides = array<i32>} : memref<4x128x32xf32, #tpu.memory_space<vmem>>, vector<1x128x32xf32>,
    %c2_71 = arith.constant 2 : index
    %c0_72 = arith.constant 0 : index
    %c0_73 = arith.constant 0 : index
    %137 = vector.load %arg8[%c2_71, %c0_72, %c0_73] : memref<4x128x1xf32, #tpu.memory_space<vmem>>, vector<1x128x1xf32>
    %138 = vector.shape_cast %137 : vector<1x128x1xf32> to vector<128x1xf32>
    %139 = vector.shape_cast %111 : vector<128x1xf32> to vector<1x128x1xf32>
    tpu.vector_store %arg8[%c2_71, %c0_72, %c0_73], %139 {strides = array<i32>} : memref<4x128x1xf32, #tpu.memory_space<vmem>>, vector<1x128x1xf32>,
    %140 = vector.extract_strided_slice %7 {offsets = [0, 3], sizes = [128, 1], strides = [1, 1]} : vector<128x4xf32> to vector<128x1xf32>
    %141 = vector.extract_strided_slice %6 {offsets = [3, 0], sizes = [1, 128], strides = [1, 1]} : vector<4x128xf32> to vector<1x128xf32>
    %142 = vector.broadcast %140 : vector<128x1xf32> to vector<128x128xf32>
    %143 = vector.broadcast %141 : vector<1x128xf32> to vector<128x128xf32>
    %144 = arith.addf %142, %143 : vector<128x128xf32>
    %cst_74 = arith.constant 0.000000e+00 : f32
    %145 = vector.broadcast %cst_74 : f32 to vector<128x128xf32>
    %146 = arith.cmpf ogt, %144, %145 : vector<128x128xf32>
    %cst_75 = arith.constant 2.000000e-01 : f32
    %147 = vector.broadcast %cst_75 : f32 to vector<128x128xf32>
    %148 = arith.mulf %147, %144 : vector<128x128xf32>
    %149 = arith.select %146, %144, %148 : vector<128x128xi1>, vector<128x128xf32>
    %150 = arith.addf %149, %4 : vector<128x128xf32>
    %c3 = arith.constant 3 : index
    %c0_76 = arith.constant 0 : index
    %c0_77 = arith.constant 0 : index
    %151 = vector.load %arg8[%c3, %c0_76, %c0_77] : memref<4x128x1xf32, #tpu.memory_space<vmem>>, vector<1x128x1xf32>
    %152 = vector.shape_cast %151 : vector<1x128x1xf32> to vector<128x1xf32>
    %cst_78 = arith.constant dense<0xFF800000> : vector<128xf32>
    %153 = vector.multi_reduction <maximumf>, %150, %cst_78 [1] : vector<128x128xf32> to vector<128xf32>
    %154 = vector.shape_cast %153 : vector<128xf32> to vector<128x1xf32>
    %155 = arith.maximumf %152, %154 : vector<128x1xf32>
    %156 = arith.subf %152, %155 : vector<128x1xf32>
    %157 = math.exp %156 : vector<128x1xf32>
    %158 = vector.broadcast %155 : vector<128x1xf32> to vector<128x128xf32>
    %159 = arith.subf %150, %158 : vector<128x128xf32>
    %160 = math.exp %159 : vector<128x128xf32>
    %c3_79 = arith.constant 3 : index
    %c0_80 = arith.constant 0 : index
    %c0_81 = arith.constant 0 : index
    %161 = vector.load %arg9[%c3_79, %c0_80, %c0_81] : memref<4x128x1xf32, #tpu.memory_space<vmem>>, vector<1x128x1xf32>
    %162 = vector.shape_cast %161 : vector<1x128x1xf32> to vector<128x1xf32>
    %163 = arith.mulf %157, %162 : vector<128x1xf32>
    %cst_82 = arith.constant dense<0.000000e+00> : vector<128xf32>
    %164 = vector.multi_reduction <add>, %160, %cst_82 [1] : vector<128x128xf32> to vector<128xf32>
    %165 = vector.shape_cast %164 : vector<128xf32> to vector<128x1xf32>
    %166 = arith.addf %163, %165 : vector<128x1xf32>
    %c3_83 = arith.constant 3 : index
    %c0_84 = arith.constant 0 : index
    %c0_85 = arith.constant 0 : index
    %167 = vector.load %arg9[%c3_83, %c0_84, %c0_85] : memref<4x128x1xf32, #tpu.memory_space<vmem>>, vector<1x128x1xf32>
    %168 = vector.shape_cast %167 : vector<1x128x1xf32> to vector<128x1xf32>
    %169 = vector.shape_cast %166 : vector<128x1xf32> to vector<1x128x1xf32>
    tpu.vector_store %arg9[%c3_83, %c0_84, %c0_85], %169 {strides = array<i32>} : memref<4x128x1xf32, #tpu.memory_space<vmem>>, vector<1x128x1xf32>,
    %170 = vector.extract_strided_slice %5 {offsets = [0, 96], sizes = [128, 32], strides = [1, 1]} : vector<128x128xbf16> to vector<128x32xbf16>
    %c3_86 = arith.constant 3 : index
    %c0_87 = arith.constant 0 : index
    %c0_88 = arith.constant 0 : index
    %171 = vector.load %arg10[%c3_86, %c0_87, %c0_88] : memref<4x128x32xf32, #tpu.memory_space<vmem>>, vector<1x128x32xf32>
    %172 = vector.shape_cast %171 : vector<1x128x32xf32> to vector<128x32xf32>
    %173 = vector.broadcast %157 : vector<128x1xf32> to vector<128x32xf32>
    %174 = arith.mulf %173, %172 : vector<128x32xf32>
    %175 = arith.truncf %160 : vector<128x128xf32> to vector<128x128xbf16>
    %cst_89 = arith.constant dense<0.000000e+00> : vector<128x32xf32>
    %176 = tpu.matmul %175, %170, %cst_89 {dimension_numbers = #tpu.dot_dimension_numbers<[1], [0], [0], [1], [0, 0, 1, 1], [], []>} : vector<128x128xbf16>, vector<128x32xbf16>, vector<128x32xf32> -> vector<128x32xf32>
    %177 = arith.addf %174, %176 : vector<128x32xf32>
    %c3_90 = arith.constant 3 : index
    %c0_91 = arith.constant 0 : index
    %c0_92 = arith.constant 0 : index
    %178 = vector.load %arg10[%c3_90, %c0_91, %c0_92] : memref<4x128x32xf32, #tpu.memory_space<vmem>>, vector<1x128x32xf32>
    %179 = vector.shape_cast %178 : vector<1x128x32xf32> to vector<128x32xf32>
    %180 = vector.shape_cast %177 : vector<128x32xf32> to vector<1x128x32xf32>
    tpu.vector_store %arg10[%c3_90, %c0_91, %c0_92], %180 {strides = array<i32>} : memref<4x128x32xf32, #tpu.memory_space<vmem>>, vector<1x128x32xf32>,
    %c3_93 = arith.constant 3 : index
    %c0_94 = arith.constant 0 : index
    %c0_95 = arith.constant 0 : index
    %181 = vector.load %arg8[%c3_93, %c0_94, %c0_95] : memref<4x128x1xf32, #tpu.memory_space<vmem>>, vector<1x128x1xf32>
    %182 = vector.shape_cast %181 : vector<1x128x1xf32> to vector<128x1xf32>
    %183 = vector.shape_cast %155 : vector<128x1xf32> to vector<1x128x1xf32>
    tpu.vector_store %arg8[%c3_93, %c0_94, %c0_95], %183 {strides = array<i32>} : memref<4x128x1xf32, #tpu.memory_space<vmem>>, vector<1x128x1xf32>,
    %c1_i32 = arith.constant 1 : i32
    %184 = arith.cmpi eq, %arg1, %c1_i32 : i32
    %185 = arith.extui %184 : i1 to i32
    %c0_i32_96 = arith.constant 0 : i32
    %186 = arith.cmpi ne, %185, %c0_i32_96 : i32
    scf.if %186 {
      %c0_97 = arith.constant 0 : index
      %c0_98 = arith.constant 0 : index
      %c0_99 = arith.constant 0 : index
      %187 = vector.load %arg9[%c0_97, %c0_98, %c0_99] : memref<4x128x1xf32, #tpu.memory_space<vmem>>, vector<1x128x1xf32>
      %188 = vector.shape_cast %187 : vector<1x128x1xf32> to vector<128x1xf32>
      %189 = tpu.reciprocal %188 {approx = true} : vector<128x1xf32> -> vector<128x1xf32>
      %c0_100 = arith.constant 0 : index
      %c0_101 = arith.constant 0 : index
      %c0_102 = arith.constant 0 : index
      %190 = vector.load %arg10[%c0_100, %c0_101, %c0_102] : memref<4x128x32xf32, #tpu.memory_space<vmem>>, vector<1x128x32xf32>
      %191 = vector.shape_cast %190 : vector<1x128x32xf32> to vector<128x32xf32>
      %192 = vector.broadcast %189 : vector<128x1xf32> to vector<128x32xf32>
      %193 = arith.mulf %191, %192 : vector<128x32xf32>
      %c1_103 = arith.constant 1 : index
      %c0_104 = arith.constant 0 : index
      %c0_105 = arith.constant 0 : index
      %194 = vector.load %arg9[%c1_103, %c0_104, %c0_105] : memref<4x128x1xf32, #tpu.memory_space<vmem>>, vector<1x128x1xf32>
      %195 = vector.shape_cast %194 : vector<1x128x1xf32> to vector<128x1xf32>
      %196 = tpu.reciprocal %195 {approx = true} : vector<128x1xf32> -> vector<128x1xf32>
      %c1_106 = arith.constant 1 : index
      %c0_107 = arith.constant 0 : index
      %c0_108 = arith.constant 0 : index
      %197 = vector.load %arg10[%c1_106, %c0_107, %c0_108] : memref<4x128x32xf32, #tpu.memory_space<vmem>>, vector<1x128x32xf32>
      %198 = vector.shape_cast %197 : vector<1x128x32xf32> to vector<128x32xf32>
      %199 = vector.broadcast %196 : vector<128x1xf32> to vector<128x32xf32>
      %200 = arith.mulf %198, %199 : vector<128x32xf32>
      %c2_109 = arith.constant 2 : index
      %c0_110 = arith.constant 0 : index
      %c0_111 = arith.constant 0 : index
      %201 = vector.load %arg9[%c2_109, %c0_110, %c0_111] : memref<4x128x1xf32, #tpu.memory_space<vmem>>, vector<1x128x1xf32>
      %202 = vector.shape_cast %201 : vector<1x128x1xf32> to vector<128x1xf32>
      %203 = tpu.reciprocal %202 {approx = true} : vector<128x1xf32> -> vector<128x1xf32>
      %c2_112 = arith.constant 2 : index
      %c0_113 = arith.constant 0 : index
      %c0_114 = arith.constant 0 : index
      %204 = vector.load %arg10[%c2_112, %c0_113, %c0_114] : memref<4x128x32xf32, #tpu.memory_space<vmem>>, vector<1x128x32xf32>
      %205 = vector.shape_cast %204 : vector<1x128x32xf32> to vector<128x32xf32>
      %206 = vector.broadcast %203 : vector<128x1xf32> to vector<128x32xf32>
      %207 = arith.mulf %205, %206 : vector<128x32xf32>
      %c3_115 = arith.constant 3 : index
      %c0_116 = arith.constant 0 : index
      %c0_117 = arith.constant 0 : index
      %208 = vector.load %arg9[%c3_115, %c0_116, %c0_117] : memref<4x128x1xf32, #tpu.memory_space<vmem>>, vector<1x128x1xf32>
      %209 = vector.shape_cast %208 : vector<1x128x1xf32> to vector<128x1xf32>
      %210 = tpu.reciprocal %209 {approx = true} : vector<128x1xf32> -> vector<128x1xf32>
      %c3_118 = arith.constant 3 : index
      %c0_119 = arith.constant 0 : index
      %c0_120 = arith.constant 0 : index
      %211 = vector.load %arg10[%c3_118, %c0_119, %c0_120] : memref<4x128x32xf32, #tpu.memory_space<vmem>>, vector<1x128x32xf32>
      %212 = vector.shape_cast %211 : vector<1x128x32xf32> to vector<128x32xf32>
      %213 = vector.broadcast %210 : vector<128x1xf32> to vector<128x32xf32>
      %214 = arith.mulf %212, %213 : vector<128x32xf32>
      %215 = tpu.concatenate %193, %200, %207, %214 in 1 : vector<128x32xf32>, vector<128x32xf32>, vector<128x32xf32>, vector<128x32xf32> -> vector<128x128xf32>
      %c0_121 = arith.constant 0 : index
      %c0_122 = arith.constant 0 : index
      %216 = vector.load %arg6[%c0_121, %c0_122] : memref<1x128xf32, #tpu.memory_space<vmem>>, vector<1x128xf32>
      %217 = vector.broadcast %216 : vector<1x128xf32> to vector<128x128xf32>
      %218 = arith.addf %215, %217 : vector<128x128xf32>
      %cst_123 = arith.constant 0.000000e+00 : f32
      %219 = vector.broadcast %cst_123 : f32 to vector<128x128xf32>
      %220 = arith.cmpf ogt, %218, %219 : vector<128x128xf32>
      %cst_124 = arith.constant 0.000000e+00 : f32
      %221 = vector.broadcast %cst_124 : f32 to vector<128x128xf32>
      %222 = arith.minimumf %218, %221 : vector<128x128xf32>
      %223 = math.exp %222 : vector<128x128xf32>
      %cst_125 = arith.constant 1.000000e+00 : f32
      %224 = vector.broadcast %cst_125 : f32 to vector<128x128xf32>
      %225 = arith.subf %223, %224 : vector<128x128xf32>
      %226 = arith.select %220, %218, %225 : vector<128x128xi1>, vector<128x128xf32>
      %c0_126 = arith.constant 0 : index
      %c0_127 = arith.constant 0 : index
      %227 = vector.load %arg7[%c0_126, %c0_127] : memref<128x128xf32, #tpu.memory_space<vmem>>, vector<128x128xf32>
      tpu.vector_store %arg7[%c0_126, %c0_127], %226 {strides = array<i32>} : memref<128x128xf32, #tpu.memory_space<vmem>>, vector<128x128xf32>,
    } else {
    }
    return
  }
  func.func @transform_0(%arg0: i32, %arg1: i32) -> (i32, i32) {
    %c0_i32 = arith.constant 0 : i32
    %c0_i32_0 = arith.constant 0 : i32
    return %arg1, %c0_i32 : i32, i32
  }
  func.func @transform_1(%arg0: i32, %arg1: i32) -> (i32, i32) {
    %c0_i32 = arith.constant 0 : i32
    %c0_i32_0 = arith.constant 0 : i32
    return %c0_i32, %arg1 : i32, i32
  }
  func.func @transform_2(%arg0: i32, %arg1: i32) -> (i32, i32) {
    %c0_i32 = arith.constant 0 : i32
    %c0_i32_0 = arith.constant 0 : i32
    return %arg0, %c0_i32 : i32, i32
  }
  func.func @transform_3(%arg0: i32, %arg1: i32) -> (i32, i32) {
    %c0_i32 = arith.constant 0 : i32
    return %arg0, %arg1 : i32, i32
  }
  func.func @transform_4(%arg0: i32, %arg1: i32) -> (i32, i32) {
    %c0_i32 = arith.constant 0 : i32
    %c0_i32_0 = arith.constant 0 : i32
    %c0_i32_1 = arith.constant 0 : i32
    return %c0_i32, %c0_i32_0 : i32, i32
  }
  func.func @transform_5(%arg0: i32, %arg1: i32) -> (i32, i32) {
    %c0_i32 = arith.constant 0 : i32
    %c0_i32_0 = arith.constant 0 : i32
    return %arg0, %c0_i32 : i32, i32
  }
}

module attributes {stable_mosaic.version = 11 : i64} {
  func.func @gat_project_kernel(%arg0: i32, %arg1: memref<128x128xf32, #tpu.memory_space<vmem>>, %arg2: memref<128x64xbf16, #tpu.memory_space<vmem>>, %arg3: memref<1x128xf32, #tpu.memory_space<vmem>>, %arg4: memref<128x1xf32, #tpu.memory_space<vmem>>, %arg5: memref<128x64xbf16, #tpu.memory_space<vmem>>, %arg6: memref<1x128xf32, #tpu.memory_space<vmem>>, %arg7: memref<128x1xf32, #tpu.memory_space<vmem>>) attributes {dimension_semantics = [#tpu.dimension_semantics<parallel>], iteration_bounds = array<i64: 2>, scalar_prefetch = 0 : i64, scratch_operands = 0 : i64, tpu.core_type = #tpu.core_type<tc>, window_params = [{transform_indices = @transform_0, window_bounds = array<i64: 128, 128>}, {pipeline_mode = #tpu.pipeline_mode<synchronous>, transform_indices = @transform_1, window_bounds = array<i64: 128, 64>}, {pipeline_mode = #tpu.pipeline_mode<synchronous>, transform_indices = @transform_2, window_bounds = array<i64: 1, 128>}, {pipeline_mode = #tpu.pipeline_mode<synchronous>, transform_indices = @transform_3, window_bounds = array<i64: 128, 1>}, {transform_indices = @transform_4, window_bounds = array<i64: 128, 64>}, {transform_indices = @transform_5, window_bounds = array<i64: 1, 128>}, {transform_indices = @transform_6, window_bounds = array<i64: 128, 1>}]} {
    %c0 = arith.constant 0 : index
    %c0_0 = arith.constant 0 : index
    %0 = vector.load %arg1[%c0, %c0_0] : memref<128x128xf32, #tpu.memory_space<vmem>>, vector<128x128xf32>
    %1 = arith.truncf %0 : vector<128x128xf32> to vector<128x128xbf16>
    %c0_1 = arith.constant 0 : index
    %c0_2 = arith.constant 0 : index
    %2 = vector.load %arg2[%c0_1, %c0_2] : memref<128x64xbf16, #tpu.memory_space<vmem>>, vector<128x64xbf16>
    %cst = arith.constant dense<0.000000e+00> : vector<128x64xf32>
    %3 = tpu.matmul %1, %2, %cst {dimension_numbers = #tpu.dot_dimension_numbers<[1], [0], [0], [1], [0, 0, 1, 1], [], []>} : vector<128x128xbf16>, vector<128x64xbf16>, vector<128x64xf32> -> vector<128x64xf32>
    %4 = arith.truncf %3 : vector<128x64xf32> to vector<128x64xbf16>
    %c0_3 = arith.constant 0 : index
    %c0_4 = arith.constant 0 : index
    %5 = vector.load %arg5[%c0_3, %c0_4] : memref<128x64xbf16, #tpu.memory_space<vmem>>, vector<128x64xbf16>
    tpu.vector_store %arg5[%c0_3, %c0_4], %4 {strides = array<i32>} : memref<128x64xbf16, #tpu.memory_space<vmem>>, vector<128x64xbf16>,
    %c0_5 = arith.constant 0 : index
    %c0_6 = arith.constant 0 : index
    %6 = vector.load %arg3[%c0_5, %c0_6] : memref<1x128xf32, #tpu.memory_space<vmem>>, vector<1x128xf32>
    %cst_7 = arith.constant dense<0.000000e+00> : vector<1x128xf32>
    %7 = tpu.matmul %6, %0, %cst_7 {dimension_numbers = #tpu.dot_dimension_numbers<[1], [1], [0], [0], [0, 0, 1, 0], [], []>} : vector<1x128xf32>, vector<128x128xf32>, vector<1x128xf32> -> vector<1x128xf32>
    %c0_8 = arith.constant 0 : index
    %c0_9 = arith.constant 0 : index
    %8 = vector.load %arg6[%c0_8, %c0_9] : memref<1x128xf32, #tpu.memory_space<vmem>>, vector<1x128xf32>
    tpu.vector_store %arg6[%c0_8, %c0_9], %7 {strides = array<i32>} : memref<1x128xf32, #tpu.memory_space<vmem>>, vector<1x128xf32>,
    %c0_10 = arith.constant 0 : index
    %c0_11 = arith.constant 0 : index
    %9 = vector.load %arg4[%c0_10, %c0_11] : memref<128x1xf32, #tpu.memory_space<vmem>>, vector<128x1xf32>
    %cst_12 = arith.constant dense<0.000000e+00> : vector<128x1xf32>
    %10 = tpu.matmul %0, %9, %cst_12 {dimension_numbers = #tpu.dot_dimension_numbers<[1], [0], [0], [1], [0, 0, 1, 1], [], []>} : vector<128x128xf32>, vector<128x1xf32>, vector<128x1xf32> -> vector<128x1xf32>
    %c0_13 = arith.constant 0 : index
    %c0_14 = arith.constant 0 : index
    %11 = vector.load %arg7[%c0_13, %c0_14] : memref<128x1xf32, #tpu.memory_space<vmem>>, vector<128x1xf32>
    tpu.vector_store %arg7[%c0_13, %c0_14], %10 {strides = array<i32>} : memref<128x1xf32, #tpu.memory_space<vmem>>, vector<128x1xf32>,
    return
  }
  func.func @transform_0(%arg0: i32) -> (i32, i32) {
    %c0_i32 = arith.constant 0 : i32
    %c0_i32_0 = arith.constant 0 : i32
    return %arg0, %c0_i32 : i32, i32
  }
  func.func @transform_1(%arg0: i32) -> (i32, i32) {
    %c0_i32 = arith.constant 0 : i32
    %c0_i32_0 = arith.constant 0 : i32
    %c0_i32_1 = arith.constant 0 : i32
    return %c0_i32, %c0_i32_0 : i32, i32
  }
  func.func @transform_2(%arg0: i32) -> (i32, i32) {
    %c0_i32 = arith.constant 0 : i32
    %c0_i32_0 = arith.constant 0 : i32
    %c0_i32_1 = arith.constant 0 : i32
    return %c0_i32, %c0_i32_0 : i32, i32
  }
  func.func @transform_3(%arg0: i32) -> (i32, i32) {
    %c0_i32 = arith.constant 0 : i32
    %c0_i32_0 = arith.constant 0 : i32
    %c0_i32_1 = arith.constant 0 : i32
    return %c0_i32, %c0_i32_0 : i32, i32
  }
  func.func @transform_4(%arg0: i32) -> (i32, i32) {
    %c0_i32 = arith.constant 0 : i32
    %c0_i32_0 = arith.constant 0 : i32
    return %arg0, %c0_i32 : i32, i32
  }
  func.func @transform_5(%arg0: i32) -> (i32, i32) {
    %c0_i32 = arith.constant 0 : i32
    %c0_i32_0 = arith.constant 0 : i32
    return %c0_i32, %arg0 : i32, i32
  }
  func.func @transform_6(%arg0: i32) -> (i32, i32) {
    %c0_i32 = arith.constant 0 : i32
    %c0_i32_0 = arith.constant 0 : i32
    return %arg0, %c0_i32 : i32, i32
  }
}

module attributes {stable_mosaic.version = 11 : i64} {
  func.func @gat_attn_kernel(%arg0: i32, %arg1: i32, %arg2: memref<128x64xbf16, #tpu.memory_space<vmem>>, %arg3: memref<1x128xf32, #tpu.memory_space<vmem>>, %arg4: memref<128x1xf32, #tpu.memory_space<vmem>>, %arg5: memref<128x128xbf16, #tpu.memory_space<vmem>>, %arg6: memref<1x64xf32, #tpu.memory_space<vmem>>, %arg7: memref<128x64xf32, #tpu.memory_space<vmem>>, %arg8: memref<1x128x1xf32, #tpu.memory_space<vmem>>, %arg9: memref<1x128x1xf32, #tpu.memory_space<vmem>>, %arg10: memref<1x128x64xf32, #tpu.memory_space<vmem>>) attributes {dimension_semantics = [#tpu.dimension_semantics<parallel>, #tpu.dimension_semantics<arbitrary>], iteration_bounds = array<i64: 2, 2>, scalar_prefetch = 0 : i64, scratch_operands = 3 : i64, tpu.core_type = #tpu.core_type<tc>, window_params = [{transform_indices = @transform_0, window_bounds = array<i64: 128, 64>}, {transform_indices = @transform_1, window_bounds = array<i64: 1, 128>}, {transform_indices = @transform_2, window_bounds = array<i64: 128, 1>}, {transform_indices = @transform_3, window_bounds = array<i64: 128, 128>}, {pipeline_mode = #tpu.pipeline_mode<synchronous>, transform_indices = @transform_4, window_bounds = array<i64: 1, 64>}, {transform_indices = @transform_5, window_bounds = array<i64: 128, 64>}]} {
    %c0_i32 = arith.constant 0 : i32
    %0 = arith.cmpi eq, %arg1, %c0_i32 : i32
    %1 = arith.extui %0 : i1 to i32
    %c0_i32_0 = arith.constant 0 : i32
    %2 = arith.cmpi ne, %1, %c0_i32_0 : i32
    scf.if %2 {
      %cst_31 = arith.constant -1.000000e+30 : f32
      %52 = vector.broadcast %cst_31 : f32 to vector<1x128x1xf32>
      %c0_32 = arith.constant 0 : index
      %c0_33 = arith.constant 0 : index
      %c0_34 = arith.constant 0 : index
      %53 = vector.load %arg8[%c0_32, %c0_33, %c0_34] : memref<1x128x1xf32, #tpu.memory_space<vmem>>, vector<1x128x1xf32>
      tpu.vector_store %arg8[%c0_32, %c0_33, %c0_34], %52 {strides = array<i32>} : memref<1x128x1xf32, #tpu.memory_space<vmem>>, vector<1x128x1xf32>,
      %cst_35 = arith.constant 0.000000e+00 : f32
      %54 = vector.broadcast %cst_35 : f32 to vector<1x128x1xf32>
      %c0_36 = arith.constant 0 : index
      %c0_37 = arith.constant 0 : index
      %c0_38 = arith.constant 0 : index
      %55 = vector.load %arg9[%c0_36, %c0_37, %c0_38] : memref<1x128x1xf32, #tpu.memory_space<vmem>>, vector<1x128x1xf32>
      tpu.vector_store %arg9[%c0_36, %c0_37, %c0_38], %54 {strides = array<i32>} : memref<1x128x1xf32, #tpu.memory_space<vmem>>, vector<1x128x1xf32>,
      %cst_39 = arith.constant 0.000000e+00 : f32
      %56 = vector.broadcast %cst_39 : f32 to vector<1x128x64xf32>
      %c0_40 = arith.constant 0 : index
      %c0_41 = arith.constant 0 : index
      %c0_42 = arith.constant 0 : index
      %57 = vector.load %arg10[%c0_40, %c0_41, %c0_42] : memref<1x128x64xf32, #tpu.memory_space<vmem>>, vector<1x128x64xf32>
      tpu.vector_store %arg10[%c0_40, %c0_41, %c0_42], %56 {strides = array<i32>} : memref<1x128x64xf32, #tpu.memory_space<vmem>>, vector<1x128x64xf32>,
    } else {
    }
    %c0 = arith.constant 0 : index
    %c0_1 = arith.constant 0 : index
    %3 = vector.load %arg5[%c0, %c0_1] : memref<128x128xbf16, #tpu.memory_space<vmem>>, vector<128x128xbf16>
    %4 = arith.extf %3 : vector<128x128xbf16> to vector<128x128xf32>
    %c0_2 = arith.constant 0 : index
    %c0_3 = arith.constant 0 : index
    %5 = vector.load %arg2[%c0_2, %c0_3] : memref<128x64xbf16, #tpu.memory_space<vmem>>, vector<128x64xbf16>
    %c0_4 = arith.constant 0 : index
    %c0_5 = arith.constant 0 : index
    %6 = vector.load %arg3[%c0_4, %c0_5] : memref<1x128xf32, #tpu.memory_space<vmem>>, vector<1x128xf32>
    %c0_6 = arith.constant 0 : index
    %c0_7 = arith.constant 0 : index
    %7 = vector.load %arg4[%c0_6, %c0_7] : memref<128x1xf32, #tpu.memory_space<vmem>>, vector<128x1xf32>
    %8 = vector.broadcast %7 : vector<128x1xf32> to vector<128x128xf32>
    %9 = vector.broadcast %6 : vector<1x128xf32> to vector<128x128xf32>
    %10 = arith.addf %8, %9 : vector<128x128xf32>
    %cst = arith.constant 0.000000e+00 : f32
    %11 = vector.broadcast %cst : f32 to vector<128x128xf32>
    %12 = arith.cmpf ogt, %10, %11 : vector<128x128xf32>
    %cst_8 = arith.constant 2.000000e-01 : f32
    %13 = vector.broadcast %cst_8 : f32 to vector<128x128xf32>
    %14 = arith.mulf %13, %10 : vector<128x128xf32>
    %15 = arith.select %12, %10, %14 : vector<128x128xi1>, vector<128x128xf32>
    %16 = arith.addf %15, %4 : vector<128x128xf32>
    %c0_9 = arith.constant 0 : index
    %c0_10 = arith.constant 0 : index
    %c0_11 = arith.constant 0 : index
    %17 = vector.load %arg8[%c0_9, %c0_10, %c0_11] : memref<1x128x1xf32, #tpu.memory_space<vmem>>, vector<1x128x1xf32>
    %18 = vector.shape_cast %17 : vector<1x128x1xf32> to vector<128x1xf32>
    %cst_12 = arith.constant dense<0xFF800000> : vector<128xf32>
    %19 = vector.multi_reduction <maximumf>, %16, %cst_12 [1] : vector<128x128xf32> to vector<128xf32>
    %20 = vector.shape_cast %19 : vector<128xf32> to vector<128x1xf32>
    %21 = arith.maximumf %18, %20 : vector<128x1xf32>
    %22 = arith.subf %18, %21 : vector<128x1xf32>
    %23 = math.exp %22 : vector<128x1xf32>
    %24 = vector.broadcast %21 : vector<128x1xf32> to vector<128x128xf32>
    %25 = arith.subf %16, %24 : vector<128x128xf32>
    %26 = math.exp %25 : vector<128x128xf32>
    %c0_13 = arith.constant 0 : index
    %c0_14 = arith.constant 0 : index
    %c0_15 = arith.constant 0 : index
    %27 = vector.load %arg9[%c0_13, %c0_14, %c0_15] : memref<1x128x1xf32, #tpu.memory_space<vmem>>, vector<1x128x1xf32>
    %28 = vector.shape_cast %27 : vector<1x128x1xf32> to vector<128x1xf32>
    %29 = arith.mulf %23, %28 : vector<128x1xf32>
    %cst_16 = arith.constant dense<0.000000e+00> : vector<128xf32>
    %30 = vector.multi_reduction <add>, %26, %cst_16 [1] : vector<128x128xf32> to vector<128xf32>
    %31 = vector.shape_cast %30 : vector<128xf32> to vector<128x1xf32>
    %32 = arith.addf %29, %31 : vector<128x1xf32>
    %c0_17 = arith.constant 0 : index
    %c0_18 = arith.constant 0 : index
    %c0_19 = arith.constant 0 : index
    %33 = vector.load %arg9[%c0_17, %c0_18, %c0_19] : memref<1x128x1xf32, #tpu.memory_space<vmem>>, vector<1x128x1xf32>
    %34 = vector.shape_cast %33 : vector<1x128x1xf32> to vector<128x1xf32>
    %35 = vector.shape_cast %32 : vector<128x1xf32> to vector<1x128x1xf32>
    tpu.vector_store %arg9[%c0_17, %c0_18, %c0_19], %35 {strides = array<i32>} : memref<1x128x1xf32, #tpu.memory_space<vmem>>, vector<1x128x1xf32>,
    %c0_20 = arith.constant 0 : index
    %c0_21 = arith.constant 0 : index
    %c0_22 = arith.constant 0 : index
    %36 = vector.load %arg10[%c0_20, %c0_21, %c0_22] : memref<1x128x64xf32, #tpu.memory_space<vmem>>, vector<1x128x64xf32>
    %37 = vector.shape_cast %36 : vector<1x128x64xf32> to vector<128x64xf32>
    %38 = vector.broadcast %23 : vector<128x1xf32> to vector<128x64xf32>
    %39 = arith.mulf %38, %37 : vector<128x64xf32>
    %40 = arith.truncf %26 : vector<128x128xf32> to vector<128x128xbf16>
    %cst_23 = arith.constant dense<0.000000e+00> : vector<128x64xf32>
    %41 = tpu.matmul %40, %5, %cst_23 {dimension_numbers = #tpu.dot_dimension_numbers<[1], [0], [0], [1], [0, 0, 1, 1], [], []>} : vector<128x128xbf16>, vector<128x64xbf16>, vector<128x64xf32> -> vector<128x64xf32>
    %42 = arith.addf %39, %41 : vector<128x64xf32>
    %c0_24 = arith.constant 0 : index
    %c0_25 = arith.constant 0 : index
    %c0_26 = arith.constant 0 : index
    %43 = vector.load %arg10[%c0_24, %c0_25, %c0_26] : memref<1x128x64xf32, #tpu.memory_space<vmem>>, vector<1x128x64xf32>
    %44 = vector.shape_cast %43 : vector<1x128x64xf32> to vector<128x64xf32>
    %45 = vector.shape_cast %42 : vector<128x64xf32> to vector<1x128x64xf32>
    tpu.vector_store %arg10[%c0_24, %c0_25, %c0_26], %45 {strides = array<i32>} : memref<1x128x64xf32, #tpu.memory_space<vmem>>, vector<1x128x64xf32>,
    %c0_27 = arith.constant 0 : index
    %c0_28 = arith.constant 0 : index
    %c0_29 = arith.constant 0 : index
    %46 = vector.load %arg8[%c0_27, %c0_28, %c0_29] : memref<1x128x1xf32, #tpu.memory_space<vmem>>, vector<1x128x1xf32>
    %47 = vector.shape_cast %46 : vector<1x128x1xf32> to vector<128x1xf32>
    %48 = vector.shape_cast %21 : vector<128x1xf32> to vector<1x128x1xf32>
    tpu.vector_store %arg8[%c0_27, %c0_28, %c0_29], %48 {strides = array<i32>} : memref<1x128x1xf32, #tpu.memory_space<vmem>>, vector<1x128x1xf32>,
    %c1_i32 = arith.constant 1 : i32
    %49 = arith.cmpi eq, %arg1, %c1_i32 : i32
    %50 = arith.extui %49 : i1 to i32
    %c0_i32_30 = arith.constant 0 : i32
    %51 = arith.cmpi ne, %50, %c0_i32_30 : i32
    scf.if %51 {
      %c0_31 = arith.constant 0 : index
      %c0_32 = arith.constant 0 : index
      %c0_33 = arith.constant 0 : index
      %52 = vector.load %arg9[%c0_31, %c0_32, %c0_33] : memref<1x128x1xf32, #tpu.memory_space<vmem>>, vector<1x128x1xf32>
      %53 = vector.shape_cast %52 : vector<1x128x1xf32> to vector<128x1xf32>
      %54 = tpu.reciprocal %53 {approx = true} : vector<128x1xf32> -> vector<128x1xf32>
      %c0_34 = arith.constant 0 : index
      %c0_35 = arith.constant 0 : index
      %c0_36 = arith.constant 0 : index
      %55 = vector.load %arg10[%c0_34, %c0_35, %c0_36] : memref<1x128x64xf32, #tpu.memory_space<vmem>>, vector<1x128x64xf32>
      %56 = vector.shape_cast %55 : vector<1x128x64xf32> to vector<128x64xf32>
      %57 = vector.broadcast %54 : vector<128x1xf32> to vector<128x64xf32>
      %58 = arith.mulf %56, %57 : vector<128x64xf32>
      %c0_37 = arith.constant 0 : index
      %c0_38 = arith.constant 0 : index
      %59 = vector.load %arg6[%c0_37, %c0_38] : memref<1x64xf32, #tpu.memory_space<vmem>>, vector<1x64xf32>
      %60 = vector.broadcast %59 : vector<1x64xf32> to vector<128x64xf32>
      %61 = arith.addf %58, %60 : vector<128x64xf32>
      %c0_39 = arith.constant 0 : index
      %c0_40 = arith.constant 0 : index
      %62 = vector.load %arg7[%c0_39, %c0_40] : memref<128x64xf32, #tpu.memory_space<vmem>>, vector<128x64xf32>
      tpu.vector_store %arg7[%c0_39, %c0_40], %61 {strides = array<i32>} : memref<128x64xf32, #tpu.memory_space<vmem>>, vector<128x64xf32>,
    } else {
    }
    return
  }
  func.func @transform_0(%arg0: i32, %arg1: i32) -> (i32, i32) {
    %c0_i32 = arith.constant 0 : i32
    %c0_i32_0 = arith.constant 0 : i32
    return %arg1, %c0_i32 : i32, i32
  }
  func.func @transform_1(%arg0: i32, %arg1: i32) -> (i32, i32) {
    %c0_i32 = arith.constant 0 : i32
    %c0_i32_0 = arith.constant 0 : i32
    return %c0_i32, %arg1 : i32, i32
  }
  func.func @transform_2(%arg0: i32, %arg1: i32) -> (i32, i32) {
    %c0_i32 = arith.constant 0 : i32
    %c0_i32_0 = arith.constant 0 : i32
    return %arg0, %c0_i32 : i32, i32
  }
  func.func @transform_3(%arg0: i32, %arg1: i32) -> (i32, i32) {
    %c0_i32 = arith.constant 0 : i32
    return %arg0, %arg1 : i32, i32
  }
  func.func @transform_4(%arg0: i32, %arg1: i32) -> (i32, i32) {
    %c0_i32 = arith.constant 0 : i32
    %c0_i32_0 = arith.constant 0 : i32
    %c0_i32_1 = arith.constant 0 : i32
    return %c0_i32, %c0_i32_0 : i32, i32
  }
  func.func @transform_5(%arg0: i32, %arg1: i32) -> (i32, i32) {
    %c0_i32 = arith.constant 0 : i32
    %c0_i32_0 = arith.constant 0 : i32
    return %arg0, %c0_i32 : i32, i32
  }
}

</mosaic_0001>

<bundles_post_ra>
// kernel: gat_forward.4
= control target key start
LH: loop header
LB: loop body
LE: loop exit
PB: predicated region body
PF: predicated region fallthrough
CT: control target
= control target key end

     0   :  { %s911_s21 = smov 0   ;;  %s1099_s0 = inlined_call_operand.vmem [shape: f32[256,64], index: 0, kind: input, shape index: {}]   ;;  %s1100_s1 = inlined_call_operand.vmem [shape: bf16[64,128], index: 1, kind: input, shape index: {}]   ;;  %s1101_s2 = inlined_call_operand.vmem [shape: f32[4,64], index: 2, kind: input, shape index: {}]   ;;  %s1102_s3 = inlined_call_operand.vmem [shape: f32[64,4], index: 3, kind: input, shape index: {}]   ;;  %s1103_s4 = inlined_call_operand.vmem [shape: bf16[256,128], index: 4, kind: output, shape index: {0}]   ;;  %s1104_s5 = inlined_call_operand.vmem [shape: f32[4,256], index: 5, kind: output, shape index: {1}]   ;;  %s1105_s6 = inlined_call_operand.vmem [shape: f32[256,4], index: 6, kind: output, shape index: {2}]  }
   0x1 LB: > { %s917_s22 = sadd.s32 4294967295, %s874_s21   ;;  %p730_p0 = scmp.ge.s32.totalorder %s874_s21, 1  ;;  %s874_s21 = sphi %s911_s21, %s17_s21  }
   0x2   : > { %p218_p1 = scmp.lt.s32.totalorder %s874_s21, 3 }
   0x4   : > { %p219_p2 = pnand %p730_p0, %p218_p1 }
   0x5   : > { %s731_s29 = sshll.u32 (!%p219_p2), %s917_s22, 4  ;;  %p269_p4 = scmp.lt.s32.totalorder (!%p219_p2), %s917_s22, 1 }
   0x6   : > { %222 = sbr.rel (%p219_p2) target bundleno = 232 (0xe8), region = 36  ;;  %p258_p3 = scmp.lt.s32.totalorder (!%p219_p2), %s731_s29, 31 }
   0xb   : > { %v522_v0 = vld [vmem:[%s1102_s3 + $0x38] sm:$0xff]  ;;  %v521_v2 = vld [vmem:[%s1102_s3 + $0x30] sm:$0xff]  ;;  %v520_v3 = vld [vmem:[%s1102_s3 + $0x28] sm:$0xff]  ;;  %s1107_s29 = smov (!%p258_p3, %s731_s29), 31  ;;  %vm336_vm0 = vcmask 523264   ;;  %vm588_vm1 = vcmask 31744  }
   0xc   : > { %v800_v1 = vld [vmem:[%s1100_s1 + $0x18] sm:$0xff]  ;;  %531 = vmatpush.msra.mxu2 %v522_v0  ;;  %852 = vmatpush.msra.mxu3 %v522_v0  ;;  %v799_v4 = vld [vmem:[%s1100_s1 + $0x10] sm:$0xff]  ;;  %v519_v5 = vld [vmem:[%s1102_s3 + $0x20] sm:$0xff]  ;;  %s732_s12 = sshll.u32 %s1107_s29, 3  ;;  %s734_s13 = sshll.u32 %s1107_s29, 2 }
   0xd   : > { %365 = vmatpush.bf16.msra.mxu0 %v800_v1  ;;  %848 = vmatpush.bf16.msra.mxu1 %v800_v1  ;;  %v518_v6 = vld [vmem:[%s1102_s3 + $0x18] sm:$0xff]  ;;  %v798_v7 = vld [vmem:[%s1100_s1 + $0x8] sm:$0xff]  ;;  %s954_s19 = scalar_lea.vmem %s1099_s0, %s732_s12  ;;  %v517_v8 = vld [vmem:[%s1102_s3 + $0x10] sm:$0xff]  ;;  %s1043_s11 = scalar_lea.vmem %s1105_s6, %s732_s12 }
   0xe   : > { %532 = vmatpush.msra.mxu2 %v521_v2  ;;  %853 = vmatpush.msra.mxu3 %v521_v2  ;;  %v516_v9 = vld [vmem:[%s1102_s3 + $0x8] sm:$0xff]  ;;  %v797_v10 = vld [vmem:[%s1100_s1] sm:$0xff]  ;;  %v290_v13 = vld [vmem:[%s954_s19 + $0x50] sm:$0xff]  ;;  %s1051_s16 = scalar_lea.vmem %s1103_s4, %s734_s13  ;;  %s1109_s22 = smov (!%p269_p4, %s917_s22), 1 }
   0xf   : > { %v966_v11 = vld [vmem:[%s954_s19] sm:$0xff]  ;;  %v969_v12 = vld [vmem:[%s954_s19 + $0x8] sm:$0xff]  ;;  %v291_v14 = vld [vmem:[%s954_s19 + $0x58] sm:$0xff]  ;;  %s735_s29 = sshll.u32 %s1109_s22, 2 }
  0x10   : > { %533 = vmatpush.msra.mxu2 %v520_v3  ;;  %854 = vmatpush.msra.mxu3 %v520_v3  ;;  %v515_v15 = vld [vmem:[%s1102_s3] sm:$0xff]  ;;  %v295_v16 = vld [vmem:[%s954_s19 + $0x78] sm:$0xff]  ;;  %v296_v17 = vpack.c.bf16 %v969_v12, %v966_v11  ;;  %v301_v18 = vpack.c.bf16 %v291_v14, %v290_v13  ;;  %v294_v19 = vld [vmem:[%s954_s19 + $0x70] sm:$0xff]  ;;  %s272_s18 = scalar_lea.vmem %s1104_s5, %s735_s29 }
  0x11   : > { %366 = vmatpush.bf16.msra.mxu0 %v799_v4  ;;  %849 = vmatpush.bf16.msra.mxu1 %v799_v4  ;;  %v293_v20 = vld [vmem:[%s954_s19 + $0x68] sm:$0xff]  ;;  %v292_v21 = vld [vmem:[%s954_s19 + $0x60] sm:$0xff]  ;;  %v282_v22 = vld [vmem:[%s954_s19 + $0x10] sm:$0xff]  ;;  %v303_v32 = vpack.c.bf16 %v295_v16, %v294_v19 }
  0x12   : > { %534 = vmatpush.msra.mxu2 %v519_v5  ;;  %855 = vmatpush.msra.mxu3 %v519_v5  ;;  %v283_v23 = vld [vmem:[%s954_s19 + $0x18] sm:$0xff]  ;;  %v302_v25 = vpack.c.bf16 %v293_v20, %v292_v21  ;;  %v289_v26 = vld [vmem:[%s954_s19 + $0x48] sm:$0xff]  ;;  %v288_v27 = vld [vmem:[%s954_s19 + $0x40] sm:$0xff] }
  0x13   : > { %v297_v24 = vpack.c.bf16 %v283_v23, %v282_v22  ;;  %v284_v28 = vld [vmem:[%s954_s19 + $0x20] sm:$0xff]  ;;  %v285_v29 = vld [vmem:[%s954_s19 + $0x28] sm:$0xff]  ;;  %v287_v30 = vld [vmem:[%s954_s19 + $0x38] sm:$0xff]  ;;  %v300_v36 = vpack.c.bf16 %v289_v26, %v288_v27 }
  0x14   : > { %535 = vmatpush.msra.mxu2 %v518_v6  ;;  %856 = vmatpush.msra.mxu3 %v518_v6  ;;  %v298_v31 = vpack.c.bf16 %v285_v29, %v284_v28  ;;  %v286_v33 = vld [vmem:[%s954_s19 + $0x30] sm:$0xff]  ;;  %v442_v35 = vld [vmem:[%s1101_s2] sm:$0xf] }
  0x15   : > { %367 = vmatpush.bf16.msra.mxu0 %v798_v7  ;;  %850 = vmatpush.bf16.msra.mxu1 %v798_v7  ;;  %v299_v34 = vpack.c.bf16 %v287_v30, %v286_v33 }
  0x16   : > { %536 = vmatpush.msra.mxu2 %v517_v8  ;;  %857 = vmatpush.msra.mxu3 %v517_v8 }
  0x18   : > { %537 = vmatpush.msra.mxu2 %v516_v9  ;;  %858 = vmatpush.msra.mxu3 %v516_v9 }
  0x19   : > { %368 = vmatpush.bf16.msra.mxu0 %v797_v10  ;;  %851 = vmatpush.bf16.msra.mxu1 %v797_v10 }
  0x1a   : > { %538 = vmatpush.msra.mxu2 %v515_v15  ;;  %859 = vmatpush.msra.mxu3 %v515_v15 }
  0x1b   : > { %779 = vmatmul.msk.f32.vlgmr.msra.gmra.mxu2 %vm336_vm0, %v966_v11  ;;  %789 = vmatmul.msk.f32.vlgmr.msra.gmra.mxu3 %vm336_vm0, %v290_v13 }
  0x1c   : > { %754 = vmatmul.msk.bf16.vlgmr.msra.gmra.mxu0 %vm336_vm0, %v296_v17  ;;  %759 = vmatmul.msk.bf16.vlgmr.msra.gmra.mxu1 %vm336_vm0, %v301_v18 }
  0x1d   : > { %762 = vmatpush.xpose.msk.msrb.mxu1 %vm336_vm0, %v295_v16 }
  0x21   : > { %763 = vmatpush.xpose.msk.msrb.mxu1 %vm336_vm0, %v294_v19 }
  0x23   : > { %780 = vmatmul.msk.f32.gmra.mxu2 %vm336_vm0, %v969_v12  ;;  %790 = vmatmul.msk.f32.gmra.mxu3 %vm336_vm0, %v291_v14 }
  0x25   : > { %764 = vmatpush.xpose.msk.msrb.mxu1 %vm336_vm0, %v293_v20 }
  0x29   : > { %765 = vmatpush.xpose.msk.msrb.mxu1 %vm336_vm0, %v292_v21 }
  0x2b   : > { %781 = vmatmul.msk.f32.gmra.mxu2 %vm336_vm0, %v282_v22  ;;  %791 = vmatmul.msk.f32.gmra.mxu3 %vm336_vm0, %v292_v21 }
  0x2c   : > { %755 = vmatmul.msk.bf16.gmra.mxu0 %vm336_vm0, %v297_v24  ;;  %760 = vmatmul.msk.bf16.gmra.mxu1 %vm336_vm0, %v302_v25 }
  0x2d   : > { %766 = vmatpush.xpose.msk.msrb.mxu1 %vm336_vm0, %v291_v14 }
  0x31   : > { %767 = vmatpush.xpose.msk.msrb.mxu1 %vm336_vm0, %v290_v13 }
  0x33   : > { %782 = vmatmul.msk.f32.gmra.mxu2 %vm336_vm0, %v283_v23  ;;  %792 = vmatmul.msk.f32.gmra.mxu3 %vm336_vm0, %v293_v20 }
  0x35   : > { %768 = vmatpush.xpose.msk.msrb.mxu1 %vm336_vm0, %v289_v26 }
  0x39   : > { %769 = vmatpush.xpose.msk.msrb.mxu1 %vm336_vm0, %v288_v27 }
  0x3b   : > { %783 = vmatmul.msk.f32.gmra.mxu2 %vm336_vm0, %v284_v28  ;;  %793 = vmatmul.msk.f32.gmra.mxu3 %vm336_vm0, %v294_v19 }
  0x3c   : > { %756 = vmatmul.msk.bf16.gmra.mxu0 %vm336_vm0, %v298_v31  ;;  %761 = vmatmul.msk.bf16.gmra.mxu1 %vm336_vm0, %v303_v32 }
  0x3d   : > { %770 = vmatpush.xpose.msk.msrb.mxu1 %vm336_vm0, %v287_v30 }
  0x41   : > { %771 = vmatpush.xpose.msk.msrb.mxu1 %vm336_vm0, %v286_v33 }
  0x43   : > { %784 = vmatmul.msk.f32.gmra.mxu2 %vm336_vm0, %v285_v29  ;;  %794 = vmatmul.msk.f32.gmra.mxu3 %vm336_vm0, %v295_v16 }
  0x45   : > { %772 = vmatpush.xpose.msk.msrb.mxu1 %vm336_vm0, %v285_v29 }
  0x49   : > { %773 = vmatpush.xpose.msk.msrb.mxu1 %vm336_vm0, %v284_v28 }
  0x4b   : > { %785 = vmatmul.msk.f32.gmra.mxu2 %vm336_vm0, %v286_v33 }
  0x4c   : > { %757 = vmatmul.msk.bf16.gmra.mxu0 %vm336_vm0, %v299_v34 }
  0x4d   : > { %774 = vmatpush.xpose.msk.msrb.mxu1 %vm336_vm0, %v283_v23 }
  0x51   : > { %775 = vmatpush.xpose.msk.msrb.mxu1 %vm336_vm0, %v282_v22 }
  0x53   : > { %786 = vmatmul.msk.f32.gmra.mxu2 %vm336_vm0, %v287_v30 }
  0x55   : > { %776 = vmatpush.xpose.msk.msrb.mxu1 %vm336_vm0, %v969_v12 }
  0x59   : > { %777 = vmatpush.xpose.msk.msrb.mxu1 %vm336_vm0, %v966_v11 }
  0x5b   : > { %787 = vmatmul.msk.f32.gmra.mxu2 %vm336_vm0, %v288_v27 }
  0x5c   : > { %778 = vmatmul.msk.f32.vlgmr.msrb.gmra.mxu1 %vm336_vm0, %v442_v35  ;;  %758 = vmatmul.msk.bf16.gmra.mxu0 %vm336_vm0, %v300_v36 }
  0x63   : > { %788 = vmatmul.msk.f32.gmra.mxu2 %vm336_vm0, %v289_v26 }
  0x99   : > { %v370_v37 = vpop.f32.mrf.mxu0  ;;  %v395_v38 = vpop.f32.mrf.mxu1 }
  0x9e   : > { %v540_v39 = vpop.f32.mrf.mxu2  ;;  %v570_v40 = vpop.f32.mrf.mxu3 }
  0x9f   : > { %589 = vst.msk [vmem:[%s1043_s11] sm:$0xff] %vm588_vm1, %v540_v39 }
  0xa0   : > { %599 = vst.msk [vmem:[%s1043_s11 + $0x50] sm:$0xff] %vm588_vm1, %v570_v40 }
  0xa1   : > { %v372_v41 = vpop.f32.mrf.mxu0  ;;  %v397_v42 = vpop.f32.mrf.mxu1 }
  0xa2   : > { %v804_v43 = vpack.c.bf16 %v372_v41, %v370_v37  ;;  %v829_v44 = vpack.c.bf16 %v397_v42, %v395_v38 }
  0xa4   : > { %805 = vst [vmem:[%s1051_s16] sm:$0xff] %v804_v43  }
  0xa5   : > { %845 = vst [vmem:[%s1051_s16 + $0x28] sm:$0xff] %v829_v44  }
  0xa6   : > { %v543_v45 = vpop.f32.mrf.mxu2  ;;  %v573_v46 = vpop.f32.mrf.mxu3 }
  0xa7   : > { %590 = vst.msk [vmem:[%s1043_s11 + $0x8] sm:$0xff] %vm588_vm1, %v543_v45 }
  0xa8   : > { %600 = vst.msk [vmem:[%s1043_s11 + $0x58] sm:$0xff] %vm588_vm1, %v573_v46 }
  0xa9   : > { %v375_v47 = vpop.f32.mrf.mxu0  ;;  %v400_v48 = vpop.f32.mrf.mxu1 }
  0xae   : > { %v546_v49 = vpop.f32.mrf.mxu2  ;;  %v576_v50 = vpop.f32.mrf.mxu3 }
  0xaf   : > { %591 = vst.msk [vmem:[%s1043_s11 + $0x10] sm:$0xff] %vm588_vm1, %v546_v49 }
  0xb0   : > { %601 = vst.msk [vmem:[%s1043_s11 + $0x60] sm:$0xff] %vm588_vm1, %v576_v50 }
  0xb1   : > { %v377_v51 = vpop.f32.mrf.mxu0  ;;  %v402_v52 = vpop.f32.mrf.mxu1 }
  0xb2   : > { %v809_v53 = vpack.c.bf16 %v377_v51, %v375_v47  ;;  %v834_v54 = vpack.c.bf16 %v402_v52, %v400_v48 }
  0xb4   : > { %841 = vst [vmem:[%s1051_s16 + $0x8] sm:$0xff] %v809_v53  }
  0xb5   : > { %846 = vst [vmem:[%s1051_s16 + $0x30] sm:$0xff] %v834_v54  }
  0xb6   : > { %v549_v55 = vpop.f32.mrf.mxu2  ;;  %v579_v56 = vpop.f32.mrf.mxu3 }
  0xb7   : > { %592 = vst.msk [vmem:[%s1043_s11 + $0x18] sm:$0xff] %vm588_vm1, %v549_v55 }
  0xb8   : > { %602 = vst.msk [vmem:[%s1043_s11 + $0x68] sm:$0xff] %vm588_vm1, %v579_v56 }
  0xb9   : > { %v380_v57 = vpop.f32.mrf.mxu0  ;;  %v405_v58 = vpop.f32.mrf.mxu1 }
  0xbe   : > { %v552_v59 = vpop.f32.mrf.mxu2  ;;  %v582_v60 = vpop.f32.mrf.mxu3 }
  0xbf   : > { %593 = vst.msk [vmem:[%s1043_s11 + $0x20] sm:$0xff] %vm588_vm1, %v552_v59 }
  0xc0   : > { %603 = vst.msk [vmem:[%s1043_s11 + $0x70] sm:$0xff] %vm588_vm1, %v582_v60 }
  0xc1   : > { %v382_v61 = vpop.f32.mrf.mxu0  ;;  %v407_v62 = vpop.f32.mrf.mxu1 }
  0xc2   : > { %v814_v63 = vpack.c.bf16 %v382_v61, %v380_v57  ;;  %v839_v0 = vpack.c.bf16 %v407_v62, %v405_v58 }
  0xc4   : > { %842 = vst [vmem:[%s1051_s16 + $0x10] sm:$0xff] %v814_v63  }
  0xc5   : > { %847 = vst [vmem:[%s1051_s16 + $0x38] sm:$0xff] %v839_v0  }
  0xc6   : > { %v555_v1 = vpop.f32.mrf.mxu2  ;;  %v585_v2 = vpop.f32.mrf.mxu3 }
  0xc7   : > { %594 = vst.msk [vmem:[%s1043_s11 + $0x28] sm:$0xff] %vm588_vm1, %v555_v1 }
  0xc8   : > { %604 = vst.msk [vmem:[%s1043_s11 + $0x78] sm:$0xff] %vm588_vm1, %v585_v2 }
  0xc9   : > { %v385_v3 = vpop.f32.mrf.mxu0 }
  0xce   : > { %v558_v4 = vpop.f32.mrf.mxu2 }
  0xcf   : > { %595 = vst.msk [vmem:[%s1043_s11 + $0x30] sm:$0xff] %vm588_vm1, %v558_v4 }
  0xd1   : > { %v387_v5 = vpop.f32.mrf.mxu0 }
  0xd2   : > { %v819_v6 = vpack.c.bf16 %v387_v5, %v385_v3 }
  0xd4   : > { %843 = vst [vmem:[%s1051_s16 + $0x18] sm:$0xff] %v819_v6  }
  0xd6   : > { %v561_v7 = vpop.f32.mrf.mxu2 }
  0xd7   : > { %596 = vst.msk [vmem:[%s1043_s11 + $0x38] sm:$0xff] %vm588_vm1, %v561_v7 }
  0xd9   : > { %v511_v8 = vpop.f32.mrf.mxu1  ;;  %v390_v9 = vpop.f32.mrf.mxu0 }
  0xda   : > { %514 = vst [vmem:[%s272_s18] sm:$0xf] %v511_v8 }
  0xde   : > { %v564_v10 = vpop.f32.mrf.mxu2 }
  0xdf   : > { %597 = vst.msk [vmem:[%s1043_s11 + $0x40] sm:$0xff] %vm588_vm1, %v564_v10 }
  0xe1   : > { %v392_v11 = vpop.f32.mrf.mxu0 }
  0xe2   : > { %v824_v12 = vpack.c.bf16 %v392_v11, %v390_v9 }
  0xe4   : > { %844 = vst [vmem:[%s1051_s16 + $0x20] sm:$0xff] %v824_v12  }
  0xe6   : > { %v567_v13 = vpop.f32.mrf.mxu2 }
  0xe7   : > { %598 = vst.msk [vmem:[%s1043_s11 + $0x48] sm:$0xff] %vm588_vm1, %v567_v13 }
  0xe8 PF: > { %s17_s21 = sadd.s32 1, %s874_s21  }
  0xe9   : > { %p14_p5 = scmp.ge.s32.totalorder %s17_s21, 4  }
  0xeb   :  { %16 = sbr.rel (!%p14_p5) target bundleno = 1 (0x1), region = 90 }

// kernel: gat_forward.6
= control target key start
LH: loop header
LB: loop body
LE: loop exit
PB: predicated region body
PF: predicated region fallthrough
CT: control target
= control target key end

     0   :  { %s810_s21 = smov 0   ;;  %s1022_s0 = inlined_call_operand.vmem [shape: f32[256,128], index: 0, kind: input, shape index: {}]   ;;  %s1023_s1 = inlined_call_operand.vmem [shape: bf16[128,64], index: 1, kind: input, shape index: {}]   ;;  %s1024_s2 = inlined_call_operand.vmem [shape: f32[1,128], index: 2, kind: input, shape index: {}]   ;;  %s1025_s3 = inlined_call_operand.vmem [shape: f32[128,1], index: 3, kind: input, shape index: {}]   ;;  %s1026_s4 = inlined_call_operand.vmem [shape: bf16[256,64], index: 4, kind: output, shape index: {0}]   ;;  %s1027_s5 = inlined_call_operand.vmem [shape: f32[1,256], index: 5, kind: output, shape index: {1}]   ;;  %s1028_s6 = inlined_call_operand.vmem [shape: f32[256,1], index: 6, kind: output, shape index: {2}]  }
   0x1 LB: > { %s816_s22 = sadd.s32 4294967295, %s773_s21   ;;  %p686_p0 = scmp.ge.s32.totalorder %s773_s21, 1  ;;  %s773_s21 = sphi %s810_s21, %s17_s21  }
   0x2   : > { %p218_p1 = scmp.lt.s32.totalorder %s773_s21, 3 }
   0x4   : > { %p219_p2 = pnand %p686_p0, %p218_p1 }
   0x5   : > { %s687_s17 = sshll.u32 (!%p219_p2), %s816_s22, 4  ;;  %p268_p4 = scmp.lt.s32.totalorder (!%p219_p2), %s816_s22, 1 }
   0x6   : > { %222 = sbr.rel (%p219_p2) target bundleno = 248 (0xf8), region = 36  ;;  %p257_p3 = scmp.lt.s32.totalorder (!%p219_p2), %s687_s17, 31 }
   0xb   : > { %v484_v0 = vld [vmem:[%s1025_s3 + $0x78] sm:$0xff]  ;;  %v483_v2 = vld [vmem:[%s1025_s3 + $0x70] sm:$0xff]  ;;  %v482_v3 = vld [vmem:[%s1025_s3 + $0x68] sm:$0xff]  ;;  %s1030_s17 = smov (!%p257_p3, %s687_s17), 31  ;;  %vm430_vm0 = vcmask 519168   ;;  %vm550_vm1 = vcmask 7168  }
   0xc   : > { %v734_v1 = vld [vmem:[%s1023_s1 + $0x38] sm:$0xff]  ;;  %743 = vmatpush.msra.mxu2 %v484_v0  ;;  %485 = vmatpush.msra.mxu1 %v484_v0  ;;  %v733_v4 = vld [vmem:[%s1023_s1 + $0x30] sm:$0xff]  ;;  %v481_v5 = vld [vmem:[%s1025_s3 + $0x60] sm:$0xff]  ;;  %s688_s12 = sshll.u32 %s1030_s17, 3  ;;  %s690_s11 = sshll.u32 %s1030_s17, 2 }
   0xd   : > { %365 = vmatpush.bf16.msra.mxu0 %v734_v1  ;;  %735 = vmatpush.bf16.msra.mxu3 %v734_v1  ;;  %v480_v6 = vld [vmem:[%s1025_s3 + $0x58] sm:$0xff]  ;;  %v732_v7 = vld [vmem:[%s1023_s1 + $0x28] sm:$0xff]  ;;  %v479_v8 = vld [vmem:[%s1025_s3 + $0x50] sm:$0xff]  ;;  %s889_s24 = scalar_lea.vmem %s1022_s0, %s688_s12  ;;  %s941_s15 = scalar_lea.vmem %s1026_s4, %s690_s11 }
   0xe   : > { %744 = vmatpush.msra.mxu2 %v483_v2  ;;  %486 = vmatpush.msra.mxu1 %v483_v2  ;;  %v478_v9 = vld [vmem:[%s1025_s3 + $0x48] sm:$0xff]  ;;  %v731_v10 = vld [vmem:[%s1023_s1 + $0x20] sm:$0xff]  ;;  %v476_v12 = vld [vmem:[%s1025_s3 + $0x38] sm:$0xff]  ;;  %s950_s19 = scalar_lea.vmem %s1028_s6, %s688_s12  ;;  %s1032_s22 = smov (!%p268_p4, %s816_s22), 1 }
   0xf   : > { %v477_v11 = vld [vmem:[%s1025_s3 + $0x40] sm:$0xff]  ;;  %v730_v13 = vld [vmem:[%s1023_s1 + $0x18] sm:$0xff]  ;;  %v475_v14 = vld [vmem:[%s1025_s3 + $0x30] sm:$0xff]  ;;  %s270_s20 = scalar_lea.vmem %s1027_s5, %s1032_s22 }
  0x10   : > { %745 = vmatpush.msra.mxu2 %v482_v3  ;;  %487 = vmatpush.msra.mxu1 %v482_v3  ;;  %v474_v15 = vld [vmem:[%s1025_s3 + $0x28] sm:$0xff]  ;;  %v729_v16 = vld [vmem:[%s1023_s1 + $0x10] sm:$0xff]  ;;  %v473_v17 = vld [vmem:[%s1025_s3 + $0x20] sm:$0xff] }
  0x11   : > { %366 = vmatpush.bf16.msra.mxu0 %v733_v4  ;;  %736 = vmatpush.bf16.msra.mxu3 %v733_v4  ;;  %v472_v18 = vld [vmem:[%s1025_s3 + $0x18] sm:$0xff]  ;;  %v728_v19 = vld [vmem:[%s1023_s1 + $0x8] sm:$0xff]  ;;  %v471_v20 = vld [vmem:[%s1025_s3 + $0x10] sm:$0xff] }
  0x12   : > { %746 = vmatpush.msra.mxu2 %v481_v5  ;;  %488 = vmatpush.msra.mxu1 %v481_v5  ;;  %v470_v21 = vld [vmem:[%s1025_s3 + $0x8] sm:$0xff]  ;;  %v727_v22 = vld [vmem:[%s1023_s1] sm:$0xff]  ;;  %v287_v25 = vld [vmem:[%s889_s24 + $0x50] sm:$0xff] }
  0x13   : > { %v901_v23 = vld [vmem:[%s889_s24] sm:$0xff]  ;;  %v904_v24 = vld [vmem:[%s889_s24 + $0x8] sm:$0xff]  ;;  %v288_v26 = vld [vmem:[%s889_s24 + $0x58] sm:$0xff] }
  0x14   : > { %747 = vmatpush.msra.mxu2 %v480_v6  ;;  %489 = vmatpush.msra.mxu1 %v480_v6  ;;  %v469_v27 = vld [vmem:[%s1025_s3] sm:$0xff]  ;;  %v912_v28 = vld [vmem:[%s889_s24 + $0x78] sm:$0xff]  ;;  %v283_v29 = vld [vmem:[%s889_s24 + $0x30] sm:$0xff]  ;;  %v293_v30 = vpack.c.bf16 %v904_v24, %v901_v23  ;;  %v298_v31 = vpack.c.bf16 %v288_v26, %v287_v25 }
  0x15   : > { %367 = vmatpush.bf16.msra.mxu0 %v732_v7  ;;  %737 = vmatpush.bf16.msra.mxu3 %v732_v7  ;;  %v291_v32 = vld [vmem:[%s889_s24 + $0x70] sm:$0xff]  ;;  %v290_v33 = vld [vmem:[%s889_s24 + $0x68] sm:$0xff]  ;;  %v284_v34 = vld [vmem:[%s889_s24 + $0x38] sm:$0xff] }
  0x16   : > { %748 = vmatpush.msra.mxu2 %v479_v8  ;;  %490 = vmatpush.msra.mxu1 %v479_v8  ;;  %v289_v35 = vld [vmem:[%s889_s24 + $0x60] sm:$0xff]  ;;  %v279_v36 = vld [vmem:[%s889_s24 + $0x10] sm:$0xff]  ;;  %v280_v37 = vld [vmem:[%s889_s24 + $0x18] sm:$0xff]  ;;  %v300_v45 = vpack.c.bf16 %v912_v28, %v291_v32  ;;  %v296_v46 = vpack.c.bf16 %v284_v34, %v283_v29 }
  0x17   : > { %v285_v38 = vld [vmem:[%s889_s24 + $0x40] sm:$0xff]  ;;  %v294_v39 = vpack.c.bf16 %v280_v37, %v279_v36  ;;  %v299_v40 = vpack.c.bf16 %v290_v33, %v289_v35  ;;  %v286_v41 = vld [vmem:[%s889_s24 + $0x48] sm:$0xff] }
  0x18   : > { %749 = vmatpush.msra.mxu2 %v478_v9  ;;  %491 = vmatpush.msra.mxu1 %v478_v9  ;;  %v281_v42 = vld [vmem:[%s889_s24 + $0x20] sm:$0xff]  ;;  %v282_v43 = vld [vmem:[%s889_s24 + $0x28] sm:$0xff]  ;;  %v297_v48 = vpack.c.bf16 %v286_v41, %v285_v38 }
  0x19   : > { %368 = vmatpush.bf16.msra.mxu0 %v731_v10  ;;  %738 = vmatpush.bf16.msra.mxu3 %v731_v10  ;;  %v295_v44 = vpack.c.bf16 %v282_v43, %v281_v42  ;;  %v447_v47 = vld [vmem:[%s1024_s2] sm:$0x1] }
  0x1a   : > { %750 = vmatpush.msra.mxu2 %v477_v11  ;;  %492 = vmatpush.msra.mxu1 %v477_v11 }
  0x1c   : > { %751 = vmatpush.msra.mxu2 %v476_v12  ;;  %493 = vmatpush.msra.mxu1 %v476_v12 }
  0x1d   : > { %369 = vmatpush.bf16.msra.mxu0 %v730_v13  ;;  %739 = vmatpush.bf16.msra.mxu3 %v730_v13 }
  0x1e   : > { %752 = vmatpush.msra.mxu2 %v475_v14  ;;  %494 = vmatpush.msra.mxu1 %v475_v14 }
  0x20   : > { %753 = vmatpush.msra.mxu2 %v474_v15  ;;  %495 = vmatpush.msra.mxu1 %v474_v15 }
  0x21   : > { %370 = vmatpush.bf16.msra.mxu0 %v729_v16  ;;  %740 = vmatpush.bf16.msra.mxu3 %v729_v16 }
  0x22   : > { %754 = vmatpush.msra.mxu2 %v473_v17  ;;  %496 = vmatpush.msra.mxu1 %v473_v17 }
  0x24   : > { %755 = vmatpush.msra.mxu2 %v472_v18  ;;  %497 = vmatpush.msra.mxu1 %v472_v18 }
  0x25   : > { %371 = vmatpush.bf16.msra.mxu0 %v728_v19  ;;  %741 = vmatpush.bf16.msra.mxu3 %v728_v19 }
  0x26   : > { %756 = vmatpush.msra.mxu2 %v471_v20  ;;  %498 = vmatpush.msra.mxu1 %v471_v20 }
  0x28   : > { %757 = vmatpush.msra.mxu2 %v470_v21  ;;  %499 = vmatpush.msra.mxu1 %v470_v21 }
  0x29   : > { %372 = vmatpush.bf16.msra.mxu0 %v727_v22  ;;  %742 = vmatpush.bf16.msra.mxu3 %v727_v22 }
  0x2a   : > { %758 = vmatpush.msra.mxu2 %v469_v27  ;;  %500 = vmatpush.msra.mxu1 %v469_v27 }
  0x2b   : > { %519 = vmatmul.f32.vlgmr.msra.gmra.mxu2 %v283_v29  ;;  %501 = vmatmul.f32.vlgmr.msra.gmra.mxu1 %v901_v23 }
  0x2c   : > { %373 = vmatmul.bf16.vlgmr.msra.gmra.mxu0 %v293_v30  ;;  %398 = vmatmul.bf16.vlgmr.msra.gmra.mxu3 %v298_v31 }
  0x2d   : > { %448 = vmatpush.xpose.msrb.mxu3 %v912_v28 }
  0x31   : > { %449 = vmatpush.xpose.msrb.mxu3 %v291_v32 }
  0x33   : > { %522 = vmatmul.f32.gmra.mxu2 %v284_v34  ;;  %504 = vmatmul.f32.gmra.mxu1 %v904_v24 }
  0x35   : > { %450 = vmatpush.xpose.msrb.mxu3 %v290_v33 }
  0x39   : > { %451 = vmatpush.xpose.msrb.mxu3 %v289_v35 }
  0x3b   : > { %525 = vmatmul.f32.gmra.mxu2 %v285_v38  ;;  %507 = vmatmul.f32.gmra.mxu1 %v279_v36 }
  0x3c   : > { %378 = vmatmul.bf16.gmra.mxu0 %v294_v39  ;;  %403 = vmatmul.bf16.gmra.mxu3 %v299_v40 }
  0x3d   : > { %452 = vmatpush.xpose.msrb.mxu3 %v288_v26 }
  0x41   : > { %453 = vmatpush.xpose.msrb.mxu3 %v287_v25 }
  0x43   : > { %528 = vmatmul.f32.gmra.mxu2 %v286_v41  ;;  %510 = vmatmul.f32.gmra.mxu1 %v280_v37 }
  0x45   : > { %454 = vmatpush.xpose.msrb.mxu3 %v286_v41 }
  0x49   : > { %455 = vmatpush.xpose.msrb.mxu3 %v285_v38 }
  0x4b   : > { %531 = vmatmul.f32.gmra.mxu2 %v287_v25  ;;  %513 = vmatmul.f32.gmra.mxu1 %v281_v42 }
  0x4c   : > { %383 = vmatmul.bf16.gmra.mxu0 %v295_v44  ;;  %408 = vmatmul.bf16.gmra.mxu3 %v300_v45 }
  0x4d   : > { %456 = vmatpush.xpose.msrb.mxu3 %v284_v34 }
  0x51   : > { %457 = vmatpush.xpose.msrb.mxu3 %v283_v29 }
  0x53   : > { %534 = vmatmul.f32.gmra.mxu2 %v288_v26  ;;  %516 = vmatmul.f32.gmra.mxu1 %v282_v43 }
  0x55   : > { %458 = vmatpush.xpose.msrb.mxu3 %v282_v43 }
  0x59   : > { %459 = vmatpush.xpose.msrb.mxu3 %v281_v42 }
  0x5b   : > { %537 = vmatmul.f32.gmra.mxu2 %v289_v35 }
  0x5c   : > { %388 = vmatmul.bf16.gmra.mxu0 %v296_v46 }
  0x5d   : > { %460 = vmatpush.xpose.msrb.mxu3 %v280_v37 }
  0x61   : > { %461 = vmatpush.xpose.msrb.mxu3 %v279_v36 }
  0x63   : > { %540 = vmatmul.f32.gmra.mxu2 %v290_v33 }
  0x65   : > { %462 = vmatpush.xpose.msrb.mxu3 %v904_v24 }
  0x69   : > { %463 = vmatpush.xpose.msrb.mxu3 %v901_v23 }
  0x6b   : > { %543 = vmatmul.f32.gmra.mxu2 %v291_v32 }
  0x6c   : > { %464 = vmatmul.f32.vlgmr.msrb.gmra.mxu3 %v447_v47  ;;  %393 = vmatmul.bf16.gmra.mxu0 %v297_v48 }
  0x73   : > { %546 = vmatmul.f32.gmra.mxu2 %v912_v28 }
  0xa8   : > { %v502_v51 = vpop.f32.mrf.mxu1 }
  0xa9   : > { %v374_v49 = vpop.f32.mrf.mxu0  ;;  %551 = vst.msk [vmem:[%s950_s19] sm:$0xff] %vm550_vm1, %v502_v51 }
  0xaa   : > { %v414_v50 = vpack.c.bf16 %v374_v49, %v374_v49 }
  0xac   : > { %431 = vst.msk [vmem:[%s941_s15] sm:$0xf] %vm430_vm0, %v414_v50 }
  0xae   : > { %v520_v52 = vpop.f32.mrf.mxu2 }
  0xaf   : > { %557 = vst.msk [vmem:[%s950_s19 + $0x30] sm:$0xff] %vm550_vm1, %v520_v52  ;;  %v399_v53 = vpop.f32.mrf.mxu3 }
  0xb0   : > { %v424_v54 = vpack.c.bf16 %v399_v53, %v399_v53  ;;  %v505_v57 = vpop.f32.mrf.mxu1 }
  0xb1   : > { %v376_v55 = vpop.f32.mrf.mxu0  ;;  %552 = vst.msk [vmem:[%s950_s19 + $0x8] sm:$0xff] %vm550_vm1, %v505_v57 }
  0xb2   : > { %v415_v56 = vpack.c.bf16 %v376_v55, %v376_v55  ;;  %441 = vst.msk [vmem:[%s941_s15 + $0x28] sm:$0xf] %vm430_vm0, %v424_v54 }
  0xb4   : > { %432 = vst.msk [vmem:[%s941_s15 + $0x4] sm:$0xf] %vm430_vm0, %v415_v56 }
  0xb6   : > { %v523_v58 = vpop.f32.mrf.mxu2 }
  0xb7   : > { %558 = vst.msk [vmem:[%s950_s19 + $0x38] sm:$0xff] %vm550_vm1, %v523_v58  ;;  %v401_v59 = vpop.f32.mrf.mxu3 }
  0xb8   : > { %v425_v60 = vpack.c.bf16 %v401_v59, %v401_v59  ;;  %v508_v63 = vpop.f32.mrf.mxu1 }
  0xb9   : > { %v379_v61 = vpop.f32.mrf.mxu0  ;;  %553 = vst.msk [vmem:[%s950_s19 + $0x10] sm:$0xff] %vm550_vm1, %v508_v63 }
  0xba   : > { %v416_v62 = vpack.c.bf16 %v379_v61, %v379_v61  ;;  %442 = vst.msk [vmem:[%s941_s15 + $0x2c] sm:$0xf] %vm430_vm0, %v425_v60 }
  0xbc   : > { %433 = vst.msk [vmem:[%s941_s15 + $0x8] sm:$0xf] %vm430_vm0, %v416_v62 }
  0xbe   : > { %v526_v0 = vpop.f32.mrf.mxu2 }
  0xbf   : > { %559 = vst.msk [vmem:[%s950_s19 + $0x40] sm:$0xff] %vm550_vm1, %v526_v0  ;;  %v404_v1 = vpop.f32.mrf.mxu3 }
  0xc0   : > { %v426_v2 = vpack.c.bf16 %v404_v1, %v404_v1  ;;  %v511_v5 = vpop.f32.mrf.mxu1 }
  0xc1   : > { %v381_v3 = vpop.f32.mrf.mxu0  ;;  %554 = vst.msk [vmem:[%s950_s19 + $0x18] sm:$0xff] %vm550_vm1, %v511_v5 }
  0xc2   : > { %v417_v4 = vpack.c.bf16 %v381_v3, %v381_v3  ;;  %443 = vst.msk [vmem:[%s941_s15 + $0x30] sm:$0xf] %vm430_vm0, %v426_v2 }
  0xc4   : > { %434 = vst.msk [vmem:[%s941_s15 + $0xc] sm:$0xf] %vm430_vm0, %v417_v4 }
  0xc6   : > { %v529_v6 = vpop.f32.mrf.mxu2 }
  0xc7   : > { %560 = vst.msk [vmem:[%s950_s19 + $0x48] sm:$0xff] %vm550_vm1, %v529_v6  ;;  %v406_v7 = vpop.f32.mrf.mxu3 }
  0xc8   : > { %v427_v8 = vpack.c.bf16 %v406_v7, %v406_v7  ;;  %v514_v11 = vpop.f32.mrf.mxu1 }
  0xc9   : > { %v384_v9 = vpop.f32.mrf.mxu0  ;;  %555 = vst.msk [vmem:[%s950_s19 + $0x20] sm:$0xff] %vm550_vm1, %v514_v11 }
  0xca   : > { %v418_v10 = vpack.c.bf16 %v384_v9, %v384_v9  ;;  %444 = vst.msk [vmem:[%s941_s15 + $0x34] sm:$0xf] %vm430_vm0, %v427_v8 }
  0xcc   : > { %435 = vst.msk [vmem:[%s941_s15 + $0x10] sm:$0xf] %vm430_vm0, %v418_v10 }
  0xce   : > { %v532_v12 = vpop.f32.mrf.mxu2 }
  0xcf   : > { %561 = vst.msk [vmem:[%s950_s19 + $0x50] sm:$0xff] %vm550_vm1, %v532_v12  ;;  %v409_v13 = vpop.f32.mrf.mxu3 }
  0xd0   : > { %v428_v14 = vpack.c.bf16 %v409_v13, %v409_v13  ;;  %v517_v17 = vpop.f32.mrf.mxu1 }
  0xd1   : > { %v386_v15 = vpop.f32.mrf.mxu0  ;;  %556 = vst.msk [vmem:[%s950_s19 + $0x28] sm:$0xff] %vm550_vm1, %v517_v17 }
  0xd2   : > { %v419_v16 = vpack.c.bf16 %v386_v15, %v386_v15  ;;  %445 = vst.msk [vmem:[%s941_s15 + $0x38] sm:$0xf] %vm430_vm0, %v428_v14 }
  0xd4   : > { %436 = vst.msk [vmem:[%s941_s15 + $0x14] sm:$0xf] %vm430_vm0, %v419_v16 }
  0xd6   : > { %v535_v18 = vpop.f32.mrf.mxu2 }
  0xd7   : > { %562 = vst.msk [vmem:[%s950_s19 + $0x58] sm:$0xff] %vm550_vm1, %v535_v18  ;;  %v411_v19 = vpop.f32.mrf.mxu3 }
  0xd8   : > { %v429_v20 = vpack.c.bf16 %v411_v19, %v411_v19 }
  0xd9   : > { %v389_v21 = vpop.f32.mrf.mxu0 }
  0xda   : > { %v420_v22 = vpack.c.bf16 %v389_v21, %v389_v21  ;;  %446 = vst.msk [vmem:[%s941_s15 + $0x3c] sm:$0xf] %vm430_vm0, %v429_v20 }
  0xdc   : > { %437 = vst.msk [vmem:[%s941_s15 + $0x18] sm:$0xf] %vm430_vm0, %v420_v22 }
  0xde   : > { %v538_v23 = vpop.f32.mrf.mxu2 }
  0xdf   : > { %563 = vst.msk [vmem:[%s950_s19 + $0x60] sm:$0xff] %vm550_vm1, %v538_v23 }
  0xe1   : > { %v391_v24 = vpop.f32.mrf.mxu0 }
  0xe2   : > { %v421_v25 = vpack.c.bf16 %v391_v24, %v391_v24 }
  0xe4   : > { %438 = vst.msk [vmem:[%s941_s15 + $0x1c] sm:$0xf] %vm430_vm0, %v421_v25 }
  0xe6   : > { %v541_v26 = vpop.f32.mrf.mxu2 }
  0xe7   : > { %564 = vst.msk [vmem:[%s950_s19 + $0x68] sm:$0xff] %vm550_vm1, %v541_v26 }
  0xe9   : > { %v394_v27 = vpop.f32.mrf.mxu0 }
  0xea   : > { %v422_v28 = vpack.c.bf16 %v394_v27, %v394_v27 }
  0xec   : > { %439 = vst.msk [vmem:[%s941_s15 + $0x20] sm:$0xf] %vm430_vm0, %v422_v28 }
  0xee   : > { %v544_v30 = vpop.f32.mrf.mxu2 }
  0xef   : > { %v465_v29 = vpop.f32.mrf.mxu3  ;;  %565 = vst.msk [vmem:[%s950_s19 + $0x70] sm:$0xff] %vm550_vm1, %v544_v30 }
  0xf0   : > { %468 = vst [vmem:[%s270_s20] sm:$0x1] %v465_v29 }
  0xf1   : > { %v396_v31 = vpop.f32.mrf.mxu0 }
  0xf2   : > { %v423_v32 = vpack.c.bf16 %v396_v31, %v396_v31 }
  0xf4   : > { %440 = vst.msk [vmem:[%s941_s15 + $0x24] sm:$0xf] %vm430_vm0, %v423_v32 }
  0xf6   : > { %v547_v33 = vpop.f32.mrf.mxu2 }
  0xf7   : > { %566 = vst.msk [vmem:[%s950_s19 + $0x78] sm:$0xff] %vm550_vm1, %v547_v33 }
  0xf8 PF: > { %s17_s21 = sadd.s32 1, %s773_s21  }
  0xf9   : > { %p14_p5 = scmp.ge.s32.totalorder %s17_s21, 4  }
  0xfb   :  { %16 = sbr.rel (!%p14_p5) target bundleno = 1 (0x1), region = 90 }

// kernel: gat_forward.7
= control target key start
LH: loop header
LB: loop body
LE: loop exit
PB: predicated region body
PF: predicated region fallthrough
CT: control target
= control target key end

     0   :  { %s1961_s18 = smov 0   ;;  %s1963_s19 = smov 0   ;;  %s2606_s0 = inlined_call_operand.vmem [shape: bf16[256,64], index: 0, kind: input, shape index: {}]   ;;  %s2607_s1 = inlined_call_operand.vmem [shape: f32[1,256], index: 1, kind: input, shape index: {}]   ;;  %s2608_s2 = inlined_call_operand.vmem [shape: f32[256,1], index: 2, kind: input, shape index: {}]   ;;  %s2609_s3 = inlined_call_operand.vmem [shape: bf16[256,256], index: 3, kind: input, shape index: {}]   ;;  %s2610_s4 = inlined_call_operand.vmem [shape: f32[1,64], index: 4, kind: input, shape index: {}]   ;;  %s2611_s5 = inlined_call_operand.vmem [shape: f32[256,64], index: 5, kind: output, shape index: {}]  }
   0x1   :  { %s1965_s20 = smov 0   ;;  %s1967_s21 = smov 0  }
   0x2   :  { %s1969_s22 = smov 0   ;;  %s1971_s23 = smov 0  }
   0x3   :  { %s1973_s24 = smov 0  }
   0x4 LB: > { %s24_s25 = sadd.s32 1, %s1917_s22  ;;  %s27_s26 = sadd.s32 1, %s1921_s23  ;;  %s1925_s24 = sphi %s1973_s24, %s15_s24   ;;  %s1921_s23 = sphi %s1971_s23, %s2617_s23   ;;  %s1917_s22 = sphi %s1969_s22, %s2616_s22   ;;  %s1913_s21 = sphi %s1967_s21, %s2615_s21   ;;  %s1909_s20 = sphi %s1965_s20, %s2614_s20   ;;  %s1905_s19 = sphi %s1963_s19, %s2613_s19   ;;  %s1901_s18 = sphi %s1961_s18, %s2612_s18  }
   0x5   : > { %p25_p0 = scmp.ge.s32.totalorder %s24_s25, 2  ;;  %p121_p1 = scmp.ne.s32.totalorder %s1905_s19, %s1901_s18 }
   0x6   : > { %p122_p2 = scmp.eq.s32.totalorder %s1925_s24, 0  ;;  %s114_s30 = sadd.s32 1, %s1905_s19 }
   0x7   : > { %s2619_s25 = smov (%p25_p0, %s24_s25), 0  ;;  %s2621_s26 = smov (!%p25_p0, %s27_s26), %s1921_s23 }
   0x8   : > { %p123_p3 = por %p122_p2, %p121_p1  ;;  %p29_p4 = scmp.ge.s32.totalorder %s2621_s26, 2 }
   0x9   : > { %s110_s27 = ssub.s32 %s1917_s22, %s2619_s25  ;;  %p1586_p6 = scmp.ge.s32.totalorder %s1925_s24, 4 }
   0xa   : > { %s2623_s26 = smov (%p29_p4, %s2621_s26), 0 }
   0xb   : > { %s109_s28 = ssub.s32 %s1921_s23, %s2623_s26  ;;  %197 = sbr.rel (%p1586_p6) target bundleno = 38 (0x26), region = 20 }
   0xc   : > { %s111_s29 = sor.u32 %s110_s27, %s109_s28 }
   0xd   : > { %p112_p5 = scmp.eq.s32.totalorder %s111_s29, 0 }
   0xf   : > { %s2012_s6 = scalar_select %p112_p5, %s1905_s19, %s114_s30  }
  0x10   : > { %224 = sbr.rel (!%p123_p3) target bundleno = 38 (0x26), region = 36  ;;  %s226_s7 = sand.u32 (%p123_p3), 1, %s1905_s19  }
  0x11   : > { %s1635_s8 = sshll.u32 (%p123_p3), %s1921_s23, 5  ;;  %s1587_s9 = sshll.u32 (%p123_p3), %s226_s7, 6 }
  0x12   : > { %s231_s10 = sadd.s32 (%p123_p3), %s1917_s22, %s1635_s8  ;;  %s228_s15 = scalar_lea.vmem (%p123_p3), [#allocation5], %s1587_s9 }
  0x13   : > { %s1590_s11 = sshll.u32 (%p123_p3), %s231_s10, 2 }
  0x14   : > { %s2021_s14 = scalar_lea.vmem (%p123_p3), %s2609_s3, %s1590_s11 }
  0x15   : > { %v250_v0 = vld [vmem:[%s2021_s14] sm:$0xf]  ;;  %v252_v1 = vld [vmem:[%s2021_s14 + $0x8] sm:$0xf]  ;;  %v254_v2 = vld [vmem:[%s2021_s14 + $0x10] sm:$0xf] }
  0x16   : > { %251 = vst [vmem:[%s228_s15] sm:$0xf] %v250_v0  ;;  %v256_v3 = vld [vmem:[%s2021_s14 + $0x18] sm:$0xf]  ;;  %v258_v4 = vld [vmem:[%s2021_s14 + $0x20] sm:$0xf] }
  0x17   : > { %253 = vst [vmem:[%s228_s15 + $0x4] sm:$0xf] %v252_v1  ;;  %v260_v5 = vld [vmem:[%s2021_s14 + $0x28] sm:$0xf]  ;;  %v262_v6 = vld [vmem:[%s2021_s14 + $0x30] sm:$0xf] }
  0x18   : > { %255 = vst [vmem:[%s228_s15 + $0x8] sm:$0xf] %v254_v2  ;;  %v264_v7 = vld [vmem:[%s2021_s14 + $0x38] sm:$0xf]  ;;  %v266_v8 = vld [vmem:[%s2021_s14 + $0x40] sm:$0xf] }
  0x19   : > { %257 = vst [vmem:[%s228_s15 + $0xc] sm:$0xf] %v256_v3  ;;  %v268_v9 = vld [vmem:[%s2021_s14 + $0x48] sm:$0xf]  ;;  %v270_v10 = vld [vmem:[%s2021_s14 + $0x50] sm:$0xf] }
  0x1a   : > { %259 = vst [vmem:[%s228_s15 + $0x10] sm:$0xf] %v258_v4  ;;  %v272_v11 = vld [vmem:[%s2021_s14 + $0x58] sm:$0xf]  ;;  %v274_v12 = vld [vmem:[%s2021_s14 + $0x60] sm:$0xf] }
  0x1b   : > { %261 = vst [vmem:[%s228_s15 + $0x14] sm:$0xf] %v260_v5  ;;  %v276_v13 = vld [vmem:[%s2021_s14 + $0x68] sm:$0xf]  ;;  %v278_v14 = vld [vmem:[%s2021_s14 + $0x70] sm:$0xf] }
  0x1c   : > { %263 = vst [vmem:[%s228_s15 + $0x18] sm:$0xf] %v262_v6  ;;  %v280_v15 = vld [vmem:[%s2021_s14 + $0x78] sm:$0xf] }
  0x1d   : > { %265 = vst [vmem:[%s228_s15 + $0x1c] sm:$0xf] %v264_v7 }
  0x1e   : > { %267 = vst [vmem:[%s228_s15 + $0x20] sm:$0xf] %v266_v8 }
  0x1f   : > { %269 = vst [vmem:[%s228_s15 + $0x24] sm:$0xf] %v268_v9 }
  0x20   : > { %271 = vst [vmem:[%s228_s15 + $0x28] sm:$0xf] %v270_v10 }
  0x21   : > { %273 = vst [vmem:[%s228_s15 + $0x2c] sm:$0xf] %v272_v11 }
  0x22   : > { %275 = vst [vmem:[%s228_s15 + $0x30] sm:$0xf] %v274_v12 }
  0x23   : > { %277 = vst [vmem:[%s228_s15 + $0x34] sm:$0xf] %v276_v13 }
  0x24   : > { %279 = vst [vmem:[%s228_s15 + $0x38] sm:$0xf] %v278_v14 }
  0x25   : > { %281 = vst [vmem:[%s228_s15 + $0x3c] sm:$0xf] %v280_v15 }
  0x26 PF: > { %p1591_p7 = scmp.ge.s32.totalorder %s1925_s24, 1  ;;  %p336_p8 = scmp.lt.s32.totalorder %s1925_s24, 5 }
  0x28   : > { %p337_p9 = pnand %p1591_p7, %p336_p8 }
  0x29   : > { %s343_s16 = sand.u32 (!%p337_p9), 1, %s1901_s18   ;;  %s1593_s17 = sshll.u32 (!%p337_p9), %s1909_s20, 4 }
  0x2a   : > { %340 = sbr.rel (%p337_p9) target bundleno = 839 (0x347), region = 77  ;;  %s1592_s27 = sshll.u32 (!%p337_p9), %s343_s16, 6 }
  0x2b   : > { %p384_p10 = scmp.lt.s32.totalorder (!%p337_p9), %s1593_s17, 31  ;;  %p389_p11 = scmp.lt.s32.totalorder (!%p337_p9), %s1909_s20, 1 }
  0x2c   : > { %s1595_s30 = sshll.u32 (!%p337_p9), %s1913_s21, 4  ;;  %s2067_s7 = scalar_lea.vmem (!%p337_p9), [#allocation5], %s1592_s27 }
  0x2d   : > { %p393_p12 = scmp.lt.s32.totalorder (!%p337_p9), %s1595_s30, 31  ;;  %p1599_p13 = scmp.ne.s32.totalorder (!%p337_p9), %s1909_s20, 0 }
  0x2f   : > { %s2625_s17 = smov (!%p384_p10, %s1593_s17), 31  ;;  %s2627_s30 = smov (!%p393_p12, %s1595_s30), 31 }
  0x30   : > { %s2045_s28 = scalar_select %p389_p11, %s1909_s20, 1 }
  0x31   : > { %s1594_s29 = sshll.u32 %s2625_s17, 2  ;;  %s1596_s18 = sshll.u32 %s2627_s30, 3 }
  0x32   : > { %s2051_s9 = scalar_lea.vmem %s2606_s0, %s1594_s29  ;;  %s391_s12 = scalar_lea.vmem %s2607_s1, %s2045_s28 }
  0x33   : > { %s2060_s15 = scalar_lea.vmem %s2608_s2, %s1596_s18  ;;  %s2065_s21 = scalar_lea.vmem %s2611_s5, %s1596_s18 }
  0x34   : > { %408 = sbr.rel (%p1599_p13) target bundleno = 106 (0x6a), region = 85 }
  0x39   : > { %vm409_vm0 = vcmask 7168   ;;  %v1927_v16 = vmov -1e+30   ;;  %v1928_v17 = vmov 0.0   ;;  %vm442_vm1 = vcmask 523264  }
  0x3a   : > { %410 = vst.msk [vmem:[#allocation2] sm:$0xff] %vm409_vm0, %v1927_v16 }
  0x3b   : > { %411 = vst.msk [vmem:[#allocation2 + $0x8] sm:$0xff] %vm409_vm0, %v1927_v16 }
  0x3c   : > { %412 = vst.msk [vmem:[#allocation2 + $0x10] sm:$0xff] %vm409_vm0, %v1927_v16 }
  0x3d   : > { %413 = vst.msk [vmem:[#allocation2 + $0x18] sm:$0xff] %vm409_vm0, %v1927_v16 }
  0x3e   : > { %414 = vst.msk [vmem:[#allocation2 + $0x20] sm:$0xff] %vm409_vm0, %v1927_v16 }
  0x3f   : > { %415 = vst.msk [vmem:[#allocation2 + $0x28] sm:$0xff] %vm409_vm0, %v1927_v16 }
  0x40   : > { %416 = vst.msk [vmem:[#allocation2 + $0x30] sm:$0xff] %vm409_vm0, %v1927_v16 }
  0x41   : > { %417 = vst.msk [vmem:[#allocation2 + $0x38] sm:$0xff] %vm409_vm0, %v1927_v16 }
  0x42   : > { %418 = vst.msk [vmem:[#allocation2 + $0x40] sm:$0xff] %vm409_vm0, %v1927_v16 }
  0x43   : > { %419 = vst.msk [vmem:[#allocation2 + $0x48] sm:$0xff] %vm409_vm0, %v1927_v16 }
  0x44   : > { %420 = vst.msk [vmem:[#allocation2 + $0x50] sm:$0xff] %vm409_vm0, %v1927_v16 }
  0x45   : > { %421 = vst.msk [vmem:[#allocation2 + $0x58] sm:$0xff] %vm409_vm0, %v1927_v16 }
  0x46   : > { %422 = vst.msk [vmem:[#allocation2 + $0x60] sm:$0xff] %vm409_vm0, %v1927_v16 }
  0x47   : > { %423 = vst.msk [vmem:[#allocation2 + $0x68] sm:$0xff] %vm409_vm0, %v1927_v16 }
  0x48   : > { %424 = vst.msk [vmem:[#allocation2 + $0x70] sm:$0xff] %vm409_vm0, %v1927_v16 }
  0x49   : > { %425 = vst.msk [vmem:[#allocation2 + $0x78] sm:$0xff] %vm409_vm0, %v1927_v16 }
  0x4a   : > { %426 = vst.msk [vmem:[#allocation3] sm:$0xff] %vm409_vm0, %v1928_v17 }
  0x4b   : > { %427 = vst.msk [vmem:[#allocation3 + $0x8] sm:$0xff] %vm409_vm0, %v1928_v17 }
  0x4c   : > { %428 = vst.msk [vmem:[#allocation3 + $0x10] sm:$0xff] %vm409_vm0, %v1928_v17 }
  0x4d   : > { %429 = vst.msk [vmem:[#allocation3 + $0x18] sm:$0xff] %vm409_vm0, %v1928_v17 }
  0x4e   : > { %430 = vst.msk [vmem:[#allocation3 + $0x20] sm:$0xff] %vm409_vm0, %v1928_v17 }
  0x4f   : > { %431 = vst.msk [vmem:[#allocation3 + $0x28] sm:$0xff] %vm409_vm0, %v1928_v17 }
  0x50   : > { %432 = vst.msk [vmem:[#allocation3 + $0x30] sm:$0xff] %vm409_vm0, %v1928_v17 }
  0x51   : > { %433 = vst.msk [vmem:[#allocation3 + $0x38] sm:$0xff] %vm409_vm0, %v1928_v17 }
  0x52   : > { %434 = vst.msk [vmem:[#allocation3 + $0x40] sm:$0xff] %vm409_vm0, %v1928_v17 }
  0x53   : > { %435 = vst.msk [vmem:[#allocation3 + $0x48] sm:$0xff] %vm409_vm0, %v1928_v17 }
  0x54   : > { %436 = vst.msk [vmem:[#allocation3 + $0x50] sm:$0xff] %vm409_vm0, %v1928_v17 }
  0x55   : > { %437 = vst.msk [vmem:[#allocation3 + $0x58] sm:$0xff] %vm409_vm0, %v1928_v17 }
  0x56   : > { %438 = vst.msk [vmem:[#allocation3 + $0x60] sm:$0xff] %vm409_vm0, %v1928_v17 }
  0x57   : > { %439 = vst.msk [vmem:[#allocation3 + $0x68] sm:$0xff] %vm409_vm0, %v1928_v17 }
  0x58   : > { %440 = vst.msk [vmem:[#allocation3 + $0x70] sm:$0xff] %vm409_vm0, %v1928_v17 }
  0x59   : > { %441 = vst.msk [vmem:[#allocation3 + $0x78] sm:$0xff] %vm409_vm0, %v1928_v17 }
  0x5a   : > { %443 = vst.msk [vmem:[#allocation4] sm:$0xff] %vm442_vm1, %v1928_v17 }
  0x5b   : > { %444 = vst.msk [vmem:[#allocation4 + $0x8] sm:$0xff] %vm442_vm1, %v1928_v17 }
  0x5c   : > { %445 = vst.msk [vmem:[#allocation4 + $0x10] sm:$0xff] %vm442_vm1, %v1928_v17 }
  0x5d   : > { %446 = vst.msk [vmem:[#allocation4 + $0x18] sm:$0xff] %vm442_vm1, %v1928_v17 }
  0x5e   : > { %447 = vst.msk [vmem:[#allocation4 + $0x20] sm:$0xff] %vm442_vm1, %v1928_v17 }
  0x5f   : > { %448 = vst.msk [vmem:[#allocation4 + $0x28] sm:$0xff] %vm442_vm1, %v1928_v17 }
  0x60   : > { %449 = vst.msk [vmem:[#allocation4 + $0x30] sm:$0xff] %vm442_vm1, %v1928_v17 }
  0x61   : > { %450 = vst.msk [vmem:[#allocation4 + $0x38] sm:$0xff] %vm442_vm1, %v1928_v17 }
  0x62   : > { %451 = vst.msk [vmem:[#allocation4 + $0x40] sm:$0xff] %vm442_vm1, %v1928_v17 }
  0x63   : > { %452 = vst.msk [vmem:[#allocation4 + $0x48] sm:$0xff] %vm442_vm1, %v1928_v17 }
  0x64   : > { %453 = vst.msk [vmem:[#allocation4 + $0x50] sm:$0xff] %vm442_vm1, %v1928_v17 }
  0x65   : > { %454 = vst.msk [vmem:[#allocation4 + $0x58] sm:$0xff] %vm442_vm1, %v1928_v17 }
  0x66   : > { %455 = vst.msk [vmem:[#allocation4 + $0x60] sm:$0xff] %vm442_vm1, %v1928_v17 }
  0x67   : > { %456 = vst.msk [vmem:[#allocation4 + $0x68] sm:$0xff] %vm442_vm1, %v1928_v17 }
  0x68   : > { %457 = vst.msk [vmem:[#allocation4 + $0x70] sm:$0xff] %vm442_vm1, %v1928_v17 }
  0x69   : > { %458 = vst.msk [vmem:[#allocation4 + $0x78] sm:$0xff] %vm442_vm1, %v1928_v17 }
  0x6a PF: > { %v510_v18 = vld [vmem:[%s2060_s15 + $0x10] sm:$0xff]  ;;  %v508_v19 = vld [vmem:[%s2060_s15] sm:$0xff]  ;;  %v1929_v20 = vmov 0   ;;  %v511_v22 = vld [vmem:[%s2060_s15 + $0x18] sm:$0xff]  ;;  %p1632_p0 = scmp.ne.s32.totalorder %s1909_s20, 1 }
  0x6b   : > { %1768 = vset.pattern.permute.xlu1 %v1929_v20  ;;  %1767 = vset.pattern.permute.xlu0 %v1929_v20  ;;  %v512_v21 = vld [vmem:[%s2060_s15 + $0x20] sm:$0xff]  ;;  %v509_v23 = vld [vmem:[%s2060_s15 + $0x8] sm:$0xff]  ;;  %v515_v25 = vld [vmem:[%s2060_s15 + $0x38] sm:$0xff] }
  0x6c   : > { %536 = vperm.xlu1 %1768, %v510_v18   ;;  %526 = vperm.xlu0 %1767, %v508_v19   ;;  %v513_v24 = vld [vmem:[%s2060_s15 + $0x28] sm:$0xff]  ;;  %v514_v26 = vld [vmem:[%s2060_s15 + $0x30] sm:$0xff]  ;;  %v516_v27 = vld [vmem:[%s2060_s15 + $0x40] sm:$0xff] }
  0x6d   : > { %1769 = vset.pattern.permute.xlu2 %v1929_v20  ;;  %v518_v28 = vld [vmem:[%s2060_s15 + $0x50] sm:$0xff]  ;;  %v517_v29 = vld [vmem:[%s2060_s15 + $0x48] sm:$0xff]  ;;  %v519_v30 = vld [vmem:[%s2060_s15 + $0x58] sm:$0xff] }
  0x6e   : > { %546 = vperm.xlu2 %1769, %v512_v21   ;;  %v521_v31 = vld [vmem:[%s2060_s15 + $0x68] sm:$0xff]  ;;  %v520_v32 = vld [vmem:[%s2060_s15 + $0x60] sm:$0xff]  ;;  %v522_v33 = vld [vmem:[%s2060_s15 + $0x70] sm:$0xff] }
  0x6f   : > { %v523_v34 = vld [vmem:[%s2060_s15 + $0x78] sm:$0xff]  ;;  %v2139_v35 = vld [vmem:[%s391_s12] ss:$0 sm:$0xff]  ;;  %v1676_v37 = vld [vmem:[%s2067_s7 + $0x8] sm:$0xff]  }
  0x70   : > { %v1645_v38 = vld [vmem:[%s2067_s7] sm:$0xff]   ;;  %v1650_v44 = vunpack.c.l.bf16 %v1676_v37  ;;  %v2147_v51 = vld [vmem:[%s2067_s7 + $0x10] sm:$0xff]   ;;  %v1678_v3 = vld [vmem:[%s2067_s7 + $0x18] sm:$0xff]   ;;  %v1651_v8 = vunpack.c.h.bf16 %v1676_v37 }
  0x71   : > { %v1646_v45 = vunpack.c.l.bf16 %v1645_v38  ;;  %v1654_v56 = vunpack.c.l.bf16 %v2147_v51  ;;  %v1647_v61 = vunpack.c.h.bf16 %v1645_v38  ;;  %v1658_v10 = vunpack.c.l.bf16 %v1678_v3 }
  0x72   : > { %v1659_v12 = vunpack.c.h.bf16 %v1678_v3 }
  0x74   : > { %541 = vperm.xlu1 %1768, %v511_v22   ;;  %531 = vperm.xlu0 %1767, %v509_v23  }
  0x76   : > { %551 = vperm.xlu2 %1769, %v513_v24  }
  0x7c   : > { %561 = vperm.xlu1 %1768, %v515_v25   ;;  %556 = vperm.xlu0 %1767, %v514_v26   ;;  %v1679_v26 = vld [vmem:[%s2067_s7 + $0x20] sm:$0xff]  }
  0x7e   : > { %566 = vperm.xlu2 %1769, %v516_v27   ;;  %v1655_v27 = vunpack.c.h.bf16 %v2147_v51 }
  0x84   : > { %576 = vperm.xlu1 %1768, %v518_v28   ;;  %571 = vperm.xlu0 %1767, %v517_v29   ;;  %v1680_v28 = vld [vmem:[%s2067_s7 + $0x28] sm:$0xff]  }
  0x86   : > { %581 = vperm.xlu2 %1769, %v519_v30   ;;  %v1663_v30 = vunpack.c.h.bf16 %v1679_v26 }
  0x8c   : > { %591 = vperm.xlu1 %1768, %v521_v31   ;;  %586 = vperm.xlu0 %1767, %v520_v32   ;;  %v1666_v32 = vunpack.c.l.bf16 %v1680_v28 }
  0x8e   : > { %596 = vperm.xlu2 %1769, %v522_v33  }
  0x94   : > { %601 = vperm.xlu0 %1767, %v523_v34  }
  0xc8   : > { %v547_v36 = vpop.permute.xlu2 %546 }
  0xc9   : > { %v611_v41 = vadd.f32 %v2139_v35, %v547_v36 }
  0xcb   : > { %v643_v48 = vmul.f32 0.2, %v611_v41  ;;  %vm627_vm4 = vcmp.gt.f32.partialorder %v611_v41, 0.0 }
  0xcd   : > { %v659_v58 = vsel %vm627_vm4, %v611_v41, %v643_v48  ;;  %v1662_v48 = vunpack.c.l.bf16 %v1679_v26  ;;  %v2235_v26 = vld [vmem:[#allocation2 + $0x20] sm:$0xff] }
  0xce   : > { %v2158_v63 = vadd.f32 %v1654_v56, %v659_v58 }
  0xd0   : > { %v552_v59 = vpop.permute.xlu2 %551 }
  0xd1   : > { %v612_v9 = vadd.f32 %v2139_v35, %v552_v59 }
  0xd3   : > { %v644_v18 = vmul.f32 0.2, %v612_v9  ;;  %vm628_vm9 = vcmp.gt.f32.partialorder %v612_v9, 0.0 }
  0xd5   : > { %v660_v31 = vsel %vm628_vm9, %v612_v9, %v644_v18 }
  0xd6   : > { %v2185_v41 = vadd.f32 %v1655_v27, %v660_v31  ;;  %v2249_v31 = vld [vmem:[#allocation2 + $0x30] sm:$0xff] }
  0xd8   : > { %v567_v15 = vpop.permute.xlu2 %566 }
  0xd9   : > { %v615_v29 = vadd.f32 %v2139_v35, %v567_v15 }
  0xdb   : > { %v647_v38 = vmul.f32 0.2, %v615_v29  ;;  %vm631_vm12 = vcmp.gt.f32.partialorder %v615_v29, 0.0 }
  0xdd   : > { %v663_v51 = vsel %vm631_vm12, %v615_v29, %v647_v38 }
  0xde   : > { %v537_v39 = vpop.permute.xlu1 %536  ;;  %v527_v40 = vpop.permute.xlu0 %526 }
  0xdf   : > { %v609_v42 = vadd.f32 %v2139_v35, %v537_v39  ;;  %v607_v43 = vadd.f32 %v2139_v35, %v527_v40 }
  0xe0   : > { %v582_v39 = vpop.permute.xlu2 %581 }
  0xe1   : > { %v641_v46 = vmul.f32 0.2, %v609_v42  ;;  %v639_v47 = vmul.f32 0.2, %v607_v43  ;;  %vm625_vm2 = vcmp.gt.f32.partialorder %v609_v42, 0.0  ;;  %vm623_vm3 = vcmp.gt.f32.partialorder %v607_v43, 0.0 }
  0xe3   : > { %v657_v49 = vsel %vm625_vm2, %v609_v42, %v641_v46  ;;  %v655_v50 = vsel %vm623_vm3, %v607_v43, %v639_v47  ;;  %v1681_v43 = vld [vmem:[%s2067_s7 + $0x30] sm:$0xff]   ;;  %vm1007_vm2 = vcmask 7168   ;;  %vm1257_vm3 = vcmask 523264  }
  0xe4   : > { %v2149_v52 = vadd.f32 %v1650_v44, %v657_v49  ;;  %v2151_v53 = vadd.f32 %v1646_v45, %v655_v50  ;;  %v618_v49 = vadd.f32 %v2139_v35, %v582_v39  ;;  %v1670_v50 = vunpack.c.l.bf16 %v1681_v43 }
  0xe6   : > { %v542_v54 = vpop.permute.xlu1 %541  ;;  %v532_v55 = vpop.permute.xlu0 %531  ;;  %707 = vmax.xlane.f32.xlu0 %v2149_v52  ;;  %703 = vmax.xlane.f32.xlu1 %v2151_v53  ;;  %vm634_vm15 = vcmp.gt.f32.partialorder %v618_v49, 0.0 }
  0xe7   : > { %v608_v57 = vadd.f32 %v2139_v35, %v532_v55  ;;  %v610_v60 = vadd.f32 %v2139_v35, %v542_v54  ;;  %v1671_v54 = vunpack.c.h.bf16 %v1681_v43 }
  0xe9   : > { %v640_v62 = vmul.f32 0.2, %v608_v57  ;;  %vm624_vm5 = vcmp.gt.f32.partialorder %v608_v57, 0.0  ;;  %v642_v1 = vmul.f32 0.2, %v610_v60  ;;  %vm626_vm6 = vcmp.gt.f32.partialorder %v610_v60, 0.0 }
  0xeb   : > { %v656_v0 = vsel %vm624_vm5, %v608_v57, %v640_v62  ;;  %v658_v11 = vsel %vm626_vm6, %v610_v60, %v642_v1  ;;  %v2198_v60 = vadd.f32 %v1662_v48, %v663_v51  ;;  %v650_v62 = vmul.f32 0.2, %v618_v49 }
  0xec   : > { %v2160_v2 = vadd.f32 %v1647_v61, %v656_v0  ;;  %v2170_v20 = vadd.f32 %v1651_v8, %v658_v11  ;;  %v597_v0 = vpop.permute.xlu2 %596 }
  0xed   : > { %v666_v9 = vsel %vm634_vm15, %v618_v49, %v650_v62 }
  0xee   : > { %v562_v4 = vpop.permute.xlu1 %561  ;;  %v557_v5 = vpop.permute.xlu0 %556  ;;  %705 = vmax.xlane.f32.xlu2 %v2160_v2  ;;  %711 = vmax.xlane.f32.xlu1 %v2158_v63 }
  0xef   : > { %v614_v6 = vadd.f32 %v2139_v35, %v562_v4  ;;  %v613_v7 = vadd.f32 %v2139_v35, %v557_v5  ;;  %v1682_v4 = vld [vmem:[%s2067_s7 + $0x38] sm:$0xff]  }
  0xf0   : > { %v1675_v5 = vunpack.c.h.bf16 %v1682_v4 }
  0xf1   : > { %v646_v13 = vmul.f32 0.2, %v614_v6  ;;  %v645_v14 = vmul.f32 0.2, %v613_v7  ;;  %vm629_vm7 = vcmp.gt.f32.partialorder %v613_v7, 0.0  ;;  %vm630_vm8 = vcmp.gt.f32.partialorder %v614_v6, 0.0 }
  0xf3   : > { %v661_v16 = vsel %vm629_vm7, %v613_v7, %v645_v14  ;;  %v662_v17 = vsel %vm630_vm8, %v614_v6, %v646_v13  ;;  %v1667_v6 = vunpack.c.h.bf16 %v1680_v28  ;;  %v621_v7 = vadd.f32 %v2139_v35, %v597_v0 }
  0xf4   : > { %v2168_v19 = vadd.f32 %v1658_v10, %v661_v16  ;;  %v2172_v21 = vadd.f32 %v1659_v12, %v662_v17  ;;  %v1674_v14 = vunpack.c.l.bf16 %v1682_v4  ;;  %v2219_v17 = vld [vmem:[#allocation2] sm:$0xff] }
  0xf5   : > { %v2210_v12 = vadd.f32 %v1667_v6, %v666_v9  ;;  %v653_v13 = vmul.f32 0.2, %v621_v7  ;;  %vm637_vm1 = vcmp.gt.f32.partialorder %v621_v7, 0.0 }
  0xf6   : > { %v577_v22 = vpop.permute.xlu1 %576  ;;  %v572_v23 = vpop.permute.xlu0 %571  ;;  %715 = vmax.xlane.f32.xlu0 %v2168_v19  ;;  %709 = vmax.xlane.f32.xlu2 %v2170_v20 }
  0xf7   : > { %v617_v24 = vadd.f32 %v2139_v35, %v577_v22  ;;  %v616_v25 = vadd.f32 %v2139_v35, %v572_v23  ;;  %717 = vmax.xlane.f32.xlu1 %v2172_v21  ;;  %v669_v15 = vsel %vm637_vm1, %v621_v7, %v653_v13  ;;  %v2319_v7 = vld [vmem:[#allocation2 + $0x78] sm:$0xff] }
  0xf8   : > { %v2214_v16 = vadd.f32 %v1674_v14, %v669_v15 }
  0xf9   : > { %v649_v33 = vmul.f32 0.2, %v617_v24  ;;  %v648_v34 = vmul.f32 0.2, %v616_v25  ;;  %vm632_vm10 = vcmp.gt.f32.partialorder %v616_v25, 0.0  ;;  %vm633_vm11 = vcmp.gt.f32.partialorder %v617_v24, 0.0 }
  0xfb   : > { %v664_v36 = vsel %vm632_vm10, %v616_v25, %v648_v34  ;;  %v665_v37 = vsel %vm633_vm11, %v617_v24, %v649_v33  ;;  %v2233_v25 = vld [vmem:[#allocation2 + $0x8] sm:$0xff]  ;;  %v2253_v33 = vld [vmem:[#allocation2 + $0x38] sm:$0xff] }
  0xfc   : > { %v2183_v40 = vadd.f32 %v1663_v30, %v664_v36  ;;  %v2187_v42 = vadd.f32 %v1666_v32, %v665_v37  ;;  %v2251_v32 = vld [vmem:[#allocation2 + $0x18] sm:$0xff] }
  0xfe   : > { %v592_v44 = vpop.permute.xlu1 %591  ;;  %v587_v45 = vpop.permute.xlu0 %586  ;;  %721 = vmax.xlane.f32.xlu0 %v2183_v40  ;;  %713 = vmax.xlane.f32.xlu2 %v2185_v41 }
  0xff   : > { %v620_v46 = vadd.f32 %v2139_v35, %v592_v44  ;;  %v619_v47 = vadd.f32 %v2139_v35, %v587_v45  ;;  %723 = vmax.xlane.f32.xlu1 %v2187_v42  ;;  %v2272_v44 = vld [vmem:[#allocation2 + $0x48] sm:$0xff] }
 0x100   : > { %v2274_v45 = vld [vmem:[#allocation2 + $0x28] sm:$0xff] }
 0x101   : > { %v652_v55 = vmul.f32 0.2, %v620_v46  ;;  %v651_v56 = vmul.f32 0.2, %v619_v47  ;;  %vm635_vm13 = vcmp.gt.f32.partialorder %v619_v47, 0.0  ;;  %vm636_vm14 = vcmp.gt.f32.partialorder %v620_v46, 0.0 }
 0x103   : > { %v667_v57 = vsel %vm635_vm13, %v619_v47, %v651_v56  ;;  %v668_v58 = vsel %vm636_vm14, %v620_v46, %v652_v55  ;;  %v2276_v46 = vld [vmem:[#allocation2 + $0x50] sm:$0xff]  ;;  %v2291_v55 = vld [vmem:[#allocation2 + $0x60] sm:$0xff] }
 0x104   : > { %v2196_v59 = vadd.f32 %v1670_v50, %v667_v57  ;;  %v2200_v61 = vadd.f32 %v1671_v54, %v668_v58  ;;  %v2293_v56 = vld [vmem:[#allocation2 + $0x40] sm:$0xff]  ;;  %v2295_v57 = vld [vmem:[#allocation2 + $0x68] sm:$0xff] }
 0x106   : > { %v602_v1 = vpop.permute.xlu0 %601  ;;  %727 = vmax.xlane.f32.xlu0 %v2196_v59  ;;  %719 = vmax.xlane.f32.xlu2 %v2198_v60 }
 0x107   : > { %v622_v3 = vadd.f32 %v2139_v35, %v602_v1  ;;  %729 = vmax.xlane.f32.xlu1 %v2200_v61  ;;  %v2217_v35 = vld [vmem:[#allocation2 + $0x10] sm:$0xff] }
 0x109   : > { %v654_v8 = vmul.f32 0.2, %v622_v3  ;;  %vm638_vm0 = vcmp.gt.f32.partialorder %v622_v3, 0.0 }
 0x10b   : > { %v670_v10 = vsel %vm638_vm0, %v622_v3, %v654_v8  ;;  %v2321_v8 = vld [vmem:[#allocation2 + $0x58] sm:$0xff] }
 0x10c   : > { %v2208_v11 = vadd.f32 %v1675_v5, %v670_v10 }
 0x10e   : > { %733 = vmax.xlane.f32.xlu0 %v2208_v11  ;;  %725 = vmax.xlane.f32.xlu2 %v2210_v12 }
 0x116   : > { %731 = vmax.xlane.f32.xlu2 %v2214_v16 }
 0x159   : > { %v708_v18 = vpop.xlane.xlu0 %707  ;;  %v704_v22 = vpop.xlane.xlu1 %703 }
 0x15a   : > { %v2222_v23 = vmax.f32 %v2217_v35, %v708_v18  ;;  %v2225_v24 = vmax.f32 %v2219_v17, %v704_v22 }
 0x15c   : > { %1276 = vst.msk [vmem:[#allocation2 + $0x10] sm:$0xff] %vm1007_vm2, %v2222_v23  ;;  %811 = vperm.xlu0 %1767, %v2222_v23   ;;  %801 = vperm.xlu1 %1768, %v2225_v24   ;;  %v753_v6 = vsub.f32 %v2217_v35, %v2222_v23  ;;  %v751_v18 = vsub.f32 %v2219_v17, %v2225_v24  ;;  %v2344_v23 = vld [vmem:[#allocation2 + $0x70] sm:$0xff] }
 0x15d   : > { %1274 = vst.msk [vmem:[#allocation2] sm:$0xff] %vm1007_vm2, %v2225_v24 }
 0x15e   : > { %v771_v13 = vmul.f32 1.442695, %v753_v6  ;;  %v767_v24 = vmul.f32 1.442695, %v751_v18 }
 0x160   : > { %1771 = vpow2.f32 %v771_v13 }
 0x161   : > { %v706_v27 = vpop.xlane.xlu2 %705  ;;  %v712_v28 = vpop.xlane.xlu1 %711  ;;  %1773 = vpow2.f32 %v767_v24 }
 0x162   : > { %v2238_v29 = vmax.f32 %v2233_v25, %v706_v27  ;;  %v2241_v30 = vmax.f32 %v2235_v26, %v712_v28 }
 0x164   : > { %1275 = vst.msk [vmem:[#allocation2 + $0x8] sm:$0xff] %vm1007_vm2, %v2238_v29  ;;  %806 = vperm.xlu2 %1769, %v2238_v29   ;;  %821 = vperm.xlu0 %1767, %v2241_v30   ;;  %v752_v22 = vsub.f32 %v2233_v25, %v2238_v29  ;;  %v755_v17 = vsub.f32 %v2235_v26, %v2241_v30 }
 0x165   : > { %1278 = vst.msk [vmem:[#allocation2 + $0x20] sm:$0xff] %vm1007_vm2, %v2241_v30 }
 0x166   : > { %v769_v27 = vmul.f32 1.442695, %v752_v22 }
 0x168   : > { %1775 = vpow2.f32 %v769_v27  ;;  %v1639_v27 = vld [vmem:[%s2051_s9 + $0x18] sm:$0xff] }
 0x169   : > { %v716_v34 = vpop.xlane.xlu0 %715  ;;  %v710_v36 = vpop.xlane.xlu2 %709 }
 0x16a   : > { %v2256_v37 = vmax.f32 %v2249_v31, %v716_v34  ;;  %v2259_v38 = vmax.f32 %v2251_v32, %v710_v36  ;;  %v718_v39 = vpop.xlane.xlu1 %717  ;;  %v775_v34 = vmul.f32 1.442695, %v755_v17 }
 0x16b   : > { %v2262_v43 = vmax.f32 %v2253_v33, %v718_v39  ;;  %v2349_v39 = vpop.eup %1771 }
 0x16c   : > { %1280 = vst.msk [vmem:[#allocation2 + $0x30] sm:$0xff] %vm1007_vm2, %v2256_v37  ;;  %816 = vperm.xlu1 %1768, %v2259_v38   ;;  %v754_v25 = vsub.f32 %v2251_v32, %v2259_v38  ;;  %1777 = vpow2.f32 %v775_v34  ;;  %v1636_v34 = vld [vmem:[%s2051_s9] sm:$0xff] }
 0x16d   : > { %1277 = vst.msk [vmem:[#allocation2 + $0x18] sm:$0xff] %vm1007_vm2, %v2259_v38  ;;  %836 = vperm.xlu0 %1767, %v2262_v43   ;;  %v758_v30 = vsub.f32 %v2253_v33, %v2262_v43 }
 0x16e   : > { %1281 = vst.msk [vmem:[#allocation2 + $0x38] sm:$0xff] %vm1007_vm2, %v2262_v43  ;;  %v773_v32 = vmul.f32 1.442695, %v754_v25 }
 0x170   : > { %1779 = vpow2.f32 %v773_v32 }
 0x171   : > { %v722_v47 = vpop.xlane.xlu0 %721  ;;  %v714_v48 = vpop.xlane.xlu2 %713 }
 0x172   : > { %v2279_v49 = vmax.f32 %v2272_v44, %v722_v47  ;;  %v740_v50 = vmax.f32 %v2274_v45, %v714_v48  ;;  %v724_v51 = vpop.xlane.xlu1 %723  ;;  %v2363_v47 = vpop.eup %1773  ;;  %v781_v48 = vmul.f32 1.442695, %v758_v30 }
 0x173   : > { %v2283_v54 = vmax.f32 %v2276_v46, %v724_v51  ;;  %v2365_v51 = vpop.eup %1775 }
 0x174   : > { %1283 = vst.msk [vmem:[#allocation2 + $0x48] sm:$0xff] %vm1007_vm2, %v2279_v49  ;;  %826 = vperm.xlu2 %1769, %v740_v50   ;;  %831 = vperm.xlu1 %1768, %v2256_v37   ;;  %v756_v26 = vsub.f32 %v2274_v45, %v740_v50  ;;  %v1643_v45 = vld [vmem:[%s2051_s9 + $0x38] sm:$0xff] }
 0x175   : > { %1279 = vst.msk [vmem:[#allocation2 + $0x28] sm:$0xff] %vm1007_vm2, %v740_v50  ;;  %v761_v43 = vsub.f32 %v2276_v46, %v2283_v54  ;;  %1192 = vmatpush.bf16.msra.mxu0 %v1643_v45  ;;  %1683 = vmatpush.bf16.msra.mxu1 %v1643_v45 }
 0x176   : > { %1284 = vst.msk [vmem:[#allocation2 + $0x50] sm:$0xff] %vm1007_vm2, %v2283_v54  ;;  %v777_v38 = vmul.f32 1.442695, %v756_v26  ;;  %1684 = vmatpush.bf16.msra.mxu2 %v1643_v45  ;;  %1685 = vmatpush.bf16.msra.mxu3 %v1643_v45 }
 0x178   : > { %1781 = vpow2.f32 %v777_v38 }
 0x179   : > { %v728_v58 = vpop.xlane.xlu0 %727  ;;  %v720_v62 = vpop.xlane.xlu2 %719  ;;  %1783 = vpow2.f32 %v781_v48 }
 0x17a   : > { %v2298_v0 = vmax.f32 %v2291_v55, %v728_v58  ;;  %v2301_v1 = vmax.f32 %v2293_v56, %v720_v62  ;;  %v730_v3 = vpop.xlane.xlu1 %729  ;;  %v2367_v58 = vpop.eup %1777  ;;  %v757_v62 = vsub.f32 %v2249_v31, %v2256_v37 }
 0x17b   : > { %v2304_v4 = vmax.f32 %v2295_v57, %v730_v3  ;;  %v2379_v50 = vpop.eup %1779  ;;  %v787_v3 = vmul.f32 1.442695, %v761_v43 }
 0x17c   : > { %1286 = vst.msk [vmem:[#allocation2 + $0x60] sm:$0xff] %vm1007_vm2, %v2298_v0  ;;  %841 = vperm.xlu2 %1769, %v2301_v1   ;;  %846 = vperm.xlu1 %1768, %v2279_v49   ;;  %v759_v33 = vsub.f32 %v2293_v56, %v2301_v1  ;;  %v779_v31 = vmul.f32 1.442695, %v757_v62 }
 0x17d   : > { %1282 = vst.msk [vmem:[#allocation2 + $0x40] sm:$0xff] %vm1007_vm2, %v2301_v1  ;;  %v764_v5 = vsub.f32 %v2295_v57, %v2304_v4  ;;  %861 = vperm.xlu0 %1767, %v2298_v0   ;;  %v760_v1 = vsub.f32 %v2272_v44, %v2279_v49  ;;  %v1641_v44 = vld [vmem:[%s2051_s9 + $0x28] sm:$0xff] }
 0x17e   : > { %1287 = vst.msk [vmem:[#allocation2 + $0x68] sm:$0xff] %vm1007_vm2, %v2304_v4  ;;  %v783_v37 = vmul.f32 1.442695, %v759_v33  ;;  %v2381_v6 = vpop.eup %1781  ;;  %1785 = vpow2.f32 %v779_v31 }
 0x17f   : > { %v2383_v56 = vpop.eup %1783 }
 0x180   : > { %1787 = vpow2.f32 %v783_v37 }
 0x181   : > { %v734_v9 = vpop.xlane.xlu0 %733  ;;  %v726_v10 = vpop.xlane.xlu2 %725  ;;  %1789 = vpow2.f32 %v787_v3 }
 0x182   : > { %v2324_v14 = vmax.f32 %v2319_v7, %v734_v9  ;;  %v2327_v15 = vmax.f32 %v2321_v8, %v726_v10  ;;  %v1642_v10 = vld [vmem:[%s2051_s9 + $0x30] sm:$0xff] }
 0x183   : > { %1193 = vmatpush.bf16.msra.mxu0 %v1642_v10  ;;  %1686 = vmatpush.bf16.msra.mxu1 %v1642_v10 }
 0x184   : > { %v766_v35 = vsub.f32 %v2319_v7, %v2324_v14  ;;  %1289 = vst.msk [vmem:[#allocation2 + $0x78] sm:$0xff] %vm1007_vm2, %v2324_v14  ;;  %851 = vperm.xlu1 %1768, %v2283_v54   ;;  %866 = vperm.xlu2 %1769, %v2304_v4   ;;  %v762_v46 = vsub.f32 %v2321_v8, %v2327_v15  ;;  %v785_v54 = vmul.f32 1.442695, %v760_v1  ;;  %v2393_v13 = vpop.eup %1785 }
 0x185   : > { %1285 = vst.msk [vmem:[#allocation2 + $0x58] sm:$0xff] %vm1007_vm2, %v2327_v15  ;;  %856 = vperm.xlu0 %1767, %v2327_v15   ;;  %v763_v8 = vsub.f32 %v2291_v55, %v2298_v0  ;;  %1687 = vmatpush.bf16.msra.mxu2 %v1642_v10  ;;  %v1640_v15 = vld [vmem:[%s2051_s9 + $0x20] sm:$0xff]  ;;  %v1638_v55 = vld [vmem:[%s2051_s9 + $0x10] sm:$0xff] }
 0x186   : > { %v789_v9 = vmul.f32 1.442695, %v762_v46  ;;  %v2395_v18 = vpop.eup %1787  ;;  %1791 = vpow2.f32 %v785_v54  ;;  %1688 = vmatpush.bf16.msra.mxu3 %v1642_v10 }
 0x187   : > { %v2398_v49 = vpop.eup %1789  ;;  %1194 = vmatpush.bf16.msra.mxu0 %v1641_v44  ;;  %1689 = vmatpush.bf16.msra.mxu1 %v1641_v44  ;;  %v791_v22 = vmul.f32 1.442695, %v763_v8 }
 0x188   : > { %1793 = vpow2.f32 %v789_v9 }
 0x189   : > { %v732_v28 = vpop.xlane.xlu2 %731  ;;  %1690 = vmatpush.bf16.msra.mxu2 %v1641_v44  ;;  %1795 = vpow2.f32 %v791_v22 }
 0x18a   : > { %v2347_v36 = vmax.f32 %v2344_v23, %v732_v28  ;;  %1691 = vmatpush.bf16.msra.mxu3 %v1641_v44  ;;  %v1637_v28 = vld [vmem:[%s2051_s9 + $0x8] sm:$0xff] }
 0x18b   : > { %1195 = vmatpush.bf16.msra.mxu0 %v1640_v15  ;;  %1692 = vmatpush.bf16.msra.mxu1 %v1640_v15 }
 0x18c   : > { %v765_v29 = vsub.f32 %v2344_v23, %v2347_v36  ;;  %1288 = vst.msk [vmem:[#allocation2 + $0x70] sm:$0xff] %vm1007_vm2, %v2347_v36  ;;  %876 = vperm.xlu1 %1768, %v2324_v14   ;;  %871 = vperm.xlu2 %1769, %v2347_v36   ;;  %v2406_v17 = vpop.eup %1791 }
 0x18d   : > { %1052 = vperm.xlu0 %1767, %v2349_v39   ;;  %1693 = vmatpush.bf16.msra.mxu2 %v1640_v15 }
 0x18e   : > { %v2408_v24 = vpop.eup %1793  ;;  %1694 = vmatpush.bf16.msra.mxu3 %v1640_v15 }
 0x18f   : > { %1196 = vmatpush.bf16.msra.mxu0 %v1639_v27  ;;  %1695 = vmatpush.bf16.msra.mxu1 %v1639_v27  ;;  %v2414_v0 = vpop.eup %1795 }
 0x191   : > { %1696 = vmatpush.bf16.msra.mxu2 %v1639_v27 }
 0x192   : > { %1697 = vmatpush.bf16.msra.mxu3 %v1639_v27 }
 0x193   : > { %1197 = vmatpush.bf16.msra.mxu0 %v1638_v55  ;;  %1698 = vmatpush.bf16.msra.mxu1 %v1638_v55 }
 0x194   : > { %1047 = vperm.xlu1 %1768, %v2365_v51   ;;  %1042 = vperm.xlu2 %1769, %v2363_v47  }
 0x195   : > { %1062 = vperm.xlu0 %1767, %v2367_v58   ;;  %1699 = vmatpush.bf16.msra.mxu2 %v1638_v55 }
 0x196   : > { %1700 = vmatpush.bf16.msra.mxu3 %v1638_v55 }
 0x197   : > { %1198 = vmatpush.bf16.msra.mxu0 %v1637_v28  ;;  %1701 = vmatpush.bf16.msra.mxu1 %v1637_v28 }
 0x199   : > { %1702 = vmatpush.bf16.msra.mxu2 %v1637_v28 }
 0x19a   : > { %1703 = vmatpush.bf16.msra.mxu3 %v1637_v28 }
 0x19b   : > { %1199 = vmatpush.bf16.msra.mxu0 %v1636_v34  ;;  %1704 = vmatpush.bf16.msra.mxu1 %v1636_v34 }
 0x19c   : > { %1067 = vperm.xlu1 %1768, %v2381_v6   ;;  %1057 = vperm.xlu2 %1769, %v2379_v50  }
 0x19d   : > { %1077 = vperm.xlu0 %1767, %v2383_v56   ;;  %1705 = vmatpush.bf16.msra.mxu2 %v1636_v34 }
 0x19e   : > { %1706 = vmatpush.bf16.msra.mxu3 %v1636_v34 }
 0x1a4   : > { %1082 = vperm.xlu1 %1768, %v2395_v18   ;;  %1072 = vperm.xlu2 %1769, %v2393_v13  }
 0x1a5   : > { %1092 = vperm.xlu0 %1767, %v2398_v49  }
 0x1ac   : > { %1097 = vperm.xlu1 %1768, %v2408_v24   ;;  %1087 = vperm.xlu2 %1769, %v2406_v17  }
 0x1b4   : > { %1102 = vperm.xlu2 %1769, %v2414_v0  }
 0x1be   : > { %v807_v25 = vpop.permute.xlu2 %806 }
 0x1bf   : > { %v880_v26 = vsub.f32 %v2160_v2, %v807_v25 }
 0x1c1   : > { %v897_v62 = vmul.f32 1.442695, %v880_v26 }
 0x1ce   : > { %v812_v30 = vpop.permute.xlu0 %811  ;;  %v827_v32 = vpop.permute.xlu2 %826 }
 0x1cf   : > { %v881_v38 = vsub.f32 %v2149_v52, %v812_v30  ;;  %v802_v48 = vpop.permute.xlu1 %801  ;;  %v884_v31 = vsub.f32 %v2185_v41, %v827_v32 }
 0x1d0   : > { %v879_v45 = vsub.f32 %v2151_v53, %v802_v48 }
 0x1d1   : > { %v899_v33 = vmul.f32 1.442695, %v881_v38  ;;  %v905_v3 = vmul.f32 1.442695, %v884_v31 }
 0x1d2   : > { %v895_v43 = vmul.f32 1.442695, %v879_v45 }
 0x1d3   : > { %1797 = vpow2.f32 %v899_v33 }
 0x1d4   : > { %1799 = vpow2.f32 %v897_v62 }
 0x1d5   : > { %1801 = vpow2.f32 %v895_v43 }
 0x1d6   : > { %v822_v37 = vpop.permute.xlu0 %821  ;;  %v842_v2 = vpop.permute.xlu2 %841  ;;  %1803 = vpow2.f32 %v905_v3 }
 0x1d7   : > { %v883_v1 = vsub.f32 %v2158_v63, %v822_v37  ;;  %v887_v53 = vsub.f32 %v2198_v60, %v842_v2 }
 0x1d9   : > { %v1798_v46 = vpop.eup %1797  ;;  %v903_v54 = vmul.f32 1.442695, %v883_v1  ;;  %v911_v44 = vmul.f32 1.442695, %v887_v53 }
 0x1da   : > { %v1800_v9 = vpop.eup %1799  ;;  %963 = vadd.xlane.f32.xlu1 %v1798_v46 }
 0x1db   : > { %v1802_v52 = vpop.eup %1801  ;;  %1805 = vpow2.f32 %v903_v54 }
 0x1dc   : > { %959 = vadd.xlane.f32.xlu0 %v1802_v52  ;;  %v1136_v10 = vpack.c.bf16 %v1800_v9, %v1802_v52  ;;  %v1804_v22 = vpop.eup %1803  ;;  %1807 = vpow2.f32 %v911_v44 }
 0x1dd   : > { %961 = vadd.xlane.f32.xlu2 %v1800_v9 }
 0x1de   : > { %1200 = vmatmul.bf16.vlgmr.msra.gmra.mxu0 %v1136_v10  ;;  %v817_v41 = vpop.permute.xlu1 %816  ;;  %v867_v25 = vpop.permute.xlu2 %866 }
 0x1df   : > { %v837_v8 = vpop.permute.xlu0 %836  ;;  %v882_v15 = vsub.f32 %v2170_v20, %v817_v41  ;;  %v892_v20 = vsub.f32 %v2200_v61, %v867_v25  ;;  %v795_v25 = vmul.f32 1.442695, %v765_v29 }
 0x1e0   : > { %v886_v63 = vsub.f32 %v2172_v21, %v837_v8 }
 0x1e1   : > { %v901_v27 = vmul.f32 1.442695, %v882_v15  ;;  %v1806_v55 = vpop.eup %1805  ;;  %v921_v62 = vmul.f32 1.442695, %v892_v20 }
 0x1e2   : > { %v909_v28 = vmul.f32 1.442695, %v886_v63  ;;  %969 = vadd.xlane.f32.xlu1 %v1804_v22  ;;  %v1138_v34 = vpack.c.bf16 %v1804_v22, %v1806_v55  ;;  %v1808_v30 = vpop.eup %1807 }
 0x1e3   : > { %1809 = vpow2.f32 %v901_v27 }
 0x1e4   : > { %1210 = vmatmul.bf16.vlgmr.msra.gmra.mxu1 %v1138_v34  ;;  %1811 = vpow2.f32 %v909_v28 }
 0x1e5   : > { %967 = vadd.xlane.f32.xlu2 %v1806_v55 }
 0x1e6   : > { %v832_v60 = vpop.permute.xlu1 %831  ;;  %v872_v2 = vpop.permute.xlu2 %871 }
 0x1e7   : > { %v885_v26 = vsub.f32 %v2168_v19, %v832_v60  ;;  %v893_v10 = vsub.f32 %v2214_v16, %v872_v2  ;;  %v797_v60 = vmul.f32 1.442695, %v766_v35 }
 0x1e9   : > { %v907_v32 = vmul.f32 1.442695, %v885_v26  ;;  %v1810_v21 = vpop.eup %1809  ;;  %v923_v15 = vmul.f32 1.442695, %v893_v10  ;;  %v935_v10 = vld [vmem:[#allocation3 + $0x40] sm:$0xff] }
 0x1ea   : > { %975 = vadd.xlane.f32.xlu1 %v1808_v30  ;;  %v1812_v38 = vpop.eup %1811  ;;  %965 = vadd.xlane.f32.xlu0 %v1810_v21  ;;  %v1137_v48 = vpack.c.bf16 %v1810_v21, %v1798_v46 }
 0x1eb   : > { %1813 = vpow2.f32 %v907_v32 }
 0x1ec   : > { %1815 = vpow2.f32 %v921_v62  ;;  %v929_v62 = vld [vmem:[#allocation3 + $0x10] sm:$0xff] }
 0x1ed   : > { %973 = vadd.xlane.f32.xlu2 %v1812_v38 }
 0x1ee   : > { %1205 = vmatmul.bf16.gmra.mxu0 %v1137_v48  ;;  %v847_v45 = vpop.permute.xlu1 %846 }
 0x1ef   : > { %v862_v33 = vpop.permute.xlu0 %861  ;;  %v888_v43 = vsub.f32 %v2183_v40, %v847_v45  ;;  %v927_v45 = vld [vmem:[#allocation3] sm:$0xff] }
 0x1f0   : > { %v891_v31 = vsub.f32 %v2196_v59, %v862_v33  ;;  %v945_v33 = vmul.f32 %v2349_v39, %v929_v62 }
 0x1f1   : > { %v913_v19 = vmul.f32 1.442695, %v888_v43  ;;  %v1814_v37 = vpop.eup %1813  ;;  %v928_v43 = vld [vmem:[#allocation3 + $0x8] sm:$0xff] }
 0x1f2   : > { %v919_v3 = vmul.f32 1.442695, %v891_v31  ;;  %v1139_v61 = vpack.c.bf16 %v1812_v38, %v1814_v37  ;;  %971 = vadd.xlane.f32.xlu0 %v1814_v37  ;;  %v1816_v9 = vpop.eup %1815 }
 0x1f3   : > { %1817 = vpow2.f32 %v913_v19  ;;  %v943_v19 = vmul.f32 %v2363_v47, %v927_v45  ;;  %v1024_v47 = vld [vmem:[#allocation4] sm:$0xff] }
 0x1f4   : > { %1819 = vpow2.f32 %v919_v3  ;;  %1215 = vmatmul.bf16.gmra.mxu1 %v1139_v61  ;;  %v944_v61 = vmul.f32 %v2365_v51, %v928_v43  ;;  %v1026_v43 = vld [vmem:[#allocation4 + $0x10] sm:$0xff] }
 0x1f6   : > { %v852_v1 = vpop.permute.xlu1 %851 }
 0x1f7   : > { %v857_v46 = vpop.permute.xlu0 %856  ;;  %v889_v54 = vsub.f32 %v2187_v42, %v852_v1 }
 0x1f8   : > { %v890_v52 = vsub.f32 %v2210_v12, %v857_v46 }
 0x1f9   : > { %v1818_v40 = vpop.eup %1817  ;;  %v915_v53 = vmul.f32 1.442695, %v889_v54  ;;  %v932_v54 = vld [vmem:[#allocation3 + $0x28] sm:$0xff] }
 0x1fa   : > { %v1820_v59 = vpop.eup %1819  ;;  %v917_v41 = vmul.f32 1.442695, %v890_v52  ;;  %v1140_v44 = vpack.c.bf16 %v1818_v40, %v1808_v30  ;;  %977 = vadd.xlane.f32.xlu0 %v1818_v40  ;;  %v1043_v30 = vpop.permute.xlu2 %1042  ;;  %v948_v39 = vmul.f32 %v2381_v6, %v932_v54  ;;  %v951_v6 = vmul.f32 %v2395_v18, %v935_v10  ;;  %v1027_v54 = vld [vmem:[#allocation4 + $0x18] sm:$0xff] }
 0x1fb   : > { %1821 = vpow2.f32 %v915_v53  ;;  %v1142_v8 = vpack.c.bf16 %v1816_v9, %v1820_v59 }
 0x1fc   : > { %1823 = vpow2.f32 %v917_v41  ;;  %1220 = vmatmul.bf16.vlgmr.msra.gmra.mxu2 %v1140_v44  ;;  %v1120_v41 = vmul.f32 %v1043_v30, %v1024_v47  ;;  %v938_v47 = vld [vmem:[#allocation3 + $0x58] sm:$0xff] }
 0x1fd   : > { %1230 = vmatmul.bf16.vlgmr.msra.gmra.mxu3 %v1142_v8  ;;  %1825 = vpow2.f32 %v923_v15  ;;  %v930_v8 = vld [vmem:[#allocation3 + $0x18] sm:$0xff] }
 0x1fe   : > { %v877_v63 = vpop.permute.xlu1 %876 }
 0x1ff   : > { %v894_v42 = vsub.f32 %v2208_v11, %v877_v63  ;;  %v793_v11 = vmul.f32 1.442695, %v764_v5  ;;  %v2453_v5 = vpop.permute.xlu0 %1052  ;;  %v934_v63 = vld [vmem:[#allocation3 + $0x38] sm:$0xff] }
 0x201   : > { %v1822_v22 = vpop.eup %1821  ;;  %v925_v27 = vmul.f32 1.442695, %v894_v42 }
 0x202   : > { %v1824_v12 = vpop.eup %1823  ;;  %979 = vadd.xlane.f32.xlu2 %v1822_v22  ;;  %983 = vadd.xlane.f32.xlu0 %v1820_v59  ;;  %v2455_v7 = vpop.permute.xlu2 %1057 }
 0x203   : > { %1827 = vpow2.f32 %v925_v27  ;;  %981 = vadd.xlane.f32.xlu1 %v1824_v12  ;;  %v1826_v16 = vpop.eup %1825  ;;  %v1141_v28 = vpack.c.bf16 %v1824_v12, %v1822_v22  ;;  %v1028_v22 = vld [vmem:[#allocation4 + $0x20] sm:$0xff]  ;;  %v1025_v12 = vld [vmem:[#allocation4 + $0x8] sm:$0xff] }
 0x204   : > { %1829 = vpow2.f32 %v793_v11 }
 0x205   : > { %1831 = vpow2.f32 %v797_v60 }
 0x206   : > { %1833 = vpow2.f32 %v795_v25  ;;  %v1048_v4 = vpop.permute.xlu1 %1047 }
 0x207   : > { %v1063_v35 = vpop.permute.xlu0 %1062  ;;  %v1121_v25 = vmul.f32 %v1048_v4, %v1025_v12 }
 0x208   : > { %v1124_v11 = vmul.f32 %v1063_v35, %v1028_v22 }
 0x209   : > { %v1828_v55 = vpop.eup %1827 }
 0x20a   : > { %985 = vadd.xlane.f32.xlu2 %v1816_v9  ;;  %v1143_v34 = vpack.c.bf16 %v1828_v55, %v1826_v16  ;;  %989 = vadd.xlane.f32.xlu0 %v1828_v55  ;;  %v2444_v26 = vpop.eup %1829  ;;  %v2459_v23 = vpop.permute.xlu2 %1072  ;;  %v931_v9 = vld [vmem:[#allocation3 + $0x20] sm:$0xff]  ;;  %v950_v55 = vmul.f32 %v2383_v56, %v934_v63 }
 0x20b   : > { %987 = vadd.xlane.f32.xlu1 %v1826_v16  ;;  %v2447_v32 = vpop.eup %1831  ;;  %v947_v53 = vmul.f32 %v2367_v58, %v931_v9  ;;  %v946_v58 = vmul.f32 %v2379_v50, %v930_v8  ;;  %v933_v50 = vld [vmem:[#allocation3 + $0x30] sm:$0xff]  ;;  %v1031_v8 = vld [vmem:[#allocation4 + $0x38] sm:$0xff] }
 0x20c   : > { %1225 = vmatmul.bf16.gmra.mxu2 %v1141_v28  ;;  %v2450_v57 = vpop.eup %1833  ;;  %v949_v56 = vmul.f32 %v2393_v13, %v933_v50 }
 0x20d   : > { %1235 = vmatmul.bf16.gmra.mxu3 %v1143_v34 }
 0x20e   : > { %v2457_v14 = vpop.permute.xlu1 %1067 }
 0x20f   : > { %v2463_v29 = vpop.permute.xlu0 %1077 }
 0x210   : > { %v1127_v22 = vmul.f32 %v2463_v29, %v1031_v8 }
 0x212   : > { %v2465_v20 = vpop.permute.xlu2 %1087 }
 0x216   : > { %v2461_v36 = vpop.permute.xlu1 %1082 }
 0x217   : > { %v2469_v38 = vpop.permute.xlu0 %1092 }
 0x21a   : > { %v2471_v48 = vpop.permute.xlu2 %1102 }
 0x21e   : > { %1107 = vperm.xlu0 %1767, %v2444_v26   ;;  %v2467_v21 = vpop.permute.xlu1 %1097 }
 0x222   : > { %1117 = vperm.xlu2 %1769, %v2447_v32  }
 0x224   : > { %1112 = vperm.xlu1 %1768, %v2450_v57  }
 0x24d   : > { %v964_v31 = vpop.xlane.xlu1 %963 }
 0x24e   : > { %v993_v37 = vadd.f32 %v964_v31, %v945_v33  ;;  %v1029_v33 = vld [vmem:[#allocation4 + $0x28] sm:$0xff] }
 0x24f   : > { %v960_v3 = vpop.xlane.xlu0 %959  ;;  %v1125_v4 = vmul.f32 %v2457_v14, %v1029_v33 }
 0x250   : > { %v991_v1 = vadd.f32 %v960_v3, %v943_v19  ;;  %1010 = vst.msk [vmem:[#allocation3 + $0x10] sm:$0xff] %vm1007_vm2, %v993_v37  ;;  %v962_v2 = vpop.xlane.xlu2 %961  ;;  %v1122_v19 = vmul.f32 %v2453_v5, %v1026_v43  ;;  %v937_v5 = vld [vmem:[#allocation3 + $0x50] sm:$0xff] }
 0x251   : > { %v992_v46 = vadd.f32 %v962_v2, %v944_v61 }
 0x252   : > { %1008 = vst.msk [vmem:[#allocation3] sm:$0xff] %vm1007_vm2, %v991_v1  ;;  %v936_v1 = vld [vmem:[#allocation3 + $0x48] sm:$0xff] }
 0x253   : > { %1009 = vst.msk [vmem:[#allocation3 + $0x8] sm:$0xff] %vm1007_vm2, %v992_v46  ;;  %v1030_v46 = vld [vmem:[#allocation4 + $0x30] sm:$0xff]  ;;  %v952_v13 = vmul.f32 %v2406_v17, %v936_v1  ;;  %v1035_v1 = vld [vmem:[#allocation4 + $0x58] sm:$0xff] }
 0x254   : > { %v1126_v14 = vmul.f32 %v2459_v23, %v1030_v46  ;;  %v1039_v46 = vld [vmem:[#allocation4 + $0x78] sm:$0xff] }
 0x255   : > { %v970_v52 = vpop.xlane.xlu1 %969 }
 0x256   : > { %v996_v40 = vadd.f32 %v970_v52, %v948_v39  ;;  %v1123_v52 = vmul.f32 %v2455_v7, %v1027_v54 }
 0x258   : > { %1013 = vst.msk [vmem:[#allocation3 + $0x28] sm:$0xff] %vm1007_vm2, %v996_v40  ;;  %v968_v51 = vpop.xlane.xlu2 %967 }
 0x259   : > { %v995_v59 = vadd.f32 %v968_v51, %v947_v53 }
 0x25b   : > { %1012 = vst.msk [vmem:[#allocation3 + $0x20] sm:$0xff] %vm1007_vm2, %v995_v59  ;;  %v1201_v44 = vpop.f32.mrf.mxu0  ;;  %v939_v59 = vld [vmem:[#allocation3 + $0x60] sm:$0xff] }
 0x25c   : > { %v1241_v15 = vadd.f32 %v1201_v44, %v1120_v41  ;;  %v953_v41 = vmul.f32 %v2398_v49, %v937_v5  ;;  %v954_v44 = vmul.f32 %v2408_v24, %v938_v47  ;;  %v955_v7 = vmul.f32 %v2414_v0, %v939_v59  ;;  %v940_v49 = vld [vmem:[#allocation3 + $0x68] sm:$0xff]  ;;  %v1036_v0 = vld [vmem:[#allocation4 + $0x60] sm:$0xff] }
 0x25d   : > { %v976_v42 = vpop.xlane.xlu1 %975  ;;  %v966_v16 = vpop.xlane.xlu0 %965 }
 0x25e   : > { %1258 = vst.msk [vmem:[#allocation4] sm:$0xff] %vm1257_vm3, %v1241_v15  ;;  %v999_v27 = vadd.f32 %v976_v42, %v951_v6  ;;  %v994_v28 = vadd.f32 %v966_v16, %v946_v58  ;;  %v941_v58 = vld [vmem:[#allocation3 + $0x70] sm:$0xff]  ;;  %v942_v16 = vld [vmem:[#allocation3 + $0x78] sm:$0xff] }
 0x260   : > { %1016 = vst.msk [vmem:[#allocation3 + $0x40] sm:$0xff] %vm1007_vm2, %v999_v27  ;;  %v974_v34 = vpop.xlane.xlu2 %973  ;;  %v1032_v27 = vld [vmem:[#allocation4 + $0x40] sm:$0xff] }
 0x261   : > { %v998_v60 = vadd.f32 %v974_v34, %v950_v55  ;;  %1011 = vst.msk [vmem:[#allocation3 + $0x18] sm:$0xff] %vm1007_vm2, %v994_v28  ;;  %v1211_v18 = vpop.f32.mrf.mxu1  ;;  %v956_v55 = vmul.f32 %v2444_v26, %v940_v49  ;;  %v957_v34 = vmul.f32 %v2450_v57, %v941_v58  ;;  %v1128_v29 = vmul.f32 %v2461_v36, %v1032_v27  ;;  %v1033_v57 = vld [vmem:[#allocation4 + $0x48] sm:$0xff] }
 0x262   : > { %v1245_v62 = vadd.f32 %v1211_v18, %v1124_v11  ;;  %v1132_v18 = vmul.f32 %v2471_v48, %v1036_v0 }
 0x263   : > { %1015 = vst.msk [vmem:[#allocation3 + $0x38] sm:$0xff] %vm1007_vm2, %v998_v60  ;;  %v1203_v30 = vpop.f32.mrf.mxu0  ;;  %v958_v60 = vmul.f32 %v2447_v32, %v942_v16  ;;  %v1129_v32 = vmul.f32 %v2465_v20, %v1033_v57  ;;  %v1038_v20 = vld [vmem:[#allocation4 + $0x70] sm:$0xff] }
 0x264   : > { %v1242_v45 = vadd.f32 %v1203_v30, %v1121_v25  ;;  %1262 = vst.msk [vmem:[#allocation4 + $0x20] sm:$0xff] %vm1257_vm3, %v1245_v62 }
 0x265   : > { %v972_v35 = vpop.xlane.xlu0 %971 }
 0x266   : > { %1259 = vst.msk [vmem:[#allocation4 + $0x8] sm:$0xff] %vm1257_vm3, %v1242_v45  ;;  %v997_v31 = vadd.f32 %v972_v35, %v949_v56  ;;  %v1034_v35 = vld [vmem:[#allocation4 + $0x50] sm:$0xff] }
 0x268   : > { %1014 = vst.msk [vmem:[#allocation3 + $0x30] sm:$0xff] %vm1007_vm2, %v997_v31  ;;  %v1130_v31 = vmul.f32 %v2469_v38, %v1034_v35 }
 0x269   : > { %v1213_v37 = vpop.f32.mrf.mxu1 }
 0x26a   : > { %v1246_v61 = vadd.f32 %v1213_v37, %v1125_v4 }
 0x26b   : > { %v1206_v3 = vpop.f32.mrf.mxu0 }
 0x26c   : > { %v1243_v2 = vadd.f32 %v1206_v3, %v1122_v19  ;;  %1263 = vst.msk [vmem:[#allocation4 + $0x28] sm:$0xff] %vm1257_vm3, %v1246_v61  ;;  %v1037_v3 = vld [vmem:[#allocation4 + $0x68] sm:$0xff] }
 0x26d   : > { %v978_v39 = vpop.xlane.xlu0 %977 }
 0x26e   : > { %1260 = vst.msk [vmem:[#allocation4 + $0x10] sm:$0xff] %vm1257_vm3, %v1243_v2  ;;  %v1000_v9 = vadd.f32 %v978_v39, %v952_v13  ;;  %v1131_v39 = vmul.f32 %v2467_v21, %v1035_v1 }
 0x270   : > { %1017 = vst.msk [vmem:[#allocation3 + $0x48] sm:$0xff] %vm1007_vm2, %v1000_v9 }
 0x271   : > { %v1216_v40 = vpop.f32.mrf.mxu1 }
 0x272   : > { %v1247_v51 = vadd.f32 %v1216_v40, %v1126_v14 }
 0x273   : > { %v1208_v53 = vpop.f32.mrf.mxu0 }
 0x274   : > { %v1244_v10 = vadd.f32 %v1208_v53, %v1123_v52  ;;  %1264 = vst.msk [vmem:[#allocation4 + $0x30] sm:$0xff] %vm1257_vm3, %v1247_v51 }
 0x275   : > { %v980_v17 = vpop.xlane.xlu2 %979  ;;  %v984_v6 = vpop.xlane.xlu0 %983 }
 0x276   : > { %1261 = vst.msk [vmem:[#allocation4 + $0x18] sm:$0xff] %vm1257_vm3, %v1244_v10  ;;  %v1001_v23 = vadd.f32 %v980_v17, %v953_v41  ;;  %v982_v15 = vpop.xlane.xlu1 %981  ;;  %v1003_v42 = vadd.f32 %v984_v6, %v955_v7 }
 0x277   : > { %v1002_v63 = vadd.f32 %v982_v15, %v954_v44 }
 0x278   : > { %1018 = vst.msk [vmem:[#allocation3 + $0x50] sm:$0xff] %vm1007_vm2, %v1001_v23 }
 0x279   : > { %1019 = vst.msk [vmem:[#allocation3 + $0x58] sm:$0xff] %vm1007_vm2, %v1002_v63  ;;  %v1218_v24 = vpop.f32.mrf.mxu1 }
 0x27a   : > { %1020 = vst.msk [vmem:[#allocation3 + $0x60] sm:$0xff] %vm1007_vm2, %v1003_v42  ;;  %v1248_v12 = vadd.f32 %v1218_v24, %v1127_v22 }
 0x27c   : > { %1265 = vst.msk [vmem:[#allocation4 + $0x38] sm:$0xff] %vm1257_vm3, %v1248_v12 }
 0x27d   : > { %v986_v28 = vpop.xlane.xlu2 %985  ;;  %v990_v30 = vpop.xlane.xlu0 %989 }
 0x27e   : > { %v1004_v11 = vadd.f32 %v986_v28, %v956_v55  ;;  %v988_v25 = vpop.xlane.xlu1 %987  ;;  %v1006_v45 = vadd.f32 %v990_v30, %v958_v60 }
 0x27f   : > { %v1005_v62 = vadd.f32 %v988_v25, %v957_v34  ;;  %v1221_v50 = vpop.f32.mrf.mxu2 }
 0x280   : > { %1021 = vst.msk [vmem:[#allocation3 + $0x68] sm:$0xff] %vm1007_vm2, %v1004_v11  ;;  %v1249_v26 = vadd.f32 %v1221_v50, %v1128_v29  ;;  %v1231_v33 = vpop.f32.mrf.mxu3 }
 0x281   : > { %1022 = vst.msk [vmem:[#allocation3 + $0x70] sm:$0xff] %vm1007_vm2, %v1005_v62  ;;  %v1253_v56 = vadd.f32 %v1231_v33, %v1132_v18 }
 0x282   : > { %1023 = vst.msk [vmem:[#allocation3 + $0x78] sm:$0xff] %vm1007_vm2, %v1006_v45 }
 0x283   : > { %1266 = vst.msk [vmem:[#allocation4 + $0x40] sm:$0xff] %vm1257_vm3, %v1249_v26 }
 0x284   : > { %1270 = vst.msk [vmem:[#allocation4 + $0x60] sm:$0xff] %vm1257_vm3, %v1253_v56 }
 0x285   : > { %v1118_v13 = vpop.permute.xlu2 %1117 }
 0x286   : > { %v1135_v14 = vmul.f32 %v1118_v13, %v1039_v46 }
 0x287   : > { %v1223_v36 = vpop.f32.mrf.mxu2 }
 0x288   : > { %v1250_v48 = vadd.f32 %v1223_v36, %v1129_v32  ;;  %v1233_v43 = vpop.f32.mrf.mxu3 }
 0x28a   : > { %1267 = vst.msk [vmem:[#allocation4 + $0x48] sm:$0xff] %vm1257_vm3, %v1250_v48 }
 0x28f   : > { %v1226_v4 = vpop.f32.mrf.mxu2 }
 0x290   : > { %v1251_v19 = vadd.f32 %v1226_v4, %v1130_v31  ;;  %v1236_v37 = vpop.f32.mrf.mxu3  ;;  %v1108_v61 = vpop.permute.xlu0 %1107 }
 0x291   : > { %v1133_v2 = vmul.f32 %v1108_v61, %v1037_v3 }
 0x292   : > { %1268 = vst.msk [vmem:[#allocation4 + $0x50] sm:$0xff] %vm1257_vm3, %v1251_v19 }
 0x293   : > { %v1254_v54 = vadd.f32 %v1233_v43, %v1133_v2 }
 0x295   : > { %1271 = vst.msk [vmem:[#allocation4 + $0x68] sm:$0xff] %vm1257_vm3, %v1254_v54 }
 0x296   : > { %v1113_v9 = vpop.permute.xlu1 %1112 }
 0x297   : > { %v1134_v38 = vmul.f32 %v1113_v9, %v1038_v20  ;;  %v1228_v5 = vpop.f32.mrf.mxu2 }
 0x298   : > { %v1252_v52 = vadd.f32 %v1228_v5, %v1131_v39  ;;  %v1238_v40 = vpop.f32.mrf.mxu3  ;;  %1293 = sbr.rel (%p1632_p0) target bundleno = 839 (0x347), region = 89 }
 0x299   : > { %v1255_v47 = vadd.f32 %v1236_v37, %v1134_v38  ;;  %v1256_v53 = vadd.f32 %v1238_v40, %v1135_v14 }
 0x29a   : > { %1269 = vst.msk [vmem:[#allocation4 + $0x58] sm:$0xff] %vm1257_vm3, %v1252_v52 }
 0x29b   : > { %1272 = vst.msk [vmem:[#allocation4 + $0x70] sm:$0xff] %vm1257_vm3, %v1255_v47 }
 0x29c   : > { %1273 = vst.msk [vmem:[#allocation4 + $0x78] sm:$0xff] %vm1257_vm3, %v1256_v53 }
 0x29d   : > { %v1298_v21 = vld [vmem:[#allocation3 + $0x20] sm:$0xff]  ;;  %v1296_v51 = vld [vmem:[#allocation3 + $0x10] sm:$0xff]  ;;  %v1930_v10 = vmov 0   ;;  %v1299_v41 = vld [vmem:[#allocation3 + $0x28] sm:$0xff] }
 0x29e   : > { %v1294_v59 = vld [vmem:[#allocation3] sm:$0xff]  ;;  %1837 = vset.pattern.permute.xlu2 %v1930_v10  ;;  %1836 = vset.pattern.permute.xlu1 %v1930_v10  ;;  %1839 = vrcp.f32 %v1298_v21  ;;  %v1297_v17 = vld [vmem:[#allocation3 + $0x18] sm:$0xff]  ;;  %v1295_v44 = vld [vmem:[#allocation3 + $0x8] sm:$0xff] }
 0x29f   : > { %1835 = vset.pattern.permute.xlu0 %v1930_v10  ;;  %1841 = vrcp.f32 %v1296_v51  ;;  %v1302_v15 = vld [vmem:[#allocation3 + $0x40] sm:$0xff]  ;;  %v1301_v63 = vld [vmem:[#allocation3 + $0x38] sm:$0xff]  ;;  %v1300_v22 = vld [vmem:[#allocation3 + $0x30] sm:$0xff] }
 0x2a0   : > { %1843 = vrcp.f32 %v1294_v59  ;;  %v1305_v24 = vld [vmem:[#allocation3 + $0x58] sm:$0xff]  ;;  %v1304_v27 = vld [vmem:[#allocation3 + $0x50] sm:$0xff]  ;;  %v1303_v16 = vld [vmem:[#allocation3 + $0x48] sm:$0xff] }
 0x2a1   : > { %1845 = vrcp.f32 %v1299_v41  ;;  %v1308_v55 = vld [vmem:[#allocation3 + $0x70] sm:$0xff]  ;;  %v1307_v34 = vld [vmem:[#allocation3 + $0x68] sm:$0xff]  ;;  %v1306_v11 = vld [vmem:[#allocation3 + $0x60] sm:$0xff] }
 0x2a2   : > { %1847 = vrcp.f32 %v1297_v17  ;;  %v1309_v30 = vld [vmem:[#allocation3 + $0x78] sm:$0xff]  ;;  %v1330_v45 = vld [vmem:[#allocation4 + $0x20] sm:$0xff]  ;;  %v1331_v32 = vld [vmem:[#allocation4 + $0x28] sm:$0xff] }
 0x2a3   : > { %1849 = vrcp.f32 %v1295_v44  ;;  %v2535_v33 = vld [vmem:[%s2610_s4] ss:$0 sm:$0xff]  ;;  %v1337_v37 = vld [vmem:[#allocation4 + $0x58] sm:$0xff]  ;;  %v1328_v3 = vld [vmem:[#allocation4 + $0x10] sm:$0xff] }
 0x2a4   : > { %v1840_v8 = vpop.eup %1839  ;;  %1851 = vrcp.f32 %v1302_v15  ;;  %v1334_v35 = vld [vmem:[#allocation4 + $0x40] sm:$0xff]  ;;  %v1340_v38 = vld [vmem:[#allocation4 + $0x70] sm:$0xff]  ;;  %v1329_v5 = vld [vmem:[#allocation4 + $0x18] sm:$0xff] }
 0x2a5   : > { %v1842_v7 = vpop.eup %1841  ;;  %1364 = vperm.xlu2 %1837, %v1840_v8   ;;  %1853 = vrcp.f32 %v1301_v63  ;;  %v1326_v1 = vld [vmem:[#allocation4] sm:$0xff]  ;;  %v1327_v40 = vld [vmem:[#allocation4 + $0x8] sm:$0xff]  ;;  %v1333_v44 = vld [vmem:[#allocation4 + $0x38] sm:$0xff] }
 0x2a6   : > { %v1844_v23 = vpop.eup %1843  ;;  %1354 = vperm.xlu1 %1836, %v1842_v7   ;;  %1855 = vrcp.f32 %v1300_v22  ;;  %v1332_v8 = vld [vmem:[#allocation4 + $0x30] sm:$0xff] }
 0x2a7   : > { %1344 = vperm.xlu0 %1835, %v1844_v23   ;;  %v1846_v6 = vpop.eup %1845  ;;  %1857 = vrcp.f32 %v1305_v24  ;;  %v1336_v22 = vld [vmem:[#allocation4 + $0x50] sm:$0xff] }
 0x2a8   : > { %v1848_v42 = vpop.eup %1847  ;;  %1859 = vrcp.f32 %v1304_v27 }
 0x2a9   : > { %v1850_v49 = vpop.eup %1849  ;;  %1861 = vrcp.f32 %v1303_v16 }
 0x2aa   : > { %v1852_v58 = vpop.eup %1851  ;;  %1863 = vrcp.f32 %v1308_v55  ;;  %v1339_v55 = vld [vmem:[#allocation4 + $0x68] sm:$0xff] }
 0x2ab   : > { %v1854_v12 = vpop.eup %1853  ;;  %1865 = vrcp.f32 %v1307_v34 }
 0x2ac   : > { %v1856_v0 = vpop.eup %1855  ;;  %1867 = vrcp.f32 %v1306_v11 }
 0x2ad   : > { %1369 = vperm.xlu2 %1837, %v1846_v6   ;;  %v1858_v28 = vpop.eup %1857  ;;  %1869 = vrcp.f32 %v1309_v30  ;;  %v1341_v30 = vld [vmem:[#allocation4 + $0x78] sm:$0xff] }
 0x2ae   : > { %1359 = vperm.xlu1 %1836, %v1848_v42   ;;  %v1860_v29 = vpop.eup %1859 }
 0x2af   : > { %1349 = vperm.xlu0 %1835, %v1850_v49   ;;  %v1862_v60 = vpop.eup %1861  ;;  %v1335_v49 = vld [vmem:[#allocation4 + $0x48] sm:$0xff] }
 0x2b0   : > { %v1864_v25 = vpop.eup %1863 }
 0x2b1   : > { %v1866_v18 = vpop.eup %1865 }
 0x2b2   : > { %v1868_v62 = vpop.eup %1867 }
 0x2b3   : > { %v1870_v50 = vpop.eup %1869 }
 0x2b5   : > { %1384 = vperm.xlu2 %1837, %v1852_v58  }
 0x2b6   : > { %1379 = vperm.xlu1 %1836, %v1854_v12  }
 0x2b7   : > { %1374 = vperm.xlu0 %1835, %v1856_v0  }
 0x2bd   : > { %1399 = vperm.xlu2 %1837, %v1858_v28   ;;  %v1338_v28 = vld [vmem:[#allocation4 + $0x60] sm:$0xff] }
 0x2be   : > { %1394 = vperm.xlu1 %1836, %v1860_v29  }
 0x2bf   : > { %1389 = vperm.xlu0 %1835, %v1862_v60  }
 0x2c5   : > { %1414 = vperm.xlu2 %1837, %v1864_v25  }
 0x2c6   : > { %1409 = vperm.xlu1 %1836, %v1866_v18  }
 0x2c7   : > { %1404 = vperm.xlu0 %1835, %v1868_v62  }
 0x2cf   : > { %1419 = vperm.xlu0 %1835, %v1870_v50  }
 0x2ff   : > { %v1365_v26 = vpop.permute.xlu2 %1364 }
 0x300   : > { %v1426_v56 = vmul.f32 %v1365_v26, %v1330_v45 }
 0x302   : > { %v1446_v57 = vadd.f32 %v2535_v33, %v1426_v56 }
 0x304   : > { %1462 = vst.msk [vmem:[%s2065_s21 + $0x20] sm:$0xff] %vm1257_vm3, %v1446_v57 }
 0x307   : > { %v1370_v36 = vpop.permute.xlu2 %1369 }
 0x308   : > { %v1427_v48 = vmul.f32 %v1370_v36, %v1331_v32 }
 0x30a   : > { %v1447_v43 = vadd.f32 %v2535_v33, %v1427_v48 }
 0x30c   : > { %1463 = vst.msk [vmem:[%s2065_s21 + $0x28] sm:$0xff] %vm1257_vm3, %v1447_v43 }
 0x30f   : > { %v1385_v31 = vpop.permute.xlu2 %1384 }
 0x310   : > { %v1430_v4 = vmul.f32 %v1385_v31, %v1334_v35 }
 0x312   : > { %v1450_v19 = vadd.f32 %v2535_v33, %v1430_v4 }
 0x314   : > { %1466 = vst.msk [vmem:[%s2065_s21 + $0x40] sm:$0xff] %vm1257_vm3, %v1450_v19 }
 0x317   : > { %v1400_v61 = vpop.permute.xlu2 %1399 }
 0x318   : > { %v1433_v2 = vmul.f32 %v1400_v61, %v1337_v37  ;;  %v1355_v46 = vpop.permute.xlu1 %1354 }
 0x319   : > { %v1424_v13 = vmul.f32 %v1355_v46, %v1328_v3  ;;  %v1345_v20 = vpop.permute.xlu0 %1344 }
 0x31a   : > { %v1453_v54 = vadd.f32 %v2535_v33, %v1433_v2  ;;  %v1422_v39 = vmul.f32 %v1345_v20, %v1326_v1 }
 0x31b   : > { %v1444_v9 = vadd.f32 %v2535_v33, %v1424_v13 }
 0x31c   : > { %1469 = vst.msk [vmem:[%s2065_s21 + $0x58] sm:$0xff] %vm1257_vm3, %v1453_v54  ;;  %v1442_v14 = vadd.f32 %v2535_v33, %v1422_v39 }
 0x31d   : > { %1460 = vst.msk [vmem:[%s2065_s21 + $0x10] sm:$0xff] %vm1257_vm3, %v1444_v9 }
 0x31e   : > { %1458 = vst.msk [vmem:[%s2065_s21] sm:$0xff] %vm1257_vm3, %v1442_v14 }
 0x31f   : > { %v1415_v52 = vpop.permute.xlu2 %1414 }
 0x320   : > { %v1436_v47 = vmul.f32 %v1415_v52, %v1340_v38  ;;  %v1360_v53 = vpop.permute.xlu1 %1359 }
 0x321   : > { %v1425_v21 = vmul.f32 %v1360_v53, %v1329_v5  ;;  %v1350_v51 = vpop.permute.xlu0 %1349 }
 0x322   : > { %v1456_v59 = vadd.f32 %v2535_v33, %v1436_v47  ;;  %v1423_v10 = vmul.f32 %v1350_v51, %v1327_v40 }
 0x323   : > { %v1445_v41 = vadd.f32 %v2535_v33, %v1425_v21 }
 0x324   : > { %1472 = vst.msk [vmem:[%s2065_s21 + $0x70] sm:$0xff] %vm1257_vm3, %v1456_v59  ;;  %v1443_v17 = vadd.f32 %v2535_v33, %v1423_v10 }
 0x325   : > { %1461 = vst.msk [vmem:[%s2065_s21 + $0x18] sm:$0xff] %vm1257_vm3, %v1445_v41 }
 0x326   : > { %1459 = vst.msk [vmem:[%s2065_s21 + $0x8] sm:$0xff] %vm1257_vm3, %v1443_v17 }
 0x328   : > { %v1380_v7 = vpop.permute.xlu1 %1379 }
 0x329   : > { %v1429_v23 = vmul.f32 %v1380_v7, %v1333_v44  ;;  %v1375_v15 = vpop.permute.xlu0 %1374 }
 0x32a   : > { %v1428_v6 = vmul.f32 %v1375_v15, %v1332_v8 }
 0x32b   : > { %v1449_v63 = vadd.f32 %v2535_v33, %v1429_v23 }
 0x32c   : > { %v1448_v42 = vadd.f32 %v2535_v33, %v1428_v6 }
 0x32d   : > { %1465 = vst.msk [vmem:[%s2065_s21 + $0x38] sm:$0xff] %vm1257_vm3, %v1449_v63 }
 0x32e   : > { %1464 = vst.msk [vmem:[%s2065_s21 + $0x30] sm:$0xff] %vm1257_vm3, %v1448_v42 }
 0x330   : > { %v1395_v24 = vpop.permute.xlu1 %1394 }
 0x331   : > { %v1432_v58 = vmul.f32 %v1395_v24, %v1336_v22  ;;  %v1390_v27 = vpop.permute.xlu0 %1389 }
 0x332   : > { %v1431_v12 = vmul.f32 %v1390_v27, %v1335_v49 }
 0x333   : > { %v1452_v16 = vadd.f32 %v2535_v33, %v1432_v58 }
 0x334   : > { %v1451_v0 = vadd.f32 %v2535_v33, %v1431_v12 }
 0x335   : > { %1468 = vst.msk [vmem:[%s2065_s21 + $0x50] sm:$0xff] %vm1257_vm3, %v1452_v16 }
 0x336   : > { %1467 = vst.msk [vmem:[%s2065_s21 + $0x48] sm:$0xff] %vm1257_vm3, %v1451_v0 }
 0x338   : > { %v1410_v34 = vpop.permute.xlu1 %1409 }
 0x339   : > { %v1435_v29 = vmul.f32 %v1410_v34, %v1339_v55  ;;  %v1405_v11 = vpop.permute.xlu0 %1404 }
 0x33a   : > { %v1434_v60 = vmul.f32 %v1405_v11, %v1338_v28 }
 0x33b   : > { %v1455_v25 = vadd.f32 %v2535_v33, %v1435_v29 }
 0x33c   : > { %v1454_v18 = vadd.f32 %v2535_v33, %v1434_v60 }
 0x33d   : > { %1471 = vst.msk [vmem:[%s2065_s21 + $0x68] sm:$0xff] %vm1257_vm3, %v1455_v25 }
 0x33e   : > { %1470 = vst.msk [vmem:[%s2065_s21 + $0x60] sm:$0xff] %vm1257_vm3, %v1454_v18 }
 0x341   : > { %v1420_v62 = vpop.permute.xlu0 %1419 }
 0x342   : > { %v1437_v50 = vmul.f32 %v1420_v62, %v1341_v30 }
 0x344   : > { %v1457_v45 = vadd.f32 %v2535_v33, %v1437_v50 }
 0x346   : > { %1473 = vst.msk [vmem:[%s2065_s21 + $0x78] sm:$0xff] %vm1257_vm3, %v1457_v45 }
 0x347 PF: > { %s15_s24 = sadd.s32 1, %s1925_s24   ;;  %s2612_s18 = smov %s1905_s19 }
 0x348   : > { %p12_p1 = scmp.ge.s32.totalorder %s15_s24, 6   ;;  %s2613_s19 = smov %s2012_s6 }
 0x349   : > { %s2614_s20 = smov %s1917_s22  ;;  %s2615_s21 = smov %s1921_s23 }
 0x34a   : > { %s2616_s22 = smov %s2619_s25  ;;  %s2617_s23 = smov %s2623_s26 }
 0x34b   :  { %14 = sbr.rel (!%p12_p1) target bundleno = 4 (0x4), region = 133 }

// kernel: gat_forward.5
= control target key start
LH: loop header
LB: loop body
LE: loop exit
PB: predicated region body
PF: predicated region fallthrough
CT: control target
= control target key end

     0   :  { %s5452_s18 = smov 0   ;;  %s5454_s19 = smov 0   ;;  %s8364_s0 = inlined_call_operand.vmem [shape: bf16[256,128], index: 0, kind: input, shape index: {}]   ;;  %s8365_s1 = inlined_call_operand.vmem [shape: f32[4,256], index: 1, kind: input, shape index: {}]   ;;  %s8366_s2 = inlined_call_operand.vmem [shape: f32[256,4], index: 2, kind: input, shape index: {}]   ;;  %s8367_s3 = inlined_call_operand.vmem [shape: bf16[256,256], index: 3, kind: input, shape index: {}]   ;;  %s8368_s4 = inlined_call_operand.vmem [shape: f32[1,128], index: 4, kind: input, shape index: {}]   ;;  %s8369_s5 = inlined_call_operand.vmem [shape: f32[256,128], index: 5, kind: output, shape index: {}]  }
   0x1   :  { %s5456_s20 = smov 0   ;;  %s5458_s21 = smov 0  }
   0x2   :  { %s5460_s22 = smov 0   ;;  %s5462_s23 = smov 0  }
   0x3   :  { %s5464_s24 = smov 0  }
   0x4 LB: > { %s24_s25 = sadd.s32 1, %s5399_s22  ;;  %s27_s26 = sadd.s32 1, %s5403_s23  ;;  %s5407_s24 = sphi %s5464_s24, %s15_s24   ;;  %s5403_s23 = sphi %s5462_s23, %s8634_s23   ;;  %s5399_s22 = sphi %s5460_s22, %s8633_s22   ;;  %s5395_s21 = sphi %s5458_s21, %s8632_s21   ;;  %s5391_s20 = sphi %s5456_s20, %s8631_s20   ;;  %s5387_s19 = sphi %s5454_s19, %s8630_s19   ;;  %s5383_s18 = sphi %s5452_s18, %s8629_s18  }
   0x5   : > { %p25_p0 = scmp.ge.s32.totalorder %s24_s25, 2  ;;  %p121_p1 = scmp.ne.s32.totalorder %s5387_s19, %s5383_s18 }
   0x6   : > { %p122_p2 = scmp.eq.s32.totalorder %s5407_s24, 0  ;;  %s114_s30 = sadd.s32 1, %s5387_s19 }
   0x7   : > { %s8636_s25 = smov (%p25_p0, %s24_s25), 0  ;;  %s8638_s26 = smov (!%p25_p0, %s27_s26), %s5403_s23 }
   0x8   : > { %p123_p3 = por %p122_p2, %p121_p1  ;;  %p29_p4 = scmp.ge.s32.totalorder %s8638_s26, 2 }
   0x9   : > { %s110_s27 = ssub.s32 %s5399_s22, %s8636_s25  ;;  %p4679_p6 = scmp.ge.s32.totalorder %s5407_s24, 4 }
   0xa   : > { %s8640_s26 = smov (%p29_p4, %s8638_s26), 0 }
   0xb   : > { %s109_s28 = ssub.s32 %s5403_s23, %s8640_s26  ;;  %197 = sbr.rel (%p4679_p6) target bundleno = 38 (0x26), region = 20 }
   0xc   : > { %s111_s29 = sor.u32 %s110_s27, %s109_s28 }
   0xd   : > { %p112_p5 = scmp.eq.s32.totalorder %s111_s29, 0 }
   0xf   : > { %s5503_s6 = scalar_select %p112_p5, %s5387_s19, %s114_s30  }
  0x10   : > { %225 = sbr.rel (!%p123_p3) target bundleno = 38 (0x26), region = 36  ;;  %s227_s7 = sand.u32 (%p123_p3), 1, %s5387_s19  }
  0x11   : > { %s4745_s8 = sshll.u32 (%p123_p3), %s5403_s23, 5  ;;  %s4680_s9 = sshll.u32 (%p123_p3), %s227_s7, 6 }
  0x12   : > { %s232_s10 = sadd.s32 (%p123_p3), %s5399_s22, %s4745_s8  ;;  %s229_s15 = scalar_lea.vmem (%p123_p3), [#allocation5], %s4680_s9 }
  0x13   : > { %s4683_s11 = sshll.u32 (%p123_p3), %s232_s10, 2 }
  0x14   : > { %s5512_s14 = scalar_lea.vmem (%p123_p3), %s8367_s3, %s4683_s11 }
  0x15   : > { %v251_v0 = vld [vmem:[%s5512_s14] sm:$0xf]  ;;  %v253_v1 = vld [vmem:[%s5512_s14 + $0x8] sm:$0xf]  ;;  %v255_v2 = vld [vmem:[%s5512_s14 + $0x10] sm:$0xf] }
  0x16   : > { %252 = vst [vmem:[%s229_s15] sm:$0xf] %v251_v0  ;;  %v257_v3 = vld [vmem:[%s5512_s14 + $0x18] sm:$0xf]  ;;  %v259_v4 = vld [vmem:[%s5512_s14 + $0x20] sm:$0xf] }
  0x17   : > { %254 = vst [vmem:[%s229_s15 + $0x4] sm:$0xf] %v253_v1  ;;  %v261_v5 = vld [vmem:[%s5512_s14 + $0x28] sm:$0xf]  ;;  %v263_v6 = vld [vmem:[%s5512_s14 + $0x30] sm:$0xf] }
  0x18   : > { %256 = vst [vmem:[%s229_s15 + $0x8] sm:$0xf] %v255_v2  ;;  %v265_v7 = vld [vmem:[%s5512_s14 + $0x38] sm:$0xf]  ;;  %v267_v8 = vld [vmem:[%s5512_s14 + $0x40] sm:$0xf] }
  0x19   : > { %258 = vst [vmem:[%s229_s15 + $0xc] sm:$0xf] %v257_v3  ;;  %v269_v9 = vld [vmem:[%s5512_s14 + $0x48] sm:$0xf]  ;;  %v271_v10 = vld [vmem:[%s5512_s14 + $0x50] sm:$0xf] }
  0x1a   : > { %260 = vst [vmem:[%s229_s15 + $0x10] sm:$0xf] %v259_v4  ;;  %v273_v11 = vld [vmem:[%s5512_s14 + $0x58] sm:$0xf]  ;;  %v275_v12 = vld [vmem:[%s5512_s14 + $0x60] sm:$0xf] }
  0x1b   : > { %262 = vst [vmem:[%s229_s15 + $0x14] sm:$0xf] %v261_v5  ;;  %v277_v13 = vld [vmem:[%s5512_s14 + $0x68] sm:$0xf]  ;;  %v279_v14 = vld [vmem:[%s5512_s14 + $0x70] sm:$0xf] }
  0x1c   : > { %264 = vst [vmem:[%s229_s15 + $0x18] sm:$0xf] %v263_v6  ;;  %v281_v15 = vld [vmem:[%s5512_s14 + $0x78] sm:$0xf] }
  0x1d   : > { %266 = vst [vmem:[%s229_s15 + $0x1c] sm:$0xf] %v265_v7 }
  0x1e   : > { %268 = vst [vmem:[%s229_s15 + $0x20] sm:$0xf] %v267_v8 }
  0x1f   : > { %270 = vst [vmem:[%s229_s15 + $0x24] sm:$0xf] %v269_v9 }
  0x20   : > { %272 = vst [vmem:[%s229_s15 + $0x28] sm:$0xf] %v271_v10 }
  0x21   : > { %274 = vst [vmem:[%s229_s15 + $0x2c] sm:$0xf] %v273_v11 }
  0x22   : > { %276 = vst [vmem:[%s229_s15 + $0x30] sm:$0xf] %v275_v12 }
  0x23   : > { %278 = vst [vmem:[%s229_s15 + $0x34] sm:$0xf] %v277_v13 }
  0x24   : > { %280 = vst [vmem:[%s229_s15 + $0x38] sm:$0xf] %v279_v14 }
  0x25   : > { %282 = vst [vmem:[%s229_s15 + $0x3c] sm:$0xf] %v281_v15 }
  0x26 PF: > { %p4684_p7 = scmp.ge.s32.totalorder %s5407_s24, 1  ;;  %p337_p8 = scmp.lt.s32.totalorder %s5407_s24, 5 }
  0x28   : > { %p338_p9 = pnand %p4684_p7, %p337_p8 }
  0x2a   : > { %341 = sbr.rel (%p338_p9) target bundleno = 2663 (0xa67), region = 77 }
  0x2f   : > { %s344_s16 = sand.u32 1, %s5383_s18   ;;  %s4686_s17 = sshll.u32 %s5391_s20, 4 }
  0x30   : > { %s4685_s27 = sshll.u32 %s344_s16, 6  ;;  %p386_p10 = scmp.lt.s32.totalorder %s4686_s17, 31 }
  0x31   : > { %p391_p11 = scmp.lt.s32.totalorder %s5391_s20, 1  ;;  %s4689_s30 = sshll.u32 %s5395_s21, 4 }
  0x32   : > { %s8642_s17 = smov (!%p386_p10, %s4686_s17), 31  ;;  %p396_p12 = scmp.lt.s32.totalorder %s4689_s30, 31 }
  0x33   : > { %s392_s28 = scalar_select %p391_p11, %s5391_s20, 1 }
  0x34   : > { %s4687_s29 = sshll.u32 %s8642_s17, 2  ;;  %s8644_s30 = smov (!%p396_p12, %s4689_s30), 31 }
  0x35   : > { %s5540_s9 = scalar_lea.vmem %s8364_s0, %s4687_s29  ;;  %s4688_s10 = sshll.u32 %s392_s28, 2 }
  0x36   : > { %s5545_s13 = scalar_lea.vmem %s8365_s1, %s4688_s10  ;;  %s4690_s18 = sshll.u32 %s8644_s30, 3 }
  0x37   : > { %s5550_s16 = scalar_lea.vmem %s8366_s2, %s4690_s18  ;;  %s5555_s7 = scalar_lea.vmem %s8369_s5, %s4690_s18 }
  0x38   : > { %s5557_s29 = scalar_lea.vmem [#allocation5], %s4685_s27  ;;  %p4693_p13 = scmp.ne.s32.totalorder %s5391_s20, 0 }
  0x3a   : > { %411 = sbr.rel (%p4693_p13) target bundleno = 256 (0x100), region = 85 }
  0x3f   : > { %vm412_vm0 = vcmask 7168   ;;  %v5409_v16 = vmov -1e+30   ;;  %v5410_v17 = vmov 0.0   ;;  %vm541_vm1 = vcmask 261120  }
  0x40   : > { %413 = vst.msk [vmem:[#allocation2] sm:$0xff] %vm412_vm0, %v5409_v16 }
  0x41   : > { %414 = vst.msk [vmem:[#allocation2 + $0x8] sm:$0xff] %vm412_vm0, %v5409_v16 }
  0x42   : > { %415 = vst.msk [vmem:[#allocation2 + $0x10] sm:$0xff] %vm412_vm0, %v5409_v16 }
  0x43   : > { %416 = vst.msk [vmem:[#allocation2 + $0x18] sm:$0xff] %vm412_vm0, %v5409_v16 }
  0x44   : > { %417 = vst.msk [vmem:[#allocation2 + $0x20] sm:$0xff] %vm412_vm0, %v5409_v16 }
  0x45   : > { %418 = vst.msk [vmem:[#allocation2 + $0x28] sm:$0xff] %vm412_vm0, %v5409_v16 }
  0x46   : > { %419 = vst.msk [vmem:[#allocation2 + $0x30] sm:$0xff] %vm412_vm0, %v5409_v16 }
  0x47   : > { %420 = vst.msk [vmem:[#allocation2 + $0x38] sm:$0xff] %vm412_vm0, %v5409_v16 }
  0x48   : > { %421 = vst.msk [vmem:[#allocation2 + $0x40] sm:$0xff] %vm412_vm0, %v5409_v16 }
  0x49   : > { %422 = vst.msk [vmem:[#allocation2 + $0x48] sm:$0xff] %vm412_vm0, %v5409_v16 }
  0x4a   : > { %423 = vst.msk [vmem:[#allocation2 + $0x50] sm:$0xff] %vm412_vm0, %v5409_v16 }
  0x4b   : > { %424 = vst.msk [vmem:[#allocation2 + $0x58] sm:$0xff] %vm412_vm0, %v5409_v16 }
  0x4c   : > { %425 = vst.msk [vmem:[#allocation2 + $0x60] sm:$0xff] %vm412_vm0, %v5409_v16 }
  0x4d   : > { %426 = vst.msk [vmem:[#allocation2 + $0x68] sm:$0xff] %vm412_vm0, %v5409_v16 }
  0x4e   : > { %427 = vst.msk [vmem:[#allocation2 + $0x70] sm:$0xff] %vm412_vm0, %v5409_v16 }
  0x4f   : > { %428 = vst.msk [vmem:[#allocation2 + $0x78] sm:$0xff] %vm412_vm0, %v5409_v16 }
  0x50   : > { %429 = vst.msk [vmem:[#allocation2 + $0x80] sm:$0xff] %vm412_vm0, %v5409_v16 }
  0x51   : > { %430 = vst.msk [vmem:[#allocation2 + $0x88] sm:$0xff] %vm412_vm0, %v5409_v16 }
  0x52   : > { %431 = vst.msk [vmem:[#allocation2 + $0x90] sm:$0xff] %vm412_vm0, %v5409_v16 }
  0x53   : > { %432 = vst.msk [vmem:[#allocation2 + $0x98] sm:$0xff] %vm412_vm0, %v5409_v16 }
  0x54   : > { %433 = vst.msk [vmem:[#allocation2 + $0xa0] sm:$0xff] %vm412_vm0, %v5409_v16 }
  0x55   : > { %434 = vst.msk [vmem:[#allocation2 + $0xa8] sm:$0xff] %vm412_vm0, %v5409_v16 }
  0x56   : > { %435 = vst.msk [vmem:[#allocation2 + $0xb0] sm:$0xff] %vm412_vm0, %v5409_v16 }
  0x57   : > { %436 = vst.msk [vmem:[#allocation2 + $0xb8] sm:$0xff] %vm412_vm0, %v5409_v16 }
  0x58   : > { %437 = vst.msk [vmem:[#allocation2 + $0xc0] sm:$0xff] %vm412_vm0, %v5409_v16 }
  0x59   : > { %438 = vst.msk [vmem:[#allocation2 + $0xc8] sm:$0xff] %vm412_vm0, %v5409_v16 }
  0x5a   : > { %439 = vst.msk [vmem:[#allocation2 + $0xd0] sm:$0xff] %vm412_vm0, %v5409_v16 }
  0x5b   : > { %440 = vst.msk [vmem:[#allocation2 + $0xd8] sm:$0xff] %vm412_vm0, %v5409_v16 }
  0x5c   : > { %441 = vst.msk [vmem:[#allocation2 + $0xe0] sm:$0xff] %vm412_vm0, %v5409_v16 }
  0x5d   : > { %442 = vst.msk [vmem:[#allocation2 + $0xe8] sm:$0xff] %vm412_vm0, %v5409_v16 }
  0x5e   : > { %443 = vst.msk [vmem:[#allocation2 + $0xf0] sm:$0xff] %vm412_vm0, %v5409_v16 }
  0x5f   : > { %444 = vst.msk [vmem:[#allocation2 + $0xf8] sm:$0xff] %vm412_vm0, %v5409_v16 }
  0x60   : > { %445 = vst.msk [vmem:[#allocation2 + $0x100] sm:$0xff] %vm412_vm0, %v5409_v16 }
  0x61   : > { %446 = vst.msk [vmem:[#allocation2 + $0x108] sm:$0xff] %vm412_vm0, %v5409_v16 }
  0x62   : > { %447 = vst.msk [vmem:[#allocation2 + $0x110] sm:$0xff] %vm412_vm0, %v5409_v16 }
  0x63   : > { %448 = vst.msk [vmem:[#allocation2 + $0x118] sm:$0xff] %vm412_vm0, %v5409_v16 }
  0x64   : > { %449 = vst.msk [vmem:[#allocation2 + $0x120] sm:$0xff] %vm412_vm0, %v5409_v16 }
  0x65   : > { %450 = vst.msk [vmem:[#allocation2 + $0x128] sm:$0xff] %vm412_vm0, %v5409_v16 }
  0x66   : > { %451 = vst.msk [vmem:[#allocation2 + $0x130] sm:$0xff] %vm412_vm0, %v5409_v16 }
  0x67   : > { %452 = vst.msk [vmem:[#allocation2 + $0x138] sm:$0xff] %vm412_vm0, %v5409_v16 }
  0x68   : > { %453 = vst.msk [vmem:[#allocation2 + $0x140] sm:$0xff] %vm412_vm0, %v5409_v16 }
  0x69   : > { %454 = vst.msk [vmem:[#allocation2 + $0x148] sm:$0xff] %vm412_vm0, %v5409_v16 }
  0x6a   : > { %455 = vst.msk [vmem:[#allocation2 + $0x150] sm:$0xff] %vm412_vm0, %v5409_v16 }
  0x6b   : > { %456 = vst.msk [vmem:[#allocation2 + $0x158] sm:$0xff] %vm412_vm0, %v5409_v16 }
  0x6c   : > { %457 = vst.msk [vmem:[#allocation2 + $0x160] sm:$0xff] %vm412_vm0, %v5409_v16 }
  0x6d   : > { %458 = vst.msk [vmem:[#allocation2 + $0x168] sm:$0xff] %vm412_vm0, %v5409_v16 }
  0x6e   : > { %459 = vst.msk [vmem:[#allocation2 + $0x170] sm:$0xff] %vm412_vm0, %v5409_v16 }
  0x6f   : > { %460 = vst.msk [vmem:[#allocation2 + $0x178] sm:$0xff] %vm412_vm0, %v5409_v16 }
  0x70   : > { %461 = vst.msk [vmem:[#allocation2 + $0x180] sm:$0xff] %vm412_vm0, %v5409_v16 }
  0x71   : > { %462 = vst.msk [vmem:[#allocation2 + $0x188] sm:$0xff] %vm412_vm0, %v5409_v16 }
  0x72   : > { %463 = vst.msk [vmem:[#allocation2 + $0x190] sm:$0xff] %vm412_vm0, %v5409_v16 }
  0x73   : > { %464 = vst.msk [vmem:[#allocation2 + $0x198] sm:$0xff] %vm412_vm0, %v5409_v16 }
  0x74   : > { %465 = vst.msk [vmem:[#allocation2 + $0x1a0] sm:$0xff] %vm412_vm0, %v5409_v16 }
  0x75   : > { %466 = vst.msk [vmem:[#allocation2 + $0x1a8] sm:$0xff] %vm412_vm0, %v5409_v16 }
  0x76   : > { %467 = vst.msk [vmem:[#allocation2 + $0x1b0] sm:$0xff] %vm412_vm0, %v5409_v16 }
  0x77   : > { %468 = vst.msk [vmem:[#allocation2 + $0x1b8] sm:$0xff] %vm412_vm0, %v5409_v16 }
  0x78   : > { %469 = vst.msk [vmem:[#allocation2 + $0x1c0] sm:$0xff] %vm412_vm0, %v5409_v16 }
  0x79   : > { %470 = vst.msk [vmem:[#allocation2 + $0x1c8] sm:$0xff] %vm412_vm0, %v5409_v16 }
  0x7a   : > { %471 = vst.msk [vmem:[#allocation2 + $0x1d0] sm:$0xff] %vm412_vm0, %v5409_v16 }
  0x7b   : > { %472 = vst.msk [vmem:[#allocation2 + $0x1d8] sm:$0xff] %vm412_vm0, %v5409_v16 }
  0x7c   : > { %473 = vst.msk [vmem:[#allocation2 + $0x1e0] sm:$0xff] %vm412_vm0, %v5409_v16 }
  0x7d   : > { %474 = vst.msk [vmem:[#allocation2 + $0x1e8] sm:$0xff] %vm412_vm0, %v5409_v16 }
  0x7e   : > { %475 = vst.msk [vmem:[#allocation2 + $0x1f0] sm:$0xff] %vm412_vm0, %v5409_v16 }
  0x7f   : > { %476 = vst.msk [vmem:[#allocation2 + $0x1f8] sm:$0xff] %vm412_vm0, %v5409_v16 }
  0x80   : > { %477 = vst.msk [vmem:[#allocation3] sm:$0xff] %vm412_vm0, %v5410_v17 }
  0x81   : > { %478 = vst.msk [vmem:[#allocation3 + $0x8] sm:$0xff] %vm412_vm0, %v5410_v17 }
  0x82   : > { %479 = vst.msk [vmem:[#allocation3 + $0x10] sm:$0xff] %vm412_vm0, %v5410_v17 }
  0x83   : > { %480 = vst.msk [vmem:[#allocation3 + $0x18] sm:$0xff] %vm412_vm0, %v5410_v17 }
  0x84   : > { %481 = vst.msk [vmem:[#allocation3 + $0x20] sm:$0xff] %vm412_vm0, %v5410_v17 }
  0x85   : > { %482 = vst.msk [vmem:[#allocation3 + $0x28] sm:$0xff] %vm412_vm0, %v5410_v17 }
  0x86   : > { %483 = vst.msk [vmem:[#allocation3 + $0x30] sm:$0xff] %vm412_vm0, %v5410_v17 }
  0x87   : > { %484 = vst.msk [vmem:[#allocation3 + $0x38] sm:$0xff] %vm412_vm0, %v5410_v17 }
  0x88   : > { %485 = vst.msk [vmem:[#allocation3 + $0x40] sm:$0xff] %vm412_vm0, %v5410_v17 }
  0x89   : > { %486 = vst.msk [vmem:[#allocation3 + $0x48] sm:$0xff] %vm412_vm0, %v5410_v17 }
  0x8a   : > { %487 = vst.msk [vmem:[#allocation3 + $0x50] sm:$0xff] %vm412_vm0, %v5410_v17 }
  0x8b   : > { %488 = vst.msk [vmem:[#allocation3 + $0x58] sm:$0xff] %vm412_vm0, %v5410_v17 }
  0x8c   : > { %489 = vst.msk [vmem:[#allocation3 + $0x60] sm:$0xff] %vm412_vm0, %v5410_v17 }
  0x8d   : > { %490 = vst.msk [vmem:[#allocation3 + $0x68] sm:$0xff] %vm412_vm0, %v5410_v17 }
  0x8e   : > { %491 = vst.msk [vmem:[#allocation3 + $0x70] sm:$0xff] %vm412_vm0, %v5410_v17 }
  0x8f   : > { %492 = vst.msk [vmem:[#allocation3 + $0x78] sm:$0xff] %vm412_vm0, %v5410_v17 }
  0x90   : > { %493 = vst.msk [vmem:[#allocation3 + $0x80] sm:$0xff] %vm412_vm0, %v5410_v17 }
  0x91   : > { %494 = vst.msk [vmem:[#allocation3 + $0x88] sm:$0xff] %vm412_vm0, %v5410_v17 }
  0x92   : > { %495 = vst.msk [vmem:[#allocation3 + $0x90] sm:$0xff] %vm412_vm0, %v5410_v17 }
  0x93   : > { %496 = vst.msk [vmem:[#allocation3 + $0x98] sm:$0xff] %vm412_vm0, %v5410_v17 }
  0x94   : > { %497 = vst.msk [vmem:[#allocation3 + $0xa0] sm:$0xff] %vm412_vm0, %v5410_v17 }
  0x95   : > { %498 = vst.msk [vmem:[#allocation3 + $0xa8] sm:$0xff] %vm412_vm0, %v5410_v17 }
  0x96   : > { %499 = vst.msk [vmem:[#allocation3 + $0xb0] sm:$0xff] %vm412_vm0, %v5410_v17 }
  0x97   : > { %500 = vst.msk [vmem:[#allocation3 + $0xb8] sm:$0xff] %vm412_vm0, %v5410_v17 }
  0x98   : > { %501 = vst.msk [vmem:[#allocation3 + $0xc0] sm:$0xff] %vm412_vm0, %v5410_v17 }
  0x99   : > { %502 = vst.msk [vmem:[#allocation3 + $0xc8] sm:$0xff] %vm412_vm0, %v5410_v17 }
  0x9a   : > { %503 = vst.msk [vmem:[#allocation3 + $0xd0] sm:$0xff] %vm412_vm0, %v5410_v17 }
  0x9b   : > { %504 = vst.msk [vmem:[#allocation3 + $0xd8] sm:$0xff] %vm412_vm0, %v5410_v17 }
  0x9c   : > { %505 = vst.msk [vmem:[#allocation3 + $0xe0] sm:$0xff] %vm412_vm0, %v5410_v17 }
  0x9d   : > { %506 = vst.msk [vmem:[#allocation3 + $0xe8] sm:$0xff] %vm412_vm0, %v5410_v17 }
  0x9e   : > { %507 = vst.msk [vmem:[#allocation3 + $0xf0] sm:$0xff] %vm412_vm0, %v5410_v17 }
  0x9f   : > { %508 = vst.msk [vmem:[#allocation3 + $0xf8] sm:$0xff] %vm412_vm0, %v5410_v17 }
  0xa0   : > { %509 = vst.msk [vmem:[#allocation3 + $0x100] sm:$0xff] %vm412_vm0, %v5410_v17 }
  0xa1   : > { %510 = vst.msk [vmem:[#allocation3 + $0x108] sm:$0xff] %vm412_vm0, %v5410_v17 }
  0xa2   : > { %511 = vst.msk [vmem:[#allocation3 + $0x110] sm:$0xff] %vm412_vm0, %v5410_v17 }
  0xa3   : > { %512 = vst.msk [vmem:[#allocation3 + $0x118] sm:$0xff] %vm412_vm0, %v5410_v17 }
  0xa4   : > { %513 = vst.msk [vmem:[#allocation3 + $0x120] sm:$0xff] %vm412_vm0, %v5410_v17 }
  0xa5   : > { %514 = vst.msk [vmem:[#allocation3 + $0x128] sm:$0xff] %vm412_vm0, %v5410_v17 }
  0xa6   : > { %515 = vst.msk [vmem:[#allocation3 + $0x130] sm:$0xff] %vm412_vm0, %v5410_v17 }
  0xa7   : > { %516 = vst.msk [vmem:[#allocation3 + $0x138] sm:$0xff] %vm412_vm0, %v5410_v17 }
  0xa8   : > { %517 = vst.msk [vmem:[#allocation3 + $0x140] sm:$0xff] %vm412_vm0, %v5410_v17 }
  0xa9   : > { %518 = vst.msk [vmem:[#allocation3 + $0x148] sm:$0xff] %vm412_vm0, %v5410_v17 }
  0xaa   : > { %519 = vst.msk [vmem:[#allocation3 + $0x150] sm:$0xff] %vm412_vm0, %v5410_v17 }
  0xab   : > { %520 = vst.msk [vmem:[#allocation3 + $0x158] sm:$0xff] %vm412_vm0, %v5410_v17 }
  0xac   : > { %521 = vst.msk [vmem:[#allocation3 + $0x160] sm:$0xff] %vm412_vm0, %v5410_v17 }
  0xad   : > { %522 = vst.msk [vmem:[#allocation3 + $0x168] sm:$0xff] %vm412_vm0, %v5410_v17 }
  0xae   : > { %523 = vst.msk [vmem:[#allocation3 + $0x170] sm:$0xff] %vm412_vm0, %v5410_v17 }
  0xaf   : > { %524 = vst.msk [vmem:[#allocation3 + $0x178] sm:$0xff] %vm412_vm0, %v5410_v17 }
  0xb0   : > { %525 = vst.msk [vmem:[#allocation3 + $0x180] sm:$0xff] %vm412_vm0, %v5410_v17 }
  0xb1   : > { %526 = vst.msk [vmem:[#allocation3 + $0x188] sm:$0xff] %vm412_vm0, %v5410_v17 }
  0xb2   : > { %527 = vst.msk [vmem:[#allocation3 + $0x190] sm:$0xff] %vm412_vm0, %v5410_v17 }
  0xb3   : > { %528 = vst.msk [vmem:[#allocation3 + $0x198] sm:$0xff] %vm412_vm0, %v5410_v17 }
  0xb4   : > { %529 = vst.msk [vmem:[#allocation3 + $0x1a0] sm:$0xff] %vm412_vm0, %v5410_v17 }
  0xb5   : > { %530 = vst.msk [vmem:[#allocation3 + $0x1a8] sm:$0xff] %vm412_vm0, %v5410_v17 }
  0xb6   : > { %531 = vst.msk [vmem:[#allocation3 + $0x1b0] sm:$0xff] %vm412_vm0, %v5410_v17 }
  0xb7   : > { %532 = vst.msk [vmem:[#allocation3 + $0x1b8] sm:$0xff] %vm412_vm0, %v5410_v17 }
  0xb8   : > { %533 = vst.msk [vmem:[#allocation3 + $0x1c0] sm:$0xff] %vm412_vm0, %v5410_v17 }
  0xb9   : > { %534 = vst.msk [vmem:[#allocation3 + $0x1c8] sm:$0xff] %vm412_vm0, %v5410_v17 }
  0xba   : > { %535 = vst.msk [vmem:[#allocation3 + $0x1d0] sm:$0xff] %vm412_vm0, %v5410_v17 }
  0xbb   : > { %536 = vst.msk [vmem:[#allocation3 + $0x1d8] sm:$0xff] %vm412_vm0, %v5410_v17 }
  0xbc   : > { %537 = vst.msk [vmem:[#allocation3 + $0x1e0] sm:$0xff] %vm412_vm0, %v5410_v17 }
  0xbd   : > { %538 = vst.msk [vmem:[#allocation3 + $0x1e8] sm:$0xff] %vm412_vm0, %v5410_v17 }
  0xbe   : > { %539 = vst.msk [vmem:[#allocation3 + $0x1f0] sm:$0xff] %vm412_vm0, %v5410_v17 }
  0xbf   : > { %540 = vst.msk [vmem:[#allocation3 + $0x1f8] sm:$0xff] %vm412_vm0, %v5410_v17 }
  0xc0   : > { %542 = vst.msk [vmem:[#allocation4] sm:$0xff] %vm541_vm1, %v5410_v17 }
  0xc1   : > { %543 = vst.msk [vmem:[#allocation4 + $0x8] sm:$0xff] %vm541_vm1, %v5410_v17 }
  0xc2   : > { %544 = vst.msk [vmem:[#allocation4 + $0x10] sm:$0xff] %vm541_vm1, %v5410_v17 }
  0xc3   : > { %545 = vst.msk [vmem:[#allocation4 + $0x18] sm:$0xff] %vm541_vm1, %v5410_v17 }
  0xc4   : > { %546 = vst.msk [vmem:[#allocation4 + $0x20] sm:$0xff] %vm541_vm1, %v5410_v17 }
  0xc5   : > { %547 = vst.msk [vmem:[#allocation4 + $0x28] sm:$0xff] %vm541_vm1, %v5410_v17 }
  0xc6   : > { %548 = vst.msk [vmem:[#allocation4 + $0x30] sm:$0xff] %vm541_vm1, %v5410_v17 }
  0xc7   : > { %549 = vst.msk [vmem:[#allocation4 + $0x38] sm:$0xff] %vm541_vm1, %v5410_v17 }
  0xc8   : > { %550 = vst.msk [vmem:[#allocation4 + $0x40] sm:$0xff] %vm541_vm1, %v5410_v17 }
  0xc9   : > { %551 = vst.msk [vmem:[#allocation4 + $0x48] sm:$0xff] %vm541_vm1, %v5410_v17 }
  0xca   : > { %552 = vst.msk [vmem:[#allocation4 + $0x50] sm:$0xff] %vm541_vm1, %v5410_v17 }
  0xcb   : > { %553 = vst.msk [vmem:[#allocation4 + $0x58] sm:$0xff] %vm541_vm1, %v5410_v17 }
  0xcc   : > { %554 = vst.msk [vmem:[#allocation4 + $0x60] sm:$0xff] %vm541_vm1, %v5410_v17 }
  0xcd   : > { %555 = vst.msk [vmem:[#allocation4 + $0x68] sm:$0xff] %vm541_vm1, %v5410_v17 }
  0xce   : > { %556 = vst.msk [vmem:[#allocation4 + $0x70] sm:$0xff] %vm541_vm1, %v5410_v17 }
  0xcf   : > { %557 = vst.msk [vmem:[#allocation4 + $0x78] sm:$0xff] %vm541_vm1, %v5410_v17 }
  0xd0   : > { %558 = vst.msk [vmem:[#allocation4 + $0x80] sm:$0xff] %vm541_vm1, %v5410_v17 }
  0xd1   : > { %559 = vst.msk [vmem:[#allocation4 + $0x88] sm:$0xff] %vm541_vm1, %v5410_v17 }
  0xd2   : > { %560 = vst.msk [vmem:[#allocation4 + $0x90] sm:$0xff] %vm541_vm1, %v5410_v17 }
  0xd3   : > { %561 = vst.msk [vmem:[#allocation4 + $0x98] sm:$0xff] %vm541_vm1, %v5410_v17 }
  0xd4   : > { %562 = vst.msk [vmem:[#allocation4 + $0xa0] sm:$0xff] %vm541_vm1, %v5410_v17 }
  0xd5   : > { %563 = vst.msk [vmem:[#allocation4 + $0xa8] sm:$0xff] %vm541_vm1, %v5410_v17 }
  0xd6   : > { %564 = vst.msk [vmem:[#allocation4 + $0xb0] sm:$0xff] %vm541_vm1, %v5410_v17 }
  0xd7   : > { %565 = vst.msk [vmem:[#allocation4 + $0xb8] sm:$0xff] %vm541_vm1, %v5410_v17 }
  0xd8   : > { %566 = vst.msk [vmem:[#allocation4 + $0xc0] sm:$0xff] %vm541_vm1, %v5410_v17 }
  0xd9   : > { %567 = vst.msk [vmem:[#allocation4 + $0xc8] sm:$0xff] %vm541_vm1, %v5410_v17 }
  0xda   : > { %568 = vst.msk [vmem:[#allocation4 + $0xd0] sm:$0xff] %vm541_vm1, %v5410_v17 }
  0xdb   : > { %569 = vst.msk [vmem:[#allocation4 + $0xd8] sm:$0xff] %vm541_vm1, %v5410_v17 }
  0xdc   : > { %570 = vst.msk [vmem:[#allocation4 + $0xe0] sm:$0xff] %vm541_vm1, %v5410_v17 }
  0xdd   : > { %571 = vst.msk [vmem:[#allocation4 + $0xe8] sm:$0xff] %vm541_vm1, %v5410_v17 }
  0xde   : > { %572 = vst.msk [vmem:[#allocation4 + $0xf0] sm:$0xff] %vm541_vm1, %v5410_v17 }
  0xdf   : > { %573 = vst.msk [vmem:[#allocation4 + $0xf8] sm:$0xff] %vm541_vm1, %v5410_v17 }
  0xe0   : > { %574 = vst.msk [vmem:[#allocation4 + $0x100] sm:$0xff] %vm541_vm1, %v5410_v17 }
  0xe1   : > { %575 = vst.msk [vmem:[#allocation4 + $0x108] sm:$0xff] %vm541_vm1, %v5410_v17 }
  0xe2   : > { %576 = vst.msk [vmem:[#allocation4 + $0x110] sm:$0xff] %vm541_vm1, %v5410_v17 }
  0xe3   : > { %577 = vst.msk [vmem:[#allocation4 + $0x118] sm:$0xff] %vm541_vm1, %v5410_v17 }
  0xe4   : > { %578 = vst.msk [vmem:[#allocation4 + $0x120] sm:$0xff] %vm541_vm1, %v5410_v17 }
  0xe5   : > { %579 = vst.msk [vmem:[#allocation4 + $0x128] sm:$0xff] %vm541_vm1, %v5410_v17 }
  0xe6   : > { %580 = vst.msk [vmem:[#allocation4 + $0x130] sm:$0xff] %vm541_vm1, %v5410_v17 }
  0xe7   : > { %581 = vst.msk [vmem:[#allocation4 + $0x138] sm:$0xff] %vm541_vm1, %v5410_v17 }
  0xe8   : > { %582 = vst.msk [vmem:[#allocation4 + $0x140] sm:$0xff] %vm541_vm1, %v5410_v17 }
  0xe9   : > { %583 = vst.msk [vmem:[#allocation4 + $0x148] sm:$0xff] %vm541_vm1, %v5410_v17 }
  0xea   : > { %584 = vst.msk [vmem:[#allocation4 + $0x150] sm:$0xff] %vm541_vm1, %v5410_v17 }
  0xeb   : > { %585 = vst.msk [vmem:[#allocation4 + $0x158] sm:$0xff] %vm541_vm1, %v5410_v17 }
  0xec   : > { %586 = vst.msk [vmem:[#allocation4 + $0x160] sm:$0xff] %vm541_vm1, %v5410_v17 }
  0xed   : > { %587 = vst.msk [vmem:[#allocation4 + $0x168] sm:$0xff] %vm541_vm1, %v5410_v17 }
  0xee   : > { %588 = vst.msk [vmem:[#allocation4 + $0x170] sm:$0xff] %vm541_vm1, %v5410_v17 }
  0xef   : > { %589 = vst.msk [vmem:[#allocation4 + $0x178] sm:$0xff] %vm541_vm1, %v5410_v17 }
  0xf0   : > { %590 = vst.msk [vmem:[#allocation4 + $0x180] sm:$0xff] %vm541_vm1, %v5410_v17 }
  0xf1   : > { %591 = vst.msk [vmem:[#allocation4 + $0x188] sm:$0xff] %vm541_vm1, %v5410_v17 }
  0xf2   : > { %592 = vst.msk [vmem:[#allocation4 + $0x190] sm:$0xff] %vm541_vm1, %v5410_v17 }
  0xf3   : > { %593 = vst.msk [vmem:[#allocation4 + $0x198] sm:$0xff] %vm541_vm1, %v5410_v17 }
  0xf4   : > { %594 = vst.msk [vmem:[#allocation4 + $0x1a0] sm:$0xff] %vm541_vm1, %v5410_v17 }
  0xf5   : > { %595 = vst.msk [vmem:[#allocation4 + $0x1a8] sm:$0xff] %vm541_vm1, %v5410_v17 }
  0xf6   : > { %596 = vst.msk [vmem:[#allocation4 + $0x1b0] sm:$0xff] %vm541_vm1, %v5410_v17 }
  0xf7   : > { %597 = vst.msk [vmem:[#allocation4 + $0x1b8] sm:$0xff] %vm541_vm1, %v5410_v17 }
  0xf8   : > { %598 = vst.msk [vmem:[#allocation4 + $0x1c0] sm:$0xff] %vm541_vm1, %v5410_v17 }
  0xf9   : > { %599 = vst.msk [vmem:[#allocation4 + $0x1c8] sm:$0xff] %vm541_vm1, %v5410_v17 }
  0xfa   : > { %600 = vst.msk [vmem:[#allocation4 + $0x1d0] sm:$0xff] %vm541_vm1, %v5410_v17 }
  0xfb   : > { %601 = vst.msk [vmem:[#allocation4 + $0x1d8] sm:$0xff] %vm541_vm1, %v5410_v17 }
  0xfc   : > { %602 = vst.msk [vmem:[#allocation4 + $0x1e0] sm:$0xff] %vm541_vm1, %v5410_v17 }
  0xfd   : > { %603 = vst.msk [vmem:[#allocation4 + $0x1e8] sm:$0xff] %vm541_vm1, %v5410_v17 }
  0xfe   : > { %604 = vst.msk [vmem:[#allocation4 + $0x1f0] sm:$0xff] %vm541_vm1, %v5410_v17 }
  0xff   : > { %605 = vst.msk [vmem:[#allocation4 + $0x1f8] sm:$0xff] %vm541_vm1, %v5410_v17 }
 0x100 PF: > { %v5945_v18 = vld [vmem:[%s5550_s16 + $0x10] sm:$0xff]  ;;  %v5948_v19 = vld [vmem:[%s5550_s16] sm:$0xff]  ;;  %v8370_v20 = vmov 0   ;;  %v5960_v22 = vld [vmem:[%s5550_s16 + $0x18] sm:$0xff]  ;;  %s5414_s27 = smov 96   ;;  %s5416_s28 = smov 64  }
 0x101   : > { %4863 = vset.pattern.permute.xlu1 %v8370_v20  ;;  %4862 = vset.pattern.permute.xlu0 %v8370_v20  ;;  %v5955_v21 = vld [vmem:[%s5550_s16 + $0x20] sm:$0xff]  ;;  %v5963_v23 = vld [vmem:[%s5550_s16 + $0x8] sm:$0xff]  ;;  %v5972_v25 = vld [vmem:[%s5550_s16 + $0x38] sm:$0xff]  ;;  %s5417_s30 = smov 32   ;;  %p4726_p0 = scmp.ne.s32.totalorder %s5391_s20, 1 }
 0x102   : > { %683 = vperm.xlu1 %4863, %v5945_v18   ;;  %673 = vperm.xlu0 %4862, %v5948_v19   ;;  %v5966_v24 = vld [vmem:[%s5550_s16 + $0x28] sm:$0xff]  ;;  %v5975_v26 = vld [vmem:[%s5550_s16 + $0x30] sm:$0xff]  ;;  %v5978_v27 = vld [vmem:[%s5550_s16 + $0x40] sm:$0xff]  ;;  %s5419_s20 = smov (!%p4726_p0), 32   ;;  %s5420_s8 = smov (!%p4726_p0), 64  }
 0x103   : > { %4864 = vset.pattern.permute.xlu2 %v8370_v20  ;;  %v5984_v28 = vld [vmem:[%s5550_s16 + $0x50] sm:$0xff]  ;;  %v5987_v29 = vld [vmem:[%s5550_s16 + $0x48] sm:$0xff]  ;;  %v5990_v30 = vld [vmem:[%s5550_s16 + $0x58] sm:$0xff] }
 0x104   : > { %693 = vperm.xlu2 %4864, %v5955_v21   ;;  %v5996_v31 = vld [vmem:[%s5550_s16 + $0x68] sm:$0xff]  ;;  %v5999_v32 = vld [vmem:[%s5550_s16 + $0x60] sm:$0xff]  ;;  %v6002_v33 = vld [vmem:[%s5550_s16 + $0x70] sm:$0xff] }
 0x105   : > { %v6008_v34 = vld [vmem:[%s5550_s16 + $0x78] sm:$0xff]  ;;  %v6012_v35 = vld [vmem:[%s5545_s13] sm:$0xf]  ;;  %v4786_v38 = vld [vmem:[%s5557_s29 + $0x8] sm:$0xff]  }
 0x106   : > { %v6015_v36 = vperm.slane %v6012_v35, 0  ;;  %v4755_v39 = vld [vmem:[%s5557_s29] sm:$0xff]   ;;  %v6022_v45 = vunpack.c.l.bf16 %v4786_v38  ;;  %v4787_v52 = vld [vmem:[%s5557_s29 + $0x10] sm:$0xff]   ;;  %v4788_v4 = vld [vmem:[%s5557_s29 + $0x18] sm:$0xff]   ;;  %v6055_v11 = vunpack.c.h.bf16 %v4786_v38 }
 0x107   : > { %v6024_v46 = vunpack.c.l.bf16 %v4755_v39  ;;  %v6035_v57 = vunpack.c.l.bf16 %v4787_v52  ;;  %v6039_v62 = vunpack.c.h.bf16 %v4755_v39  ;;  %v6053_v10 = vunpack.c.l.bf16 %v4788_v4 }
 0x108   : > { %8438 = vst [vmem:[#allocation6_spill] sm:$0xff] %v6022_v45  ;;  %v6057_v13 = vunpack.c.h.bf16 %v4788_v4 }
 0x109   : > { %8439 = vst [vmem:[#allocation7_spill] sm:$0xff] %v6024_v46 }
 0x10a   : > { %688 = vperm.xlu1 %4863, %v5960_v22   ;;  %678 = vperm.xlu0 %4862, %v5963_v23   ;;  %8440 = vst [vmem:[#allocation8_spill] sm:$0xff] %v6035_v57 }
 0x10b   : > { %8441 = vst [vmem:[#allocation9_spill] sm:$0xff] %v6039_v62 }
 0x10c   : > { %698 = vperm.xlu2 %4864, %v5966_v24   ;;  %8442 = vst [vmem:[#allocation10_spill] sm:$0xff] %v6053_v10 }
 0x10d   : > { %8443 = vst [vmem:[#allocation11_spill] sm:$0xff] %v6055_v11 }
 0x10e   : > { %8444 = vst [vmem:[#allocation12_spill] sm:$0xff] %v6057_v13 }
 0x112   : > { %708 = vperm.xlu1 %4863, %v5972_v25   ;;  %703 = vperm.xlu0 %4862, %v5975_v26  }
 0x114   : > { %713 = vperm.xlu2 %4864, %v5978_v27  }
 0x11a   : > { %723 = vperm.xlu1 %4863, %v5984_v28   ;;  %718 = vperm.xlu0 %4862, %v5987_v29  }
 0x11c   : > { %728 = vperm.xlu2 %4864, %v5990_v30  }
 0x122   : > { %738 = vperm.xlu1 %4863, %v5996_v31   ;;  %733 = vperm.xlu0 %4862, %v5999_v32  }
 0x124   : > { %743 = vperm.xlu2 %4864, %v6002_v33  }
 0x12a   : > { %748 = vperm.xlu0 %4862, %v6008_v34  }
 0x15e   : > { %v694_v37 = vpop.permute.xlu2 %693 }
 0x15f   : > { %v756_v42 = vadd.f32 %v6015_v36, %v694_v37 }
 0x161   : > { %v788_v49 = vmul.f32 0.2, %v756_v42  ;;  %vm772_vm4 = vcmp.gt.f32.partialorder %v756_v42, 0.0 }
 0x163   : > { %v804_v59 = vsel %vm772_vm4, %v756_v42, %v788_v49  ;;  %v4789_v42 = vld [vmem:[%s5557_s29 + $0x20] sm:$0xff]  }
 0x164   : > { %v6042_v0 = vadd.f32 %v6035_v57, %v804_v59 }
 0x166   : > { %v699_v60 = vpop.permute.xlu2 %698 }
 0x167   : > { %v757_v7 = vadd.f32 %v6015_v36, %v699_v60 }
 0x169   : > { %v789_v17 = vmul.f32 0.2, %v757_v7  ;;  %vm773_vm9 = vcmp.gt.f32.partialorder %v757_v7, 0.0 }
 0x16e   : > { %v714_v16 = vpop.permute.xlu2 %713 }
 0x174   : > { %v684_v40 = vpop.permute.xlu1 %683  ;;  %v674_v41 = vpop.permute.xlu0 %673 }
 0x175   : > { %v754_v43 = vadd.f32 %v6015_v36, %v684_v40  ;;  %v752_v44 = vadd.f32 %v6015_v36, %v674_v41 }
 0x176   : > { %v729_v4 = vpop.permute.xlu2 %728 }
 0x177   : > { %v786_v47 = vmul.f32 0.2, %v754_v43  ;;  %v784_v48 = vmul.f32 0.2, %v752_v44  ;;  %vm770_vm2 = vcmp.gt.f32.partialorder %v754_v43, 0.0  ;;  %vm768_vm3 = vcmp.gt.f32.partialorder %v752_v44, 0.0 }
 0x179   : > { %v802_v50 = vsel %vm770_vm2, %v754_v43, %v786_v47  ;;  %v800_v51 = vsel %vm768_vm3, %v752_v44, %v784_v48  ;;  %v4790_v43 = vld [vmem:[%s5557_s29 + $0x28] sm:$0xff]   ;;  %v6072_v48 = vunpack.c.h.bf16 %v4787_v52  ;;  %vm1152_vm2 = vcmask 7168  }
 0x17a   : > { %v6028_v53 = vadd.f32 %v6022_v45, %v802_v50  ;;  %v6031_v54 = vadd.f32 %v6024_v46, %v800_v51  ;;  %v805_v51 = vsel %vm773_vm9, %v757_v7, %v789_v17  ;;  %v6080_v59 = vunpack.c.l.bf16 %v4790_v43  ;;  %v4791_v7 = vld [vmem:[%s5557_s29 + $0x30] sm:$0xff]  }
 0x17b   : > { %8445 = vst [vmem:[#allocation13_spill] sm:$0xff] %v6072_v48  ;;  %v6100_v17 = vunpack.c.l.bf16 %v4791_v7 }
 0x17c   : > { %v689_v55 = vpop.permute.xlu1 %688  ;;  %v679_v56 = vpop.permute.xlu0 %678  ;;  %852 = vmax.xlane.f32.xlu0 %v6028_v53  ;;  %848 = vmax.xlane.f32.xlu1 %v6031_v54  ;;  %8447 = vst [vmem:[#allocation15_spill] sm:$0xff] %v6080_v59 }
 0x17d   : > { %v753_v58 = vadd.f32 %v6015_v36, %v679_v56  ;;  %v755_v61 = vadd.f32 %v6015_v36, %v689_v55  ;;  %v5412_v55 = vmov 1   ;;  %v760_v56 = vadd.f32 %v6015_v36, %v714_v16  ;;  %8449 = vst [vmem:[#allocation17_spill] sm:$0xff] %v6100_v17 }
 0x17e   : > { %4865 = vset.pattern.permute.xlu0 %v5412_v55  ;;  %4866 = vset.pattern.permute.xlu1 %v5412_v55  ;;  %v763_v16 = vadd.f32 %v6015_v36, %v729_v4  ;;  %v6120_v4 = vunpack.c.h.bf16 %v4790_v43 }
 0x17f   : > { %v785_v63 = vmul.f32 0.2, %v753_v58  ;;  %vm769_vm5 = vcmp.gt.f32.partialorder %v753_v58, 0.0  ;;  %v787_v2 = vmul.f32 0.2, %v755_v61  ;;  %vm771_vm6 = vcmp.gt.f32.partialorder %v755_v61, 0.0  ;;  %4867 = vset.pattern.permute.xlu2 %v5412_v55 }
 0x180   : > { %vm776_vm12 = vcmp.gt.f32.partialorder %v760_v56, 0.0  ;;  %vm779_vm15 = vcmp.gt.f32.partialorder %v763_v16, 0.0  ;;  %8452 = vst [vmem:[#allocation20_spill] sm:$0xff] %v6120_v4 }
 0x181   : > { %v801_v1 = vsel %vm769_vm5, %v753_v58, %v785_v63  ;;  %v803_v12 = vsel %vm771_vm6, %v755_v61, %v787_v2  ;;  %v6078_v58 = vunpack.c.h.bf16 %v4789_v42  ;;  %v6083_v61 = vadd.f32 %v6072_v48, %v805_v51 }
 0x182   : > { %v6045_v3 = vadd.f32 %v6039_v62, %v801_v1  ;;  %v6063_v41 = vadd.f32 %v6055_v11, %v803_v12  ;;  %v792_v2 = vmul.f32 0.2, %v760_v56 }
 0x183   : > { %8446 = vst [vmem:[#allocation14_spill] sm:$0xff] %v6078_v58 }
 0x184   : > { %v709_v5 = vpop.permute.xlu1 %708  ;;  %v704_v6 = vpop.permute.xlu0 %703  ;;  %850 = vmax.xlane.f32.xlu2 %v6045_v3  ;;  %856 = vmax.xlane.f32.xlu1 %v6042_v0 }
 0x185   : > { %v759_v8 = vadd.f32 %v6015_v36, %v709_v5  ;;  %v758_v9 = vadd.f32 %v6015_v36, %v704_v6 }
 0x187   : > { %v791_v14 = vmul.f32 0.2, %v759_v8  ;;  %v790_v15 = vmul.f32 0.2, %v758_v9  ;;  %vm774_vm7 = vcmp.gt.f32.partialorder %v758_v9, 0.0  ;;  %vm775_vm8 = vcmp.gt.f32.partialorder %v759_v8, 0.0 }
 0x189   : > { %v806_v37 = vsel %vm774_vm7, %v758_v9, %v790_v15  ;;  %v807_v39 = vsel %vm775_vm8, %v759_v8, %v791_v14  ;;  %v6097_v15 = vunpack.c.l.bf16 %v4789_v42 }
 0x18a   : > { %v6060_v40 = vadd.f32 %v6053_v10, %v806_v37  ;;  %v6066_v38 = vadd.f32 %v6057_v13, %v807_v39  ;;  %v808_v37 = vsel %vm776_vm12, %v760_v56, %v792_v2  ;;  %v6102_v39 = vunpack.c.h.bf16 %v4791_v7  ;;  %v744_v56 = vpop.permute.xlu2 %743 }
 0x18b   : > { %8448 = vst [vmem:[#allocation16_spill] sm:$0xff] %v6097_v15  ;;  %v6108_v42 = vadd.f32 %v6097_v15, %v808_v37  ;;  %v766_v7 = vadd.f32 %v6015_v36, %v744_v56 }
 0x18c   : > { %v724_v44 = vpop.permute.xlu1 %723  ;;  %v719_v47 = vpop.permute.xlu0 %718  ;;  %860 = vmax.xlane.f32.xlu0 %v6060_v40  ;;  %854 = vmax.xlane.f32.xlu2 %v6063_v41  ;;  %8450 = vst [vmem:[#allocation18_spill] sm:$0xff] %v6102_v39 }
 0x18d   : > { %v762_v49 = vadd.f32 %v6015_v36, %v724_v44  ;;  %v761_v50 = vadd.f32 %v6015_v36, %v719_v47  ;;  %862 = vmax.xlane.f32.xlu1 %v6066_v38  ;;  %vm782_vm1 = vcmp.gt.f32.partialorder %v766_v7, 0.0 }
 0x18f   : > { %v794_v52 = vmul.f32 0.2, %v762_v49  ;;  %v793_v60 = vmul.f32 0.2, %v761_v50  ;;  %vm777_vm10 = vcmp.gt.f32.partialorder %v761_v50, 0.0  ;;  %vm778_vm11 = vcmp.gt.f32.partialorder %v762_v49, 0.0 }
 0x191   : > { %v809_v63 = vsel %vm777_vm10, %v761_v50, %v793_v60  ;;  %v810_v1 = vsel %vm778_vm11, %v762_v49, %v794_v52  ;;  %v795_v52 = vmul.f32 0.2, %v763_v16 }
 0x192   : > { %v6086_v5 = vadd.f32 %v6078_v58, %v809_v63  ;;  %v6089_v6 = vadd.f32 %v6080_v59, %v810_v1  ;;  %v4792_v1 = vld [vmem:[%s5557_s29 + $0x38] sm:$0xff]  }
 0x193   : > { %v6118_v2 = vunpack.c.h.bf16 %v4792_v1  ;;  %v6131_v43 = vunpack.c.l.bf16 %v4792_v1 }
 0x194   : > { %v739_v8 = vpop.permute.xlu1 %738  ;;  %v734_v9 = vpop.permute.xlu0 %733  ;;  %866 = vmax.xlane.f32.xlu0 %v6086_v5  ;;  %858 = vmax.xlane.f32.xlu2 %v6083_v61 }
 0x195   : > { %v765_v12 = vadd.f32 %v6015_v36, %v739_v8  ;;  %v764_v14 = vadd.f32 %v6015_v36, %v734_v9  ;;  %868 = vmax.xlane.f32.xlu1 %v6089_v6  ;;  %8451 = vst [vmem:[#allocation19_spill] sm:$0xff] %v6118_v2  ;;  %v811_v9 = vsel %vm779_vm15, %v763_v16, %v795_v52  ;;  %v6196_v16 = vld [vmem:[#allocation2 + $0x30] sm:$0xff] }
 0x196   : > { %v6127_v37 = vadd.f32 %v6120_v4, %v811_v9  ;;  %8453 = vst [vmem:[#allocation21_spill] sm:$0xff] %v6131_v43 }
 0x197   : > { %v797_v44 = vmul.f32 0.2, %v765_v12  ;;  %v796_v47 = vmul.f32 0.2, %v764_v14  ;;  %vm780_vm13 = vcmp.gt.f32.partialorder %v764_v14, 0.0  ;;  %vm781_vm14 = vcmp.gt.f32.partialorder %v765_v12, 0.0 }
 0x198   : > { %8456 = vst [vmem:[#allocation24_spill] sm:$0xff] %v6196_v16 }
 0x199   : > { %v812_v49 = vsel %vm780_vm13, %v764_v14, %v796_v47  ;;  %v813_v50 = vsel %vm781_vm14, %v765_v12, %v797_v44  ;;  %v798_v44 = vmul.f32 0.2, %v766_v7 }
 0x19a   : > { %v6105_v51 = vadd.f32 %v6100_v17, %v812_v49  ;;  %v6111_v55 = vadd.f32 %v6102_v39, %v813_v50  ;;  %v6198_v49 = vld [vmem:[#allocation2 + $0x18] sm:$0xff] }
 0x19b   : > { %v814_v47 = vsel %vm782_vm1, %v766_v7, %v798_v44  ;;  %v6200_v50 = vld [vmem:[#allocation2 + $0x38] sm:$0xff]  ;;  %v6225_v44 = vld [vmem:[#allocation2 + $0x48] sm:$0xff] }
 0x19c   : > { %v749_v60 = vpop.permute.xlu0 %748  ;;  %872 = vmax.xlane.f32.xlu0 %v6105_v51  ;;  %864 = vmax.xlane.f32.xlu2 %v6108_v42  ;;  %8457 = vst [vmem:[#allocation25_spill] sm:$0xff] %v6200_v50 }
 0x19d   : > { %v767_v63 = vadd.f32 %v6015_v36, %v749_v60  ;;  %874 = vmax.xlane.f32.xlu1 %v6111_v55  ;;  %v6134_v36 = vadd.f32 %v6131_v43, %v814_v47  ;;  %8460 = vst [vmem:[#allocation28_spill] sm:$0xff] %v6225_v44  ;;  %v6227_v47 = vld [vmem:[#allocation2 + $0x28] sm:$0xff] }
 0x19f   : > { %v799_v8 = vmul.f32 0.2, %v767_v63  ;;  %vm783_vm0 = vcmp.gt.f32.partialorder %v767_v63, 0.0 }
 0x1a1   : > { %v815_v12 = vsel %vm783_vm0, %v767_v63, %v799_v8 }
 0x1a2   : > { %v6124_v14 = vadd.f32 %v6118_v2, %v815_v12 }
 0x1a4   : > { %878 = vmax.xlane.f32.xlu0 %v6124_v14  ;;  %870 = vmax.xlane.f32.xlu2 %v6127_v37 }
 0x1ac   : > { %876 = vmax.xlane.f32.xlu2 %v6134_v36 }
 0x1b6   : > { %1440 = vperm.xlu1 %4866, %v5963_v23  }
 0x1b8   : > { %1436 = vperm.xlu0 %4865, %v5948_v19   ;;  %v6158_v19 = vld [vmem:[#allocation2] sm:$0xff] }
 0x1be   : > { %1448 = vperm.xlu1 %4866, %v5960_v22  }
 0x1c0   : > { %1456 = vperm.xlu0 %4865, %v5966_v24  }
 0x1c4   : > { %1444 = vperm.xlu2 %4867, %v5945_v18   ;;  %v6156_v18 = vld [vmem:[#allocation2 + $0x10] sm:$0xff] }
 0x1c6   : > { %1460 = vperm.xlu1 %4866, %v5975_v26  }
 0x1c8   : > { %1468 = vperm.xlu0 %4865, %v5978_v27   ;;  %v6176_v27 = vld [vmem:[#allocation2 + $0x8] sm:$0xff] }
 0x1cc   : > { %1452 = vperm.xlu2 %4867, %v5955_v21  }
 0x1ce   : > { %1472 = vperm.xlu1 %4866, %v5987_v29  }
 0x1d0   : > { %1480 = vperm.xlu0 %4865, %v5990_v30  }
 0x1d4   : > { %1464 = vperm.xlu2 %4867, %v5972_v25  }
 0x1d6   : > { %1484 = vperm.xlu1 %4866, %v5999_v32  }
 0x1d8   : > { %1492 = vperm.xlu0 %4865, %v6002_v33  }
 0x1dc   : > { %1476 = vperm.xlu2 %4867, %v5984_v28   ;;  %v6178_v28 = vld [vmem:[#allocation2 + $0x20] sm:$0xff] }
 0x1dd   : > { %8454 = vst [vmem:[#allocation22_spill] sm:$0xff] %v6178_v28 }
 0x1de   : > { %1496 = vperm.xlu1 %4866, %v6008_v34  }
 0x1e0   : > { %4870 = vset.pattern.permute.xlu0 %v8370_v20 }
 0x1e4   : > { %1488 = vperm.xlu2 %4867, %v5996_v31  }
 0x1e6   : > { %4868 = vset.pattern.permute.xlu1 %v8370_v20 }
 0x1ec   : > { %4869 = vset.pattern.permute.xlu2 %v8370_v20  ;;  %v6259_v20 = vld [vmem:[#allocation2 + $0x68] sm:$0xff] }
 0x1ed   : > { %8465 = vst [vmem:[#allocation33_spill] sm:$0xff] %v6259_v20 }
 0x1ef   : > { %v853_v21 = vpop.xlane.xlu0 %852  ;;  %v849_v22 = vpop.xlane.xlu1 %848 }
 0x1f0   : > { %v6161_v23 = vmax.f32 %v6156_v18, %v853_v21  ;;  %v6164_v24 = vmax.f32 %v6158_v19, %v849_v22  ;;  %v6229_v21 = vld [vmem:[#allocation2 + $0x50] sm:$0xff] }
 0x1f1   : > { %8461 = vst [vmem:[#allocation29_spill] sm:$0xff] %v6229_v21 }
 0x1f2   : > { %1421 = vst.msk [vmem:[#allocation2 + $0x10] sm:$0xff] %vm1152_vm2, %v6161_v23  ;;  %956 = vperm.xlu0 %4870, %v6161_v23   ;;  %946 = vperm.xlu1 %4868, %v6164_v24  }
 0x1f3   : > { %1419 = vst.msk [vmem:[#allocation2] sm:$0xff] %vm1152_vm2, %v6164_v24 }
 0x1f7   : > { %v851_v29 = vpop.xlane.xlu2 %850  ;;  %v857_v30 = vpop.xlane.xlu1 %856 }
 0x1f8   : > { %v6181_v31 = vmax.f32 %v6176_v27, %v851_v29  ;;  %v6184_v32 = vmax.f32 %v6178_v28, %v857_v30 }
 0x1fa   : > { %8455 = vst [vmem:[#allocation23_spill] sm:$0xff] %v6184_v32  ;;  %951 = vperm.xlu2 %4869, %v6181_v31   ;;  %966 = vperm.xlu0 %4870, %v6184_v32  }
 0x1fb   : > { %1420 = vst.msk [vmem:[#allocation2 + $0x8] sm:$0xff] %vm1152_vm2, %v6181_v31 }
 0x1fc   : > { %1423 = vst.msk [vmem:[#allocation2 + $0x20] sm:$0xff] %vm1152_vm2, %v6184_v32 }
 0x1ff   : > { %v861_v52 = vpop.xlane.xlu0 %860  ;;  %v855_v56 = vpop.xlane.xlu2 %854 }
 0x200   : > { %v6203_v60 = vmax.f32 %v6196_v16, %v861_v52  ;;  %v6206_v63 = vmax.f32 %v6198_v49, %v855_v56  ;;  %v863_v1 = vpop.xlane.xlu1 %862 }
 0x201   : > { %v6209_v7 = vmax.f32 %v6200_v50, %v863_v1 }
 0x202   : > { %8458 = vst [vmem:[#allocation26_spill] sm:$0xff] %v6203_v60  ;;  %961 = vperm.xlu1 %4868, %v6206_v63  }
 0x203   : > { %8459 = vst [vmem:[#allocation27_spill] sm:$0xff] %v6209_v7  ;;  %981 = vperm.xlu0 %4870, %v6209_v7  }
 0x204   : > { %1425 = vst.msk [vmem:[#allocation2 + $0x30] sm:$0xff] %vm1152_vm2, %v6203_v60 }
 0x205   : > { %1422 = vst.msk [vmem:[#allocation2 + $0x18] sm:$0xff] %vm1152_vm2, %v6206_v63 }
 0x206   : > { %1426 = vst.msk [vmem:[#allocation2 + $0x38] sm:$0xff] %vm1152_vm2, %v6209_v7 }
 0x207   : > { %v867_v22 = vpop.xlane.xlu0 %866  ;;  %v859_v29 = vpop.xlane.xlu2 %858 }
 0x208   : > { %v6232_v30 = vmax.f32 %v6225_v44, %v867_v22  ;;  %v6235_v52 = vmax.f32 %v6227_v47, %v859_v29  ;;  %v869_v56 = vpop.xlane.xlu1 %868  ;;  %v6255_v29 = vld [vmem:[#allocation2 + $0x60] sm:$0xff] }
 0x209   : > { %v6238_v1 = vmax.f32 %v6229_v21, %v869_v56  ;;  %8464 = vst [vmem:[#allocation32_spill] sm:$0xff] %v6255_v29  ;;  %v6257_v56 = vld [vmem:[#allocation2 + $0x40] sm:$0xff] }
 0x20a   : > { %8462 = vst [vmem:[#allocation30_spill] sm:$0xff] %v6232_v30  ;;  %971 = vperm.xlu2 %4869, %v6235_v52   ;;  %976 = vperm.xlu1 %4868, %v6203_v60  }
 0x20b   : > { %8463 = vst [vmem:[#allocation31_spill] sm:$0xff] %v6238_v1  ;;  %996 = vperm.xlu0 %4870, %v6238_v1  }
 0x20c   : > { %1428 = vst.msk [vmem:[#allocation2 + $0x48] sm:$0xff] %vm1152_vm2, %v6232_v30 }
 0x20d   : > { %1424 = vst.msk [vmem:[#allocation2 + $0x28] sm:$0xff] %vm1152_vm2, %v6235_v52 }
 0x20e   : > { %1429 = vst.msk [vmem:[#allocation2 + $0x50] sm:$0xff] %vm1152_vm2, %v6238_v1 }
 0x20f   : > { %v873_v34 = vpop.xlane.xlu0 %872  ;;  %v865_v8 = vpop.xlane.xlu2 %864 }
 0x210   : > { %v6262_v25 = vmax.f32 %v6255_v29, %v873_v34  ;;  %v6265_v9 = vmax.f32 %v6257_v56, %v865_v8  ;;  %v875_v22 = vpop.xlane.xlu1 %874  ;;  %v6285_v8 = vld [vmem:[#allocation2 + $0x78] sm:$0xff] }
 0x211   : > { %v6268_v12 = vmax.f32 %v6259_v20, %v875_v22  ;;  %8468 = vst [vmem:[#allocation36_spill] sm:$0xff] %v6285_v8  ;;  %v6287_v22 = vld [vmem:[#allocation2 + $0x58] sm:$0xff] }
 0x212   : > { %8466 = vst [vmem:[#allocation34_spill] sm:$0xff] %v6262_v25  ;;  %986 = vperm.xlu2 %4869, %v6265_v9   ;;  %991 = vperm.xlu1 %4868, %v6232_v30   ;;  %v4753_v34 = vld [vmem:[%s5540_s9 + $0x38] sm:$0xff] }
 0x213   : > { %8467 = vst [vmem:[#allocation35_spill] sm:$0xff] %v6268_v12  ;;  %1011 = vperm.xlu0 %4870, %v6268_v12   ;;  %1337 = vmatpush.bf16.msra.mxu0 %v4753_v34  ;;  %v4750_v34 = vld [vmem:[%s5540_s9 + $0x20] sm:$0xff] }
 0x214   : > { %1431 = vst.msk [vmem:[#allocation2 + $0x60] sm:$0xff] %vm1152_vm2, %v6262_v25 }
 0x215   : > { %1427 = vst.msk [vmem:[#allocation2 + $0x40] sm:$0xff] %vm1152_vm2, %v6265_v9 }
 0x216   : > { %1432 = vst.msk [vmem:[#allocation2 + $0x68] sm:$0xff] %vm1152_vm2, %v6268_v12 }
 0x217   : > { %8469 = vst [vmem:[#allocation37_spill] sm:$0xff] %v6287_v22  ;;  %v879_v26 = vpop.xlane.xlu0 %878  ;;  %v871_v33 = vpop.xlane.xlu2 %870 }
 0x218   : > { %v6290_v1 = vmax.f32 %v6285_v8, %v879_v26  ;;  %v6293_v21 = vmax.f32 %v6287_v22, %v871_v33  ;;  %v6305_v26 = vld [vmem:[#allocation2 + $0x70] sm:$0xff]  ;;  %v6317_v8 = vperm.slane %v6012_v35, 1  ;;  %v4751_v35 = vld [vmem:[%s5540_s9 + $0x28] sm:$0xff] }
 0x219   : > { %8472 = vst [vmem:[#allocation40_spill] sm:$0xff] %v6305_v26 }
 0x21a   : > { %8470 = vst [vmem:[#allocation38_spill] sm:$0xff] %v6290_v1  ;;  %1001 = vperm.xlu2 %4869, %v6293_v21   ;;  %1006 = vperm.xlu1 %4868, %v6262_v25  }
 0x21b   : > { %8471 = vst [vmem:[#allocation39_spill] sm:$0xff] %v6293_v21 }
 0x21c   : > { %1434 = vst.msk [vmem:[#allocation2 + $0x78] sm:$0xff] %vm1152_vm2, %v6290_v1 }
 0x21d   : > { %1430 = vst.msk [vmem:[#allocation2 + $0x58] sm:$0xff] %vm1152_vm2, %v6293_v21 }
 0x21f   : > { %v877_v33 = vpop.xlane.xlu2 %876 }
 0x220   : > { %v6308_v20 = vmax.f32 %v6305_v26, %v877_v33 }
 0x222   : > { %8473 = vst [vmem:[#allocation41_spill] sm:$0xff] %v6308_v20  ;;  %1016 = vperm.xlu2 %4869, %v6308_v20   ;;  %1021 = vperm.xlu1 %4868, %v6290_v1   ;;  %v4752_v1 = vld [vmem:[%s5540_s9 + $0x30] sm:$0xff] }
 0x223   : > { %1433 = vst.msk [vmem:[#allocation2 + $0x70] sm:$0xff] %vm1152_vm2, %v6308_v20  ;;  %1338 = vmatpush.bf16.msra.mxu0 %v4752_v1 }
 0x227   : > { %v1445_v12 = vpop.permute.xlu2 %1444  ;;  %1339 = vmatpush.bf16.msra.mxu0 %v4751_v35 }
 0x228   : > { %v1441_v25 = vpop.permute.xlu1 %1440  ;;  %v1502_v32 = vadd.f32 %v6317_v8, %v1445_v12 }
 0x229   : > { %v1501_v33 = vadd.f32 %v6317_v8, %v1441_v25 }
 0x22a   : > { %v1437_v26 = vpop.permute.xlu0 %1436  ;;  %v1534_v1 = vmul.f32 0.2, %v1502_v32  ;;  %vm1518_vm6 = vcmp.gt.f32.partialorder %v1502_v32, 0.0 }
 0x22b   : > { %v1533_v7 = vmul.f32 0.2, %v1501_v33  ;;  %vm1517_vm3 = vcmp.gt.f32.partialorder %v1501_v33, 0.0  ;;  %v1500_v25 = vadd.f32 %v6317_v8, %v1437_v26  ;;  %1340 = vmatpush.bf16.msra.mxu0 %v4750_v34  ;;  %v4749_v26 = vld [vmem:[%s5540_s9 + $0x18] sm:$0xff] }
 0x22d   : > { %v1549_v30 = vsel %vm1517_vm3, %v1501_v33, %v1533_v7  ;;  %vm1516_vm5 = vcmp.gt.f32.partialorder %v1500_v25, 0.0 }
 0x22e   : > { %v6324_v44 = vadd.f32 %v6039_v62, %v1549_v30  ;;  %v1532_v62 = vmul.f32 0.2, %v1500_v25 }
 0x22f   : > { %v1453_v29 = vpop.permute.xlu2 %1452  ;;  %1341 = vmatpush.bf16.msra.mxu0 %v4749_v26 }
 0x230   : > { %v1449_v50 = vpop.permute.xlu1 %1448  ;;  %v1504_v20 = vadd.f32 %v6317_v8, %v1453_v29  ;;  %8474 = vst [vmem:[#allocation42_spill] sm:$0xff] %v6324_v44  ;;  %v1548_v12 = vsel %vm1516_vm5, %v1500_v25, %v1532_v62 }
 0x231   : > { %v6341_v34 = vadd.f32 %v6024_v46, %v1548_v12  ;;  %v4746_v12 = vld [vmem:[%s5540_s9] sm:$0xff] }
 0x232   : > { %v1536_v21 = vmul.f32 0.2, %v1504_v20  ;;  %vm1520_vm4 = vcmp.gt.f32.partialorder %v1504_v20, 0.0  ;;  %v1457_v29 = vpop.permute.xlu0 %1456 }
 0x233   : > { %v1505_v35 = vadd.f32 %v6317_v8, %v1457_v29 }
 0x234   : > { %v1552_v33 = vsel %vm1520_vm4, %v1504_v20, %v1536_v21  ;;  %v1550_v20 = vsel %vm1518_vm6, %v1502_v32, %v1534_v1  ;;  %v1503_v21 = vadd.f32 %v6317_v8, %v1449_v50  ;;  %vm1402_vm4 = vcmask 261120  }
 0x235   : > { %v6333_v28 = vadd.f32 %v6035_v57, %v1552_v33  ;;  %v4748_v57 = vld [vmem:[%s5540_s9 + $0x10] sm:$0xff]  ;;  %v6345_v62 = vadd.f32 %v6022_v45, %v1550_v20  ;;  %v1537_v25 = vmul.f32 0.2, %v1505_v35  ;;  %vm1521_vm8 = vcmp.gt.f32.partialorder %v1505_v35, 0.0 }
 0x236   : > { %1342 = vmatpush.bf16.msra.mxu0 %v4748_v57  ;;  %v1535_v32 = vmul.f32 0.2, %v1503_v21  ;;  %vm1519_vm9 = vcmp.gt.f32.partialorder %v1503_v21, 0.0 }
 0x237   : > { %v1465_v22 = vpop.permute.xlu2 %1464  ;;  %8475 = vst [vmem:[#allocation43_spill] sm:$0xff] %v6333_v28 }
 0x238   : > { %v1507_v7 = vadd.f32 %v6317_v8, %v1465_v22  ;;  %v1461_v30 = vpop.permute.xlu1 %1460  ;;  %v1551_v57 = vsel %vm1519_vm9, %v1503_v21, %v1535_v32 }
 0x239   : > { %v1506_v1 = vadd.f32 %v6317_v8, %v1461_v30 }
 0x23a   : > { %v1539_v60 = vmul.f32 0.2, %v1507_v7  ;;  %vm1523_vm7 = vcmp.gt.f32.partialorder %v1507_v7, 0.0  ;;  %v1469_v16 = vpop.permute.xlu0 %1468 }
 0x23b   : > { %vm1522_vm12 = vcmp.gt.f32.partialorder %v1506_v1, 0.0 }
 0x23c   : > { %v1555_v33 = vsel %vm1523_vm7, %v1507_v7, %v1539_v60  ;;  %v4747_v60 = vld [vmem:[%s5540_s9 + $0x8] sm:$0xff]  ;;  %v1553_v7 = vsel %vm1521_vm8, %v1505_v35, %v1537_v25 }
 0x23d   : > { %1599 = vmax.xlane.f32.xlu0 %v6324_v44  ;;  %1343 = vmatpush.bf16.msra.mxu0 %v4747_v60  ;;  %v6358_v20 = vadd.f32 %v6072_v48, %v1553_v7  ;;  %v1073_v48 = vld [vmem:[#allocation3 + $0x8] sm:$0xff] }
 0x23f   : > { %v1477_v44 = vpop.permute.xlu2 %1476 }
 0x240   : > { %v1510_v22 = vadd.f32 %v6317_v8, %v1477_v44  ;;  %v1473_v29 = vpop.permute.xlu1 %1472  ;;  %v1508_v44 = vadd.f32 %v6317_v8, %v1469_v16  ;;  %v1538_v16 = vmul.f32 0.2, %v1506_v1 }
 0x241   : > { %1344 = vmatpush.bf16.msra.mxu0 %v4746_v12 }
 0x242   : > { %v1542_v50 = vmul.f32 0.2, %v1510_v22  ;;  %vm1526_vm10 = vcmp.gt.f32.partialorder %v1510_v22, 0.0  ;;  %v1481_v35 = vpop.permute.xlu0 %1480  ;;  %vm1524_vm11 = vcmp.gt.f32.partialorder %v1508_v44, 0.0  ;;  %v1554_v25 = vsel %vm1522_vm12, %v1506_v1, %v1538_v16 }
 0x243   : > { %v1511_v32 = vadd.f32 %v6317_v8, %v1481_v35  ;;  %v6377_v60 = vadd.f32 %v6053_v10, %v1554_v25 }
 0x244   : > { %v1558_v26 = vsel %vm1526_vm10, %v1510_v22, %v1542_v50  ;;  %v1509_v22 = vadd.f32 %v6317_v8, %v1473_v29 }
 0x245   : > { %1605 = vmax.xlane.f32.xlu0 %v6333_v28  ;;  %v6348_v28 = vadd.f32 %v6057_v13, %v1555_v33  ;;  %v1540_v33 = vmul.f32 0.2, %v1508_v44  ;;  %v6361_v13 = vadd.f32 %v6055_v11, %v1551_v57  ;;  %v6364_v46 = vadd.f32 %v6080_v59, %v1558_v26 }
 0x246   : > { %v1541_v7 = vmul.f32 0.2, %v1509_v22  ;;  %v1543_v57 = vmul.f32 0.2, %v1511_v32  ;;  %vm1525_vm13 = vcmp.gt.f32.partialorder %v1509_v22, 0.0  ;;  %vm1527_vm14 = vcmp.gt.f32.partialorder %v1511_v32, 0.0 }
 0x247   : > { %v6366_v45 = vpop.permute.xlu2 %1488  ;;  %v1556_v21 = vsel %vm1524_vm11, %v1508_v44, %v1540_v33 }
 0x248   : > { %v1485_v30 = vpop.permute.xlu1 %1484  ;;  %v6374_v50 = vadd.f32 %v6097_v15, %v1556_v21  ;;  %v1557_v1 = vsel %vm1525_vm13, %v1509_v22, %v1541_v7  ;;  %v1559_v33 = vsel %vm1527_vm14, %v1511_v32, %v1543_v57 }
 0x249   : > { %v1512_v44 = vadd.f32 %v6317_v8, %v1485_v30  ;;  %v6387_v16 = vadd.f32 %v6078_v58, %v1557_v1  ;;  %v6391_v25 = vadd.f32 %v6120_v4, %v1559_v33 }
 0x24a   : > { %v6380_v12 = vpop.permute.xlu0 %1492 }
 0x24b   : > { %1597 = vmax.xlane.f32.xlu2 %v6341_v34  ;;  %v1544_v35 = vmul.f32 0.2, %v1512_v44  ;;  %vm1528_vm15 = vcmp.gt.f32.partialorder %v1512_v44, 0.0 }
 0x24c   : > { %1601 = vmax.xlane.f32.xlu1 %v6345_v62 }
 0x24d   : > { %1611 = vmax.xlane.f32.xlu0 %v6348_v28  ;;  %v1560_v57 = vsel %vm1528_vm15, %v1512_v44, %v1544_v35 }
 0x250   : > { %v6383_v29 = vpop.permute.xlu1 %1496 }
 0x253   : > { %1603 = vmax.xlane.f32.xlu2 %v6361_v13 }
 0x254   : > { %1607 = vmax.xlane.f32.xlu1 %v6358_v20  ;;  %v952_v26 = vpop.permute.xlu2 %951 }
 0x255   : > { %1617 = vmax.xlane.f32.xlu0 %v6364_v46  ;;  %v1025_v21 = vsub.f32 %v6045_v3, %v952_v26  ;;  %v6399_v26 = vadd.f32 %v6100_v17, %v1560_v57 }
 0x257   : > { %v1042_v32 = vmul.f32 1.442695, %v1025_v21 }
 0x25b   : > { %1609 = vmax.xlane.f32.xlu2 %v6377_v60 }
 0x25c   : > { %1613 = vmax.xlane.f32.xlu1 %v6374_v50 }
 0x263   : > { %1615 = vmax.xlane.f32.xlu2 %v6387_v16 }
 0x264   : > { %v957_v59 = vpop.permute.xlu0 %956  ;;  %v972_v10 = vpop.permute.xlu2 %971  ;;  %1619 = vmax.xlane.f32.xlu1 %v6391_v25 }
 0x265   : > { %v1026_v30 = vsub.f32 %v6028_v53, %v957_v59  ;;  %v947_v22 = vpop.permute.xlu1 %946  ;;  %v1029_v3 = vsub.f32 %v6083_v61, %v972_v10 }
 0x266   : > { %v1024_v7 = vsub.f32 %v6031_v54, %v947_v22 }
 0x267   : > { %v1044_v1 = vmul.f32 1.442695, %v1026_v30  ;;  %v1050_v53 = vmul.f32 1.442695, %v1029_v3 }
 0x268   : > { %v1040_v58 = vmul.f32 1.442695, %v1024_v7 }
 0x269   : > { %4883 = vpow2.f32 %v1044_v1 }
 0x26a   : > { %4885 = vpow2.f32 %v1042_v32 }
 0x26b   : > { %4887 = vpow2.f32 %v1040_v58  ;;  %1621 = vmax.xlane.f32.xlu2 %v6399_v26 }
 0x26c   : > { %v987_v33 = vpop.permute.xlu2 %986  ;;  %v967_v4 = vpop.permute.xlu0 %966  ;;  %4889 = vpow2.f32 %v1050_v53 }
 0x26d   : > { %v1028_v59 = vsub.f32 %v6042_v0, %v967_v4  ;;  %v1032_v10 = vsub.f32 %v6108_v42, %v987_v33 }
 0x26f   : > { %v4884_v21 = vpop.eup %4883  ;;  %v1048_v44 = vmul.f32 1.442695, %v1028_v59  ;;  %v1056_v22 = vmul.f32 1.442695, %v1032_v10 }
 0x270   : > { %v4886_v54 = vpop.eup %4885  ;;  %1108 = vadd.xlane.f32.xlu1 %v4884_v21 }
 0x271   : > { %v4888_v35 = vpop.eup %4887  ;;  %4891 = vpow2.f32 %v1048_v44 }
 0x272   : > { %1104 = vadd.xlane.f32.xlu0 %v4888_v35  ;;  %v1281_v61 = vpack.c.bf16 %v4886_v54, %v4888_v35  ;;  %v6406_v4 = vpop.eup %4889  ;;  %4893 = vpow2.f32 %v1056_v22 }
 0x273   : > { %1106 = vadd.xlane.f32.xlu2 %v4886_v54 }
 0x274   : > { %1345 = vmatmul.bf16.vlgmr.msra.gmra.mxu0 %v1281_v61  ;;  %v1002_v58 = vpop.permute.xlu2 %1001  ;;  %v962_v30 = vpop.permute.xlu1 %961 }
 0x275   : > { %v982_v32 = vpop.permute.xlu0 %981  ;;  %v1027_v7 = vsub.f32 %v6063_v41, %v962_v30  ;;  %v1035_v42 = vsub.f32 %v6127_v37, %v1002_v58 }
 0x276   : > { %v1031_v0 = vsub.f32 %v6066_v38, %v982_v32 }
 0x277   : > { %v1046_v57 = vmul.f32 1.442695, %v1027_v7  ;;  %v4892_v3 = vpop.eup %4891  ;;  %v1062_v53 = vmul.f32 1.442695, %v1035_v42  ;;  %v1514_v42 = vadd.f32 %v6317_v8, %v6380_v12 }
 0x278   : > { %v1054_v1 = vmul.f32 1.442695, %v1031_v0  ;;  %1114 = vadd.xlane.f32.xlu1 %v6406_v4  ;;  %v6412_v44 = vpop.eup %4893 }
 0x279   : > { %4895 = vpow2.f32 %v1046_v57  ;;  %vm1530_vm0 = vcmp.gt.f32.partialorder %v1514_v42, 0.0 }
 0x27a   : > { %4897 = vpow2.f32 %v1054_v1 }
 0x27b   : > { %1112 = vadd.xlane.f32.xlu2 %v4892_v3  ;;  %4899 = vpow2.f32 %v1062_v53  ;;  %v1515_v53 = vadd.f32 %v6317_v8, %v6383_v29 }
 0x27c   : > { %v977_v33 = vpop.permute.xlu1 %976  ;;  %v1017_v59 = vpop.permute.xlu2 %1016 }
 0x27d   : > { %v997_v54 = vpop.permute.xlu0 %996  ;;  %v1030_v41 = vsub.f32 %v6060_v40, %v977_v33  ;;  %v1038_v10 = vsub.f32 %v6134_v36, %v1017_v59  ;;  %v1547_v12 = vmul.f32 0.2, %v1515_v53  ;;  %vm1531_vm1 = vcmp.gt.f32.partialorder %v1515_v53, 0.0 }
 0x27e   : > { %v1034_v38 = vsub.f32 %v6089_v6, %v997_v54  ;;  %v1546_v54 = vmul.f32 0.2, %v1514_v42 }
 0x27f   : > { %v1052_v35 = vmul.f32 1.442695, %v1030_v41  ;;  %v4896_v37 = vpop.eup %4895  ;;  %v1068_v22 = vmul.f32 1.442695, %v1038_v10 }
 0x280   : > { %v1060_v61 = vmul.f32 1.442695, %v1034_v38  ;;  %1120 = vadd.xlane.f32.xlu1 %v6412_v44  ;;  %v4898_v58 = vpop.eup %4897  ;;  %1110 = vadd.xlane.f32.xlu0 %v4896_v37  ;;  %v1282_v30 = vpack.c.bf16 %v4896_v37, %v4884_v21  ;;  %v1563_v37 = vsel %vm1531_vm1, %v1515_v53, %v1547_v12  ;;  %v6493_v12 = vld [vmem:[#allocation2 + $0xa0] sm:$0xff] }
 0x281   : > { %4901 = vpow2.f32 %v1052_v35  ;;  %v6418_v36 = vpop.eup %4899  ;;  %v1283_v35 = vpack.c.bf16 %v6406_v4, %v4892_v3  ;;  %v6444_v4 = vadd.f32 %v6118_v2, %v1563_v37 }
 0x282   : > { %4903 = vpow2.f32 %v1060_v61 }
 0x283   : > { %1118 = vadd.xlane.f32.xlu2 %v4898_v58  ;;  %4905 = vpow2.f32 %v1068_v22 }
 0x284   : > { %1350 = vmatmul.bf16.gmra.mxu0 %v1282_v30  ;;  %v992_v40 = vpop.permute.xlu1 %991 }
 0x285   : > { %v1012_v6 = vpop.permute.xlu0 %1011  ;;  %v1033_v32 = vsub.f32 %v6086_v5, %v992_v40 }
 0x286   : > { %v1037_v7 = vsub.f32 %v6111_v55, %v1012_v6 }
 0x287   : > { %v1058_v0 = vmul.f32 1.442695, %v1033_v32  ;;  %v4902_v1 = vpop.eup %4901 }
 0x288   : > { %v1066_v57 = vmul.f32 1.442695, %v1037_v7  ;;  %1126 = vadd.xlane.f32.xlu1 %v6418_v36  ;;  %v6421_v21 = vpop.eup %4903  ;;  %1116 = vadd.xlane.f32.xlu0 %v4902_v1  ;;  %v1284_v32 = vpack.c.bf16 %v4898_v58, %v4902_v1  ;;  %v8478_v58 = vsub.f32 %v6227_v47, %v6235_v52  ;;  %v8480_v52 = vsub.f32 %v6156_v18, %v6161_v23  ;;  %v8482_v18 = vld [vmem:[#allocation24_spill] sm:$0xff]  ;;  %v8483_v23 = vld [vmem:[#allocation26_spill] sm:$0xff] }
 0x289   : > { %4907 = vpow2.f32 %v1058_v0  ;;  %v6427_v33 = vpop.eup %4905  ;;  %v8476_v0 = vsub.f32 %v6176_v27, %v6181_v31  ;;  %v8479_v27 = vsub.f32 %v6198_v49, %v6206_v63  ;;  %v8481_v49 = vsub.f32 %v6257_v56, %v6265_v9  ;;  %v8485_v9 = vld [vmem:[#allocation22_spill] sm:$0xff]  ;;  %v8486_v56 = vld [vmem:[#allocation23_spill] sm:$0xff] }
 0x28a   : > { %4909 = vpow2.f32 %v1066_v57  ;;  %v922_v1 = vmul.f32 1.442695, %v8478_v58  ;;  %v8487_v37 = vsub.f32 %v8485_v9, %v8486_v56  ;;  %v1286_v9 = vpack.c.bf16 %v6418_v36, %v6421_v21  ;;  %v8494_v56 = vld [vmem:[#allocation25_spill] sm:$0xff]  ;;  %v8497_v36 = vld [vmem:[#allocation40_spill] sm:$0xff] }
 0x28b   : > { %1124 = vadd.xlane.f32.xlu2 %v6421_v21  ;;  %v914_v57 = vmul.f32 1.442695, %v8476_v0  ;;  %v928_v63 = vmul.f32 1.442695, %v8481_v49  ;;  %v8488_v0 = vld [vmem:[#allocation37_spill] sm:$0xff] }
 0x28c   : > { %v1007_v5 = vpop.permute.xlu1 %1006  ;;  %v8498_v21 = vld [vmem:[#allocation41_spill] sm:$0xff] }
 0x28d   : > { %v1036_v55 = vsub.f32 %v6105_v51, %v1007_v5  ;;  %v1562_v51 = vsel %vm1530_vm0, %v1514_v42, %v1546_v54  ;;  %v8477_v42 = vsub.f32 %v6158_v19, %v6164_v24  ;;  %v6468_v5 = vld [vmem:[#allocation2 + $0x88] sm:$0xff]  ;;  %v918_v19 = vmul.f32 1.442695, %v8479_v27 }
 0x28e   : > { %v6438_v61 = vadd.f32 %v6131_v43, %v1562_v51  ;;  %v916_v54 = vmul.f32 1.442695, %v8480_v52  ;;  %v8492_v52 = vld [vmem:[#allocation30_spill] sm:$0xff]  ;;  %v6645_v43 = vld [vmem:[#allocation2 + $0xd8] sm:$0xff] }
 0x28f   : > { %v4908_v59 = vpop.eup %4907  ;;  %v1064_v41 = vmul.f32 1.442695, %v1036_v55  ;;  %8516 = vst [vmem:[#allocation37_spill] sm:$0xff] %v6645_v43 }
 0x290   : > { %1132 = vadd.xlane.f32.xlu1 %v6427_v33  ;;  %v6432_v38 = vpop.eup %4909  ;;  %1122 = vadd.xlane.f32.xlu0 %v4908_v59  ;;  %v1285_v47 = vpack.c.bf16 %v4908_v59, %v6412_v44  ;;  %v8484_v59 = vsub.f32 %v8482_v18, %v8483_v23 }
 0x291   : > { %4911 = vpow2.f32 %v1064_v41  ;;  %v8510_v41 = vld [vmem:[#allocation38_spill] sm:$0xff] }
 0x293   : > { %1130 = vadd.xlane.f32.xlu2 %v6432_v38 }
 0x294   : > { %1355 = vmatmul.bf16.gmra.mxu0 %v1283_v35  ;;  %v1022_v10 = vpop.permute.xlu1 %1021  ;;  %v924_v35 = vmul.f32 1.442695, %v8484_v59 }
 0x295   : > { %v1039_v29 = vsub.f32 %v6124_v14, %v1022_v10  ;;  %v1513_v14 = vadd.f32 %v6317_v8, %v6366_v45  ;;  %v912_v45 = vmul.f32 1.442695, %v8477_v42 }
 0x297   : > { %v6440_v30 = vpop.eup %4911  ;;  %v1070_v22 = vmul.f32 1.442695, %v1039_v29  ;;  %v1545_v6 = vmul.f32 0.2, %v1513_v14  ;;  %vm1529_vm3 = vcmp.gt.f32.partialorder %v1513_v14, 0.0 }
 0x298   : > { %1625 = vmax.xlane.f32.xlu1 %v6438_v61  ;;  %1128 = vadd.xlane.f32.xlu0 %v6440_v30 }
 0x299   : > { %4913 = vpow2.f32 %v1070_v22  ;;  %v1561_v7 = vsel %vm1529_vm3, %v1513_v14, %v1545_v6  ;;  %v920_v22 = vmul.f32 1.442695, %v8487_v37  ;;  %v6514_v6 = vld [vmem:[#allocation2 + $0x80] sm:$0xff]  ;;  %v8495_v37 = vld [vmem:[#allocation27_spill] sm:$0xff] }
 0x29a   : > { %v6462_v8 = vadd.f32 %v6102_v39, %v1561_v7  ;;  %4915 = vpow2.f32 %v914_v57  ;;  %v6518_v7 = vld [vmem:[#allocation2 + $0x90] sm:$0xff]  ;;  %v8489_v57 = vld [vmem:[#allocation39_spill] sm:$0xff] }
 0x29b   : > { %1627 = vmax.xlane.f32.xlu2 %v6444_v4  ;;  %4917 = vpow2.f32 %v912_v45  ;;  %v8490_v42 = vsub.f32 %v8488_v0, %v8489_v57  ;;  %v6641_v39 = vld [vmem:[#allocation2 + $0xc8] sm:$0xff] }
 0x29c   : > { %4919 = vpow2.f32 %v922_v1  ;;  %v6524_v1 = vld [vmem:[#allocation2 + $0xb8] sm:$0xff]  ;;  %8515 = vst [vmem:[#allocation23_spill] sm:$0xff] %v6641_v39 }
 0x29d   : > { %4921 = vpow2.f32 %v918_v19  ;;  %v934_v45 = vmul.f32 1.442695, %v8490_v42  ;;  %v6561_v42 = vld [vmem:[#allocation2 + $0x98] sm:$0xff] }
 0x29e   : > { %4923 = vpow2.f32 %v916_v54 }
 0x29f   : > { %v6450_v3 = vpop.eup %4913  ;;  %4925 = vpow2.f32 %v928_v63 }
 0x2a0   : > { %1134 = vadd.xlane.f32.xlu0 %v6450_v3  ;;  %v6470_v55 = vpop.eup %4915  ;;  %4927 = vpow2.f32 %v924_v35 }
 0x2a1   : > { %v6479_v53 = vpop.eup %4917  ;;  %4929 = vpow2.f32 %v920_v22  ;;  %v8496_v22 = vsub.f32 %v8494_v56, %v8495_v37  ;;  %v8501_v56 = vld [vmem:[#allocation32_spill] sm:$0xff]  ;;  %v8502_v37 = vld [vmem:[#allocation34_spill] sm:$0xff] }
 0x2a2   : > { %v6495_v44 = vpop.eup %4919  ;;  %4931 = vpow2.f32 %v934_v45 }
 0x2a3   : > { %v6504_v29 = vpop.eup %4921  ;;  %v926_v0 = vmul.f32 1.442695, %v8496_v22  ;;  %v8503_v22 = vsub.f32 %v8501_v56, %v8502_v37  ;;  %v8505_v56 = vld [vmem:[#allocation31_spill] sm:$0xff] }
 0x2a4   : > { %1360 = vmatmul.bf16.gmra.mxu0 %v1284_v32  ;;  %v6516_v32 = vpop.eup %4923 }
 0x2a5   : > { %v936_v57 = vmul.f32 1.442695, %v8503_v22 }
 0x2a8   : > { %1623 = vmax.xlane.f32.xlu0 %v6462_v8 }
 0x2b0   : > { %v1600_v24 = vpop.xlane.xlu0 %1599 }
 0x2b1   : > { %1192 = vperm.xlu1 %4868, %v6470_v55   ;;  %v6477_v31 = vmax.f32 %v6468_v5, %v1600_v24  ;;  %v6529_v24 = vpop.eup %4925 }
 0x2b2   : > { %v6545_v35 = vpop.eup %4927 }
 0x2b3   : > { %2145 = vst.msk [vmem:[#allocation2 + $0x88] sm:$0xff] %vm1152_vm2, %v6477_v31  ;;  %1187 = vperm.xlu2 %4869, %v6479_v53   ;;  %v6563_v45 = vpop.eup %4929 }
 0x2b4   : > { %1365 = vmatmul.bf16.gmra.mxu0 %v1285_v47  ;;  %v8491_v47 = vld [vmem:[#allocation28_spill] sm:$0xff] }
 0x2b5   : > { %v8493_v54 = vsub.f32 %v8491_v47, %v8492_v52 }
 0x2b7   : > { %v930_v49 = vmul.f32 1.442695, %v8493_v54  ;;  %v6571_v54 = vld [vmem:[#allocation2 + $0xd0] sm:$0xff] }
 0x2b8   : > { %v1606_v51 = vpop.xlane.xlu0 %1605  ;;  %8500 = vst [vmem:[#allocation24_spill] sm:$0xff] %v6571_v54 }
 0x2b9   : > { %1212 = vperm.xlu1 %4868, %v6495_v44   ;;  %v6502_v10 = vmax.f32 %v6493_v12, %v1606_v51  ;;  %4933 = vpow2.f32 %v930_v49 }
 0x2ba   : > { %4935 = vpow2.f32 %v926_v0 }
 0x2bb   : > { %2148 = vst.msk [vmem:[#allocation2 + $0xa0] sm:$0xff] %vm1152_vm2, %v6502_v10  ;;  %1202 = vperm.xlu2 %4869, %v6504_v29  }
 0x2bc   : > { %1197 = vperm.xlu0 %4870, %v6516_v32  }
 0x2be   : > { %v1598_v58 = vpop.xlane.xlu2 %1597 }
 0x2bf   : > { %v6527_v27 = vmax.f32 %v6514_v6, %v1598_v58  ;;  %v1602_v19 = vpop.xlane.xlu1 %1601  ;;  %v6565_v58 = vld [vmem:[#allocation2 + $0xa8] sm:$0xff] }
 0x2c0   : > { %v6535_v63 = vmax.f32 %v6518_v7, %v1602_v19  ;;  %v1612_v18 = vpop.xlane.xlu0 %1611  ;;  %v8499_v19 = vsub.f32 %v8497_v36, %v8498_v21  ;;  %v8509_v21 = vld [vmem:[#allocation36_spill] sm:$0xff] }
 0x2c1   : > { %2144 = vst.msk [vmem:[#allocation2 + $0x80] sm:$0xff] %vm1152_vm2, %v6527_v27  ;;  %1227 = vperm.xlu1 %4868, %v6529_v24   ;;  %v6543_v59 = vmax.f32 %v6524_v1, %v1612_v18  ;;  %v8511_v51 = vsub.f32 %v8509_v21, %v8510_v41  ;;  %v1287_v41 = vpack.c.bf16 %v6432_v38, %v6440_v30  ;;  %v8513_v21 = vld [vmem:[#allocation35_spill] sm:$0xff] }
 0x2c2   : > { %2146 = vst.msk [vmem:[#allocation2 + $0x90] sm:$0xff] %vm1152_vm2, %v6535_v63  ;;  %v940_v47 = vmul.f32 1.442695, %v8499_v19 }
 0x2c3   : > { %2151 = vst.msk [vmem:[#allocation2 + $0xb8] sm:$0xff] %vm1152_vm2, %v6543_v59  ;;  %1217 = vperm.xlu2 %4869, %v6545_v35  }
 0x2c4   : > { %1370 = vmatmul.bf16.gmra.mxu0 %v1286_v9  ;;  %1207 = vperm.xlu0 %4870, %v6563_v45   ;;  %v6576_v9 = vpop.eup %4931  ;;  %4937 = vpow2.f32 %v940_v47  ;;  %v6606_v47 = vld [vmem:[#allocation2 + $0xb0] sm:$0xff] }
 0x2c5   : > { %v6592_v19 = vpop.eup %4933  ;;  %4939 = vpow2.f32 %v936_v57  ;;  %8507 = vst [vmem:[#allocation26_spill] sm:$0xff] %v6606_v47  ;;  %v942_v57 = vmul.f32 1.442695, %v8511_v51  ;;  %v8512_v51 = vld [vmem:[#allocation33_spill] sm:$0xff] }
 0x2c6   : > { %v1604_v52 = vpop.xlane.xlu2 %1603 }
 0x2c7   : > { %v6574_v18 = vmax.f32 %v6561_v42, %v1604_v52  ;;  %v1608_v49 = vpop.xlane.xlu1 %1607  ;;  %v6610_v52 = vld [vmem:[#allocation2 + $0xc0] sm:$0xff] }
 0x2c8   : > { %v6582_v23 = vmax.f32 %v6565_v58, %v1608_v49  ;;  %v1618_v36 = vpop.xlane.xlu0 %1617  ;;  %v8504_v49 = vld [vmem:[#allocation29_spill] sm:$0xff]  ;;  %8508 = vst [vmem:[#allocation22_spill] sm:$0xff] %v6610_v52 }
 0x2c9   : > { %2147 = vst.msk [vmem:[#allocation2 + $0x98] sm:$0xff] %vm1152_vm2, %v6574_v18  ;;  %1242 = vperm.xlu1 %4868, %v6576_v9   ;;  %v6590_v0 = vmax.f32 %v6571_v54, %v1618_v36  ;;  %v8506_v37 = vsub.f32 %v8504_v49, %v8505_v56  ;;  %v6608_v36 = vpop.eup %4935 }
 0x2ca   : > { %2149 = vst.msk [vmem:[#allocation2 + $0xa8] sm:$0xff] %vm1152_vm2, %v6582_v23 }
 0x2cb   : > { %v932_v22 = vmul.f32 1.442695, %v8506_v37  ;;  %2154 = vst.msk [vmem:[#allocation2 + $0xd0] sm:$0xff] %vm1152_vm2, %v6590_v0  ;;  %1232 = vperm.xlu2 %4869, %v6592_v19   ;;  %v6616_v37 = vpop.eup %4937 }
 0x2cc   : > { %1222 = vperm.xlu0 %4870, %v6608_v36  }
 0x2cd   : > { %4941 = vpow2.f32 %v932_v22 }
 0x2ce   : > { %v1610_v14 = vpop.xlane.xlu2 %1609  ;;  %4943 = vpow2.f32 %v942_v57  ;;  %v1074_v57 = vld [vmem:[#allocation3 + $0x10] sm:$0xff] }
 0x2cf   : > { %v6614_v49 = vmax.f32 %v6606_v47, %v1610_v14  ;;  %v1614_v56 = vpop.xlane.xlu1 %1613  ;;  %v6629_v14 = vpop.eup %4939  ;;  %v1090_v11 = vmul.f32 %v6516_v32, %v1074_v57 }
 0x2d0   : > { %v6622_v40 = vmax.f32 %v6610_v52, %v1614_v56  ;;  %v8514_v56 = vsub.f32 %v8512_v51, %v8513_v21  ;;  %v1077_v52 = vld [vmem:[#allocation3 + $0x28] sm:$0xff] }
 0x2d1   : > { %2150 = vst.msk [vmem:[#allocation2 + $0xb0] sm:$0xff] %vm1152_vm2, %v6614_v49  ;;  %1257 = vperm.xlu1 %4868, %v6616_v37  }
 0x2d2   : > { %2152 = vst.msk [vmem:[#allocation2 + $0xc0] sm:$0xff] %vm1152_vm2, %v6622_v40  ;;  %v938_v2 = vmul.f32 1.442695, %v8514_v56 }
 0x2d3   : > { %1247 = vperm.xlu2 %4869, %v6629_v14   ;;  %v6643_v17 = vpop.eup %4941 }
 0x2d4   : > { %1375 = vmatmul.bf16.gmra.mxu0 %v1287_v41  ;;  %1237 = vperm.xlu0 %4870, %v6643_v17   ;;  %4945 = vpow2.f32 %v938_v2  ;;  %v6659_v41 = vpop.eup %4943  ;;  %v1072_v2 = vld [vmem:[#allocation3] sm:$0xff] }
 0x2d6   : > { %v1616_v22 = vpop.xlane.xlu2 %1615 }
 0x2d7   : > { %v6649_v38 = vmax.f32 %v6641_v39, %v1616_v22  ;;  %v1620_v30 = vpop.xlane.xlu1 %1619  ;;  %v6666_v22 = vld [vmem:[#allocation2 + $0xe0] sm:$0xff] }
 0x2d8   : > { %v6652_v51 = vmax.f32 %v6645_v43, %v1620_v30  ;;  %8517 = vst [vmem:[#allocation39_spill] sm:$0xff] %v6666_v22  ;;  %v1088_v43 = vmul.f32 %v6479_v53, %v1072_v2 }
 0x2d9   : > { %2153 = vst.msk [vmem:[#allocation2 + $0xc8] sm:$0xff] %vm1152_vm2, %v6649_v38  ;;  %1700 = vperm.xlu1 %4868, %v6477_v31  }
 0x2da   : > { %2155 = vst.msk [vmem:[#allocation2 + $0xd8] sm:$0xff] %vm1152_vm2, %v6652_v51  ;;  %v6668_v21 = vpop.eup %4945 }
 0x2db   : > { %1262 = vperm.xlu2 %4869, %v6659_v41  }
 0x2dc   : > { %1252 = vperm.xlu0 %4870, %v6668_v21  }
 0x2de   : > { %v1622_v56 = vpop.xlane.xlu2 %1621 }
 0x2df   : > { %v6672_v30 = vmax.f32 %v6666_v22, %v1622_v56  ;;  %v8518_v56 = vpack.c.bf16 %v6450_v3, %v6427_v33  ;;  %v1089_v22 = vmul.f32 %v6470_v55, %v1073_v48  ;;  %v1093_v33 = vmul.f32 %v6495_v44, %v1077_v52  ;;  %v1080_v55 = vld [vmem:[#allocation3 + $0x40] sm:$0xff]  ;;  %v1075_v44 = vld [vmem:[#allocation3 + $0x18] sm:$0xff] }
 0x2e0   : > { %v1079_v52 = vld [vmem:[#allocation3 + $0x38] sm:$0xff] }
 0x2e1   : > { %2156 = vst.msk [vmem:[#allocation2 + $0xe0] sm:$0xff] %vm1152_vm2, %v6672_v30  ;;  %1710 = vperm.xlu1 %4868, %v6574_v18  }
 0x2e3   : > { %1705 = vperm.xlu2 %4869, %v6535_v63   ;;  %v1109_v39 = vpop.xlane.xlu1 %1108 }
 0x2e4   : > { %1380 = vmatmul.bf16.gmra.mxu0 %v8518_v56  ;;  %v1138_v47 = vadd.f32 %v1109_v39, %v1090_v11  ;;  %1695 = vperm.xlu0 %4870, %v6527_v27   ;;  %v1076_v11 = vld [vmem:[#allocation3 + $0x20] sm:$0xff]  ;;  %v1095_v56 = vmul.f32 %v6608_v36, %v1079_v52  ;;  %v1082_v36 = vld [vmem:[#allocation3 + $0x50] sm:$0xff] }
 0x2e5   : > { %v1105_v15 = vpop.xlane.xlu0 %1104  ;;  %v1092_v39 = vmul.f32 %v6563_v45, %v1076_v11  ;;  %v1083_v11 = vld [vmem:[#allocation3 + $0x58] sm:$0xff] }
 0x2e6   : > { %v1136_v54 = vadd.f32 %v1105_v15, %v1088_v43  ;;  %1155 = vst.msk [vmem:[#allocation3 + $0x10] sm:$0xff] %vm1152_vm2, %v1138_v47  ;;  %v1107_v32 = vpop.xlane.xlu2 %1106  ;;  %v1091_v47 = vmul.f32 %v6504_v29, %v1075_v44  ;;  %v1078_v29 = vld [vmem:[#allocation3 + $0x30] sm:$0xff] }
 0x2e7   : > { %v1137_v57 = vadd.f32 %v1107_v32, %v1089_v22 }
 0x2e8   : > { %1153 = vst.msk [vmem:[#allocation3] sm:$0xff] %vm1152_vm2, %v1136_v54  ;;  %v1096_v54 = vmul.f32 %v6529_v24, %v1080_v55  ;;  %v1098_v55 = vmul.f32 %v6643_v17, %v1082_v36  ;;  %v6727_v36 = vld [vmem:[#allocation2 + $0xf0] sm:$0xff] }
 0x2e9   : > { %1154 = vst.msk [vmem:[#allocation3 + $0x8] sm:$0xff] %vm1152_vm2, %v1137_v57  ;;  %1720 = vperm.xlu1 %4868, %v6582_v23  }
 0x2eb   : > { %1715 = vperm.xlu2 %4869, %v6502_v10   ;;  %v1115_v48 = vpop.xlane.xlu1 %1114 }
 0x2ec   : > { %v1141_v15 = vadd.f32 %v1115_v48, %v1093_v33  ;;  %1730 = vperm.xlu0 %4870, %v6543_v59   ;;  %v1099_v48 = vmul.f32 %v6576_v9, %v1083_v11 }
 0x2ee   : > { %1158 = vst.msk [vmem:[#allocation3 + $0x28] sm:$0xff] %vm1152_vm2, %v1141_v15  ;;  %v1113_v43 = vpop.xlane.xlu2 %1112 }
 0x2ef   : > { %v1140_v3 = vadd.f32 %v1113_v43, %v1092_v39  ;;  %v1094_v39 = vmul.f32 %v6545_v35, %v1078_v29  ;;  %v1085_v35 = vld [vmem:[#allocation3 + $0x68] sm:$0xff] }
 0x2f1   : > { %1157 = vst.msk [vmem:[#allocation3 + $0x20] sm:$0xff] %vm1152_vm2, %v1140_v3  ;;  %v6697_v53 = vpop.f32.mrf.mxu0  ;;  %1735 = vperm.xlu1 %4868, %v6622_v40  }
 0x2f3   : > { %1725 = vperm.xlu2 %4869, %v6614_v49   ;;  %v1121_v45 = vpop.xlane.xlu1 %1120  ;;  %v1111_v22 = vpop.xlane.xlu0 %1110 }
 0x2f4   : > { %v1144_v2 = vadd.f32 %v1121_v45, %v1096_v54  ;;  %v1139_v32 = vadd.f32 %v1111_v22, %v1091_v47  ;;  %1745 = vperm.xlu0 %4870, %v6590_v0   ;;  %v1086_v45 = vld [vmem:[#allocation3 + $0x70] sm:$0xff]  ;;  %v1081_v47 = vld [vmem:[#allocation3 + $0x48] sm:$0xff] }
 0x2f5   : > { %v1097_v17 = vmul.f32 %v6592_v19, %v1081_v47 }
 0x2f6   : > { %1161 = vst.msk [vmem:[#allocation3 + $0x40] sm:$0xff] %vm1152_vm2, %v1144_v2  ;;  %v1119_v57 = vpop.xlane.xlu2 %1118  ;;  %v1102_v2 = vmul.f32 %v6616_v37, %v1086_v45  ;;  %v1087_v45 = vld [vmem:[#allocation3 + $0x78] sm:$0xff] }
 0x2f7   : > { %v1143_v33 = vadd.f32 %v1119_v57, %v1095_v56  ;;  %1156 = vst.msk [vmem:[#allocation3 + $0x18] sm:$0xff] %vm1152_vm2, %v1139_v32  ;;  %v1101_v57 = vmul.f32 %v6668_v21, %v1085_v35  ;;  %v6733_v21 = vld [vmem:[#allocation2 + $0xf8] sm:$0xff]  ;;  %v1103_v47 = vmul.f32 %v6659_v41, %v1087_v45 }
 0x2f9   : > { %1160 = vst.msk [vmem:[#allocation3 + $0x38] sm:$0xff] %vm1152_vm2, %v1143_v33  ;;  %v6708_v24 = vpop.f32.mrf.mxu0  ;;  %1750 = vperm.xlu1 %4868, %v6652_v51  }
 0x2fb   : > { %1740 = vperm.xlu2 %4869, %v6649_v38   ;;  %v1127_v15 = vpop.xlane.xlu1 %1126  ;;  %v1117_v3 = vpop.xlane.xlu0 %1116 }
 0x2fc   : > { %v1147_v43 = vadd.f32 %v1127_v15, %v1099_v48  ;;  %v1142_v44 = vadd.f32 %v1117_v3, %v1094_v39  ;;  %v1084_v48 = vld [vmem:[#allocation3 + $0x60] sm:$0xff] }
 0x2fd   : > { %v1100_v19 = vmul.f32 %v6629_v14, %v1084_v48  ;;  %v8520_v14 = vld [vmem:[#allocation43_spill] sm:$0xff] }
 0x2fe   : > { %1164 = vst.msk [vmem:[#allocation3 + $0x58] sm:$0xff] %vm1152_vm2, %v1147_v43  ;;  %v1125_v54 = vpop.xlane.xlu2 %1124 }
 0x2ff   : > { %v1146_v52 = vadd.f32 %v1125_v54, %v1098_v55  ;;  %1159 = vst.msk [vmem:[#allocation3 + $0x30] sm:$0xff] %vm1152_vm2, %v1142_v44 }
 0x301   : > { %1163 = vst.msk [vmem:[#allocation3 + $0x50] sm:$0xff] %vm1152_vm2, %v1146_v52  ;;  %v6718_v9 = vpop.f32.mrf.mxu0 }
 0x303   : > { %1755 = vperm.xlu2 %4869, %v6672_v30   ;;  %v1133_v22 = vpop.xlane.xlu1 %1132  ;;  %v1123_v32 = vpop.xlane.xlu0 %1122 }
 0x304   : > { %v1150_v56 = vadd.f32 %v1133_v22, %v1102_v2  ;;  %v1145_v33 = vadd.f32 %v1123_v32, %v1097_v17  ;;  %v1169_v2 = vld [vmem:[#allocation4] sm:$0xff] }
 0x306   : > { %1167 = vst.msk [vmem:[#allocation3 + $0x70] sm:$0xff] %vm1152_vm2, %v1150_v56  ;;  %v1131_v11 = vpop.xlane.xlu2 %1130 }
 0x307   : > { %v1149_v29 = vadd.f32 %v1131_v11, %v1101_v57  ;;  %1162 = vst.msk [vmem:[#allocation3 + $0x48] sm:$0xff] %vm1152_vm2, %v1145_v33  ;;  %v6753_v33 = vld [vmem:[#allocation2 + $0xe8] sm:$0xff]  ;;  %v1172_v11 = vld [vmem:[#allocation4 + $0x18] sm:$0xff] }
 0x309   : > { %1166 = vst.msk [vmem:[#allocation3 + $0x68] sm:$0xff] %vm1152_vm2, %v1149_v29  ;;  %v1353_v37 = vpop.f32.mrf.mxu0 }
 0x30b   : > { %v1626_v15 = vpop.xlane.xlu1 %1625  ;;  %v1129_v43 = vpop.xlane.xlu0 %1128 }
 0x30c   : > { %v6731_v39 = vmax.f32 %v6727_v36, %v1626_v15  ;;  %v1148_v3 = vadd.f32 %v1129_v43, %v1100_v19 }
 0x30e   : > { %v1659_v55 = vsub.f32 %v6727_v36, %v6731_v39  ;;  %2158 = vst.msk [vmem:[#allocation2 + $0xf0] sm:$0xff] %vm1152_vm2, %v6731_v39  ;;  %v1628_v44 = vpop.xlane.xlu2 %1627  ;;  %1765 = vperm.xlu1 %4868, %v6731_v39  }
 0x30f   : > { %v6741_v54 = vmax.f32 %v6733_v21, %v1628_v44  ;;  %1165 = vst.msk [vmem:[#allocation3 + $0x60] sm:$0xff] %vm1152_vm2, %v1148_v3  ;;  %v1170_v3 = vld [vmem:[#allocation4 + $0x8] sm:$0xff] }
 0x311   : > { %2159 = vst.msk [vmem:[#allocation2 + $0xf8] sm:$0xff] %vm1152_vm2, %v6741_v54  ;;  %v1356_v52 = vpop.f32.mrf.mxu0  ;;  %1770 = vperm.xlu2 %4869, %v6741_v54  }
 0x313   : > { %v1135_v35 = vpop.xlane.xlu0 %1134 }
 0x314   : > { %v1151_v22 = vadd.f32 %v1135_v35, %v1103_v47  ;;  %v1175_v47 = vld [vmem:[#allocation4 + $0x30] sm:$0xff] }
 0x316   : > { %v1188_v17 = vpop.permute.xlu2 %1187  ;;  %1168 = vst.msk [vmem:[#allocation3 + $0x78] sm:$0xff] %vm1152_vm2, %v1151_v22 }
 0x317   : > { %v1265_v56 = vmul.f32 %v1188_v17, %v1169_v2 }
 0x319   : > { %v1386_v32 = vadd.f32 %v6697_v53, %v1265_v56  ;;  %v1358_v57 = vpop.f32.mrf.mxu0 }
 0x31b   : > { %1403 = vst.msk [vmem:[#allocation4] sm:$0xff] %vm1402_vm4, %v1386_v32  ;;  %v1624_v29 = vpop.xlane.xlu0 %1623  ;;  %v1174_v32 = vld [vmem:[#allocation4 + $0x28] sm:$0xff] }
 0x31c   : > { %v6756_v48 = vmax.f32 %v6753_v33, %v1624_v29 }
 0x31e   : > { %v1203_v41 = vpop.permute.xlu2 %1202  ;;  %2157 = vst.msk [vmem:[#allocation2 + $0xe8] sm:$0xff] %vm1152_vm2, %v6756_v48  ;;  %1760 = vperm.xlu0 %4870, %v6756_v48  }
 0x31f   : > { %v1268_v15 = vmul.f32 %v1203_v41, %v1172_v11 }
 0x321   : > { %v1389_v53 = vadd.f32 %v1353_v37, %v1268_v15  ;;  %v1361_v43 = vpop.f32.mrf.mxu0  ;;  %v1171_v15 = vld [vmem:[#allocation4 + $0x10] sm:$0xff] }
 0x323   : > { %1406 = vst.msk [vmem:[#allocation4 + $0x18] sm:$0xff] %vm1402_vm4, %v1389_v53  ;;  %v1193_v44 = vpop.permute.xlu1 %1192 }
 0x324   : > { %v1266_v45 = vmul.f32 %v1193_v44, %v1170_v3 }
 0x326   : > { %v1387_v2 = vadd.f32 %v6708_v24, %v1266_v45  ;;  %v1218_v35 = vpop.permute.xlu2 %1217  ;;  %v1177_v24 = vld [vmem:[#allocation4 + $0x40] sm:$0xff] }
 0x327   : > { %v1271_v22 = vmul.f32 %v1218_v35, %v1175_v47 }
 0x328   : > { %1404 = vst.msk [vmem:[#allocation4 + $0x8] sm:$0xff] %vm1402_vm4, %v1387_v2 }
 0x329   : > { %v1392_v17 = vadd.f32 %v1361_v43, %v1271_v22  ;;  %v1363_v56 = vpop.f32.mrf.mxu0  ;;  %v1178_v43 = vld [vmem:[#allocation4 + $0x48] sm:$0xff] }
 0x32b   : > { %1409 = vst.msk [vmem:[#allocation4 + $0x30] sm:$0xff] %vm1402_vm4, %v1392_v17  ;;  %v1213_v11 = vpop.permute.xlu1 %1212  ;;  %v1173_v17 = vld [vmem:[#allocation4 + $0x20] sm:$0xff] }
 0x32c   : > { %v1270_v37 = vmul.f32 %v1213_v11, %v1174_v32 }
 0x32e   : > { %v1391_v29 = vadd.f32 %v1358_v57, %v1270_v37  ;;  %v1233_v41 = vpop.permute.xlu2 %1232  ;;  %v1198_v53 = vpop.permute.xlu0 %1197 }
 0x32f   : > { %v1267_v3 = vmul.f32 %v1198_v53, %v1171_v15  ;;  %v1274_v32 = vmul.f32 %v1233_v41, %v1178_v43  ;;  %v1179_v43 = vld [vmem:[#allocation4 + $0x50] sm:$0xff] }
 0x330   : > { %1408 = vst.msk [vmem:[#allocation4 + $0x28] sm:$0xff] %vm1402_vm4, %v1391_v29 }
 0x331   : > { %v1366_v44 = vpop.f32.mrf.mxu0  ;;  %v1388_v45 = vadd.f32 %v6718_v9, %v1267_v3  ;;  %v1176_v3 = vld [vmem:[#allocation4 + $0x38] sm:$0xff] }
 0x333   : > { %v1228_v47 = vpop.permute.xlu1 %1227  ;;  %1405 = vst.msk [vmem:[#allocation4 + $0x10] sm:$0xff] %vm1402_vm4, %v1388_v45 }
 0x334   : > { %v1273_v2 = vmul.f32 %v1228_v47, %v1177_v24 }
 0x336   : > { %v1394_v35 = vadd.f32 %v1366_v44, %v1273_v2  ;;  %v1248_v22 = vpop.permute.xlu2 %1247  ;;  %v1208_v57 = vpop.permute.xlu0 %1207  ;;  %v1180_v2 = vld [vmem:[#allocation4 + $0x58] sm:$0xff] }
 0x337   : > { %v1269_v11 = vmul.f32 %v1208_v57, %v1173_v17 }
 0x338   : > { %1411 = vst.msk [vmem:[#allocation4 + $0x40] sm:$0xff] %vm1402_vm4, %v1394_v35 }
 0x339   : > { %v1368_v37 = vpop.f32.mrf.mxu0  ;;  %v1390_v15 = vadd.f32 %v1356_v52, %v1269_v11 }
 0x33a   : > { %v1395_v29 = vadd.f32 %v1368_v37, %v1274_v32 }
 0x33b   : > { %v1243_v53 = vpop.permute.xlu1 %1242  ;;  %1407 = vst.msk [vmem:[#allocation4 + $0x20] sm:$0xff] %vm1402_vm4, %v1390_v15 }
 0x33c   : > { %1412 = vst.msk [vmem:[#allocation4 + $0x48] sm:$0xff] %vm1402_vm4, %v1395_v29  ;;  %v1276_v17 = vmul.f32 %v1243_v53, %v1180_v2 }
 0x33e   : > { %v6773_v9 = vpop.permute.xlu2 %1262  ;;  %v1223_v24 = vpop.permute.xlu0 %1222 }
 0x33f   : > { %v1272_v44 = vmul.f32 %v1223_v24, %v1176_v3  ;;  %v1181_v24 = vld [vmem:[#allocation4 + $0x60] sm:$0xff] }
 0x340   : > { %v1277_v53 = vmul.f32 %v1248_v22, %v1181_v24 }
 0x341   : > { %v1371_v45 = vpop.f32.mrf.mxu0  ;;  %v1393_v47 = vadd.f32 %v1363_v56, %v1272_v44  ;;  %v8519_v56 = vld [vmem:[#allocation42_spill] sm:$0xff] }
 0x343   : > { %v1258_v41 = vpop.permute.xlu1 %1257  ;;  %1410 = vst.msk [vmem:[#allocation4 + $0x38] sm:$0xff] %vm1402_vm4, %v1393_v47 }
 0x346   : > { %v1706_v35 = vpop.permute.xlu2 %1705  ;;  %v1238_v32 = vpop.permute.xlu0 %1237 }
 0x347   : > { %v1775_v52 = vsub.f32 %v6345_v62, %v1706_v35  ;;  %v1275_v57 = vmul.f32 %v1238_v32, %v1179_v43  ;;  %v1182_v32 = vld [vmem:[#allocation4 + $0x68] sm:$0xff] }
 0x349   : > { %v1793_v11 = vmul.f32 1.442695, %v1775_v52  ;;  %v1373_v37 = vpop.f32.mrf.mxu0  ;;  %v1396_v15 = vadd.f32 %v1371_v45, %v1275_v57 }
 0x34a   : > { %v1397_v29 = vadd.f32 %v1373_v37, %v1276_v17 }
 0x34b   : > { %4947 = vpow2.f32 %v1793_v11  ;;  %v1701_v19 = vpop.permute.xlu1 %1700  ;;  %1413 = vst.msk [vmem:[#allocation4 + $0x50] sm:$0xff] %vm1402_vm4, %v1396_v15 }
 0x34c   : > { %1414 = vst.msk [vmem:[#allocation4 + $0x58] sm:$0xff] %vm1402_vm4, %v1397_v29  ;;  %v1774_v3 = vsub.f32 %v8519_v56, %v1701_v19 }
 0x34e   : > { %v1791_v44 = vmul.f32 1.442695, %v1774_v3  ;;  %v1716_v47 = vpop.permute.xlu2 %1715  ;;  %v1253_v2 = vpop.permute.xlu0 %1252 }
 0x34f   : > { %v1777_v62 = vsub.f32 %v8520_v14, %v1716_v47  ;;  %v1278_v22 = vmul.f32 %v1253_v2, %v1182_v32 }
 0x350   : > { %4949 = vpow2.f32 %v1791_v44 }
 0x351   : > { %v6781_v43 = vpop.eup %4947  ;;  %v1376_v35 = vpop.f32.mrf.mxu0  ;;  %v1797_v52 = vmul.f32 1.442695, %v1777_v62  ;;  %v1183_v62 = vld [vmem:[#allocation4 + $0x70] sm:$0xff] }
 0x352   : > { %v1398_v45 = vadd.f32 %v1376_v35, %v1277_v53  ;;  %1858 = vadd.xlane.f32.xlu2 %v6781_v43 }
 0x353   : > { %v1711_v17 = vpop.permute.xlu1 %1710  ;;  %4951 = vpow2.f32 %v1797_v52 }
 0x354   : > { %1415 = vst.msk [vmem:[#allocation4 + $0x60] sm:$0xff] %vm1402_vm4, %v1398_v45  ;;  %v1776_v19 = vsub.f32 %v6361_v13, %v1711_v17 }
 0x356   : > { %v6786_v57 = vpop.eup %4949  ;;  %v1795_v11 = vmul.f32 1.442695, %v1776_v19  ;;  %v1726_v14 = vpop.permute.xlu2 %1725 }
 0x357   : > { %1856 = vadd.xlane.f32.xlu1 %v6786_v57  ;;  %v1696_v37 = vpop.permute.xlu0 %1695  ;;  %v1779_v44 = vsub.f32 %v6377_v60, %v1726_v14  ;;  %v1279_v60 = vmul.f32 %v1258_v41, %v1183_v62 }
 0x358   : > { %4953 = vpow2.f32 %v1795_v11  ;;  %v1773_v29 = vsub.f32 %v6341_v34, %v1696_v37 }
 0x359   : > { %v1378_v15 = vpop.f32.mrf.mxu0  ;;  %v6793_v47 = vpop.eup %4951  ;;  %v1801_v52 = vmul.f32 1.442695, %v1779_v44 }
 0x35a   : > { %v1399_v56 = vadd.f32 %v1378_v15, %v1278_v22  ;;  %v1789_v3 = vmul.f32 1.442695, %v1773_v29  ;;  %v1184_v29 = vld [vmem:[#allocation4 + $0x78] sm:$0xff] }
 0x35b   : > { %v1721_v24 = vpop.permute.xlu1 %1720 }
 0x35c   : > { %1416 = vst.msk [vmem:[#allocation4 + $0x68] sm:$0xff] %vm1402_vm4, %v1399_v56  ;;  %v1778_v13 = vsub.f32 %v6358_v20, %v1721_v24  ;;  %4955 = vpow2.f32 %v1789_v3  ;;  %v1280_v3 = vmul.f32 %v6773_v9, %v1184_v29  ;;  %v8548_v56 = vld [vmem:[#allocation16_spill] sm:$0xff] }
 0x35e   : > { %v6795_v53 = vpop.eup %4953  ;;  %v1799_v2 = vmul.f32 1.442695, %v1778_v13  ;;  %v1741_v35 = vpop.permute.xlu2 %1740 }
 0x35f   : > { %v1782_v34 = vsub.f32 %v6387_v16, %v1741_v35  ;;  %1862 = vadd.xlane.f32.xlu1 %v6793_v47  ;;  %v1731_v17 = vpop.permute.xlu0 %1730 }
 0x360   : > { %4957 = vpow2.f32 %v1799_v2  ;;  %v1780_v20 = vsub.f32 %v6348_v28, %v1731_v17 }
 0x361   : > { %v1381_v19 = vpop.f32.mrf.mxu0  ;;  %v1807_v22 = vmul.f32 1.442695, %v1782_v34  ;;  %4959 = vpow2.f32 %v1801_v52 }
 0x362   : > { %v1400_v32 = vadd.f32 %v1381_v19, %v1279_v60  ;;  %v6802_v11 = vpop.eup %4955  ;;  %v1803_v14 = vmul.f32 1.442695, %v1780_v20  ;;  %v8547_v19 = vld [vmem:[#allocation11_spill] sm:$0xff] }
 0x363   : > { %v1736_v37 = vpop.permute.xlu1 %1735  ;;  %1854 = vadd.xlane.f32.xlu0 %v6802_v11  ;;  %v2031_v41 = vpack.c.bf16 %v6786_v57, %v6802_v11 }
 0x364   : > { %1417 = vst.msk [vmem:[#allocation4 + $0x70] sm:$0xff] %vm1402_vm4, %v1400_v32  ;;  %v1781_v16 = vsub.f32 %v6374_v50, %v1736_v37  ;;  %4961 = vpow2.f32 %v1803_v14 }
 0x365   : > { %4963 = vpow2.f32 %v1807_v22 }
 0x366   : > { %v6809_v28 = vpop.eup %4957  ;;  %v1805_v15 = vmul.f32 1.442695, %v1781_v16  ;;  %v1756_v20 = vpop.permute.xlu2 %1755 }
 0x367   : > { %1864 = vadd.xlane.f32.xlu2 %v6809_v28  ;;  %v1746_v24 = vpop.permute.xlu0 %1745  ;;  %v6816_v13 = vpop.eup %4959 }
 0x368   : > { %4965 = vpow2.f32 %v1805_v15  ;;  %v1783_v50 = vsub.f32 %v6364_v46, %v1746_v24 }
 0x369   : > { %v1383_v44 = vpop.f32.mrf.mxu0 }
 0x36a   : > { %v1401_v62 = vadd.f32 %v1383_v44, %v1280_v3  ;;  %v6818_v2 = vpop.eup %4961  ;;  %v1809_v35 = vmul.f32 1.442695, %v1783_v50  ;;  %v5413_v44 = vmov 2  }
 0x36b   : > { %v1751_v34 = vpop.permute.xlu1 %1750  ;;  %1868 = vadd.xlane.f32.xlu1 %v6818_v2  ;;  %1860 = vadd.xlane.f32.xlu0 %v6795_v53  ;;  %v6826_v46 = vpop.eup %4963 }
 0x36c   : > { %1418 = vst.msk [vmem:[#allocation4 + $0x78] sm:$0xff] %vm1402_vm4, %v1401_v62  ;;  %v1784_v9 = vsub.f32 %v6391_v25, %v1751_v34  ;;  %4967 = vpow2.f32 %v1809_v35  ;;  %v1785_v25 = vsub.f32 %v6399_v26, %v1756_v20  ;;  %4871 = vset.pattern.permute.xlu0 %v5413_v44  ;;  %4873 = vset.pattern.permute.xlu2 %v5413_v44  ;;  %v8546_v20 = vld [vmem:[#allocation13_spill] sm:$0xff] }
 0x36d   : > { %4872 = vset.pattern.permute.xlu1 %v5413_v44  ;;  %v5146_v44 = vld [vmem:[%s5550_s16 + $0x28] sm:$0xff] }
 0x36e   : > { %v6828_v52 = vpop.eup %4965  ;;  %v1811_v17 = vmul.f32 1.442695, %v1784_v9  ;;  %v1813_v37 = vmul.f32 1.442695, %v1785_v25  ;;  %v1771_v16 = vpop.permute.xlu2 %1770  ;;  %v5139_v25 = vld [vmem:[%s5540_s9 + $0x10] sm:$0xff] }
 0x36f   : > { %1870 = vadd.xlane.f32.xlu2 %v6828_v52  ;;  %v1788_v29 = vsub.f32 %v6444_v4, %v1771_v16  ;;  %v5142_v16 = vld [vmem:[%s5540_s9 + $0x20] sm:$0xff] }
 0x370   : > { %4969 = vpow2.f32 %v1811_v17 }
 0x371   : > { %4971 = vpow2.f32 %v1813_v37  ;;  %v1819_v15 = vmul.f32 1.442695, %v1788_v29  ;;  %v5140_v37 = vld [vmem:[%s5540_s9 + $0x8] sm:$0xff]  ;;  %v5143_v29 = vld [vmem:[%s5550_s16] sm:$0xff] }
 0x372   : > { %v6833_v32 = vpop.eup %4967 }
 0x373   : > { %1874 = vadd.xlane.f32.xlu1 %v6833_v32  ;;  %1866 = vadd.xlane.f32.xlu0 %v6816_v13  ;;  %4973 = vpow2.f32 %v1819_v15  ;;  %v5144_v15 = vld [vmem:[%s5540_s9 + $0x38] sm:$0xff] }
 0x376   : > { %v6838_v14 = vpop.eup %4969 }
 0x377   : > { %1876 = vadd.xlane.f32.xlu2 %v6838_v14  ;;  %v6846_v50 = vpop.eup %4971 }
 0x379   : > { %v6849_v62 = vpop.eup %4973 }
 0x37b   : > { %1872 = vadd.xlane.f32.xlu0 %v6826_v46 }
 0x380   : > { %v1766_v3 = vpop.permute.xlu1 %1765 }
 0x381   : > { %v1787_v24 = vsub.f32 %v6438_v61, %v1766_v3  ;;  %v8521_v3 = vsub.f32 %v6518_v7, %v6535_v63  ;;  %v5149_v7 = vld [vmem:[%s5550_s16 + $0x40] sm:$0xff] }
 0x383   : > { %v1817_v26 = vmul.f32 1.442695, %v1787_v24  ;;  %1878 = vadd.xlane.f32.xlu0 %v6846_v50  ;;  %v1665_v24 = vmul.f32 1.442695, %v8521_v3 }
 0x385   : > { %4975 = vpow2.f32 %v1817_v26  ;;  %v5145_v26 = vld [vmem:[%s5540_s9] sm:$0xff] }
 0x38b   : > { %v6851_v4 = vpop.eup %4975  ;;  %1884 = vadd.xlane.f32.xlu0 %v6849_v62 }
 0x38c   : > { %1882 = vadd.xlane.f32.xlu2 %v6851_v4 }
 0x390   : > { %v1761_v35 = vpop.permute.xlu0 %1760 }
 0x391   : > { %v1786_v34 = vsub.f32 %v6462_v8, %v1761_v35  ;;  %v5141_v8 = vld [vmem:[%s5540_s9 + $0x28] sm:$0xff]  ;;  %v8522_v35 = vsub.f32 %v6468_v5, %v6477_v31  ;;  %v5150_v31 = vld [vmem:[%s5550_s16 + $0x20] sm:$0xff] }
 0x393   : > { %v1815_v9 = vmul.f32 1.442695, %v1786_v34  ;;  %v1663_v34 = vmul.f32 1.442695, %v8522_v35 }
 0x395   : > { %4977 = vpow2.f32 %v1815_v9  ;;  %v5147_v9 = vld [vmem:[%s5550_s16 + $0x10] sm:$0xff] }
 0x396   : > { %4979 = vpow2.f32 %v1665_v24  ;;  %v1823_v24 = vld [vmem:[#allocation3 + $0x88] sm:$0xff] }
 0x397   : > { %4981 = vpow2.f32 %v1663_v34 }
 0x39b   : > { %v6858_v17 = vpop.eup %4977 }
 0x39c   : > { %1880 = vadd.xlane.f32.xlu1 %v6858_v17  ;;  %v6887_v63 = vpop.eup %4979 }
 0x39f   : > { %2043 = vrot.lane.b32.xlu0 %v5139_v25, %s5414_s27  ;;  %v5148_v25 = vld [vmem:[%s5540_s9 + $0x18] sm:$0xff] }
 0x3a4   : > { %2041 = vrot.lane.b32.xlu2 %v5140_v37, %s5414_s27  ;;  %v1824_v37 = vld [vmem:[#allocation3 + $0x90] sm:$0xff] }
 0x3a5   : > { %v1840_v5 = vmul.f32 %v6887_v63, %v1824_v37  ;;  %v5153_v37 = vld [vmem:[%s5550_s16 + $0x38] sm:$0xff] }
 0x3a7   : > { %2049 = vrot.lane.b32.xlu0 %v5141_v8, %s5414_s27  ;;  %v8523_v8 = vsub.f32 %v6493_v12, %v6502_v10  ;;  %v8524_v12 = vsub.f32 %v6514_v6, %v6527_v27  ;;  %v5154_v6 = vld [vmem:[%s5550_s16 + $0x8] sm:$0xff]  ;;  %v8526_v27 = vsub.f32 %v6524_v1, %v6543_v59 }
 0x3a9   : > { %v1661_v10 = vmul.f32 1.442695, %v8524_v12  ;;  %v8528_v12 = vld [vmem:[#allocation22_spill] sm:$0xff] }
 0x3aa   : > { %v8529_v1 = vsub.f32 %v8528_v12, %v6622_v40 }
 0x3ac   : > { %2047 = vrot.lane.b32.xlu2 %v5142_v16, %s5414_s27  ;;  %v1669_v16 = vmul.f32 1.442695, %v8523_v8  ;;  %v1677_v59 = vmul.f32 1.442695, %v8529_v1 }
 0x3ae   : > { %4983 = vpow2.f32 %v1669_v16  ;;  %v1826_v16 = vld [vmem:[#allocation3 + $0xa0] sm:$0xff] }
 0x3af   : > { %2161 = vperm.xlu0 %4871, %v5143_v29   ;;  %4985 = vpow2.f32 %v1661_v10  ;;  %v5156_v10 = vld [vmem:[%s5550_s16 + $0x50] sm:$0xff] }
 0x3b4   : > { %2053 = vrot.lane.b32.xlu2 %v5144_v15, %s5414_s27  ;;  %v6894_v15 = vpop.eup %4981 }
 0x3b5   : > { %2039 = vrot.lane.b32.xlu1 %v5145_v26, %s5414_s27  ;;  %v5151_v26 = vld [vmem:[%s5540_s9 + $0x30] sm:$0xff]  ;;  %v1839_v35 = vmul.f32 %v6894_v15, %v1823_v24  ;;  %v6909_v8 = vpop.eup %4983 }
 0x3b6   : > { %v6920_v24 = vpop.eup %4985 }
 0x3b7   : > { %2181 = vperm.xlu0 %4871, %v5146_v44   ;;  %v5152_v44 = vld [vmem:[%s5550_s16 + $0x58] sm:$0xff] }
 0x3bc   : > { %2169 = vperm.xlu2 %4873, %v5147_v9  }
 0x3bd   : > { %2045 = vrot.lane.b32.xlu1 %v5148_v25, %s5414_s27  ;;  %v8525_v25 = vsub.f32 %v6565_v58, %v6582_v23  ;;  %v8527_v23 = vsub.f32 %v6561_v42, %v6574_v18 }
 0x3bf   : > { %2193 = vperm.xlu0 %4871, %v5149_v7   ;;  %v1671_v7 = vmul.f32 1.442695, %v8525_v25  ;;  %v1667_v58 = vmul.f32 1.442695, %v8527_v23  ;;  %v8530_v25 = vld [vmem:[#allocation24_spill] sm:$0xff] }
 0x3c1   : > { %4987 = vpow2.f32 %v1671_v7  ;;  %v8531_v7 = vsub.f32 %v8530_v25, %v6590_v0 }
 0x3c4   : > { %2177 = vperm.xlu2 %4873, %v5150_v31   ;;  %v5155_v31 = vld [vmem:[%s5550_s16 + $0x70] sm:$0xff] }
 0x3c5   : > { %v1859_v29 = vpop.xlane.xlu2 %1858  ;;  %2051 = vrot.lane.b32.xlu1 %v5151_v26, %s5414_s27 }
 0x3c6   : > { %v1888_v3 = vadd.f32 %v1859_v29, %v1840_v5  ;;  %v1675_v5 = vmul.f32 1.442695, %v8526_v27  ;;  %v1842_v29 = vmul.f32 %v6909_v8, %v1826_v16  ;;  %v8532_v16 = vmov 0  }
 0x3c7   : > { %2205 = vperm.xlu0 %4871, %v5152_v44   ;;  %v1822_v44 = vld [vmem:[#allocation3 + $0x80] sm:$0xff]  ;;  %v6927_v42 = vpop.eup %4987 }
 0x3c8   : > { %1904 = vst.msk [vmem:[#allocation3 + $0x90] sm:$0xff] %vm1152_vm2, %v1888_v3  ;;  %4989 = vpow2.f32 %v1675_v5  ;;  %v1838_v18 = vmul.f32 %v6920_v24, %v1822_v44  ;;  %v8535_v44 = vld [vmem:[#allocation37_spill] sm:$0xff] }
 0x3c9   : > { %4991 = vpow2.f32 %v1667_v58  ;;  %v8536_v12 = vsub.f32 %v8535_v44, %v6652_v51 }
 0x3ca   : > { %v1857_v34 = vpop.xlane.xlu1 %1856  ;;  %4993 = vpow2.f32 %v1677_v59 }
 0x3cb   : > { %v1887_v9 = vadd.f32 %v1857_v34, %v1839_v35  ;;  %v1827_v35 = vld [vmem:[#allocation3 + $0xa8] sm:$0xff]  ;;  %v1683_v1 = vmul.f32 1.442695, %v8536_v12 }
 0x3cc   : > { %2189 = vperm.xlu2 %4873, %v5153_v37   ;;  %v1681_v37 = vmul.f32 1.442695, %v8531_v7 }
 0x3cd   : > { %1903 = vst.msk [vmem:[#allocation3 + $0x88] sm:$0xff] %vm1152_vm2, %v1887_v9  ;;  %2165 = vperm.xlu1 %4872, %v5154_v6   ;;  %v5157_v9 = vld [vmem:[%s5550_s16 + $0x18] sm:$0xff]  ;;  %v8533_v6 = vld [vmem:[#allocation26_spill] sm:$0xff] }
 0x3ce   : > { %v8534_v27 = vsub.f32 %v8533_v6, %v6614_v49  ;;  %v6939_v23 = vpop.eup %4989  ;;  %4995 = vpow2.f32 %v1681_v37  ;;  %v5158_v49 = vld [vmem:[%s5550_s16 + $0x68] sm:$0xff] }
 0x3cf   : > { %2217 = vperm.xlu0 %4871, %v5155_v31   ;;  %v1843_v31 = vmul.f32 %v6927_v42, %v1827_v35  ;;  %v1830_v35 = vld [vmem:[#allocation3 + $0xc0] sm:$0xff]  ;;  %v8537_v37 = vld [vmem:[#allocation23_spill] sm:$0xff] }
 0x3d0   : > { %v1673_v5 = vmul.f32 1.442695, %v8534_v27 }
 0x3d2   : > { %v1863_v3 = vpop.xlane.xlu1 %1862  ;;  %4997 = vpow2.f32 %v1673_v5 }
 0x3d3   : > { %v1890_v26 = vadd.f32 %v1863_v3, %v1842_v29  ;;  %v6942_v29 = vpop.eup %4991  ;;  %v1825_v3 = vld [vmem:[#allocation3 + $0x98] sm:$0xff]  ;;  %4999 = vpow2.f32 %v1683_v1 }
 0x3d4   : > { %2201 = vperm.xlu2 %4873, %v5156_v10   ;;  %v6949_v59 = vpop.eup %4993  ;;  %v1841_v10 = vmul.f32 %v6942_v29, %v1825_v3  ;;  %v1828_v3 = vld [vmem:[#allocation3 + $0xb0] sm:$0xff]  ;;  %v1833_v1 = vld [vmem:[#allocation3 + $0xd8] sm:$0xff] }
 0x3d5   : > { %1906 = vst.msk [vmem:[#allocation3 + $0xa0] sm:$0xff] %vm1152_vm2, %v1890_v26  ;;  %2173 = vperm.xlu1 %4872, %v5157_v9   ;;  %v1829_v26 = vld [vmem:[#allocation3 + $0xb8] sm:$0xff]  ;;  %v1846_v27 = vmul.f32 %v6949_v59, %v1830_v35  ;;  %v6958_v5 = vpop.eup %4995 }
 0x3d6   : > { %v1855_v34 = vpop.xlane.xlu0 %1854 }
 0x3d7   : > { %v1886_v40 = vadd.f32 %v1855_v34, %v1838_v18  ;;  %4875 = vset.pattern.permute.xlu0 %v8532_v16  ;;  %v1845_v18 = vmul.f32 %v6939_v23, %v1829_v26  ;;  %v5159_v34 = vld [vmem:[%s5550_s16 + $0x30] sm:$0xff] }
 0x3d8   : > { %v1832_v26 = vld [vmem:[#allocation3 + $0xd0] sm:$0xff] }
 0x3d9   : > { %1902 = vst.msk [vmem:[#allocation3 + $0x80] sm:$0xff] %vm1152_vm2, %v1886_v40  ;;  %v8538_v40 = vsub.f32 %v8537_v37, %v6649_v38  ;;  %v1848_v12 = vmul.f32 %v6958_v5, %v1832_v26 }
 0x3da   : > { %v1865_v58 = vpop.xlane.xlu2 %1864 }
 0x3db   : > { %v1891_v0 = vadd.f32 %v1865_v58, %v1843_v31  ;;  %v1679_v6 = vmul.f32 1.442695, %v8538_v40  ;;  %v6961_v58 = vpop.eup %4997 }
 0x3dc   : > { %2213 = vperm.xlu2 %4873, %v5158_v49   ;;  %v6966_v38 = vpop.eup %4999  ;;  %v1844_v44 = vmul.f32 %v6961_v58, %v1828_v3  ;;  %v5160_v49 = vld [vmem:[%s5550_s16 + $0x48] sm:$0xff]  ;;  %v1689_v3 = vmul.f32 1.442695, %v1659_v55  ;;  %v1836_v55 = vld [vmem:[#allocation3 + $0xf0] sm:$0xff] }
 0x3dd   : > { %1907 = vst.msk [vmem:[#allocation3 + $0xa8] sm:$0xff] %vm1152_vm2, %v1891_v0  ;;  %2185 = vperm.xlu1 %4872, %v5159_v34   ;;  %5001 = vpow2.f32 %v1679_v6 }
 0x3de   : > { %v1861_v9 = vpop.xlane.xlu0 %1860  ;;  %v1869_v25 = vpop.xlane.xlu1 %1868 }
 0x3df   : > { %v1889_v7 = vadd.f32 %v1861_v9, %v1841_v10  ;;  %v1893_v51 = vadd.f32 %v1869_v25, %v1845_v18  ;;  %v8539_v9 = vld [vmem:[#allocation39_spill] sm:$0xff] }
 0x3e0   : > { %v8540_v25 = vsub.f32 %v8539_v9, %v6672_v30 }
 0x3e1   : > { %1905 = vst.msk [vmem:[#allocation3 + $0x98] sm:$0xff] %vm1152_vm2, %v1889_v7 }
 0x3e2   : > { %v1871_v31 = vpop.xlane.xlu2 %1870  ;;  %1909 = vst.msk [vmem:[#allocation3 + $0xb8] sm:$0xff] %vm1152_vm2, %v1893_v51  ;;  %v1685_v7 = vmul.f32 1.442695, %v8540_v25  ;;  %v1849_v51 = vmul.f32 %v6966_v38, %v1833_v1 }
 0x3e3   : > { %v1894_v0 = vadd.f32 %v1871_v31, %v1846_v27  ;;  %v6976_v40 = vpop.eup %5001  ;;  %v1831_v27 = vld [vmem:[#allocation3 + $0xc8] sm:$0xff] }
 0x3e4   : > { %4874 = vset.pattern.permute.xlu2 %v8532_v16  ;;  %5003 = vpow2.f32 %v1685_v7  ;;  %v1847_v31 = vmul.f32 %v6976_v40, %v1831_v27 }
 0x3e5   : > { %1910 = vst.msk [vmem:[#allocation3 + $0xc0] sm:$0xff] %vm1152_vm2, %v1894_v0  ;;  %2197 = vperm.xlu1 %4872, %v5160_v49   ;;  %v5161_v0 = vld [vmem:[%s5550_s16 + $0x60] sm:$0xff]  ;;  %5005 = vpow2.f32 %v1689_v3 }
 0x3e6   : > { %v1867_v10 = vpop.xlane.xlu0 %1866  ;;  %v1875_v18 = vpop.xlane.xlu1 %1874  ;;  %v1834_v49 = vld [vmem:[#allocation3 + $0xe0] sm:$0xff] }
 0x3e7   : > { %v1892_v35 = vadd.f32 %v1867_v10, %v1844_v44  ;;  %v1896_v34 = vadd.f32 %v1875_v18, %v1848_v12  ;;  %v8541_v44 = vsub.f32 %v6733_v21, %v6741_v54  ;;  %v5162_v18 = vld [vmem:[%s5550_s16 + $0x78] sm:$0xff] }
 0x3e8   : > { %v1837_v21 = vld [vmem:[#allocation3 + $0xf8] sm:$0xff] }
 0x3e9   : > { %1908 = vst.msk [vmem:[#allocation3 + $0xb0] sm:$0xff] %vm1152_vm2, %v1892_v35  ;;  %v1691_v12 = vmul.f32 1.442695, %v8541_v44 }
 0x3ea   : > { %v1877_v37 = vpop.xlane.xlu2 %1876  ;;  %1912 = vst.msk [vmem:[#allocation3 + $0xd0] sm:$0xff] %vm1152_vm2, %v1896_v34  ;;  %v6989_v1 = vpop.eup %5003 }
 0x3eb   : > { %v1897_v6 = vadd.f32 %v1877_v37, %v1849_v51  ;;  %5007 = vpow2.f32 %v1691_v12  ;;  %v1850_v10 = vmul.f32 %v6989_v1, %v1834_v49  ;;  %v6993_v36 = vpop.eup %5005 }
 0x3ec   : > { %v1852_v9 = vmul.f32 %v6993_v36, %v1836_v55 }
 0x3ed   : > { %1913 = vst.msk [vmem:[#allocation3 + $0xd8] sm:$0xff] %vm1152_vm2, %v1897_v6  ;;  %2209 = vperm.xlu1 %4872, %v5161_v0   ;;  %v8542_v6 = vsub.f32 %v6753_v33, %v6756_v48  ;;  %v5163_v48 = vld [vmem:[%s5545_s13] sm:$0xf] }
 0x3ee   : > { %v1873_v30 = vpop.xlane.xlu0 %1872 }
 0x3ef   : > { %v1895_v26 = vadd.f32 %v1873_v30, %v1847_v31  ;;  %v1687_v27 = vmul.f32 1.442695, %v8542_v6  ;;  %v1835_v30 = vld [vmem:[#allocation3 + $0xe8] sm:$0xff] }
 0x3f0   : > { %v8544_v6 = vld [vmem:[#allocation7_spill] sm:$0xff] }
 0x3f1   : > { %1911 = vst.msk [vmem:[#allocation3 + $0xc8] sm:$0xff] %vm1152_vm2, %v1895_v26  ;;  %v6996_v39 = vpop.eup %5007  ;;  %5009 = vpow2.f32 %v1687_v27 }
 0x3f2   : > { %v1853_v54 = vmul.f32 %v6996_v39, %v1837_v21 }
 0x3f5   : > { %2221 = vperm.xlu1 %4872, %v5162_v18   ;;  %v7011_v18 = vperm.slane %v5163_v48, 2 }
 0x3f6   : > { %v1879_v35 = vpop.xlane.xlu0 %1878 }
 0x3f7   : > { %v1898_v34 = vadd.f32 %v1879_v35, %v1850_v10  ;;  %v7006_v0 = vpop.eup %5009 }
 0x3f8   : > { %v1851_v26 = vmul.f32 %v7006_v0, %v1835_v30 }
 0x3f9   : > { %1914 = vst.msk [vmem:[#allocation3 + $0xe0] sm:$0xff] %vm1152_vm2, %v1898_v34 }
 0x3fd   : > { %4876 = vset.pattern.permute.xlu1 %v8532_v16 }
 0x3fe   : > { %v1885_v25 = vpop.xlane.xlu0 %1884 }
 0x3ff   : > { %v1883_v7 = vpop.xlane.xlu2 %1882  ;;  %v1901_v51 = vadd.f32 %v1885_v25, %v1853_v54 }
 0x400   : > { %v1900_v37 = vadd.f32 %v1883_v7, %v1852_v9  ;;  %v8543_v7 = vld [vmem:[#allocation6_spill] sm:$0xff] }
 0x401   : > { %1917 = vst.msk [vmem:[#allocation3 + $0xf8] sm:$0xff] %vm1152_vm2, %v1901_v51 }
 0x402   : > { %1916 = vst.msk [vmem:[#allocation3 + $0xf0] sm:$0xff] %vm1152_vm2, %v1900_v37 }
 0x407   : > { %v2042_v31 = vpop.permute.xlu2 %2041 }
 0x40f   : > { %v2048_v3 = vpop.permute.xlu2 %2047  ;;  %v1881_v44 = vpop.xlane.xlu1 %1880 }
 0x410   : > { %v1899_v12 = vadd.f32 %v1881_v44, %v1851_v26 }
 0x411   : > { %v2044_v49 = vpop.permute.xlu0 %2043 }
 0x412   : > { %1915 = vst.msk [vmem:[#allocation3 + $0xe8] sm:$0xff] %vm1152_vm2, %v1899_v12 }
 0x417   : > { %v2054_v10 = vpop.permute.xlu2 %2053 }
 0x418   : > { %2063 = vmatpush.bf16.msra.mxu1 %v2054_v10 }
 0x419   : > { %v2050_v33 = vpop.permute.xlu0 %2049 }
 0x41f   : > { %v2170_v35 = vpop.permute.xlu2 %2169 }
 0x420   : > { %v2227_v34 = vadd.f32 %v7011_v18, %v2170_v35 }
 0x421   : > { %v2162_v21 = vpop.permute.xlu0 %2161 }
 0x422   : > { %vm2243_vm5 = vcmp.gt.f32.partialorder %v2227_v34, 0.0  ;;  %v2259_v55 = vmul.f32 0.2, %v2227_v34  ;;  %v2225_v54 = vadd.f32 %v7011_v18, %v2162_v21 }
 0x424   : > { %v2275_v9 = vsel %vm2243_vm5, %v2227_v34, %v2259_v55  ;;  %vm2241_vm6 = vcmp.gt.f32.partialorder %v2225_v54, 0.0  ;;  %v2257_v25 = vmul.f32 0.2, %v2225_v54 }
 0x425   : > { %v7016_v51 = vadd.f32 %v8543_v7, %v2275_v9  ;;  %v8545_v9 = vld [vmem:[#allocation9_spill] sm:$0xff] }
 0x426   : > { %v2273_v37 = vsel %vm2241_vm6, %v2225_v54, %v2257_v25 }
 0x427   : > { %2326 = vmax.xlane.f32.xlu1 %v7016_v51  ;;  %v7020_v27 = vadd.f32 %v8544_v6, %v2273_v37  ;;  %v2040_v30 = vpop.permute.xlu1 %2039  ;;  %v2178_v35 = vpop.permute.xlu2 %2177  ;;  %v1922_v6 = vld [vmem:[#allocation4 + $0x98] sm:$0xff] }
 0x429   : > { %2322 = vmax.xlane.f32.xlu2 %v7020_v27  ;;  %v2182_v12 = vpop.permute.xlu0 %2181 }
 0x42a   : > { %v2230_v34 = vadd.f32 %v7011_v18, %v2182_v12 }
 0x42c   : > { %v2262_v37 = vmul.f32 0.2, %v2230_v34  ;;  %vm2246_vm8 = vcmp.gt.f32.partialorder %v2230_v34, 0.0 }
 0x42e   : > { %v2278_v61 = vsel %vm2246_vm8, %v2230_v34, %v2262_v37 }
 0x42f   : > { %v2046_v26 = vpop.permute.xlu1 %2045  ;;  %v7033_v22 = vadd.f32 %v8546_v20, %v2278_v61 }
 0x431   : > { %v2194_v55 = vpop.permute.xlu0 %2193 }
 0x432   : > { %v2233_v12 = vadd.f32 %v7011_v18, %v2194_v55 }
 0x434   : > { %vm2249_vm11 = vcmp.gt.f32.partialorder %v2233_v12, 0.0 }
 0x437   : > { %v2052_v44 = vpop.permute.xlu1 %2051 }
 0x438   : > { %2064 = vmatpush.bf16.msra.mxu1 %v2052_v44 }
 0x43c   : > { %2065 = vmatpush.bf16.msra.mxu1 %v2050_v33 }
 0x43f   : > { %v2166_v10 = vpop.permute.xlu1 %2165 }
 0x440   : > { %v2226_v48 = vadd.f32 %v7011_v18, %v2166_v10  ;;  %2066 = vmatpush.bf16.msra.mxu1 %v2048_v3  ;;  %v2229_v3 = vadd.f32 %v7011_v18, %v2178_v35 }
 0x442   : > { %vm2242_vm7 = vcmp.gt.f32.partialorder %v2226_v48, 0.0  ;;  %v2258_v21 = vmul.f32 0.2, %v2226_v48  ;;  %vm2245_vm10 = vcmp.gt.f32.partialorder %v2229_v3, 0.0 }
 0x444   : > { %2067 = vmatpush.bf16.msra.mxu1 %v2046_v26  ;;  %v2274_v54 = vsel %vm2242_vm7, %v2226_v48, %v2258_v21  ;;  %v2190_v26 = vpop.permute.xlu2 %2189  ;;  %v2261_v21 = vmul.f32 0.2, %v2229_v3 }
 0x445   : > { %v7026_v25 = vadd.f32 %v8545_v9, %v2274_v54  ;;  %v2206_v54 = vpop.permute.xlu0 %2205 }
 0x446   : > { %v2277_v55 = vsel %vm2245_vm10, %v2229_v3, %v2261_v21  ;;  %v2236_v61 = vadd.f32 %v7011_v18, %v2206_v54 }
 0x447   : > { %2324 = vmax.xlane.f32.xlu0 %v7026_v25  ;;  %v2174_v33 = vpop.permute.xlu1 %2173 }
 0x448   : > { %v2228_v44 = vadd.f32 %v7011_v18, %v2174_v33  ;;  %2068 = vmatpush.bf16.msra.mxu1 %v2044_v49  ;;  %v2265_v49 = vmul.f32 0.2, %v2233_v12  ;;  %v2268_v21 = vmul.f32 0.2, %v2236_v61  ;;  %vm2252_vm14 = vcmp.gt.f32.partialorder %v2236_v61, 0.0 }
 0x44a   : > { %vm2244_vm9 = vcmp.gt.f32.partialorder %v2228_v44, 0.0  ;;  %v2260_v10 = vmul.f32 0.2, %v2228_v44  ;;  %v2281_v33 = vsel %vm2249_vm11, %v2233_v12, %v2265_v49 }
 0x44b   : > { %v7047_v45 = vadd.f32 %v8548_v56, %v2281_v33 }
 0x44c   : > { %2069 = vmatpush.bf16.msra.mxu1 %v2042_v31  ;;  %v2276_v48 = vsel %vm2244_vm9, %v2228_v44, %v2260_v10  ;;  %v2232_v31 = vadd.f32 %v7011_v18, %v2190_v26  ;;  %v8550_v26 = vld [vmem:[#allocation10_spill] sm:$0xff] }
 0x44d   : > { %v7036_v60 = vadd.f32 %v8547_v19, %v2276_v48  ;;  %v2202_v48 = vpop.permute.xlu2 %2201  ;;  %v2218_v12 = vpop.permute.xlu0 %2217 }
 0x44e   : > { %v2264_v10 = vmul.f32 0.2, %v2232_v31  ;;  %vm2248_vm13 = vcmp.gt.f32.partialorder %v2232_v31, 0.0  ;;  %v2239_v49 = vadd.f32 %v7011_v18, %v2218_v12 }
 0x44f   : > { %2332 = vmax.xlane.f32.xlu0 %v7033_v22  ;;  %2328 = vmax.xlane.f32.xlu2 %v7036_v60  ;;  %v2186_v35 = vpop.permute.xlu1 %2185 }
 0x450   : > { %v2231_v34 = vadd.f32 %v7011_v18, %v2186_v35  ;;  %2070 = vmatpush.bf16.msra.mxu1 %v2040_v30  ;;  %v8549_v35 = vld [vmem:[#allocation8_spill] sm:$0xff]  ;;  %v2280_v54 = vsel %vm2248_vm13, %v2232_v31, %v2264_v10  ;;  %vm2255_vm1 = vcmp.gt.f32.partialorder %v2239_v49, 0.0 }
 0x451   : > { %v7050_v30 = vadd.f32 %v8549_v35, %v2277_v55  ;;  %v2284_v55 = vsel %vm2252_vm14, %v2236_v61, %v2268_v21  ;;  %v8553_v35 = vld [vmem:[#allocation14_spill] sm:$0xff] }
 0x452   : > { %vm2247_vm12 = vcmp.gt.f32.partialorder %v2231_v34, 0.0  ;;  %v2263_v37 = vmul.f32 0.2, %v2231_v34 }
 0x453   : > { %2071 = vmatmul.bf16.vlgmr.msra.gmra.mxu1 %v2031_v41  ;;  %v2235_v41 = vadd.f32 %v7011_v18, %v2202_v48 }
 0x454   : > { %v2279_v44 = vsel %vm2247_vm12, %v2231_v34, %v2263_v37 }
 0x455   : > { %v7053_v3 = vadd.f32 %v8550_v26, %v2279_v44  ;;  %v2267_v33 = vmul.f32 0.2, %v2235_v41  ;;  %v8551_v44 = vld [vmem:[#allocation20_spill] sm:$0xff]  ;;  %vm2251_vm0 = vcmp.gt.f32.partialorder %v2235_v41, 0.0  ;;  %v2214_v31 = vpop.permute.xlu2 %2213 }
 0x456   : > { %v7062_v56 = vadd.f32 %v8551_v44, %v2284_v55  ;;  %v8552_v26 = vld [vmem:[#allocation12_spill] sm:$0xff]  ;;  %v2238_v21 = vadd.f32 %v7011_v18, %v2214_v31  ;;  %v8555_v55 = vld [vmem:[#allocation21_spill] sm:$0xff]  ;;  %v8556_v44 = vld [vmem:[#allocation15_spill] sm:$0xff] }
 0x457   : > { %2338 = vmax.xlane.f32.xlu0 %v7047_v45  ;;  %2330 = vmax.xlane.f32.xlu2 %v7050_v30  ;;  %v2198_v57 = vpop.permute.xlu1 %2197  ;;  %v7065_v20 = vadd.f32 %v8552_v26, %v2280_v54  ;;  %v2283_v48 = vsel %vm2251_vm0, %v2235_v41, %v2267_v33  ;;  %v8554_v54 = vpack.c.bf16 %v6795_v53, %v6781_v43  ;;  %v8558_v31 = vld [vmem:[#allocation18_spill] sm:$0xff] }
 0x458   : > { %2334 = vmax.xlane.f32.xlu1 %v7053_v3  ;;  %v2234_v11 = vadd.f32 %v7011_v18, %v2198_v57  ;;  %v2271_v57 = vmul.f32 0.2, %v2239_v49  ;;  %v7082_v26 = vadd.f32 %v8556_v44, %v2283_v48  ;;  %v2270_v41 = vmul.f32 0.2, %v2238_v21 }
 0x459   : > { %vm2254_vm5 = vcmp.gt.f32.partialorder %v2238_v21, 0.0 }
 0x45a   : > { %vm2250_vm15 = vcmp.gt.f32.partialorder %v2234_v11, 0.0  ;;  %v2266_v34 = vmul.f32 0.2, %v2234_v11  ;;  %v2286_v33 = vsel %vm2254_vm5, %v2238_v21, %v2270_v41 }
 0x45c   : > { %v2282_v37 = vsel %vm2250_vm15, %v2234_v11, %v2266_v34  ;;  %v2287_v11 = vsel %vm2255_vm1, %v2239_v49, %v2271_v57 }
 0x45d   : > { %v7068_v7 = vadd.f32 %v8553_v35, %v2282_v37  ;;  %v7079_v37 = vadd.f32 %v8555_v55, %v2287_v11  ;;  %v8557_v35 = vld [vmem:[#allocation17_spill] sm:$0xff] }
 0x45f   : > { %2344 = vmax.xlane.f32.xlu0 %v7062_v56  ;;  %2336 = vmax.xlane.f32.xlu2 %v7065_v20  ;;  %v2210_v61 = vpop.permute.xlu1 %2209 }
 0x460   : > { %2340 = vmax.xlane.f32.xlu1 %v7068_v7  ;;  %v2237_v10 = vadd.f32 %v7011_v18, %v2210_v61  ;;  %v7092_v61 = vadd.f32 %v8558_v31, %v2286_v33 }
 0x462   : > { %vm2253_vm3 = vcmp.gt.f32.partialorder %v2237_v10, 0.0  ;;  %v2269_v12 = vmul.f32 0.2, %v2237_v10 }
 0x463   : > { %2076 = vmatmul.bf16.gmra.mxu1 %v8554_v54 }
 0x464   : > { %v2285_v34 = vsel %vm2253_vm3, %v2237_v10, %v2269_v12  ;;  %v8559_v10 = vld [vmem:[#allocation19_spill] sm:$0xff]  ;;  %v8560_v12 = vpack.c.bf16 %v6809_v28, %v6793_v47  ;;  %v8562_v47 = vpack.c.bf16 %v6826_v46, %v6828_v52  ;;  %v7116_v28 = vld [vmem:[#allocation2 + $0x110] sm:$0xff] }
 0x465   : > { %v7085_v19 = vadd.f32 %v8557_v35, %v2285_v34  ;;  %v1921_v35 = vld [vmem:[#allocation4 + $0x90] sm:$0xff] }
 0x467   : > { %2350 = vmax.xlane.f32.xlu0 %v7079_v37  ;;  %2342 = vmax.xlane.f32.xlu2 %v7082_v26  ;;  %v2222_v49 = vpop.permute.xlu1 %2221 }
 0x468   : > { %2346 = vmax.xlane.f32.xlu1 %v7085_v19  ;;  %v2240_v43 = vadd.f32 %v7011_v18, %v2222_v49  ;;  %v8561_v18 = vpack.c.bf16 %v6818_v2, %v6816_v13  ;;  %v7120_v2 = vld [vmem:[#allocation2 + $0x100] sm:$0xff] }
 0x46a   : > { %vm2256_vm6 = vcmp.gt.f32.partialorder %v2240_v43, 0.0  ;;  %v2272_v53 = vmul.f32 0.2, %v2240_v43 }
 0x46c   : > { %v2288_v57 = vsel %vm2256_vm6, %v2240_v43, %v2272_v53  ;;  %v7276_v43 = vld [vmem:[#allocation2 + $0x178] sm:$0xff] }
 0x46d   : > { %v7095_v48 = vadd.f32 %v8559_v10, %v2288_v57  ;;  %v7214_v57 = vld [vmem:[#allocation2 + $0x158] sm:$0xff]  ;;  %8569 = vst [vmem:[#allocation27_spill] sm:$0xff] %v7276_v43 }
 0x46f   : > { %2348 = vmax.xlane.f32.xlu2 %v7092_v61 }
 0x470   : > { %2352 = vmax.xlane.f32.xlu1 %v7095_v48 }
 0x473   : > { %2081 = vmatmul.bf16.gmra.mxu1 %v8560_v12  ;;  %v7216_v12 = vld [vmem:[#allocation2 + $0x138] sm:$0xff] }
 0x47b   : > { %1947 = vperm.xlu0 %4875, %v6887_v63  }
 0x483   : > { %2086 = vmatmul.bf16.gmra.mxu1 %v8561_v18  ;;  %1952 = vperm.xlu0 %4875, %v6942_v29   ;;  %v7218_v18 = vld [vmem:[#allocation2 + $0x148] sm:$0xff] }
 0x487   : > { %1942 = vperm.xlu2 %4874, %v6894_v15  }
 0x489   : > { %1937 = vperm.xlu1 %4876, %v6920_v24   ;;  %v8563_v24 = vpack.c.bf16 %v6838_v14, %v6833_v32 }
 0x48b   : > { %1967 = vperm.xlu0 %4875, %v6961_v58  }
 0x48f   : > { %1962 = vperm.xlu2 %4874, %v6927_v42   ;;  %v8564_v42 = vpack.c.bf16 %v6858_v17, %v6846_v50 }
 0x491   : > { %1957 = vperm.xlu1 %4876, %v6909_v8   ;;  %v1920_v8 = vld [vmem:[#allocation4 + $0x88] sm:$0xff] }
 0x493   : > { %2091 = vmatmul.bf16.gmra.mxu1 %v8562_v47  ;;  %1982 = vperm.xlu0 %4875, %v6976_v40   ;;  %v8565_v40 = vpack.c.bf16 %v6849_v62, %v6851_v4  ;;  %v7186_v62 = vld [vmem:[#allocation2 + $0x130] sm:$0xff] }
 0x497   : > { %1977 = vperm.xlu2 %4874, %v6949_v59   ;;  %v7160_v59 = vld [vmem:[#allocation2 + $0x128] sm:$0xff] }
 0x499   : > { %1972 = vperm.xlu1 %4876, %v6939_v23   ;;  %v7150_v23 = vld [vmem:[#allocation2 + $0x108] sm:$0xff] }
 0x49a   : > { %v2327_v13 = vpop.xlane.xlu1 %2326 }
 0x49b   : > { %v7123_v63 = vmax.f32 %v7116_v28, %v2327_v13  ;;  %1997 = vperm.xlu0 %4875, %v6989_v1  }
 0x49c   : > { %v2323_v15 = vpop.xlane.xlu2 %2322 }
 0x49d   : > { %2871 = vst.msk [vmem:[#allocation2 + $0x110] sm:$0xff] %vm1152_vm2, %v7123_v63  ;;  %v7131_v52 = vmax.f32 %v7120_v2, %v2323_v15 }
 0x49f   : > { %2869 = vst.msk [vmem:[#allocation2 + $0x100] sm:$0xff] %vm1152_vm2, %v7131_v52  ;;  %1992 = vperm.xlu2 %4874, %v6966_v38  }
 0x4a1   : > { %1987 = vperm.xlu1 %4876, %v6958_v5   ;;  %v7162_v5 = vld [vmem:[#allocation2 + $0x118] sm:$0xff] }
 0x4a3   : > { %2096 = vmatmul.bf16.gmra.mxu1 %v8563_v24  ;;  %2012 = vperm.xlu0 %4875, %v6996_v39   ;;  %v7182_v39 = vld [vmem:[#allocation2 + $0x140] sm:$0xff] }
 0x4a7   : > { %2007 = vperm.xlu2 %4874, %v6993_v36  }
 0x4a9   : > { %2002 = vperm.xlu1 %4876, %v7006_v0   ;;  %v7184_v0 = vld [vmem:[#allocation2 + $0x120] sm:$0xff] }
 0x4af   : > { %2420 = vperm.xlu2 %4874, %v7131_v52  }
 0x4b1   : > { %2430 = vperm.xlu1 %4876, %v7123_v63  }
 0x4b3   : > { %2101 = vmatmul.bf16.gmra.mxu1 %v8564_v42 }
 0x4ba   : > { %v2325_v29 = vpop.xlane.xlu0 %2324 }
 0x4bb   : > { %v7153_v32 = vmax.f32 %v7150_v23, %v2325_v29 }
 0x4bd   : > { %2870 = vst.msk [vmem:[#allocation2 + $0x108] sm:$0xff] %vm1152_vm2, %v7153_v32  ;;  %2425 = vperm.xlu0 %4875, %v7153_v32  }
 0x4c2   : > { %v2333_v50 = vpop.xlane.xlu0 %2332  ;;  %v2329_v17 = vpop.xlane.xlu2 %2328 }
 0x4c3   : > { %v7165_v58 = vmax.f32 %v7160_v59, %v2333_v50  ;;  %v7168_v38 = vmax.f32 %v7162_v5, %v2329_v17  ;;  %2106 = vmatmul.bf16.gmra.mxu1 %v8565_v40 }
 0x4c5   : > { %2874 = vst.msk [vmem:[#allocation2 + $0x128] sm:$0xff] %vm1152_vm2, %v7165_v58  ;;  %2435 = vperm.xlu2 %4874, %v7168_v38  }
 0x4c6   : > { %2872 = vst.msk [vmem:[#allocation2 + $0x118] sm:$0xff] %vm1152_vm2, %v7168_v38 }
 0x4ca   : > { %v2339_v4 = vpop.xlane.xlu0 %2338  ;;  %v2331_v21 = vpop.xlane.xlu2 %2330 }
 0x4cb   : > { %v7189_v11 = vmax.f32 %v7182_v39, %v2339_v4  ;;  %v7192_v54 = vmax.f32 %v7184_v0, %v2331_v21  ;;  %v2335_v34 = vpop.xlane.xlu1 %2334  ;;  %v7244_v21 = vld [vmem:[#allocation2 + $0x170] sm:$0xff] }
 0x4cc   : > { %v7195_v41 = vmax.f32 %v7186_v62, %v2335_v34  ;;  %v7246_v34 = vld [vmem:[#allocation2 + $0x150] sm:$0xff] }
 0x4cd   : > { %2877 = vst.msk [vmem:[#allocation2 + $0x140] sm:$0xff] %vm1152_vm2, %v7189_v11  ;;  %2460 = vperm.xlu0 %4875, %v7189_v11   ;;  %2445 = vperm.xlu2 %4874, %v7165_v58  }
 0x4ce   : > { %2873 = vst.msk [vmem:[#allocation2 + $0x120] sm:$0xff] %vm1152_vm2, %v7192_v54  ;;  %2440 = vperm.xlu1 %4876, %v7192_v54  }
 0x4cf   : > { %2875 = vst.msk [vmem:[#allocation2 + $0x130] sm:$0xff] %vm1152_vm2, %v7195_v41 }
 0x4d0   : > { %v7212_v33 = vpop.f32.mrf.mxu1 }
 0x4d2   : > { %v2345_v47 = vpop.xlane.xlu0 %2344  ;;  %v2337_v13 = vpop.xlane.xlu2 %2336 }
 0x4d3   : > { %v7221_v15 = vmax.f32 %v7214_v57, %v2345_v47  ;;  %v7224_v24 = vmax.f32 %v7216_v12, %v2337_v13  ;;  %v2341_v42 = vpop.xlane.xlu1 %2340  ;;  %v7248_v47 = vld [vmem:[#allocation2 + $0x160] sm:$0xff] }
 0x4d4   : > { %v7227_v29 = vmax.f32 %v7218_v18, %v2341_v42  ;;  %8566 = vst [vmem:[#allocation28_spill] sm:$0xff] %v7248_v47 }
 0x4d5   : > { %2880 = vst.msk [vmem:[#allocation2 + $0x158] sm:$0xff] %vm1152_vm2, %v7221_v15  ;;  %2475 = vperm.xlu0 %4875, %v7221_v15   ;;  %2455 = vperm.xlu2 %4874, %v7224_v24  }
 0x4d6   : > { %2876 = vst.msk [vmem:[#allocation2 + $0x138] sm:$0xff] %vm1152_vm2, %v7224_v24  ;;  %2450 = vperm.xlu1 %4876, %v7195_v41  }
 0x4d7   : > { %2878 = vst.msk [vmem:[#allocation2 + $0x148] sm:$0xff] %vm1152_vm2, %v7227_v29 }
 0x4d8   : > { %v2074_v4 = vpop.f32.mrf.mxu1 }
 0x4da   : > { %v2351_v13 = vpop.xlane.xlu0 %2350  ;;  %v2343_v42 = vpop.xlane.xlu2 %2342 }
 0x4db   : > { %v7251_v17 = vmax.f32 %v7244_v21, %v2351_v13  ;;  %v7254_v53 = vmax.f32 %v7246_v34, %v2343_v42  ;;  %v2347_v40 = vpop.xlane.xlu1 %2346  ;;  %v7274_v42 = vld [vmem:[#allocation2 + $0x168] sm:$0xff] }
 0x4dc   : > { %v7257_v50 = vmax.f32 %v7248_v47, %v2347_v40  ;;  %8568 = vst [vmem:[#allocation25_spill] sm:$0xff] %v7274_v42 }
 0x4dd   : > { %2883 = vst.msk [vmem:[#allocation2 + $0x170] sm:$0xff] %vm1152_vm2, %v7251_v17  ;;  %2490 = vperm.xlu0 %4875, %v7251_v17   ;;  %2470 = vperm.xlu2 %4874, %v7254_v53  }
 0x4de   : > { %8567 = vst [vmem:[#allocation30_spill] sm:$0xff] %v7257_v50  ;;  %2465 = vperm.xlu1 %4876, %v7227_v29  }
 0x4df   : > { %2879 = vst.msk [vmem:[#allocation2 + $0x150] sm:$0xff] %vm1152_vm2, %v7254_v53 }
 0x4e0   : > { %2881 = vst.msk [vmem:[#allocation2 + $0x160] sm:$0xff] %vm1152_vm2, %v7257_v50  ;;  %v2077_v13 = vpop.f32.mrf.mxu1 }
 0x4e2   : > { %v2349_v49 = vpop.xlane.xlu2 %2348 }
 0x4e3   : > { %v7279_v14 = vmax.f32 %v7274_v42, %v2349_v49  ;;  %v2353_v1 = vpop.xlane.xlu1 %2352 }
 0x4e4   : > { %v7282_v46 = vmax.f32 %v7276_v43, %v2353_v1  ;;  %v1924_v43 = vld [vmem:[#allocation4 + $0xa8] sm:$0xff] }
 0x4e5   : > { %8570 = vst [vmem:[#allocation40_spill] sm:$0xff] %v7279_v14  ;;  %2485 = vperm.xlu2 %4874, %v7279_v14  }
 0x4e6   : > { %8571 = vst [vmem:[#allocation41_spill] sm:$0xff] %v7282_v46  ;;  %2480 = vperm.xlu1 %4876, %v7257_v50  }
 0x4e7   : > { %2882 = vst.msk [vmem:[#allocation2 + $0x168] sm:$0xff] %vm1152_vm2, %v7279_v14 }
 0x4e8   : > { %2884 = vst.msk [vmem:[#allocation2 + $0x178] sm:$0xff] %vm1152_vm2, %v7282_v46  ;;  %v2079_v49 = vpop.f32.mrf.mxu1 }
 0x4ea   : > { %v1943_v1 = vpop.permute.xlu2 %1942 }
 0x4eb   : > { %v2016_v10 = vmul.f32 %v1943_v1, %v1920_v8 }
 0x4ed   : > { %v2113_v55 = vadd.f32 %v2074_v4, %v2016_v10  ;;  %v1948_v40 = vpop.permute.xlu0 %1947  ;;  %v1919_v10 = vld [vmem:[#allocation4 + $0x80] sm:$0xff] }
 0x4ee   : > { %v2017_v31 = vmul.f32 %v1948_v40, %v1921_v35  ;;  %2495 = vperm.xlu1 %4876, %v7282_v46  }
 0x4ef   : > { %2129 = vst.msk [vmem:[#allocation4 + $0x88] sm:$0xff] %vm1402_vm4, %v2113_v55 }
 0x4f0   : > { %v2114_v44 = vadd.f32 %v2077_v13, %v2017_v31  ;;  %v2082_v9 = vpop.f32.mrf.mxu1  ;;  %v1925_v31 = vld [vmem:[#allocation4 + $0xb0] sm:$0xff] }
 0x4f2   : > { %2130 = vst.msk [vmem:[#allocation4 + $0x90] sm:$0xff] %vm1402_vm4, %v2114_v44  ;;  %v1963_v36 = vpop.permute.xlu2 %1962 }
 0x4f3   : > { %v2020_v50 = vmul.f32 %v1963_v36, %v1924_v43  ;;  %v1923_v36 = vld [vmem:[#allocation4 + $0xa0] sm:$0xff] }
 0x4f5   : > { %v1953_v14 = vpop.permute.xlu0 %1952 }
 0x4f6   : > { %v2018_v42 = vmul.f32 %v1953_v14, %v1922_v6 }
 0x4f8   : > { %v2115_v47 = vadd.f32 %v2079_v49, %v2018_v42  ;;  %v2084_v8 = vpop.f32.mrf.mxu1 }
 0x4f9   : > { %v2117_v1 = vadd.f32 %v2084_v8, %v2020_v50  ;;  %v1926_v8 = vld [vmem:[#allocation4 + $0xb8] sm:$0xff] }
 0x4fa   : > { %2131 = vst.msk [vmem:[#allocation4 + $0x98] sm:$0xff] %vm1402_vm4, %v2115_v47  ;;  %v1978_v35 = vpop.permute.xlu2 %1977 }
 0x4fb   : > { %2133 = vst.msk [vmem:[#allocation4 + $0xa8] sm:$0xff] %vm1402_vm4, %v2117_v1  ;;  %v1938_v55 = vpop.permute.xlu1 %1937 }
 0x4fc   : > { %v2015_v4 = vmul.f32 %v1938_v55, %v1919_v10 }
 0x4fd   : > { %v1968_v40 = vpop.permute.xlu0 %1967 }
 0x4fe   : > { %v2112_v44 = vadd.f32 %v7212_v33, %v2015_v4  ;;  %v2021_v13 = vmul.f32 %v1968_v40, %v1925_v31  ;;  %v1927_v33 = vld [vmem:[#allocation4 + $0xc0] sm:$0xff] }
 0x4ff   : > { %v2023_v4 = vmul.f32 %v1978_v35, %v1927_v33 }
 0x500   : > { %2128 = vst.msk [vmem:[#allocation4 + $0x80] sm:$0xff] %vm1402_vm4, %v2112_v44  ;;  %v2087_v6 = vpop.f32.mrf.mxu1 }
 0x501   : > { %v2118_v14 = vadd.f32 %v2087_v6, %v2021_v13 }
 0x502   : > { %v1993_v43 = vpop.permute.xlu2 %1992 }
 0x503   : > { %2134 = vst.msk [vmem:[#allocation4 + $0xb0] sm:$0xff] %vm1402_vm4, %v2118_v14  ;;  %v1958_v50 = vpop.permute.xlu1 %1957 }
 0x504   : > { %v2019_v47 = vmul.f32 %v1958_v50, %v1923_v36  ;;  %v1928_v36 = vld [vmem:[#allocation4 + $0xc8] sm:$0xff] }
 0x505   : > { %v1983_v6 = vpop.permute.xlu0 %1982 }
 0x506   : > { %v2116_v42 = vadd.f32 %v2082_v9, %v2019_v47  ;;  %v2024_v47 = vmul.f32 %v1983_v6, %v1928_v36 }
 0x508   : > { %2132 = vst.msk [vmem:[#allocation4 + $0xa0] sm:$0xff] %vm1402_vm4, %v2116_v42  ;;  %v2089_v49 = vpop.f32.mrf.mxu1 }
 0x50a   : > { %v7303_v1 = vpop.permute.xlu2 %2007 }
 0x50b   : > { %v1973_v10 = vpop.permute.xlu1 %1972 }
 0x50c   : > { %v2022_v55 = vmul.f32 %v1973_v10, %v1926_v8 }
 0x50d   : > { %v1998_v10 = vpop.permute.xlu0 %1997 }
 0x50e   : > { %v2119_v31 = vadd.f32 %v2089_v49, %v2022_v55  ;;  %v1929_v49 = vld [vmem:[#allocation4 + $0xd0] sm:$0xff] }
 0x510   : > { %2135 = vst.msk [vmem:[#allocation4 + $0xb8] sm:$0xff] %vm1402_vm4, %v2119_v31  ;;  %v2092_v40 = vpop.f32.mrf.mxu1 }
 0x511   : > { %v2120_v44 = vadd.f32 %v2092_v40, %v2023_v4 }
 0x512   : > { %v2421_v13 = vpop.permute.xlu2 %2420 }
 0x513   : > { %2136 = vst.msk [vmem:[#allocation4 + $0xc0] sm:$0xff] %vm1402_vm4, %v2120_v44  ;;  %v2498_v9 = vsub.f32 %v7020_v27, %v2421_v13  ;;  %v1988_v14 = vpop.permute.xlu1 %1987  ;;  %v1930_v13 = vld [vmem:[#allocation4 + $0xd8] sm:$0xff] }
 0x514   : > { %v2025_v33 = vmul.f32 %v1988_v14, %v1929_v49  ;;  %v1931_v49 = vld [vmem:[#allocation4 + $0xe0] sm:$0xff] }
 0x515   : > { %v2514_v50 = vmul.f32 1.442695, %v2498_v9  ;;  %v2026_v9 = vmul.f32 %v1993_v43, %v1930_v13  ;;  %v2013_v36 = vpop.permute.xlu0 %2012 }
 0x517   : > { %5011 = vpow2.f32 %v2514_v50 }
 0x518   : > { %v2094_v42 = vpop.f32.mrf.mxu1 }
 0x519   : > { %v2121_v46 = vadd.f32 %v2094_v42, %v2024_v47 }
 0x51b   : > { %2137 = vst.msk [vmem:[#allocation4 + $0xc8] sm:$0xff] %vm1402_vm4, %v2121_v46  ;;  %v2003_v35 = vpop.permute.xlu1 %2002 }
 0x51d   : > { %v7309_v8 = vpop.eup %5011 }
 0x51e   : > { %2579 = vadd.xlane.f32.xlu2 %v7309_v8 }
 0x51f   : > { %v2436_v55 = vpop.permute.xlu2 %2435 }
 0x520   : > { %v2501_v27 = vsub.f32 %v7036_v60, %v2436_v55  ;;  %v2097_v31 = vpop.f32.mrf.mxu1 }
 0x521   : > { %v2122_v4 = vadd.f32 %v2097_v31, %v2025_v33 }
 0x522   : > { %v2520_v40 = vmul.f32 1.442695, %v2501_v27 }
 0x523   : > { %2138 = vst.msk [vmem:[#allocation4 + $0xd0] sm:$0xff] %vm1402_vm4, %v2122_v4  ;;  %v2431_v44 = vpop.permute.xlu1 %2430 }
 0x524   : > { %5013 = vpow2.f32 %v2520_v40  ;;  %v2500_v46 = vsub.f32 %v7016_v51, %v2431_v44  ;;  %v2027_v51 = vmul.f32 %v1998_v10, %v1931_v49  ;;  %v1932_v44 = vld [vmem:[#allocation4 + $0xe8] sm:$0xff] }
 0x525   : > { %v2028_v10 = vmul.f32 %v2003_v35, %v1932_v44 }
 0x526   : > { %v2518_v6 = vmul.f32 1.442695, %v2500_v46 }
 0x527   : > { %v2446_v50 = vpop.permute.xlu2 %2445 }
 0x528   : > { %5015 = vpow2.f32 %v2518_v6  ;;  %v2503_v14 = vsub.f32 %v7033_v22, %v2446_v50  ;;  %v2099_v47 = vpop.f32.mrf.mxu1 }
 0x529   : > { %v2123_v42 = vadd.f32 %v2099_v47, %v2026_v9 }
 0x52a   : > { %v7316_v60 = vpop.eup %5013  ;;  %v2524_v33 = vmul.f32 1.442695, %v2503_v14  ;;  %v1933_v14 = vld [vmem:[#allocation4 + $0xf0] sm:$0xff] }
 0x52b   : > { %2139 = vst.msk [vmem:[#allocation4 + $0xd8] sm:$0xff] %vm1402_vm4, %v2123_v42  ;;  %2585 = vadd.xlane.f32.xlu2 %v7316_v60  ;;  %v2029_v47 = vmul.f32 %v7303_v1, %v1933_v14 }
 0x52c   : > { %5017 = vpow2.f32 %v2524_v33 }
 0x52e   : > { %v7320_v55 = vpop.eup %5015 }
 0x52f   : > { %2583 = vadd.xlane.f32.xlu1 %v7320_v55  ;;  %v2426_v43 = vpop.permute.xlu0 %2425  ;;  %v2456_v13 = vpop.permute.xlu2 %2455 }
 0x530   : > { %v2499_v22 = vsub.f32 %v7026_v25, %v2426_v43  ;;  %v2102_v31 = vpop.f32.mrf.mxu1 }
 0x531   : > { %v2124_v4 = vadd.f32 %v2102_v31, %v2027_v51  ;;  %v2505_v31 = vsub.f32 %v7065_v20, %v2456_v13 }
 0x532   : > { %v2516_v40 = vmul.f32 1.442695, %v2499_v22  ;;  %v7327_v46 = vpop.eup %5017 }
 0x533   : > { %2140 = vst.msk [vmem:[#allocation4 + $0xe0] sm:$0xff] %vm1402_vm4, %v2124_v4  ;;  %v2528_v1 = vmul.f32 1.442695, %v2505_v31 }
 0x534   : > { %5019 = vpow2.f32 %v2516_v40 }
 0x537   : > { %2589 = vadd.xlane.f32.xlu1 %v7327_v46  ;;  %v2471_v42 = vpop.permute.xlu2 %2470 }
 0x538   : > { %v2104_v6 = vpop.f32.mrf.mxu1  ;;  %v2508_v40 = vsub.f32 %v7082_v26, %v2471_v42 }
 0x539   : > { %v2125_v9 = vadd.f32 %v2104_v6, %v2028_v10  ;;  %v1934_v10 = vld [vmem:[#allocation4 + $0xf8] sm:$0xff] }
 0x53a   : > { %v7330_v50 = vpop.eup %5019  ;;  %v2030_v6 = vmul.f32 %v2013_v36, %v1934_v10 }
 0x53b   : > { %2141 = vst.msk [vmem:[#allocation4 + $0xe8] sm:$0xff] %vm1402_vm4, %v2125_v9  ;;  %2581 = vadd.xlane.f32.xlu0 %v7330_v50  ;;  %v2756_v25 = vpack.c.bf16 %v7330_v50, %v7309_v8  ;;  %v2534_v9 = vmul.f32 1.442695, %v2508_v40 }
 0x53f   : > { %v2461_v49 = vpop.permute.xlu0 %2460 }
 0x540   : > { %v2506_v35 = vsub.f32 %v7047_v45, %v2461_v49  ;;  %v2441_v33 = vpop.permute.xlu1 %2440  ;;  %v2107_v51 = vpop.f32.mrf.mxu1 }
 0x541   : > { %v2502_v43 = vsub.f32 %v7050_v30, %v2441_v33  ;;  %v2126_v22 = vadd.f32 %v2107_v51, %v2029_v47 }
 0x542   : > { %v2530_v4 = vmul.f32 1.442695, %v2506_v35 }
 0x543   : > { %v2522_v44 = vmul.f32 1.442695, %v2502_v43  ;;  %2142 = vst.msk [vmem:[#allocation4 + $0xf0] sm:$0xff] %vm1402_vm4, %v2126_v22  ;;  %v2486_v22 = vpop.permute.xlu2 %2485 }
 0x544   : > { %5021 = vpow2.f32 %v2530_v4 }
 0x545   : > { %5023 = vpow2.f32 %v2522_v44 }
 0x546   : > { %5025 = vpow2.f32 %v2528_v1  ;;  %v8574_v1 = vsub.f32 %v7116_v28, %v7123_v63  ;;  %v5177_v63 = vld [vmem:[%s5550_s16 + $0x18] sm:$0xff] }
 0x547   : > { %v2476_v45 = vpop.permute.xlu0 %2475  ;;  %5027 = vpow2.f32 %v2534_v9 }
 0x548   : > { %v2509_v14 = vsub.f32 %v7062_v56, %v2476_v45  ;;  %v2451_v49 = vpop.permute.xlu1 %2450  ;;  %v2109_v30 = vpop.f32.mrf.mxu1 }
 0x549   : > { %v2504_v47 = vsub.f32 %v7053_v3, %v2451_v49  ;;  %v2127_v20 = vadd.f32 %v2109_v30, %v2030_v6  ;;  %v2511_v6 = vsub.f32 %v7092_v61, %v2486_v22  ;;  %v7396_v22 = vld [vmem:[%s5540_s9] sm:$0xff] }
 0x54a   : > { %v7344_v13 = vpop.eup %5021  ;;  %v2536_v26 = vmul.f32 1.442695, %v2509_v14  ;;  %v5174_v61 = vld [vmem:[%s5550_s16] sm:$0xff] }
 0x54b   : > { %v2526_v42 = vmul.f32 1.442695, %v2504_v47  ;;  %2143 = vst.msk [vmem:[#allocation4 + $0xf8] sm:$0xff] %vm1402_vm4, %v2127_v20  ;;  %2595 = vadd.xlane.f32.xlu1 %v7344_v13  ;;  %v7348_v36 = vpop.eup %5023 }
 0x54c   : > { %5029 = vpow2.f32 %v2536_v26  ;;  %2587 = vadd.xlane.f32.xlu0 %v7348_v36  ;;  %v7353_v35 = vpop.eup %5025  ;;  %v8601_v8 = vpack.c.bf16 %v7327_v46, %v7348_v36 }
 0x54d   : > { %5031 = vpow2.f32 %v2526_v42  ;;  %v7356_v43 = vpop.eup %5027 }
 0x54f   : > { %v2491_v3 = vpop.permute.xlu0 %2490 }
 0x550   : > { %v2512_v33 = vsub.f32 %v7079_v37, %v2491_v3  ;;  %v2466_v51 = vpop.permute.xlu1 %2465  ;;  %v5175_v37 = vld [vmem:[%s5550_s16 + $0x20] sm:$0xff] }
 0x551   : > { %v2507_v31 = vsub.f32 %v7068_v7, %v2466_v51  ;;  %v2540_v7 = vmul.f32 1.442695, %v2511_v6  ;;  %v8572_v6 = vsub.f32 %v7120_v2, %v7131_v52  ;;  %v5172_v2 = vld [vmem:[%s5550_s16 + $0x8] sm:$0xff] }
 0x552   : > { %v7359_v4 = vpop.eup %5029  ;;  %v2542_v40 = vmul.f32 1.442695, %v2512_v33  ;;  %v5415_v33 = vmov 3  }
 0x553   : > { %v7361_v44 = vpop.eup %5031  ;;  %v2532_v10 = vmul.f32 1.442695, %v2507_v31  ;;  %2601 = vadd.xlane.f32.xlu1 %v7359_v4  ;;  %4879 = vset.pattern.permute.xlu0 %v5415_v33  ;;  %v7400_v31 = vld [vmem:[%s5540_s9 + $0x8] sm:$0xff] }
 0x554   : > { %5033 = vpow2.f32 %v2542_v40  ;;  %2591 = vadd.xlane.f32.xlu2 %v7361_v44  ;;  %2593 = vadd.xlane.f32.xlu0 %v7353_v35  ;;  %v7404_v40 = vld [vmem:[%s5540_s9 + $0x18] sm:$0xff] }
 0x555   : > { %5035 = vpow2.f32 %v2532_v10  ;;  %4878 = vset.pattern.permute.xlu1 %v5415_v33  ;;  %4877 = vset.pattern.permute.xlu2 %v5415_v33  ;;  %v7408_v10 = vld [vmem:[%s5540_s9 + $0x20] sm:$0xff] }
 0x556   : > { %5037 = vpow2.f32 %v2540_v7  ;;  %v2386_v7 = vmul.f32 1.442695, %v8572_v6 }
 0x558   : > { %v2481_v9 = vpop.permute.xlu1 %2480 }
 0x559   : > { %v2510_v45 = vsub.f32 %v7085_v19, %v2481_v9  ;;  %v7415_v9 = vld [vmem:[%s5540_s9 + $0x10] sm:$0xff] }
 0x55a   : > { %v7372_v14 = vpop.eup %5033 }
 0x55b   : > { %v7374_v49 = vpop.eup %5035  ;;  %v2538_v30 = vmul.f32 1.442695, %v2510_v45  ;;  %2607 = vadd.xlane.f32.xlu1 %v7372_v14  ;;  %v7419_v45 = vld [vmem:[%s5540_s9 + $0x30] sm:$0xff] }
 0x55c   : > { %2597 = vadd.xlane.f32.xlu2 %v7374_v49  ;;  %2599 = vadd.xlane.f32.xlu0 %v7356_v43  ;;  %v7382_v20 = vpop.eup %5037 }
 0x55d   : > { %5039 = vpow2.f32 %v2538_v30  ;;  %v7423_v30 = vld [vmem:[%s5540_s9 + $0x38] sm:$0xff] }
 0x560   : > { %v2496_v47 = vpop.permute.xlu1 %2495 }
 0x561   : > { %v2513_v19 = vsub.f32 %v7095_v48, %v2496_v47  ;;  %v7427_v47 = vld [vmem:[%s5540_s9 + $0x28] sm:$0xff]  ;;  %s5421_s9 = smov (!%p4726_p0), 96  }
 0x563   : > { %v7384_v26 = vpop.eup %5039  ;;  %v2544_v42 = vmul.f32 1.442695, %v2513_v19  ;;  %v2547_v19 = vld [vmem:[#allocation3 + $0x100] sm:$0xff] }
 0x564   : > { %2603 = vadd.xlane.f32.xlu2 %v7384_v26  ;;  %2605 = vadd.xlane.f32.xlu0 %v7382_v20 }
 0x565   : > { %5041 = vpow2.f32 %v2544_v42  ;;  %v8573_v42 = vsub.f32 %v7162_v5, %v7168_v38  ;;  %v5176_v5 = vld [vmem:[%s5550_s16 + $0x38] sm:$0xff] }
 0x566   : > { %5043 = vpow2.f32 %v2386_v7  ;;  %v5173_v7 = vld [vmem:[%s5550_s16 + $0x10] sm:$0xff] }
 0x567   : > { %v2392_v33 = vmul.f32 1.442695, %v8573_v42  ;;  %v2549_v42 = vld [vmem:[#allocation3 + $0x110] sm:$0xff] }
 0x569   : > { %5045 = vpow2.f32 %v2392_v33 }
 0x56b   : > { %v7390_v48 = vpop.eup %5041 }
 0x56c   : > { %2609 = vadd.xlane.f32.xlu2 %v7390_v48  ;;  %v7431_v52 = vpop.eup %5043 }
 0x56d   : > { %v2563_v6 = vmul.f32 %v7431_v52, %v2547_v19  ;;  %v2550_v19 = vld [vmem:[#allocation3 + $0x118] sm:$0xff] }
 0x56f   : > { %v7445_v38 = vpop.eup %5045 }
 0x574   : > { %2764 = vrot.lane.b32.xlu1 %v7396_v22, %s5416_s28 }
 0x578   : > { %2766 = vrot.lane.b32.xlu0 %v7400_v31, %s5416_s28 }
 0x57c   : > { %2770 = vrot.lane.b32.xlu1 %v7404_v40, %s5416_s28 }
 0x580   : > { %2772 = vrot.lane.b32.xlu0 %v7408_v10, %s5416_s28 }
 0x584   : > { %2768 = vrot.lane.b32.xlu2 %v7415_v9, %s5416_s28  ;;  %2776 = vrot.lane.b32.xlu1 %v7419_v45, %s5416_s28 }
 0x588   : > { %2778 = vrot.lane.b32.xlu0 %v7423_v30, %s5416_s28 }
 0x58c   : > { %2774 = vrot.lane.b32.xlu2 %v7427_v47, %s5416_s28  ;;  %2890 = vperm.xlu1 %4878, %v5172_v2   ;;  %v2390_v2 = vmul.f32 1.442695, %v8574_v1  ;;  %v5178_v1 = vld [vmem:[%s5550_s16 + $0x30] sm:$0xff] }
 0x58e   : > { %5047 = vpow2.f32 %v2390_v2 }
 0x590   : > { %2894 = vperm.xlu0 %4879, %v5173_v7  }
 0x591   : > { %v2580_v51 = vpop.xlane.xlu2 %2579 }
 0x592   : > { %v2611_v3 = vadd.f32 %v2580_v51, %v2563_v6  ;;  %v8575_v51 = vsub.f32 %v7160_v59, %v7165_v58  ;;  %v8576_v6 = vsub.f32 %v7150_v23, %v7153_v32  ;;  %v5179_v59 = vld [vmem:[%s5550_s16 + $0x50] sm:$0xff]  ;;  %v2552_v32 = vld [vmem:[#allocation3 + $0x128] sm:$0xff] }
 0x594   : > { %2627 = vst.msk [vmem:[#allocation3 + $0x100] sm:$0xff] %vm1152_vm2, %v2611_v3  ;;  %2886 = vperm.xlu2 %4877, %v5174_v61   ;;  %2902 = vperm.xlu1 %4878, %v5175_v37   ;;  %v2396_v28 = vmul.f32 1.442695, %v8575_v51  ;;  %v2566_v61 = vmul.f32 %v7445_v38, %v2550_v19  ;;  %v7453_v37 = vpop.eup %5047  ;;  %v2388_v7 = vmul.f32 1.442695, %v8576_v6  ;;  %v5180_v19 = vld [vmem:[%s5550_s16 + $0x28] sm:$0xff] }
 0x595   : > { %v2565_v58 = vmul.f32 %v7453_v37, %v2549_v42  ;;  %v5181_v51 = vld [vmem:[%s5550_s16 + $0x48] sm:$0xff]  ;;  %v5184_v6 = vld [vmem:[%s5550_s16 + $0x60] sm:$0xff] }
 0x596   : > { %5049 = vpow2.f32 %v2396_v28  ;;  %v5182_v28 = vld [vmem:[%s5550_s16 + $0x68] sm:$0xff] }
 0x597   : > { %5051 = vpow2.f32 %v2388_v7 }
 0x598   : > { %2914 = vperm.xlu0 %4879, %v5176_v5  }
 0x59c   : > { %2898 = vperm.xlu2 %4877, %v5177_v63   ;;  %2910 = vperm.xlu1 %4878, %v5178_v1   ;;  %v7464_v23 = vpop.eup %5049 }
 0x59d   : > { %v2568_v63 = vmul.f32 %v7464_v23, %v2552_v32  ;;  %v7468_v1 = vpop.eup %5051  ;;  %v5185_v32 = vld [vmem:[%s5550_s16 + $0x58] sm:$0xff] }
 0x59e   : > { %v2586_v3 = vpop.xlane.xlu2 %2585 }
 0x59f   : > { %v2614_v33 = vadd.f32 %v2586_v3, %v2566_v61  ;;  %v2548_v3 = vld [vmem:[#allocation3 + $0x108] sm:$0xff] }
 0x5a0   : > { %2926 = vperm.xlu0 %4879, %v5179_v59   ;;  %v2564_v7 = vmul.f32 %v7468_v1, %v2548_v3 }
 0x5a1   : > { %2630 = vst.msk [vmem:[#allocation3 + $0x118] sm:$0xff] %vm1152_vm2, %v2614_v33  ;;  %v5183_v33 = vld [vmem:[%s5550_s16 + $0x40] sm:$0xff] }
 0x5a2   : > { %v2584_v2 = vpop.xlane.xlu1 %2583 }
 0x5a3   : > { %v2613_v5 = vadd.f32 %v2584_v2, %v2565_v58  ;;  %v8577_v2 = vsub.f32 %v7182_v39, %v7189_v11  ;;  %v8580_v11 = vsub.f32 %v7186_v62, %v7195_v41 }
 0x5a4   : > { %2906 = vperm.xlu2 %4877, %v5180_v19   ;;  %2922 = vperm.xlu1 %4878, %v5181_v51   ;;  %v8578_v19 = vsub.f32 %v7184_v0, %v7192_v54  ;;  %v8581_v0 = vsub.f32 %v7216_v12, %v7224_v24  ;;  %v8582_v12 = vsub.f32 %v7244_v21, %v7251_v17  ;;  %v2553_v17 = vld [vmem:[#allocation3 + $0x130] sm:$0xff] }
 0x5a5   : > { %2629 = vst.msk [vmem:[#allocation3 + $0x110] sm:$0xff] %vm1152_vm2, %v2613_v5  ;;  %v2402_v5 = vmul.f32 1.442695, %v8577_v2 }
 0x5a6   : > { %v2394_v51 = vmul.f32 1.442695, %v8578_v19  ;;  %v2400_v54 = vmul.f32 1.442695, %v8581_v0  ;;  %v2414_v24 = vmul.f32 1.442695, %v8582_v12 }
 0x5a7   : > { %5053 = vpow2.f32 %v2402_v5 }
 0x5a8   : > { %2938 = vperm.xlu0 %4879, %v5182_v28   ;;  %v5186_v28 = vld [vmem:[%s5550_s16 + $0x78] sm:$0xff]  ;;  %5055 = vpow2.f32 %v2394_v51  ;;  %v8584_v51 = vsub.f32 %v7246_v34, %v7254_v53 }
 0x5aa   : > { %v2590_v61 = vpop.xlane.xlu1 %2589 }
 0x5ab   : > { %v2616_v42 = vadd.f32 %v2590_v61, %v2568_v63  ;;  %v8579_v63 = vsub.f32 %v7214_v57, %v7221_v15  ;;  %v2398_v61 = vmul.f32 1.442695, %v8580_v11 }
 0x5ac   : > { %2918 = vperm.xlu2 %4877, %v5183_v33   ;;  %2934 = vperm.xlu1 %4878, %v5184_v6   ;;  %v5187_v6 = vld [vmem:[%s5550_s16 + $0x70] sm:$0xff] }
 0x5ad   : > { %2632 = vst.msk [vmem:[#allocation3 + $0x128] sm:$0xff] %vm1152_vm2, %v2616_v42  ;;  %v2408_v39 = vmul.f32 1.442695, %v8579_v63  ;;  %v7490_v3 = vpop.eup %5053  ;;  %v2555_v42 = vld [vmem:[#allocation3 + $0x140] sm:$0xff] }
 0x5ae   : > { %v2582_v59 = vpop.xlane.xlu0 %2581  ;;  %v7495_v33 = vpop.eup %5055  ;;  %v2571_v57 = vmul.f32 %v7490_v3, %v2555_v42  ;;  %v8585_v42 = vld [vmem:[#allocation28_spill] sm:$0xff] }
 0x5af   : > { %v2612_v58 = vadd.f32 %v2582_v59, %v2564_v7  ;;  %5057 = vpow2.f32 %v2408_v39  ;;  %v2551_v7 = vld [vmem:[#allocation3 + $0x120] sm:$0xff] }
 0x5b0   : > { %4880 = vset.pattern.permute.xlu0 %v8532_v16  ;;  %5059 = vpow2.f32 %v2398_v61  ;;  %v2567_v41 = vmul.f32 %v7495_v33, %v2551_v7 }
 0x5b1   : > { %2628 = vst.msk [vmem:[#allocation3 + $0x108] sm:$0xff] %vm1152_vm2, %v2612_v58  ;;  %5061 = vpow2.f32 %v2400_v54  ;;  %v8583_v58 = vsub.f32 %v7218_v18, %v7227_v29  ;;  %v2554_v18 = vld [vmem:[#allocation3 + $0x138] sm:$0xff] }
 0x5b2   : > { %5063 = vpow2.f32 %v2414_v24 }
 0x5b3   : > { %v2404_v2 = vmul.f32 1.442695, %v8583_v58 }
 0x5b4   : > { %2930 = vperm.xlu2 %4877, %v5185_v32   ;;  %2946 = vperm.xlu1 %4878, %v5186_v28   ;;  %v2406_v32 = vmul.f32 1.442695, %v8584_v51  ;;  %v2558_v28 = vld [vmem:[#allocation3 + $0x158] sm:$0xff]  ;;  %v2557_v51 = vld [vmem:[#allocation3 + $0x150] sm:$0xff] }
 0x5b5   : > { %v7508_v19 = vpop.eup %5057  ;;  %5065 = vpow2.f32 %v2404_v2  ;;  %v2556_v2 = vld [vmem:[#allocation3 + $0x148] sm:$0xff] }
 0x5b6   : > { %v7513_v63 = vpop.eup %5059  ;;  %v2574_v29 = vmul.f32 %v7508_v19, %v2558_v28  ;;  %5067 = vpow2.f32 %v2406_v32 }
 0x5b7   : > { %v7516_v21 = vpop.eup %5061  ;;  %v2569_v39 = vmul.f32 %v7513_v63, %v2553_v17 }
 0x5b8   : > { %v2570_v34 = vmul.f32 %v7516_v21, %v2554_v18 }
 0x5bc   : > { %2942 = vperm.xlu2 %4877, %v5187_v6   ;;  %4881 = vset.pattern.permute.xlu1 %v8532_v16  ;;  %v8586_v6 = vld [vmem:[#allocation30_spill] sm:$0xff] }
 0x5bd   : > { %v8587_v7 = vsub.f32 %v8585_v42, %v8586_v6 }
 0x5be   : > { %v2596_v62 = vpop.xlane.xlu1 %2595 }
 0x5bf   : > { %v2619_v15 = vadd.f32 %v2596_v62, %v2571_v57  ;;  %v2588_v59 = vpop.xlane.xlu0 %2587  ;;  %v2410_v57 = vmul.f32 1.442695, %v8587_v7  ;;  %v2559_v7 = vld [vmem:[#allocation3 + $0x160] sm:$0xff] }
 0x5c0   : > { %v2615_v5 = vadd.f32 %v2588_v59, %v2567_v41  ;;  %v8588_v41 = vld [vmem:[#allocation25_spill] sm:$0xff]  ;;  %v2561_v59 = vld [vmem:[#allocation3 + $0x170] sm:$0xff] }
 0x5c1   : > { %2635 = vst.msk [vmem:[#allocation3 + $0x140] sm:$0xff] %vm1152_vm2, %v2619_v15  ;;  %v8589_v15 = vld [vmem:[#allocation40_spill] sm:$0xff]  ;;  %5069 = vpow2.f32 %v2410_v57 }
 0x5c2   : > { %2631 = vst.msk [vmem:[#allocation3 + $0x120] sm:$0xff] %vm1152_vm2, %v2615_v5  ;;  %v8590_v12 = vsub.f32 %v8588_v41, %v8589_v15 }
 0x5c4   : > { %4882 = vset.pattern.permute.xlu2 %v8532_v16  ;;  %v7526_v16 = vpop.eup %5063  ;;  %v2412_v24 = vmul.f32 1.442695, %v8590_v12 }
 0x5c5   : > { %v7532_v58 = vpop.eup %5065  ;;  %v2577_v32 = vmul.f32 %v7526_v16, %v2561_v59 }
 0x5c6   : > { %v2602_v53 = vpop.xlane.xlu1 %2601  ;;  %v7535_v5 = vpop.eup %5067  ;;  %5071 = vpow2.f32 %v2412_v24  ;;  %v2572_v28 = vmul.f32 %v7532_v58, %v2556_v2 }
 0x5c7   : > { %v2592_v11 = vpop.xlane.xlu2 %2591  ;;  %v2622_v61 = vadd.f32 %v2602_v53, %v2574_v29  ;;  %v2594_v0 = vpop.xlane.xlu0 %2593  ;;  %v2573_v18 = vmul.f32 %v7535_v5, %v2557_v51 }
 0x5c8   : > { %v2617_v54 = vadd.f32 %v2592_v11, %v2569_v39  ;;  %v2618_v62 = vadd.f32 %v2594_v0, %v2570_v34  ;;  %v8591_v11 = vld [vmem:[#allocation27_spill] sm:$0xff]  ;;  %v7545_v6 = vpop.eup %5069 }
 0x5c9   : > { %2638 = vst.msk [vmem:[#allocation3 + $0x158] sm:$0xff] %vm1152_vm2, %v2622_v61  ;;  %v8592_v61 = vld [vmem:[#allocation41_spill] sm:$0xff]  ;;  %v2575_v41 = vmul.f32 %v7545_v6, %v2559_v7 }
 0x5ca   : > { %2633 = vst.msk [vmem:[#allocation3 + $0x130] sm:$0xff] %vm1152_vm2, %v2617_v54  ;;  %v8593_v0 = vsub.f32 %v8591_v11, %v8592_v61 }
 0x5cb   : > { %2634 = vst.msk [vmem:[#allocation3 + $0x138] sm:$0xff] %vm1152_vm2, %v2618_v62  ;;  %v2560_v62 = vld [vmem:[#allocation3 + $0x168] sm:$0xff] }
 0x5cc   : > { %v2416_v54 = vmul.f32 1.442695, %v8593_v0  ;;  %v7548_v57 = vpop.eup %5071  ;;  %v5188_v0 = vld [vmem:[%s5545_s13] sm:$0xf] }
 0x5cd   : > { %v2576_v15 = vmul.f32 %v7548_v57, %v2560_v62 }
 0x5ce   : > { %v2608_v17 = vpop.xlane.xlu1 %2607  ;;  %5073 = vpow2.f32 %v2416_v54  ;;  %v7561_v54 = vperm.slane %v5188_v0, 3 }
 0x5cf   : > { %v2598_v29 = vpop.xlane.xlu2 %2597  ;;  %v2625_v39 = vadd.f32 %v2608_v17, %v2577_v32  ;;  %v2600_v53 = vpop.xlane.xlu0 %2599  ;;  %v2562_v32 = vld [vmem:[#allocation3 + $0x178] sm:$0xff] }
 0x5d0   : > { %v2620_v34 = vadd.f32 %v2598_v29, %v2572_v28  ;;  %v2621_v42 = vadd.f32 %v2600_v53, %v2573_v18 }
 0x5d1   : > { %2641 = vst.msk [vmem:[#allocation3 + $0x170] sm:$0xff] %vm1152_vm2, %v2625_v39 }
 0x5d2   : > { %2636 = vst.msk [vmem:[#allocation3 + $0x148] sm:$0xff] %vm1152_vm2, %v2620_v34 }
 0x5d3   : > { %2637 = vst.msk [vmem:[#allocation3 + $0x150] sm:$0xff] %vm1152_vm2, %v2621_v42 }
 0x5d4   : > { %v7553_v51 = vpop.eup %5073 }
 0x5d5   : > { %v2578_v28 = vmul.f32 %v7553_v51, %v2562_v32 }
 0x5d7   : > { %v2604_v12 = vpop.xlane.xlu2 %2603  ;;  %v2606_v24 = vpop.xlane.xlu0 %2605 }
 0x5d8   : > { %v2623_v59 = vadd.f32 %v2604_v12, %v2575_v41  ;;  %v2624_v2 = vadd.f32 %v2606_v24, %v2576_v15  ;;  %v8594_v24 = vld [vmem:[#allocation7_spill] sm:$0xff] }
 0x5da   : > { %2639 = vst.msk [vmem:[#allocation3 + $0x160] sm:$0xff] %vm1152_vm2, %v2623_v59 }
 0x5db   : > { %2640 = vst.msk [vmem:[#allocation3 + $0x168] sm:$0xff] %vm1152_vm2, %v2624_v2 }
 0x5df   : > { %v2610_v17 = vpop.xlane.xlu2 %2609 }
 0x5e0   : > { %v2626_v18 = vadd.f32 %v2610_v17, %v2578_v28 }
 0x5e2   : > { %2642 = vst.msk [vmem:[#allocation3 + $0x178] sm:$0xff] %vm1152_vm2, %v2626_v18 }
 0x5e6   : > { %v7558_v29 = vpop.permute.xlu1 %2764 }
 0x5e7   : > { %v2769_v39 = vpop.permute.xlu2 %2768 }
 0x5ea   : > { %v2767_v53 = vpop.permute.xlu0 %2766 }
 0x5ee   : > { %v2771_v34 = vpop.permute.xlu1 %2770 }
 0x5ef   : > { %v2775_v11 = vpop.permute.xlu2 %2774 }
 0x5f2   : > { %v2773_v61 = vpop.permute.xlu0 %2772 }
 0x5f6   : > { %v2777_v42 = vpop.permute.xlu1 %2776 }
 0x5f7   : > { %v2887_v7 = vpop.permute.xlu2 %2886 }
 0x5f8   : > { %v2950_v62 = vadd.f32 %v7561_v54, %v2887_v7 }
 0x5fa   : > { %vm2966_vm7 = vcmp.gt.f32.partialorder %v2950_v62, 0.0  ;;  %v2982_v41 = vmul.f32 0.2, %v2950_v62  ;;  %v2779_v15 = vpop.permute.xlu0 %2778 }
 0x5fb   : > { %2788 = vmatpush.bf16.msra.mxu2 %v2779_v15  ;;  %v8595_v15 = vld [vmem:[#allocation9_spill] sm:$0xff] }
 0x5fc   : > { %v2998_v12 = vsel %vm2966_vm7, %v2950_v62, %v2982_v41 }
 0x5fd   : > { %v7565_v59 = vadd.f32 %v8594_v24, %v2998_v12  ;;  %v8596_v24 = vld [vmem:[#allocation11_spill] sm:$0xff] }
 0x5fe   : > { %v2891_v2 = vpop.permute.xlu1 %2890 }
 0x5ff   : > { %3047 = vmax.xlane.f32.xlu0 %v7565_v59  ;;  %v2899_v32 = vpop.permute.xlu2 %2898  ;;  %v2951_v28 = vadd.f32 %v7561_v54, %v2891_v2  ;;  %2789 = vmatpush.bf16.msra.mxu2 %v2777_v42 }
 0x600   : > { %v2953_v17 = vadd.f32 %v7561_v54, %v2899_v32 }
 0x601   : > { %vm2967_vm8 = vcmp.gt.f32.partialorder %v2951_v28, 0.0  ;;  %v2983_v18 = vmul.f32 0.2, %v2951_v28 }
 0x602   : > { %vm2969_vm9 = vcmp.gt.f32.partialorder %v2953_v17, 0.0  ;;  %v2985_v0 = vmul.f32 0.2, %v2953_v17  ;;  %v2895_v7 = vpop.permute.xlu0 %2894 }
 0x603   : > { %v2999_v56 = vsel %vm2967_vm8, %v2951_v28, %v2983_v18  ;;  %v2952_v62 = vadd.f32 %v7561_v54, %v2895_v7  ;;  %2790 = vmatpush.bf16.msra.mxu2 %v2775_v11 }
 0x604   : > { %v3001_v41 = vsel %vm2969_vm9, %v2953_v17, %v2985_v0  ;;  %v7572_v12 = vadd.f32 %v8595_v15, %v2999_v56  ;;  %v8597_v17 = vld [vmem:[#allocation6_spill] sm:$0xff] }
 0x605   : > { %v7575_v27 = vadd.f32 %v8596_v24, %v3001_v41  ;;  %vm2968_vm10 = vcmp.gt.f32.partialorder %v2952_v62, 0.0  ;;  %v2984_v2 = vmul.f32 0.2, %v2952_v62  ;;  %v8598_v41 = vld [vmem:[#allocation8_spill] sm:$0xff] }
 0x606   : > { %3049 = vmax.xlane.f32.xlu2 %v7572_v12  ;;  %v2903_v42 = vpop.permute.xlu1 %2902 }
 0x607   : > { %3053 = vmax.xlane.f32.xlu0 %v7575_v27  ;;  %v2907_v32 = vpop.permute.xlu2 %2906  ;;  %v2954_v28 = vadd.f32 %v7561_v54, %v2903_v42  ;;  %2791 = vmatpush.bf16.msra.mxu2 %v2773_v61  ;;  %v3000_v18 = vsel %vm2968_vm10, %v2952_v62, %v2984_v2  ;;  %v8599_v42 = vld [vmem:[#allocation13_spill] sm:$0xff] }
 0x608   : > { %v2955_v11 = vadd.f32 %v7561_v54, %v2907_v32  ;;  %v7582_v0 = vadd.f32 %v8597_v17, %v3000_v18  ;;  %v8604_v17 = vpack.c.bf16 %v7374_v49, %v7344_v13 }
 0x609   : > { %vm2970_vm11 = vcmp.gt.f32.partialorder %v2954_v28, 0.0  ;;  %v2986_v56 = vmul.f32 0.2, %v2954_v28 }
 0x60a   : > { %3051 = vmax.xlane.f32.xlu1 %v7582_v0  ;;  %v2987_v24 = vmul.f32 0.2, %v2955_v11  ;;  %vm2971_vm12 = vcmp.gt.f32.partialorder %v2955_v11, 0.0 }
 0x60b   : > { %v3002_v7 = vsel %vm2970_vm11, %v2954_v28, %v2986_v56  ;;  %2792 = vmatpush.bf16.msra.mxu2 %v2771_v34 }
 0x60c   : > { %v7586_v15 = vadd.f32 %v8598_v41, %v3002_v7  ;;  %v3003_v2 = vsel %vm2971_vm12, %v2955_v11, %v2987_v24  ;;  %v8600_v11 = vpack.c.bf16 %v7316_v60, %v7320_v55  ;;  %v8602_v60 = vpack.c.bf16 %v7353_v35, %v7361_v44  ;;  %v8605_v7 = vld [vmem:[#allocation16_spill] sm:$0xff]  ;;  %v8606_v24 = vld [vmem:[#allocation14_spill] sm:$0xff] }
 0x60d   : > { %v7590_v32 = vadd.f32 %v8599_v42, %v3003_v2 }
 0x60e   : > { %3055 = vmax.xlane.f32.xlu2 %v7586_v15  ;;  %v2911_v61 = vpop.permute.xlu1 %2910 }
 0x60f   : > { %v2919_v62 = vpop.permute.xlu2 %2918  ;;  %2793 = vmatpush.bf16.msra.mxu2 %v2769_v39  ;;  %v2956_v50 = vadd.f32 %v7561_v54, %v2911_v61 }
 0x611   : > { %v2988_v55 = vmul.f32 0.2, %v2956_v50  ;;  %vm2972_vm13 = vcmp.gt.f32.partialorder %v2956_v50, 0.0 }
 0x613   : > { %2794 = vmatpush.bf16.msra.mxu2 %v2767_v53 }
 0x616   : > { %3057 = vmax.xlane.f32.xlu2 %v7590_v32  ;;  %v2923_v18 = vpop.permute.xlu1 %2922 }
 0x617   : > { %v2931_v28 = vpop.permute.xlu2 %2930  ;;  %2795 = vmatpush.bf16.msra.mxu2 %v7558_v29 }
 0x618   : > { %v7594_v34 = vadd.f32 %v7561_v54, %v2931_v28  ;;  %v8608_v28 = vld [vmem:[#allocation15_spill] sm:$0xff] }
 0x61a   : > { %2796 = vmatmul.bf16.vlgmr.msra.gmra.mxu2 %v2756_v25  ;;  %v2915_v25 = vpop.permute.xlu0 %2914  ;;  %vm2977_vm5 = vcmp.gt.f32.partialorder %v7594_v34, 0.0 }
 0x61b   : > { %3501 = vrot.lane.b32.xlu0 %v7419_v45, %s5417_s30  ;;  %v8603_v45 = vld [vmem:[#allocation10_spill] sm:$0xff] }
 0x61e   : > { %v2935_v39 = vpop.permute.xlu1 %2934 }
 0x61f   : > { %v7602_v53 = vadd.f32 %v7561_v54, %v2935_v39 }
 0x621   : > { %vm2978_vm7 = vcmp.gt.f32.partialorder %v7602_v53, 0.0 }
 0x622   : > { %v2927_v36 = vpop.permute.xlu0 %2926 }
 0x623   : > { %3497 = vrot.lane.b32.xlu0 %v7408_v10, %s5417_s30  ;;  %3503 = vrot.lane.b32.xlu1 %v7423_v30, %s5417_s30  ;;  %v2957_v10 = vadd.f32 %v7561_v54, %v2915_v25  ;;  %v2960_v29 = vadd.f32 %v7561_v54, %v2927_v36  ;;  %v8610_v25 = vld [vmem:[#allocation18_spill] sm:$0xff] }
 0x625   : > { %vm2973_vm0 = vcmp.gt.f32.partialorder %v2957_v10, 0.0  ;;  %v2992_v42 = vmul.f32 0.2, %v2960_v29  ;;  %vm2976_vm1 = vcmp.gt.f32.partialorder %v2960_v29, 0.0 }
 0x627   : > { %v3008_v49 = vsel %vm2976_vm1, %v2960_v29, %v2992_v42  ;;  %v2647_v29 = vld [vmem:[#allocation4 + $0x118] sm:$0xff] }
 0x628   : > { %v7646_v39 = vadd.f32 %v8608_v28, %v3008_v49  ;;  %v2993_v49 = vmul.f32 0.2, %v7594_v34 }
 0x62a   : > { %2801 = vmatmul.bf16.gmra.mxu2 %v8600_v11 }
 0x62b   : > { %3491 = vrot.lane.b32.xlu0 %v7400_v31, %s5417_s30  ;;  %3495 = vrot.lane.b32.xlu1 %v7404_v40, %s5417_s30  ;;  %v2958_v31 = vadd.f32 %v7561_v54, %v2919_v62  ;;  %v2959_v40 = vadd.f32 %v7561_v54, %v2923_v18  ;;  %v8607_v62 = vld [vmem:[#allocation12_spill] sm:$0xff]  ;;  %v2939_v18 = vpop.permute.xlu0 %2938 }
 0x62c   : > { %v2963_v13 = vadd.f32 %v7561_v54, %v2939_v18 }
 0x62d   : > { %vm2974_vm14 = vcmp.gt.f32.partialorder %v2958_v31, 0.0  ;;  %v2991_v30 = vmul.f32 0.2, %v2959_v40  ;;  %vm2975_vm15 = vcmp.gt.f32.partialorder %v2959_v40, 0.0 }
 0x62e   : > { %3499 = vrot.lane.b32.xlu2 %v7427_v47, %s5417_s30  ;;  %v2989_v47 = vmul.f32 0.2, %v2957_v10  ;;  %v2995_v11 = vmul.f32 0.2, %v2963_v13  ;;  %vm2979_vm3 = vcmp.gt.f32.partialorder %v2963_v13, 0.0 }
 0x62f   : > { %v3007_v44 = vsel %vm2975_vm15, %v2959_v40, %v2991_v30  ;;  %v8611_v30 = vpack.c.bf16 %v7382_v20, %v7384_v26  ;;  %v7699_v26 = vld [vmem:[#allocation2 + $0x1a0] sm:$0xff] }
 0x630   : > { %v3005_v56 = vsel %vm2973_vm0, %v2957_v10, %v2989_v47  ;;  %v7636_v61 = vadd.f32 %v8606_v24, %v3007_v44  ;;  %v2645_v10 = vld [vmem:[#allocation4 + $0x108] sm:$0xff] }
 0x631   : > { %v7640_v2 = vadd.f32 %v8607_v62, %v3005_v56  ;;  %v8612_v62 = vpack.c.bf16 %v7390_v48, %v7372_v14 }
 0x633   : > { %3489 = vrot.lane.b32.xlu0 %v7396_v22, %s5417_s30  ;;  %v3004_v22 = vsel %vm2972_vm13, %v2956_v50, %v2988_v55  ;;  %v8609_v50 = vpack.c.bf16 %v7359_v4, %v7356_v43  ;;  %v7656_v55 = vld [vmem:[#allocation2 + $0x180] sm:$0xff]  ;;  %v7668_v43 = vpop.permute.xlu1 %2946  ;;  %v7671_v4 = vld [vmem:[#allocation2 + $0x188] sm:$0xff] }
 0x634   : > { %v7625_v46 = vadd.f32 %v8603_v45, %v3004_v22 }
 0x636   : > { %3493 = vrot.lane.b32.xlu2 %v7415_v9, %s5417_s30  ;;  %v2990_v9 = vmul.f32 0.2, %v2958_v31 }
 0x638   : > { %v3006_v35 = vsel %vm2974_vm14, %v2958_v31, %v2990_v9  ;;  %v7658_v31 = vpop.permute.xlu2 %2942  ;;  %v7673_v9 = vld [vmem:[#allocation2 + $0x198] sm:$0xff] }
 0x639   : > { %v7633_v41 = vadd.f32 %v8605_v7, %v3006_v35  ;;  %v7689_v35 = vld [vmem:[#allocation2 + $0x190] sm:$0xff] }
 0x63a   : > { %2806 = vmatmul.bf16.gmra.mxu2 %v8601_v8  ;;  %v3011_v8 = vsel %vm2979_vm3, %v2963_v13, %v2995_v11 }
 0x64a   : > { %2811 = vmatmul.bf16.gmra.mxu2 %v8602_v60  ;;  %v7653_v60 = vadd.f32 %v8610_v25, %v3011_v8 }
 0x655   : > { %3059 = vmax.xlane.f32.xlu1 %v7625_v46 }
 0x65a   : > { %2816 = vmatmul.bf16.gmra.mxu2 %v8604_v17 }
 0x65d   : > { %3063 = vmax.xlane.f32.xlu0 %v7633_v41  ;;  %3065 = vmax.xlane.f32.xlu1 %v7636_v61 }
 0x65f   : > { %3061 = vmax.xlane.f32.xlu2 %v7640_v2 }
 0x667   : > { %3067 = vmax.xlane.f32.xlu2 %v7646_v39 }
 0x66a   : > { %2821 = vmatmul.bf16.gmra.mxu2 %v8609_v50  ;;  %v3009_v50 = vsel %vm2977_vm5, %v7594_v34, %v2993_v49 }
 0x66f   : > { %3073 = vmax.xlane.f32.xlu2 %v7653_v60 }
 0x671   : > { %2662 = vperm.xlu0 %4880, %v7431_v52  }
 0x672   : > { %v3048_v40 = vpop.xlane.xlu0 %3047 }
 0x673   : > { %v7662_v22 = vmax.f32 %v7656_v55, %v3048_v40  ;;  %v7769_v40 = vld [vmem:[#allocation2 + $0x1c0] sm:$0xff] }
 0x675   : > { %3594 = vst.msk [vmem:[#allocation2 + $0x180] sm:$0xff] %vm1152_vm2, %v7662_v22 }
 0x676   : > { %2667 = vperm.xlu1 %4881, %v7468_v1  }
 0x679   : > { %2677 = vperm.xlu0 %4880, %v7445_v38   ;;  %v3050_v52 = vpop.xlane.xlu2 %3049 }
 0x67a   : > { %v7677_v45 = vmax.f32 %v7671_v4, %v3050_v52  ;;  %v3054_v36 = vpop.xlane.xlu0 %3053  ;;  %2826 = vmatmul.bf16.gmra.mxu2 %v8611_v30  ;;  %v8613_v52 = vld [vmem:[#allocation20_spill] sm:$0xff]  ;;  %v7774_v30 = vld [vmem:[#allocation2 + $0x1c8] sm:$0xff] }
 0x67b   : > { %v7683_v47 = vmax.f32 %v7673_v9, %v3054_v36  ;;  %v7772_v36 = vadd.f32 %v8613_v52, %v3009_v50  ;;  %v7815_v52 = vld [vmem:[#allocation2 + $0x1e8] sm:$0xff] }
 0x67c   : > { %3595 = vst.msk [vmem:[#allocation2 + $0x188] sm:$0xff] %vm1152_vm2, %v7677_v45 }
 0x67d   : > { %3597 = vst.msk [vmem:[#allocation2 + $0x198] sm:$0xff] %vm1152_vm2, %v7683_v47  ;;  %v3052_v44 = vpop.xlane.xlu1 %3051 }
 0x67e   : > { %v7696_v20 = vmax.f32 %v7689_v35, %v3052_v44  ;;  %2682 = vperm.xlu1 %4881, %v7495_v33   ;;  %v7715_v33 = vld [vmem:[#allocation2 + $0x1a8] sm:$0xff] }
 0x680   : > { %3596 = vst.msk [vmem:[#allocation2 + $0x190] sm:$0xff] %vm1152_vm2, %v7696_v20 }
 0x681   : > { %2687 = vperm.xlu0 %4880, %v7464_v23   ;;  %v3056_v56 = vpop.xlane.xlu2 %3055 }
 0x682   : > { %v7707_v17 = vmax.f32 %v7699_v26, %v3056_v56  ;;  %v7776_v56 = vld [vmem:[#allocation2 + $0x1b8] sm:$0xff] }
 0x684   : > { %3598 = vst.msk [vmem:[#allocation2 + $0x1a0] sm:$0xff] %vm1152_vm2, %v7707_v17 }
 0x686   : > { %2697 = vperm.xlu1 %4881, %v7516_v21  }
 0x687   : > { %2672 = vperm.xlu2 %4882, %v7453_v37  }
 0x689   : > { %2702 = vperm.xlu0 %4880, %v7490_v3   ;;  %v3058_v24 = vpop.xlane.xlu2 %3057 }
 0x68a   : > { %v7719_v23 = vmax.f32 %v7715_v33, %v3058_v24  ;;  %2831 = vmatmul.bf16.gmra.mxu2 %v8612_v62 }
 0x68c   : > { %3599 = vst.msk [vmem:[#allocation2 + $0x1a8] sm:$0xff] %vm1152_vm2, %v7719_v23 }
 0x68d   : > { %v3502_v37 = vpop.permute.xlu0 %3501 }
 0x68e   : > { %2712 = vperm.xlu1 %4881, %v7535_v5  }
 0x68f   : > { %2692 = vperm.xlu2 %4882, %v7513_v63  }
 0x691   : > { %2717 = vperm.xlu0 %4880, %v7508_v19   ;;  %v3500_v48 = vpop.permute.xlu2 %3499 }
 0x695   : > { %v3504_v3 = vpop.permute.xlu1 %3503  ;;  %v3498_v14 = vpop.permute.xlu0 %3497 }
 0x696   : > { %2727 = vperm.xlu1 %4881, %v7548_v57   ;;  %3513 = vmatpush.bf16.msra.mxu3 %v3504_v3 }
 0x697   : > { %2707 = vperm.xlu2 %4882, %v7532_v58  }
 0x699   : > { %2732 = vperm.xlu0 %4880, %v7526_v16   ;;  %v3494_v16 = vpop.permute.xlu2 %3493 }
 0x69a   : > { %3514 = vmatpush.bf16.msra.mxu3 %v3502_v37 }
 0x69d   : > { %v7734_v21 = vpop.f32.mrf.mxu2  ;;  %v3492_v19 = vpop.permute.xlu0 %3491 }
 0x69e   : > { %3150 = vperm.xlu1 %4881, %v7677_v45   ;;  %3515 = vmatpush.bf16.msra.mxu3 %v3500_v48  ;;  %v3496_v63 = vpop.permute.xlu1 %3495 }
 0x69f   : > { %2722 = vperm.xlu2 %4882, %v7545_v6  }
 0x6a1   : > { %3145 = vperm.xlu0 %4880, %v7662_v22  }
 0x6a2   : > { %3516 = vmatpush.bf16.msra.mxu3 %v3498_v14 }
 0x6a5   : > { %v7739_v5 = vpop.f32.mrf.mxu2  ;;  %v3490_v6 = vpop.permute.xlu0 %3489 }
 0x6a6   : > { %3170 = vperm.xlu1 %4881, %v7719_v23   ;;  %3517 = vmatpush.bf16.msra.mxu3 %v3496_v63 }
 0x6a7   : > { %2737 = vperm.xlu2 %4882, %v7553_v51   ;;  %v7754_v51 = vld [vmem:[#allocation2 + $0x1b0] sm:$0xff] }
 0x6a9   : > { %3155 = vperm.xlu0 %4880, %v7696_v20  }
 0x6aa   : > { %3518 = vmatpush.bf16.msra.mxu3 %v3494_v16  ;;  %v7804_v16 = vld [vmem:[#allocation2 + $0x1d0] sm:$0xff] }
 0x6ad   : > { %v7744_v58 = vpop.f32.mrf.mxu2 }
 0x6ae   : > { %3519 = vmatpush.bf16.msra.mxu3 %v3492_v19 }
 0x6af   : > { %3165 = vperm.xlu2 %4882, %v7707_v17  }
 0x6b1   : > { %3160 = vperm.xlu0 %4880, %v7683_v47  }
 0x6b2   : > { %3520 = vmatpush.bf16.msra.mxu3 %v3490_v6 }
 0x6b5   : > { %v7748_v57 = vpop.f32.mrf.mxu2 }
 0x6bd   : > { %v7750_v18 = vpop.f32.mrf.mxu2 }
 0x6c5   : > { %v7752_v13 = vpop.f32.mrf.mxu2 }
 0x6c8   : > { %v3060_v28 = vpop.xlane.xlu1 %3059 }
 0x6c9   : > { %v7759_v11 = vmax.f32 %v7754_v51, %v3060_v28  ;;  %v2646_v28 = vld [vmem:[#allocation4 + $0x110] sm:$0xff] }
 0x6cb   : > { %3600 = vst.msk [vmem:[#allocation2 + $0x1b0] sm:$0xff] %vm1152_vm2, %v7759_v11  ;;  %3175 = vperm.xlu0 %4880, %v7759_v11  }
 0x6cd   : > { %v7767_v25 = vpop.f32.mrf.mxu2 }
 0x6d0   : > { %v3064_v44 = vpop.xlane.xlu0 %3063  ;;  %3069 = vmax.xlane.f32.xlu1 %v7772_v36  ;;  %v3066_v62 = vpop.xlane.xlu1 %3065 }
 0x6d1   : > { %v7779_v24 = vmax.f32 %v7769_v40, %v3064_v44  ;;  %v7783_v34 = vmax.f32 %v7774_v30, %v3066_v62  ;;  %v2644_v44 = vld [vmem:[#allocation4 + $0x100] sm:$0xff] }
 0x6d2   : > { %v3062_v37 = vpop.xlane.xlu2 %3061 }
 0x6d3   : > { %3602 = vst.msk [vmem:[#allocation2 + $0x1c0] sm:$0xff] %vm1152_vm2, %v7779_v24  ;;  %3185 = vperm.xlu2 %4882, %v7779_v24   ;;  %v7791_v14 = vmax.f32 %v7776_v56, %v3062_v37 }
 0x6d4   : > { %3603 = vst.msk [vmem:[#allocation2 + $0x1c8] sm:$0xff] %vm1152_vm2, %v7783_v34 }
 0x6d5   : > { %3601 = vst.msk [vmem:[#allocation2 + $0x1b8] sm:$0xff] %vm1152_vm2, %v7791_v14  ;;  %3180 = vperm.xlu0 %4880, %v7791_v14   ;;  %v7802_v63 = vpop.f32.mrf.mxu2 }
 0x6da   : > { %v3068_v6 = vpop.xlane.xlu2 %3067 }
 0x6db   : > { %v7807_v49 = vmax.f32 %v7804_v16, %v3068_v6 }
 0x6dd   : > { %3604 = vst.msk [vmem:[#allocation2 + $0x1d0] sm:$0xff] %vm1152_vm2, %v7807_v49  ;;  %v7813_v50 = vpop.f32.mrf.mxu2 }
 0x6e2   : > { %v3074_v62 = vpop.xlane.xlu2 %3073 }
 0x6e3   : > { %v2663_v37 = vpop.permute.xlu0 %2662  ;;  %v7818_v48 = vmax.f32 %v7815_v52, %v3074_v62 }
 0x6e4   : > { %v2740_v8 = vmul.f32 %v2663_v37, %v2644_v44 }
 0x6e5   : > { %3607 = vst.msk [vmem:[#allocation2 + $0x1e8] sm:$0xff] %vm1152_vm2, %v7818_v48  ;;  %v2819_v38 = vpop.f32.mrf.mxu2 }
 0x6e6   : > { %v2837_v7 = vadd.f32 %v7734_v21, %v2740_v8 }
 0x6e8   : > { %2853 = vst.msk [vmem:[#allocation4 + $0x100] sm:$0xff] %vm1402_vm4, %v2837_v7  ;;  %v2668_v19 = vpop.permute.xlu1 %2667  ;;  %v2964_v7 = vadd.f32 %v7561_v54, %v7658_v31  ;;  %v2994_v31 = vmul.f32 0.2, %v7602_v53 }
 0x6e9   : > { %v2741_v3 = vmul.f32 %v2668_v19, %v2645_v10  ;;  %3190 = vperm.xlu1 %4881, %v7783_v34   ;;  %v2648_v10 = vld [vmem:[#allocation4 + $0x120] sm:$0xff]  ;;  %v2650_v19 = vld [vmem:[#allocation4 + $0x130] sm:$0xff] }
 0x6ea   : > { %v2673_v62 = vpop.permute.xlu2 %2672  ;;  %vm2980_vm6 = vcmp.gt.f32.partialorder %v2964_v7, 0.0 }
 0x6eb   : > { %v2678_v44 = vpop.permute.xlu0 %2677  ;;  %v2742_v37 = vmul.f32 %v2673_v62, %v2646_v28  ;;  %v2838_v6 = vadd.f32 %v7739_v5, %v2741_v3  ;;  %v2649_v62 = vld [vmem:[#allocation4 + $0x128] sm:$0xff]  ;;  %v2996_v3 = vmul.f32 0.2, %v2964_v7 }
 0x6ec   : > { %v2743_v42 = vmul.f32 %v2678_v44, %v2647_v29 }
 0x6ed   : > { %v2839_v1 = vadd.f32 %v7744_v58, %v2742_v37  ;;  %2854 = vst.msk [vmem:[#allocation4 + $0x108] sm:$0xff] %vm1402_vm4, %v2838_v6  ;;  %v2822_v8 = vpop.f32.mrf.mxu2 }
 0x6ee   : > { %v2840_v21 = vadd.f32 %v7748_v57, %v2743_v42 }
 0x6ef   : > { %2855 = vst.msk [vmem:[#allocation4 + $0x110] sm:$0xff] %vm1402_vm4, %v2839_v1 }
 0x6f0   : > { %2856 = vst.msk [vmem:[#allocation4 + $0x118] sm:$0xff] %vm1402_vm4, %v2840_v21  ;;  %v2683_v28 = vpop.permute.xlu1 %2682  ;;  %v2651_v21 = vld [vmem:[#allocation4 + $0x138] sm:$0xff] }
 0x6f1   : > { %v2744_v5 = vmul.f32 %v2683_v28, %v2648_v10  ;;  %v3012_v10 = vsel %vm2980_vm6, %v2964_v7, %v2996_v3  ;;  %v2652_v28 = vld [vmem:[#allocation4 + $0x140] sm:$0xff]  ;;  %v8615_v3 = vld [vmem:[#allocation17_spill] sm:$0xff] }
 0x6f2   : > { %v2693_v29 = vpop.permute.xlu2 %2692 }
 0x6f3   : > { %v2688_v58 = vpop.permute.xlu0 %2687  ;;  %v2746_v44 = vmul.f32 %v2693_v29, %v2650_v19  ;;  %v2841_v42 = vadd.f32 %v7750_v18, %v2744_v5  ;;  %v2653_v19 = vld [vmem:[#allocation4 + $0x148] sm:$0xff]  ;;  %v8614_v5 = vld [vmem:[#allocation21_spill] sm:$0xff] }
 0x6f4   : > { %v2745_v57 = vmul.f32 %v2688_v58, %v2649_v62  ;;  %v7844_v29 = vadd.f32 %v8614_v5, %v3012_v10  ;;  %v3010_v58 = vsel %vm2978_vm7, %v7602_v53, %v2994_v31  ;;  %v2654_v53 = vld [vmem:[#allocation4 + $0x150] sm:$0xff]  ;;  %v2655_v10 = vld [vmem:[#allocation4 + $0x158] sm:$0xff] }
 0x6f5   : > { %v2843_v6 = vadd.f32 %v7767_v25, %v2746_v44  ;;  %2857 = vst.msk [vmem:[#allocation4 + $0x120] sm:$0xff] %vm1402_vm4, %v2841_v42  ;;  %v2824_v37 = vpop.f32.mrf.mxu2 }
 0x6f6   : > { %v2842_v1 = vadd.f32 %v7752_v13, %v2745_v57 }
 0x6f7   : > { %2859 = vst.msk [vmem:[#allocation4 + $0x130] sm:$0xff] %vm1402_vm4, %v2843_v6  ;;  %v7850_v6 = vadd.f32 %v8615_v3, %v3010_v58 }
 0x6f8   : > { %2858 = vst.msk [vmem:[#allocation4 + $0x128] sm:$0xff] %vm1402_vm4, %v2842_v1  ;;  %v2698_v18 = vpop.permute.xlu1 %2697 }
 0x6f9   : > { %v2747_v62 = vmul.f32 %v2698_v18, %v2651_v21 }
 0x6fa   : > { %v2708_v25 = vpop.permute.xlu2 %2707 }
 0x6fb   : > { %v2703_v13 = vpop.permute.xlu0 %2702  ;;  %v2749_v44 = vmul.f32 %v2708_v25, %v2653_v19  ;;  %v2844_v42 = vadd.f32 %v7802_v63, %v2747_v62  ;;  %v2656_v63 = vld [vmem:[#allocation4 + $0x160] sm:$0xff] }
 0x6fc   : > { %v2748_v57 = vmul.f32 %v2703_v13, %v2652_v28  ;;  %3075 = vmax.xlane.f32.xlu2 %v7844_v29  ;;  %v2965_v13 = vadd.f32 %v7561_v54, %v7668_v43  ;;  %v2659_v43 = vld [vmem:[#allocation4 + $0x178] sm:$0xff] }
 0x6fd   : > { %v2846_v7 = vadd.f32 %v2819_v38, %v2749_v44  ;;  %2860 = vst.msk [vmem:[#allocation4 + $0x138] sm:$0xff] %vm1402_vm4, %v2844_v42  ;;  %v2827_v21 = vpop.f32.mrf.mxu2  ;;  %v2657_v44 = vld [vmem:[#allocation4 + $0x168] sm:$0xff] }
 0x6fe   : > { %v2845_v1 = vadd.f32 %v7813_v50, %v2748_v57  ;;  %v2658_v57 = vld [vmem:[#allocation4 + $0x170] sm:$0xff]  ;;  %v2997_v3 = vmul.f32 0.2, %v2965_v13  ;;  %vm2981_vm8 = vcmp.gt.f32.partialorder %v2965_v13, 0.0 }
 0x6ff   : > { %2862 = vst.msk [vmem:[#allocation4 + $0x148] sm:$0xff] %vm1402_vm4, %v2846_v7  ;;  %3071 = vmax.xlane.f32.xlu0 %v7850_v6 }
 0x700   : > { %2861 = vst.msk [vmem:[#allocation4 + $0x140] sm:$0xff] %vm1402_vm4, %v2845_v1  ;;  %v2713_v31 = vpop.permute.xlu1 %2712 }
 0x701   : > { %v2750_v19 = vmul.f32 %v2713_v31, %v2654_v53 }
 0x702   : > { %v2723_v38 = vpop.permute.xlu2 %2722 }
 0x703   : > { %v2718_v18 = vpop.permute.xlu0 %2717  ;;  %v2752_v28 = vmul.f32 %v2723_v38, %v2656_v63  ;;  %v2847_v62 = vadd.f32 %v2822_v8, %v2750_v19  ;;  %v3013_v63 = vsel %vm2981_vm8, %v2965_v13, %v2997_v3  ;;  %v8616_v19 = vld [vmem:[#allocation19_spill] sm:$0xff] }
 0x704   : > { %v2751_v25 = vmul.f32 %v2718_v18, %v2655_v10  ;;  %v7866_v38 = vadd.f32 %v8616_v19, %v3013_v63 }
 0x705   : > { %v2849_v5 = vadd.f32 %v2827_v21, %v2752_v28  ;;  %2863 = vst.msk [vmem:[#allocation4 + $0x150] sm:$0xff] %vm1402_vm4, %v2847_v62  ;;  %v2829_v58 = vpop.f32.mrf.mxu2 }
 0x706   : > { %v2848_v50 = vadd.f32 %v2824_v37, %v2751_v25 }
 0x707   : > { %2865 = vst.msk [vmem:[#allocation4 + $0x160] sm:$0xff] %vm1402_vm4, %v2849_v5 }
 0x708   : > { %2864 = vst.msk [vmem:[#allocation4 + $0x158] sm:$0xff] %vm1402_vm4, %v2848_v50  ;;  %v2728_v42 = vpop.permute.xlu1 %2727 }
 0x709   : > { %v2753_v7 = vmul.f32 %v2728_v42, %v2657_v44 }
 0x70a   : > { %v2738_v31 = vpop.permute.xlu2 %2737 }
 0x70b   : > { %v2733_v1 = vpop.permute.xlu0 %2732  ;;  %v2850_v8 = vadd.f32 %v2829_v58, %v2753_v7  ;;  %v2755_v25 = vmul.f32 %v2738_v31, %v2659_v43 }
 0x70c   : > { %v2754_v21 = vmul.f32 %v2733_v1, %v2658_v57 }
 0x70d   : > { %2866 = vst.msk [vmem:[#allocation4 + $0x168] sm:$0xff] %vm1402_vm4, %v2850_v8  ;;  %v2832_v37 = vpop.f32.mrf.mxu2 }
 0x70e   : > { %v2851_v53 = vadd.f32 %v2832_v37, %v2754_v21 }
 0x710   : > { %2867 = vst.msk [vmem:[#allocation4 + $0x170] sm:$0xff] %vm1402_vm4, %v2851_v53  ;;  %v3151_v54 = vpop.permute.xlu1 %3150 }
 0x711   : > { %v3224_v10 = vsub.f32 %v7572_v12, %v3151_v54 }
 0x712   : > { %v3166_v37 = vpop.permute.xlu2 %3165 }
 0x713   : > { %v3146_v18 = vpop.permute.xlu0 %3145  ;;  %3195 = vperm.xlu0 %4880, %v7807_v49   ;;  %v3241_v28 = vmul.f32 1.442695, %v3224_v10  ;;  %3077 = vmax.xlane.f32.xlu1 %v7866_v38  ;;  %v3227_v54 = vsub.f32 %v7586_v15, %v3166_v37 }
 0x714   : > { %v3223_v62 = vsub.f32 %v7565_v59, %v3146_v18  ;;  %3210 = vperm.xlu2 %4882, %v7818_v48  }
 0x715   : > { %v2834_v50 = vpop.f32.mrf.mxu2  ;;  %5075 = vpow2.f32 %v3241_v28  ;;  %v3247_v31 = vmul.f32 1.442695, %v3227_v54 }
 0x716   : > { %v3239_v5 = vmul.f32 1.442695, %v3223_v62  ;;  %v2852_v58 = vadd.f32 %v2834_v50, %v2755_v25 }
 0x718   : > { %5077 = vpow2.f32 %v3239_v5  ;;  %2868 = vst.msk [vmem:[#allocation4 + $0x178] sm:$0xff] %vm1402_vm4, %v2852_v58  ;;  %v3171_v8 = vpop.permute.xlu1 %3170  ;;  %v8617_v58 = vsub.f32 %v7671_v4, %v7677_v45  ;;  %v8619_v45 = vsub.f32 %v7769_v40, %v7779_v24 }
 0x719   : > { %v3228_v63 = vsub.f32 %v7590_v32, %v3171_v8  ;;  %v3042_v32 = vld [vmem:[#allocation2 + $0x1d8] sm:$0xff] }
 0x71b   : > { %v3156_v12 = vpop.permute.xlu0 %3155  ;;  %v5076_v13 = vpop.eup %5075  ;;  %v3249_v43 = vmul.f32 1.442695, %v3228_v63 }
 0x71c   : > { %v3225_v42 = vsub.f32 %v7582_v0, %v3156_v12  ;;  %v3113_v12 = vmul.f32 1.442695, %v8617_v58  ;;  %v7941_v58 = vld [vmem:[#allocation2 + $0x1f8] sm:$0xff] }
 0x71e   : > { %v7873_v44 = vpop.eup %5077  ;;  %v3243_v57 = vmul.f32 1.442695, %v3225_v42 }
 0x71f   : > { %v3481_v59 = vpack.c.bf16 %v5076_v13, %v7873_v44 }
 0x720   : > { %5079 = vpow2.f32 %v3243_v57 }
 0x721   : > { %3521 = vmatmul.bf16.vlgmr.msra.gmra.mxu3 %v3481_v59  ;;  %v8618_v59 = vsub.f32 %v7715_v33, %v7719_v23 }
 0x723   : > { %v3161_v7 = vpop.permute.xlu0 %3160  ;;  %v3121_v57 = vmul.f32 1.442695, %v8618_v59 }
 0x724   : > { %v3226_v3 = vsub.f32 %v7575_v27, %v3161_v7 }
 0x726   : > { %v3245_v1 = vmul.f32 1.442695, %v3226_v3  ;;  %v7878_v21 = vpop.eup %5079 }
 0x728   : > { %5081 = vpow2.f32 %v3245_v1  ;;  %v3127_v1 = vmul.f32 1.442695, %v8619_v45  ;;  %v8620_v45 = vsub.f32 %v7689_v35, %v7696_v20 }
 0x729   : > { %5083 = vpow2.f32 %v3249_v43 }
 0x72a   : > { %5085 = vpow2.f32 %v3247_v31  ;;  %v3045_v31 = vld [vmem:[#allocation2 + $0x1f0] sm:$0xff] }
 0x72e   : > { %v7880_v53 = vpop.eup %5081 }
 0x72f   : > { %v3482_v0 = vpack.c.bf16 %v7880_v53, %v7878_v21  ;;  %v7886_v27 = vpop.eup %5083 }
 0x730   : > { %v7888_v10 = vpop.eup %5085 }
 0x731   : > { %3526 = vmatmul.bf16.gmra.mxu3 %v3482_v0  ;;  %v3483_v18 = vpack.c.bf16 %v7886_v27, %v7888_v10 }
 0x73d   : > { %3306 = vadd.xlane.f32.xlu2 %v5076_v13  ;;  %v3176_v19 = vpop.permute.xlu0 %3175 }
 0x73e   : > { %v3229_v28 = vsub.f32 %v7625_v46, %v3176_v19 }
 0x740   : > { %v3251_v25 = vmul.f32 1.442695, %v3229_v28 }
 0x741   : > { %3531 = vmatmul.bf16.gmra.mxu3 %v3483_v18 }
 0x742   : > { %5087 = vpow2.f32 %v3251_v25 }
 0x743   : > { %v3070_v62 = vpop.xlane.xlu1 %3069 }
 0x744   : > { %v3090_v15 = vmax.f32 %v3042_v32, %v3070_v62 }
 0x746   : > { %3605 = vst.msk [vmem:[#allocation2 + $0x1d8] sm:$0xff] %vm1152_vm2, %v3090_v15  ;;  %3200 = vperm.xlu0 %4880, %v3090_v15   ;;  %v3106_v63 = vsub.f32 %v3042_v32, %v3090_v15  ;;  %v7927_v32 = vld [vmem:[#allocation2 + $0x1e0] sm:$0xff] }
 0x747   : > { %v3181_v5 = vpop.permute.xlu0 %3180 }
 0x748   : > { %v3230_v50 = vsub.f32 %v7640_v2, %v3181_v5  ;;  %v7898_v42 = vpop.eup %5087  ;;  %v3186_v2 = vpop.permute.xlu2 %3185  ;;  %v3133_v54 = vmul.f32 1.442695, %v3106_v63 }
 0x749   : > { %v3231_v4 = vsub.f32 %v7633_v41, %v3186_v2 }
 0x74a   : > { %v3253_v13 = vmul.f32 1.442695, %v3230_v50 }
 0x74b   : > { %v3255_v37 = vmul.f32 1.442695, %v3231_v4 }
 0x74c   : > { %5089 = vpow2.f32 %v3253_v13 }
 0x74d   : > { %5091 = vpow2.f32 %v3113_v12 }
 0x74e   : > { %5093 = vpow2.f32 %v3121_v57 }
 0x74f   : > { %5095 = vpow2.f32 %v3127_v1  ;;  %v3115_v1 = vmul.f32 1.442695, %v8620_v45 }
 0x750   : > { %5097 = vpow2.f32 %v3255_v37 }
 0x752   : > { %v5090_v46 = vpop.eup %5089 }
 0x753   : > { %v3484_v7 = vpack.c.bf16 %v5090_v46, %v7898_v42  ;;  %v7904_v3 = vpop.eup %5091 }
 0x754   : > { %v7911_v8 = vpop.eup %5093 }
 0x755   : > { %3392 = vperm.xlu2 %4882, %v7904_v3   ;;  %3536 = vmatmul.bf16.gmra.mxu3 %v3484_v7  ;;  %v7915_v43 = vpop.eup %5095 }
 0x756   : > { %v7918_v41 = vpop.eup %5097 }
 0x75b   : > { %v3191_v33 = vpop.permute.xlu1 %3190 }
 0x75c   : > { %v3232_v23 = vsub.f32 %v7636_v61, %v3191_v33 }
 0x75d   : > { %3412 = vperm.xlu2 %4882, %v7911_v8  }
 0x75e   : > { %v3257_v0 = vmul.f32 1.442695, %v3232_v23  ;;  %v3273_v23 = vld [vmem:[#allocation3 + $0x188] sm:$0xff] }
 0x760   : > { %5099 = vpow2.f32 %v3257_v0 }
 0x761   : > { %5101 = vpow2.f32 %v3133_v54 }
 0x765   : > { %3427 = vperm.xlu2 %4882, %v7915_v43  }
 0x766   : > { %v7920_v40 = vpop.eup %5099 }
 0x767   : > { %v3485_v61 = vpack.c.bf16 %v7920_v40, %v7918_v41  ;;  %v7924_v24 = vpop.eup %5101 }
 0x769   : > { %3541 = vmatmul.bf16.gmra.mxu3 %v3485_v61 }
 0x76d   : > { %3442 = vperm.xlu2 %4882, %v7924_v24  }
 0x76f   : > { %v3076_v19 = vpop.xlane.xlu2 %3075 }
 0x770   : > { %v3093_v18 = vmax.f32 %v3045_v31, %v3076_v19 }
 0x772   : > { %v3109_v28 = vsub.f32 %v3045_v31, %v3093_v18  ;;  %3608 = vst.msk [vmem:[#allocation2 + $0x1f0] sm:$0xff] %vm1152_vm2, %v3093_v18  ;;  %3215 = vperm.xlu1 %4881, %v3093_v18   ;;  %v3072_v62 = vpop.xlane.xlu0 %3071 }
 0x773   : > { %v7931_v15 = vmax.f32 %v7927_v32, %v3072_v62 }
 0x774   : > { %v3139_v25 = vmul.f32 1.442695, %v3109_v28 }
 0x775   : > { %v3107_v5 = vsub.f32 %v7927_v32, %v7931_v15  ;;  %3606 = vst.msk [vmem:[#allocation2 + $0x1e0] sm:$0xff] %vm1152_vm2, %v7931_v15  ;;  %3205 = vperm.xlu0 %4880, %v7931_v15  }
 0x776   : > { %5103 = vpow2.f32 %v3139_v25 }
 0x777   : > { %v3211_v4 = vpop.permute.xlu2 %3210  ;;  %5105 = vpow2.f32 %v3115_v1 }
 0x778   : > { %v3236_v63 = vsub.f32 %v7653_v60, %v3211_v4  ;;  %v3370_v60 = vld [vmem:[#allocation4 + $0x188] sm:$0xff] }
 0x77a   : > { %v3265_v61 = vmul.f32 1.442695, %v3236_v63 }
 0x77c   : > { %v7938_v50 = vpop.eup %5103 }
 0x77d   : > { %3457 = vperm.xlu2 %4882, %v7938_v50   ;;  %v7965_v35 = vpop.eup %5105 }
 0x785   : > { %v3196_v57 = vpop.permute.xlu0 %3195 }
 0x786   : > { %v3078_v12 = vpop.xlane.xlu1 %3077  ;;  %v3233_v2 = vsub.f32 %v7646_v39, %v3196_v57  ;;  %v8621_v39 = vsub.f32 %v7776_v56, %v7791_v14  ;;  %v8622_v56 = vsub.f32 %v7804_v16, %v7807_v49  ;;  %v8623_v57 = vsub.f32 %v7656_v55, %v7662_v22 }
 0x787   : > { %v7944_v13 = vmax.f32 %v7941_v58, %v3078_v12  ;;  %v8625_v55 = vsub.f32 %v7673_v9, %v7683_v47  ;;  %v8626_v9 = vsub.f32 %v7699_v26, %v7707_v17  ;;  %v8628_v26 = vsub.f32 %v7774_v30, %v7783_v34  ;;  %v3377_v30 = vld [vmem:[#allocation4 + $0x1c0] sm:$0xff] }
 0x788   : > { %v3259_v37 = vmul.f32 1.442695, %v3233_v2  ;;  %v3131_v14 = vmul.f32 1.442695, %v8622_v56  ;;  %v3111_v2 = vmul.f32 1.442695, %v8623_v57 }
 0x789   : > { %v3110_v59 = vsub.f32 %v7941_v58, %v7944_v13  ;;  %3609 = vst.msk [vmem:[#allocation2 + $0x1f8] sm:$0xff] %vm1152_vm2, %v7944_v13  ;;  %3220 = vperm.xlu0 %4880, %v7944_v13   ;;  %v3117_v22 = vmul.f32 1.442695, %v8625_v55  ;;  %v3119_v47 = vmul.f32 1.442695, %v8626_v9 }
 0x78a   : > { %5107 = vpow2.f32 %v3259_v37  ;;  %v3129_v17 = vmul.f32 1.442695, %v8628_v26 }
 0x78b   : > { %v3141_v32 = vmul.f32 1.442695, %v3110_v59 }
 0x79c   : > { %3308 = vadd.xlane.f32.xlu1 %v7878_v21  ;;  %v3289_v21 = vmul.f32 %v7904_v3, %v3273_v23 }
 0x7a4   : > { %v7952_v7 = vpop.f32.mrf.mxu3 }
 0x7a6   : > { %3312 = vadd.xlane.f32.xlu2 %v7888_v10  ;;  %v3125_v10 = vmul.f32 1.442695, %v8621_v39 }
 0x7a8   : > { %5109 = vpow2.f32 %v3125_v10 }
 0x7a9   : > { %5111 = vpow2.f32 %v3265_v61 }
 0x7aa   : > { %5113 = vpow2.f32 %v3131_v14 }
 0x7ac   : > { %v3524_v33 = vpop.f32.mrf.mxu3 }
 0x7ae   : > { %3318 = vadd.xlane.f32.xlu2 %v5090_v46  ;;  %v5108_v46 = vpop.eup %5107 }
 0x7b0   : > { %v3307_v0 = vpop.xlane.xlu2 %3306 }
 0x7b1   : > { %v3337_v54 = vadd.f32 %v3307_v0, %v3289_v21 }
 0x7b3   : > { %3353 = vst.msk [vmem:[#allocation3 + $0x188] sm:$0xff] %vm1152_vm2, %v3337_v54  ;;  %3304 = vadd.xlane.f32.xlu0 %v7873_v44  ;;  %v7975_v44 = vpop.eup %5109  ;;  %v8627_v54 = vsub.f32 %v7754_v51, %v7759_v11 }
 0x7b4   : > { %v7968_v20 = vpop.f32.mrf.mxu3  ;;  %v7979_v12 = vpop.eup %5111 }
 0x7b5   : > { %3397 = vperm.xlu1 %4881, %v7965_v35   ;;  %v7990_v49 = vpop.eup %5113  ;;  %v3123_v39 = vmul.f32 1.442695, %v8627_v54  ;;  %v3282_v54 = vld [vmem:[#allocation3 + $0x1d0] sm:$0xff] }
 0x7b6   : > { %3324 = vadd.xlane.f32.xlu2 %v5108_v46 }
 0x7b8   : > { %v3393_v3 = vpop.permute.xlu2 %3392  ;;  %v3201_v19 = vpop.permute.xlu0 %3200 }
 0x7b9   : > { %v3466_v31 = vmul.f32 %v3393_v3, %v3370_v60  ;;  %v3234_v18 = vsub.f32 %v7772_v36, %v3201_v19  ;;  %v8624_v36 = vsub.f32 %v7815_v52, %v7818_v48  ;;  %v3374_v48 = vld [vmem:[#allocation4 + $0x1a8] sm:$0xff]  ;;  %v3135_v60 = vmul.f32 1.442695, %v3107_v5 }
 0x7bb   : > { %v3563_v28 = vadd.f32 %v3524_v33, %v3466_v31  ;;  %v3261_v62 = vmul.f32 1.442695, %v3234_v18  ;;  %v3137_v16 = vmul.f32 1.442695, %v8624_v36 }
 0x7bc   : > { %v7977_v25 = vpop.f32.mrf.mxu3 }
 0x7bd   : > { %3579 = vst.msk [vmem:[#allocation4 + $0x188] sm:$0xff] %vm1402_vm4, %v3563_v28  ;;  %3422 = vperm.xlu1 %4881, %v7975_v44   ;;  %5115 = vpow2.f32 %v3261_v62 }
 0x7be   : > { %3330 = vadd.xlane.f32.xlu2 %v7979_v12  ;;  %5117 = vpow2.f32 %v3111_v2 }
 0x7bf   : > { %5119 = vpow2.f32 %v3137_v16 }
 0x7c0   : > { %v3413_v52 = vpop.permute.xlu2 %3412  ;;  %5121 = vpow2.f32 %v3117_v22 }
 0x7c1   : > { %v3470_v33 = vmul.f32 %v3413_v52, %v3374_v48  ;;  %5123 = vpow2.f32 %v3119_v47 }
 0x7c2   : > { %5125 = vpow2.f32 %v3123_v39 }
 0x7c3   : > { %v7992_v4 = vpop.eup %5115  ;;  %5127 = vpow2.f32 %v3129_v17 }
 0x7c4   : > { %v7994_v45 = vpop.f32.mrf.mxu3  ;;  %v3486_v1 = vpack.c.bf16 %v7992_v4, %v5108_v46  ;;  %v8001_v37 = vpop.eup %5117  ;;  %5129 = vpow2.f32 %v3135_v60 }
 0x7c5   : > { %3437 = vperm.xlu1 %4881, %v7990_v49   ;;  %v8004_v23 = vpop.eup %5119 }
 0x7c6   : > { %3546 = vmatmul.bf16.gmra.mxu3 %v3486_v1  ;;  %v8010_v0 = vpop.eup %5121 }
 0x7c7   : > { %3387 = vperm.xlu0 %4880, %v8001_v37   ;;  %v5124_v10 = vpop.eup %5123 }
 0x7c8   : > { %v8022_v46 = vpop.eup %5125  ;;  %v3428_v34 = vpop.permute.xlu2 %3427 }
 0x7c9   : > { %v8030_v11 = vpop.eup %5127  ;;  %v3473_v31 = vmul.f32 %v3428_v34, %v3377_v30 }
 0x7ca   : > { %v8037_v19 = vpop.eup %5129 }
 0x7cc   : > { %v3534_v63 = vpop.f32.mrf.mxu3 }
 0x7cd   : > { %v3567_v21 = vadd.f32 %v3534_v63, %v3470_v33  ;;  %3452 = vperm.xlu1 %4881, %v8004_v23  }
 0x7cf   : > { %3583 = vst.msk [vmem:[#allocation4 + $0x1a8] sm:$0xff] %vm1402_vm4, %v3567_v21  ;;  %3402 = vperm.xlu0 %4880, %v8010_v0   ;;  %v3371_v21 = vld [vmem:[#allocation4 + $0x190] sm:$0xff] }
 0x7d0   : > { %v8049_v16 = vpop.permute.xlu2 %3442 }
 0x7d7   : > { %3407 = vperm.xlu0 %4880, %v5124_v10  }
 0x7d8   : > { %v8017_v61 = vpop.f32.mrf.mxu3 }
 0x7df   : > { %3417 = vperm.xlu0 %4880, %v8022_v46  }
 0x7e0   : > { %v8028_v51 = vpop.f32.mrf.mxu3 }
 0x7e4   : > { %v3216_v28 = vpop.permute.xlu1 %3215 }
 0x7e5   : > { %v3237_v58 = vsub.f32 %v7844_v29, %v3216_v28  ;;  %v3274_v29 = vld [vmem:[#allocation3 + $0x190] sm:$0xff] }
 0x7e6   : > { %v3290_v55 = vmul.f32 %v7965_v35, %v3274_v29  ;;  %v3272_v35 = vld [vmem:[#allocation3 + $0x180] sm:$0xff]  ;;  %v3380_v29 = vld [vmem:[#allocation4 + $0x1d8] sm:$0xff] }
 0x7e7   : > { %v3206_v3 = vpop.permute.xlu0 %3205  ;;  %3432 = vperm.xlu0 %4880, %v8030_v11   ;;  %v3267_v13 = vmul.f32 1.442695, %v3237_v58  ;;  %v3288_v39 = vmul.f32 %v8001_v37, %v3272_v35  ;;  %v3285_v37 = vld [vmem:[#allocation3 + $0x1e8] sm:$0xff] }
 0x7e8   : > { %v3235_v56 = vsub.f32 %v7850_v6, %v3206_v3  ;;  %v3298_v3 = vmul.f32 %v7990_v49, %v3282_v54  ;;  %v3278_v54 = vld [vmem:[#allocation3 + $0x1b0] sm:$0xff] }
 0x7ea   : > { %v3263_v14 = vmul.f32 1.442695, %v3235_v56 }
 0x7ec   : > { %5131 = vpow2.f32 %v3263_v14  ;;  %v3542_v15 = vpop.f32.mrf.mxu3 }
 0x7ed   : > { %v3570_v5 = vadd.f32 %v3542_v15, %v3473_v31  ;;  %5133 = vpow2.f32 %v3141_v32  ;;  %v3301_v31 = vmul.f32 %v8004_v23, %v3285_v37  ;;  %v3382_v37 = vld [vmem:[#allocation4 + $0x1e8] sm:$0xff] }
 0x7ee   : > { %5135 = vpow2.f32 %v3267_v13  ;;  %v3379_v13 = vld [vmem:[#allocation4 + $0x1d0] sm:$0xff] }
 0x7ef   : > { %3586 = vst.msk [vmem:[#allocation4 + $0x1c0] sm:$0xff] %vm1402_vm4, %v3570_v5  ;;  %3447 = vperm.xlu0 %4880, %v8037_v19  }
 0x7f2   : > { %v5132_v6 = vpop.eup %5131 }
 0x7f3   : > { %v3487_v18 = vpack.c.bf16 %v7979_v12, %v5132_v6  ;;  %v8042_v62 = vpop.eup %5133 }
 0x7f4   : > { %v5136_v12 = vpop.eup %5135  ;;  %v3544_v23 = vpop.f32.mrf.mxu3 }
 0x7f5   : > { %3551 = vmatmul.bf16.gmra.mxu3 %v3487_v18  ;;  %v3372_v18 = vld [vmem:[#allocation4 + $0x198] sm:$0xff] }
 0x7f7   : > { %3310 = vadd.xlane.f32.xlu1 %v7880_v53  ;;  %3462 = vperm.xlu0 %4880, %v8042_v62  }
 0x7fb   : > { %v3221_v59 = vpop.permute.xlu0 %3220 }
 0x7fc   : > { %v3238_v57 = vsub.f32 %v7866_v38, %v3221_v59  ;;  %v8053_v38 = vpop.permute.xlu2 %3457  ;;  %v3373_v59 = vld [vmem:[#allocation4 + $0x1a0] sm:$0xff] }
 0x7fe   : > { %v3269_v2 = vmul.f32 1.442695, %v3238_v57 }
 0x7ff   : > { %3316 = vadd.xlane.f32.xlu1 %v7898_v42  ;;  %v3276_v42 = vld [vmem:[#allocation3 + $0x1a0] sm:$0xff] }
 0x800   : > { %5137 = vpow2.f32 %v3269_v2  ;;  %v3292_v48 = vmul.f32 %v5124_v10, %v3276_v42 }
 0x806   : > { %v5138_v36 = vpop.eup %5137 }
 0x807   : > { %3322 = vadd.xlane.f32.xlu1 %v7920_v40  ;;  %v3488_v53 = vpack.c.bf16 %v5138_v36, %v5136_v12  ;;  %v3279_v40 = vld [vmem:[#allocation3 + $0x1b8] sm:$0xff] }
 0x808   : > { %v3295_v63 = vmul.f32 %v7975_v44, %v3279_v40 }
 0x809   : > { %3556 = vmatmul.bf16.gmra.mxu3 %v3488_v53 }
 0x80f   : > { %3328 = vadd.xlane.f32.xlu1 %v5132_v6  ;;  %v3309_v22 = vpop.xlane.xlu1 %3308 }
 0x810   : > { %v3338_v1 = vadd.f32 %v3309_v22, %v3290_v55  ;;  %v3375_v55 = vld [vmem:[#allocation4 + $0x1b0] sm:$0xff] }
 0x812   : > { %3354 = vst.msk [vmem:[#allocation3 + $0x190] sm:$0xff] %vm1152_vm2, %v3338_v1 }
 0x817   : > { %3334 = vadd.xlane.f32.xlu1 %v5138_v36 }
 0x819   : > { %v3313_v52 = vpop.xlane.xlu2 %3312 }
 0x81a   : > { %v3340_v33 = vadd.f32 %v3313_v52, %v3292_v48 }
 0x81c   : > { %3356 = vst.msk [vmem:[#allocation3 + $0x1a0] sm:$0xff] %vm1152_vm2, %v3340_v33  ;;  %v3378_v33 = vld [vmem:[#allocation4 + $0x1c8] sm:$0xff] }
 0x821   : > { %v3319_v9 = vpop.xlane.xlu2 %3318  ;;  %3314 = vadd.xlane.f32.xlu0 %v7886_v27  ;;  %v3376_v27 = vld [vmem:[#allocation4 + $0x1b8] sm:$0xff] }
 0x822   : > { %v3343_v47 = vadd.f32 %v3319_v9, %v3295_v63 }
 0x824   : > { %3359 = vst.msk [vmem:[#allocation3 + $0x1b8] sm:$0xff] %vm1152_vm2, %v3343_v47  ;;  %v3275_v47 = vld [vmem:[#allocation3 + $0x198] sm:$0xff] }
 0x826   : > { %v3305_v26 = vpop.xlane.xlu0 %3304 }
 0x827   : > { %v3398_v10 = vpop.permute.xlu1 %3397  ;;  %v3336_v17 = vadd.f32 %v3305_v26, %v3288_v39  ;;  %v3294_v39 = vmul.f32 %v8022_v46, %v3278_v54  ;;  %v3284_v46 = vld [vmem:[#allocation3 + $0x1e0] sm:$0xff] }
 0x828   : > { %v3467_v60 = vmul.f32 %v3398_v10, %v3371_v21  ;;  %v3381_v10 = vld [vmem:[#allocation4 + $0x1e0] sm:$0xff] }
 0x829   : > { %v3325_v56 = vpop.xlane.xlu2 %3324  ;;  %3352 = vst.msk [vmem:[#allocation3 + $0x180] sm:$0xff] %vm1152_vm2, %v3336_v17  ;;  %3320 = vadd.xlane.f32.xlu0 %v7918_v41  ;;  %v3369_v41 = vld [vmem:[#allocation4 + $0x180] sm:$0xff] }
 0x82a   : > { %v3564_v44 = vadd.f32 %v7968_v20, %v3467_v60  ;;  %v3346_v30 = vadd.f32 %v3325_v56, %v3298_v3  ;;  %v3281_v60 = vld [vmem:[#allocation3 + $0x1c8] sm:$0xff] }
 0x82c   : > { %3580 = vst.msk [vmem:[#allocation4 + $0x190] sm:$0xff] %vm1402_vm4, %v3564_v44 }
 0x82d   : > { %3362 = vst.msk [vmem:[#allocation3 + $0x1d0] sm:$0xff] %vm1152_vm2, %v3346_v30  ;;  %v3297_v30 = vmul.f32 %v8030_v11, %v3281_v60  ;;  %v3287_v11 = vld [vmem:[#allocation3 + $0x1f8] sm:$0xff] }
 0x82f   : > { %v3423_v34 = vpop.permute.xlu1 %3422 }
 0x830   : > { %v3472_v14 = vmul.f32 %v3423_v34, %v3376_v27 }
 0x831   : > { %v3331_v32 = vpop.xlane.xlu2 %3330  ;;  %3326 = vadd.xlane.f32.xlu0 %v7992_v4 }
 0x832   : > { %v3569_v49 = vadd.f32 %v8028_v51, %v3472_v14  ;;  %v3349_v15 = vadd.f32 %v3331_v32, %v3301_v31  ;;  %v3300_v32 = vmul.f32 %v8037_v19, %v3284_v46  ;;  %v3384_v19 = vld [vmem:[#allocation4 + $0x1f8] sm:$0xff] }
 0x834   : > { %3585 = vst.msk [vmem:[#allocation4 + $0x1b8] sm:$0xff] %vm1402_vm4, %v3569_v49 }
 0x835   : > { %3365 = vst.msk [vmem:[#allocation3 + $0x1e8] sm:$0xff] %vm1152_vm2, %v3349_v15 }
 0x837   : > { %v3438_v4 = vpop.permute.xlu1 %3437 }
 0x838   : > { %v3475_v57 = vmul.f32 %v3438_v4, %v3379_v13 }
 0x839   : > { %v3388_v20 = vpop.permute.xlu0 %3387  ;;  %3332 = vadd.xlane.f32.xlu0 %v5136_v12 }
 0x83a   : > { %v3465_v5 = vmul.f32 %v3388_v20, %v3369_v41  ;;  %v3383_v41 = vld [vmem:[#allocation4 + $0x1f0] sm:$0xff]  ;;  %v3303_v20 = vmul.f32 %v8042_v62, %v3287_v11 }
 0x83c   : > { %v3562_v6 = vadd.f32 %v7952_v7, %v3465_v5 }
 0x83e   : > { %3578 = vst.msk [vmem:[#allocation4 + $0x180] sm:$0xff] %vm1402_vm4, %v3562_v6 }
 0x83f   : > { %v3453_v9 = vpop.permute.xlu1 %3452 }
 0x840   : > { %v3478_v34 = vmul.f32 %v3453_v9, %v3382_v37 }
 0x841   : > { %v3403_v28 = vpop.permute.xlu0 %3402 }
 0x842   : > { %v3468_v58 = vmul.f32 %v3403_v28, %v3372_v18  ;;  %v3479_v18 = vmul.f32 %v8053_v38, %v3383_v41  ;;  %v3280_v38 = vld [vmem:[#allocation3 + $0x1c0] sm:$0xff] }
 0x844   : > { %v3565_v51 = vadd.f32 %v7977_v25, %v3468_v58  ;;  %v3476_v25 = vmul.f32 %v8049_v16, %v3380_v29  ;;  %v3291_v16 = vmul.f32 %v8010_v0, %v3275_v47 }
 0x846   : > { %3581 = vst.msk [vmem:[#allocation4 + $0x198] sm:$0xff] %vm1402_vm4, %v3565_v51  ;;  %v3277_v51 = vld [vmem:[#allocation3 + $0x1a8] sm:$0xff] }
 0x847   : > { %v3293_v4 = vmul.f32 %v7911_v8, %v3277_v51 }
 0x849   : > { %v3547_v2 = vpop.f32.mrf.mxu3  ;;  %v3408_v36 = vpop.permute.xlu0 %3407 }
 0x84a   : > { %v3572_v12 = vadd.f32 %v3547_v2, %v3475_v57  ;;  %v3469_v53 = vmul.f32 %v3408_v36, %v3373_v59  ;;  %v3296_v36 = vmul.f32 %v7915_v43, %v3280_v38 }
 0x84c   : > { %3588 = vst.msk [vmem:[#allocation4 + $0x1d0] sm:$0xff] %vm1402_vm4, %v3572_v12  ;;  %v3566_v7 = vadd.f32 %v7994_v45, %v3469_v53 }
 0x84e   : > { %3582 = vst.msk [vmem:[#allocation4 + $0x1a0] sm:$0xff] %vm1402_vm4, %v3566_v7  ;;  %v3283_v7 = vld [vmem:[#allocation3 + $0x1d8] sm:$0xff] }
 0x84f   : > { %v3299_v29 = vmul.f32 %v7924_v24, %v3283_v7 }
 0x851   : > { %v3549_v22 = vpop.f32.mrf.mxu3  ;;  %v3418_v1 = vpop.permute.xlu0 %3417 }
 0x852   : > { %v3573_v42 = vadd.f32 %v3549_v22, %v3476_v25  ;;  %v3471_v48 = vmul.f32 %v3418_v1, %v3375_v55  ;;  %v3286_v25 = vld [vmem:[#allocation3 + $0x1f0] sm:$0xff] }
 0x853   : > { %v3302_v22 = vmul.f32 %v7938_v50, %v3286_v25 }
 0x854   : > { %3589 = vst.msk [vmem:[#allocation4 + $0x1d8] sm:$0xff] %vm1402_vm4, %v3573_v42  ;;  %v3568_v52 = vadd.f32 %v8017_v61, %v3471_v48 }
 0x856   : > { %3584 = vst.msk [vmem:[#allocation4 + $0x1b0] sm:$0xff] %vm1402_vm4, %v3568_v52 }
 0x859   : > { %v3433_v40 = vpop.permute.xlu0 %3432 }
 0x85a   : > { %v3474_v63 = vmul.f32 %v3433_v40, %v3378_v33 }
 0x85c   : > { %v3571_v45 = vadd.f32 %v3544_v23, %v3474_v63 }
 0x85e   : > { %3587 = vst.msk [vmem:[#allocation4 + $0x1c8] sm:$0xff] %vm1402_vm4, %v3571_v45 }
 0x861   : > { %v3448_v17 = vpop.permute.xlu0 %3447 }
 0x862   : > { %v3477_v3 = vmul.f32 %v3448_v17, %v3381_v10 }
 0x869   : > { %v3463_v23 = vpop.permute.xlu0 %3462 }
 0x86a   : > { %v3311_v35 = vpop.xlane.xlu1 %3310  ;;  %v3480_v13 = vmul.f32 %v3463_v23, %v3384_v19 }
 0x86b   : > { %v3339_v21 = vadd.f32 %v3311_v35, %v3291_v16 }
 0x86d   : > { %3355 = vst.msk [vmem:[#allocation3 + $0x198] sm:$0xff] %vm1152_vm2, %v3339_v21 }
 0x872   : > { %v3317_v61 = vpop.xlane.xlu1 %3316 }
 0x873   : > { %v3342_v26 = vadd.f32 %v3317_v61, %v3294_v39 }
 0x875   : > { %3358 = vst.msk [vmem:[#allocation3 + $0x1b0] sm:$0xff] %vm1152_vm2, %v3342_v26 }
 0x878   : > { %v3552_v56 = vpop.f32.mrf.mxu3 }
 0x879   : > { %v3574_v44 = vadd.f32 %v3552_v56, %v3477_v3 }
 0x87a   : > { %v3323_v0 = vpop.xlane.xlu1 %3322 }
 0x87b   : > { %3590 = vst.msk [vmem:[#allocation4 + $0x1e0] sm:$0xff] %vm1402_vm4, %v3574_v44  ;;  %v3345_v27 = vadd.f32 %v3323_v0, %v3297_v30 }
 0x87d   : > { %3361 = vst.msk [vmem:[#allocation3 + $0x1c8] sm:$0xff] %vm1152_vm2, %v3345_v27 }
 0x880   : > { %v3554_v14 = vpop.f32.mrf.mxu3 }
 0x881   : > { %v3575_v31 = vadd.f32 %v3554_v14, %v3478_v34 }
 0x882   : > { %v3329_v49 = vpop.xlane.xlu1 %3328 }
 0x883   : > { %3591 = vst.msk [vmem:[#allocation4 + $0x1e8] sm:$0xff] %vm1402_vm4, %v3575_v31  ;;  %v3348_v15 = vadd.f32 %v3329_v49, %v3300_v32 }
 0x885   : > { %3364 = vst.msk [vmem:[#allocation3 + $0x1e0] sm:$0xff] %vm1152_vm2, %v3348_v15 }
 0x88a   : > { %v3335_v5 = vpop.xlane.xlu1 %3334 }
 0x88b   : > { %v3351_v6 = vadd.f32 %v3335_v5, %v3303_v20 }
 0x88c   : > { %v3557_v28 = vpop.f32.mrf.mxu3 }
 0x88d   : > { %3367 = vst.msk [vmem:[#allocation3 + $0x1f8] sm:$0xff] %vm1152_vm2, %v3351_v6  ;;  %v3576_v58 = vadd.f32 %v3557_v28, %v3479_v18 }
 0x88f   : > { %3592 = vst.msk [vmem:[#allocation4 + $0x1f0] sm:$0xff] %vm1402_vm4, %v3576_v58 }
 0x894   : > { %v3315_v59 = vpop.xlane.xlu0 %3314  ;;  %v3559_v57 = vpop.f32.mrf.mxu3 }
 0x895   : > { %v3341_v2 = vadd.f32 %v3315_v59, %v3293_v4  ;;  %v3577_v62 = vadd.f32 %v3559_v57, %v3480_v13 }
 0x897   : > { %3357 = vst.msk [vmem:[#allocation3 + $0x1a8] sm:$0xff] %vm1152_vm2, %v3341_v2 }
 0x898   : > { %3593 = vst.msk [vmem:[#allocation4 + $0x1f8] sm:$0xff] %vm1402_vm4, %v3577_v62 }
 0x89c   : > { %v3321_v12 = vpop.xlane.xlu0 %3320 }
 0x89d   : > { %v3344_v53 = vadd.f32 %v3321_v12, %v3296_v36 }
 0x89f   : > { %3360 = vst.msk [vmem:[#allocation3 + $0x1c0] sm:$0xff] %vm1152_vm2, %v3344_v53 }
 0x8a4   : > { %v3327_v55 = vpop.xlane.xlu0 %3326 }
 0x8a5   : > { %v3347_v8 = vadd.f32 %v3327_v55, %v3299_v29 }
 0x8a7   : > { %3363 = vst.msk [vmem:[#allocation3 + $0x1d8] sm:$0xff] %vm1152_vm2, %v3347_v8 }
 0x8ab   : > { %3613 = sbr.rel (%p4726_p0) target bundleno = 2663 (0xa67), region = 89 }
 0x8ac   : > { %v3333_v1 = vpop.xlane.xlu0 %3332 }
 0x8ad   : > { %v3350_v42 = vadd.f32 %v3333_v1, %v3302_v22 }
 0x8af   : > { %3366 = vst.msk [vmem:[#allocation3 + $0x1f0] sm:$0xff] %vm1152_vm2, %v3350_v42 }
 0x8b0   : > { %v3618_v43 = vld [vmem:[#allocation3 + $0x20] sm:$0xff]  ;;  %v3616_v48 = vld [vmem:[#allocation3 + $0x10] sm:$0xff]  ;;  %v5418_v33 = vmov 0   ;;  %v3619_v24 = vld [vmem:[#allocation3 + $0x28] sm:$0xff]  ;;  %vm4398_vm2 = vcmask 523264   ;;  %vm4415_vm9 = vcmask 785408  }
 0x8b1   : > { %v3614_v52 = vld [vmem:[#allocation3] sm:$0xff]  ;;  %5191 = vset.pattern.permute.xlu2 %v5418_v33  ;;  %5190 = vset.pattern.permute.xlu1 %v5418_v33  ;;  %5193 = vrcp.f32 %v3618_v43  ;;  %v3617_v40 = vld [vmem:[#allocation3 + $0x18] sm:$0xff]  ;;  %v3615_v50 = vld [vmem:[#allocation3 + $0x8] sm:$0xff] }
 0x8b2   : > { %5189 = vset.pattern.permute.xlu0 %v5418_v33  ;;  %5195 = vrcp.f32 %v3616_v48  ;;  %v3622_v47 = vld [vmem:[#allocation3 + $0x40] sm:$0xff]  ;;  %v3621_v35 = vld [vmem:[#allocation3 + $0x38] sm:$0xff]  ;;  %v3620_v54 = vld [vmem:[#allocation3 + $0x30] sm:$0xff] }
 0x8b3   : > { %5197 = vrcp.f32 %v3614_v52  ;;  %v3625_v61 = vld [vmem:[#allocation3 + $0x58] sm:$0xff]  ;;  %v3624_v10 = vld [vmem:[#allocation3 + $0x50] sm:$0xff]  ;;  %v3623_v60 = vld [vmem:[#allocation3 + $0x48] sm:$0xff] }
 0x8b4   : > { %5199 = vrcp.f32 %v3619_v24  ;;  %v3628_v56 = vld [vmem:[#allocation3 + $0x70] sm:$0xff]  ;;  %v3627_v30 = vld [vmem:[#allocation3 + $0x68] sm:$0xff]  ;;  %v3626_v27 = vld [vmem:[#allocation3 + $0x60] sm:$0xff] }
 0x8b5   : > { %5201 = vrcp.f32 %v3617_v40  ;;  %v3759_v46 = vld [vmem:[#allocation3 + $0x88] sm:$0xff]  ;;  %v3758_v14 = vld [vmem:[#allocation3 + $0x80] sm:$0xff]  ;;  %v3629_v32 = vld [vmem:[#allocation3 + $0x78] sm:$0xff] }
 0x8b6   : > { %5203 = vrcp.f32 %v3615_v50  ;;  %v3762_v15 = vld [vmem:[#allocation3 + $0xa0] sm:$0xff]  ;;  %v3761_v41 = vld [vmem:[#allocation3 + $0x98] sm:$0xff]  ;;  %v3760_v5 = vld [vmem:[#allocation3 + $0x90] sm:$0xff] }
 0x8b7   : > { %v5194_v63 = vpop.eup %5193  ;;  %5205 = vrcp.f32 %v3622_v47  ;;  %v3765_v18 = vld [vmem:[#allocation3 + $0xb8] sm:$0xff]  ;;  %v3764_v28 = vld [vmem:[#allocation3 + $0xb0] sm:$0xff]  ;;  %v3763_v19 = vld [vmem:[#allocation3 + $0xa8] sm:$0xff] }
 0x8b8   : > { %v5196_v45 = vpop.eup %5195  ;;  %3684 = vperm.xlu2 %5191, %v5194_v63   ;;  %5207 = vrcp.f32 %v3621_v35  ;;  %v3768_v13 = vld [vmem:[#allocation3 + $0xd0] sm:$0xff]  ;;  %v3767_v59 = vld [vmem:[#allocation3 + $0xc8] sm:$0xff]  ;;  %v3766_v2 = vld [vmem:[#allocation3 + $0xc0] sm:$0xff] }
 0x8b9   : > { %v5198_v9 = vpop.eup %5197  ;;  %3674 = vperm.xlu1 %5190, %v5196_v45   ;;  %5209 = vrcp.f32 %v3620_v54  ;;  %v3771_v38 = vld [vmem:[#allocation3 + $0xe8] sm:$0xff]  ;;  %v3770_v12 = vld [vmem:[#allocation3 + $0xe0] sm:$0xff]  ;;  %v3769_v7 = vld [vmem:[#allocation3 + $0xd8] sm:$0xff] }
 0x8ba   : > { %3664 = vperm.xlu0 %5189, %v5198_v9   ;;  %v5200_v16 = vpop.eup %5199  ;;  %5211 = vrcp.f32 %v3625_v61  ;;  %v3902_v55 = vld [vmem:[#allocation3 + $0x100] sm:$0xff]  ;;  %v3773_v25 = vld [vmem:[#allocation3 + $0xf8] sm:$0xff]  ;;  %v3772_v1 = vld [vmem:[#allocation3 + $0xf0] sm:$0xff] }
 0x8bb   : > { %v5202_v21 = vpop.eup %5201  ;;  %5213 = vrcp.f32 %v3624_v10  ;;  %v3905_v43 = vld [vmem:[#allocation3 + $0x118] sm:$0xff]  ;;  %v3904_v52 = vld [vmem:[#allocation3 + $0x110] sm:$0xff]  ;;  %v3903_v24 = vld [vmem:[#allocation3 + $0x108] sm:$0xff] }
 0x8bc   : > { %v5204_v39 = vpop.eup %5203  ;;  %5215 = vrcp.f32 %v3623_v60  ;;  %v3908_v50 = vld [vmem:[#allocation3 + $0x130] sm:$0xff]  ;;  %v3907_v45 = vld [vmem:[#allocation3 + $0x128] sm:$0xff]  ;;  %v3906_v47 = vld [vmem:[#allocation3 + $0x120] sm:$0xff] }
 0x8bd   : > { %v5206_v26 = vpop.eup %5205  ;;  %5217 = vrcp.f32 %v3628_v56  ;;  %v3914_v60 = vld [vmem:[#allocation3 + $0x160] sm:$0xff]  ;;  %v3913_v56 = vld [vmem:[#allocation3 + $0x158] sm:$0xff] }
 0x8be   : > { %v5208_v17 = vpop.eup %5207  ;;  %5219 = vrcp.f32 %v3627_v30  ;;  %v3912_v30 = vld [vmem:[#allocation3 + $0x150] sm:$0xff] }
 0x8bf   : > { %v5210_v3 = vpop.eup %5209  ;;  %5221 = vrcp.f32 %v3626_v27 }
 0x8c0   : > { %3689 = vperm.xlu2 %5191, %v5200_v16   ;;  %v5212_v44 = vpop.eup %5211  ;;  %5223 = vrcp.f32 %v3759_v46 }
 0x8c1   : > { %3679 = vperm.xlu1 %5190, %v5202_v21   ;;  %v5214_v0 = vpop.eup %5213  ;;  %5225 = vrcp.f32 %v3758_v14  ;;  %v3911_v21 = vld [vmem:[#allocation3 + $0x148] sm:$0xff] }
 0x8c2   : > { %3669 = vperm.xlu0 %5189, %v5204_v39   ;;  %v5216_v37 = vpop.eup %5215  ;;  %5227 = vrcp.f32 %v3629_v32  ;;  %v3910_v39 = vld [vmem:[#allocation3 + $0x140] sm:$0xff] }
 0x8c3   : > { %v5218_v34 = vpop.eup %5217  ;;  %5229 = vrcp.f32 %v3762_v15 }
 0x8c4   : > { %v5220_v31 = vpop.eup %5219  ;;  %5231 = vrcp.f32 %v3761_v41  ;;  %v4048_v41 = vld [vmem:[#allocation3 + $0x190] sm:$0xff] }
 0x8c5   : > { %v5222_v49 = vpop.eup %5221  ;;  %5233 = vrcp.f32 %v3760_v5  ;;  %v4047_v5 = vld [vmem:[#allocation3 + $0x188] sm:$0xff] }
 0x8c6   : > { %v5224_v11 = vpop.eup %5223  ;;  %5235 = vrcp.f32 %v3765_v18  ;;  %v4046_v18 = vld [vmem:[#allocation3 + $0x180] sm:$0xff] }
 0x8c7   : > { %v5226_v20 = vpop.eup %5225  ;;  %5237 = vrcp.f32 %v3764_v28 }
 0x8c8   : > { %3704 = vperm.xlu2 %5191, %v5206_v26   ;;  %v5228_v6 = vpop.eup %5227  ;;  %5239 = vrcp.f32 %v3763_v19  ;;  %v3909_v26 = vld [vmem:[#allocation3 + $0x138] sm:$0xff] }
 0x8c9   : > { %3699 = vperm.xlu1 %5190, %v5208_v17   ;;  %v5230_v23 = vpop.eup %5229  ;;  %5241 = vrcp.f32 %v3768_v13 }
 0x8ca   : > { %3694 = vperm.xlu0 %5189, %v5210_v3   ;;  %v5232_v58 = vpop.eup %5231  ;;  %5243 = vrcp.f32 %v3767_v59 }
 0x8cb   : > { %v5234_v51 = vpop.eup %5233  ;;  %5245 = vrcp.f32 %v3766_v2 }
 0x8cc   : > { %v5236_v4 = vpop.eup %5235  ;;  %5247 = vrcp.f32 %v3771_v38 }
 0x8cd   : > { %v5238_v57 = vpop.eup %5237  ;;  %5249 = vrcp.f32 %v3770_v12  ;;  %v4054_v12 = vld [vmem:[#allocation3 + $0x1c0] sm:$0xff] }
 0x8ce   : > { %v5240_v62 = vpop.eup %5239  ;;  %5251 = vrcp.f32 %v3769_v7  ;;  %v4053_v7 = vld [vmem:[#allocation3 + $0x1b8] sm:$0xff] }
 0x8cf   : > { %v5242_v36 = vpop.eup %5241  ;;  %5253 = vrcp.f32 %v3902_v55  ;;  %v4052_v55 = vld [vmem:[#allocation3 + $0x1b0] sm:$0xff] }
 0x8d0   : > { %3719 = vperm.xlu2 %5191, %v5212_v44   ;;  %v5244_v53 = vpop.eup %5243  ;;  %5255 = vrcp.f32 %v3773_v25 }
 0x8d1   : > { %3714 = vperm.xlu1 %5190, %v5214_v0   ;;  %v5246_v29 = vpop.eup %5245  ;;  %5257 = vrcp.f32 %v3772_v1 }
 0x8d2   : > { %3709 = vperm.xlu0 %5189, %v5216_v37   ;;  %v5248_v8 = vpop.eup %5247  ;;  %5259 = vrcp.f32 %v3905_v43  ;;  %v3917_v37 = vld [vmem:[#allocation3 + $0x178] sm:$0xff] }
 0x8d3   : > { %v5250_v22 = vpop.eup %5249  ;;  %5261 = vrcp.f32 %v3904_v52 }
 0x8d4   : > { %v5252_v42 = vpop.eup %5251  ;;  %5263 = vrcp.f32 %v3903_v24 }
 0x8d5   : > { %v5254_v48 = vpop.eup %5253  ;;  %5265 = vrcp.f32 %v3908_v50 }
 0x8d6   : > { %v5256_v33 = vpop.eup %5255  ;;  %5267 = vrcp.f32 %v3907_v45  ;;  %v4060_v45 = vld [vmem:[#allocation3 + $0x1f0] sm:$0xff] }
 0x8d7   : > { %v5258_v40 = vpop.eup %5257  ;;  %5269 = vrcp.f32 %v3906_v47  ;;  %v4059_v47 = vld [vmem:[#allocation3 + $0x1e8] sm:$0xff] }
 0x8d8   : > { %3734 = vperm.xlu2 %5191, %v5218_v34   ;;  %v5260_v63 = vpop.eup %5259  ;;  %5271 = vrcp.f32 %v3911_v21  ;;  %v3916_v34 = vld [vmem:[#allocation3 + $0x170] sm:$0xff]  ;;  %v4058_v21 = vld [vmem:[#allocation3 + $0x1e0] sm:$0xff] }
 0x8d9   : > { %3729 = vperm.xlu1 %5190, %v5220_v31   ;;  %v5262_v9 = vpop.eup %5261  ;;  %5273 = vrcp.f32 %v3910_v39  ;;  %v3915_v31 = vld [vmem:[#allocation3 + $0x168] sm:$0xff] }
 0x8da   : > { %3724 = vperm.xlu0 %5189, %v5222_v49   ;;  %v5264_v16 = vpop.eup %5263  ;;  %5275 = vrcp.f32 %v3909_v26 }
 0x8db   : > { %v5266_v54 = vpop.eup %5265  ;;  %5277 = vrcp.f32 %v3914_v60 }
 0x8dc   : > { %v5268_v61 = vpop.eup %5267  ;;  %5279 = vrcp.f32 %v3913_v56 }
 0x8dd   : > { %v5270_v10 = vpop.eup %5269  ;;  %5281 = vrcp.f32 %v3912_v30  ;;  %v3791_v30 = vld [vmem:[#allocation4 + $0x88] sm:$0xff] }
 0x8de   : > { %v5272_v3 = vpop.eup %5271  ;;  %5283 = vrcp.f32 %v3917_v37  ;;  %v3790_v37 = vld [vmem:[#allocation4 + $0x80] sm:$0xff] }
 0x8df   : > { %v5274_v44 = vpop.eup %5273  ;;  %5285 = vrcp.f32 %v3916_v34 }
 0x8e0   : > { %3813 = vperm.xlu2 %5191, %v5224_v11   ;;  %v5276_v0 = vpop.eup %5275  ;;  %5287 = vrcp.f32 %v3915_v31 }
 0x8e1   : > { %3808 = vperm.xlu1 %5190, %v5226_v20   ;;  %v5278_v46 = vpop.eup %5277  ;;  %5289 = vrcp.f32 %v4048_v41  ;;  %v3794_v41 = vld [vmem:[#allocation4 + $0xa0] sm:$0xff] }
 0x8e2   : > { %3739 = vperm.xlu0 %5189, %v5228_v6   ;;  %v5280_v14 = vpop.eup %5279  ;;  %5291 = vrcp.f32 %v4047_v5  ;;  %v3793_v5 = vld [vmem:[#allocation4 + $0x98] sm:$0xff] }
 0x8e3   : > { %v5282_v32 = vpop.eup %5281  ;;  %5293 = vrcp.f32 %v4046_v18  ;;  %v3792_v18 = vld [vmem:[#allocation4 + $0x90] sm:$0xff] }
 0x8e4   : > { %v5284_v20 = vpop.eup %5283 }
 0x8e5   : > { %v5286_v6 = vpop.eup %5285 }
 0x8e8   : > { %3828 = vperm.xlu2 %5191, %v5230_v23   ;;  %v5288_v23 = vpop.eup %5287 }
 0x8e9   : > { %3823 = vperm.xlu1 %5190, %v5232_v58   ;;  %v5290_v13 = vpop.eup %5289 }
 0x8ea   : > { %3818 = vperm.xlu0 %5189, %v5234_v51   ;;  %v4051_v51 = vld [vmem:[#allocation3 + $0x1a8] sm:$0xff]  ;;  %v5292_v59 = vpop.eup %5291 }
 0x8eb   : > { %v5294_v2 = vpop.eup %5293  ;;  %5295 = vrcp.f32 %v4051_v51 }
 0x8f0   : > { %3843 = vperm.xlu2 %5191, %v5236_v4   ;;  %v4050_v4 = vld [vmem:[#allocation3 + $0x1a0] sm:$0xff] }
 0x8f1   : > { %3838 = vperm.xlu1 %5190, %v5238_v57   ;;  %v4049_v57 = vld [vmem:[#allocation3 + $0x198] sm:$0xff]  ;;  %5297 = vrcp.f32 %v4050_v4 }
 0x8f2   : > { %3833 = vperm.xlu0 %5189, %v5240_v62   ;;  %5299 = vrcp.f32 %v4049_v57 }
 0x8f3   : > { %5301 = vrcp.f32 %v4054_v12  ;;  %v3795_v12 = vld [vmem:[#allocation4 + $0xa8] sm:$0xff] }
 0x8f4   : > { %5303 = vrcp.f32 %v4053_v7 }
 0x8f5   : > { %5305 = vrcp.f32 %v4052_v55 }
 0x8f8   : > { %3858 = vperm.xlu2 %5191, %v5242_v36  }
 0x8f9   : > { %3853 = vperm.xlu1 %5190, %v5244_v53   ;;  %v5296_v53 = vpop.eup %5295 }
 0x8fa   : > { %3848 = vperm.xlu0 %5189, %v5246_v29   ;;  %v5298_v29 = vpop.eup %5297 }
 0x900   : > { %3873 = vperm.xlu2 %5191, %v5248_v8   ;;  %v5300_v8 = vpop.eup %5299 }
 0x901   : > { %3868 = vperm.xlu1 %5190, %v5250_v22   ;;  %v5302_v43 = vpop.eup %5301 }
 0x902   : > { %3863 = vperm.xlu0 %5189, %v5252_v42   ;;  %v4057_v42 = vld [vmem:[#allocation3 + $0x1d8] sm:$0xff]  ;;  %v5304_v52 = vpop.eup %5303 }
 0x903   : > { %v5306_v24 = vpop.eup %5305  ;;  %5307 = vrcp.f32 %v4057_v42  ;;  %v3799_v42 = vld [vmem:[#allocation4 + $0xc8] sm:$0xff] }
 0x908   : > { %3952 = vperm.xlu2 %5191, %v5254_v48   ;;  %v4056_v48 = vld [vmem:[#allocation3 + $0x1d0] sm:$0xff] }
 0x909   : > { %3883 = vperm.xlu1 %5190, %v5256_v33   ;;  %v4055_v33 = vld [vmem:[#allocation3 + $0x1c8] sm:$0xff]  ;;  %5309 = vrcp.f32 %v4056_v48  ;;  %v3798_v48 = vld [vmem:[#allocation4 + $0xc0] sm:$0xff] }
 0x90a   : > { %3878 = vperm.xlu0 %5189, %v5258_v40   ;;  %5311 = vrcp.f32 %v4055_v33 }
 0x90b   : > { %5313 = vrcp.f32 %v4060_v45  ;;  %v3803_v45 = vld [vmem:[#allocation4 + $0xe8] sm:$0xff] }
 0x90c   : > { %5315 = vrcp.f32 %v4059_v47  ;;  %v3802_v47 = vld [vmem:[#allocation4 + $0xe0] sm:$0xff] }
 0x90d   : > { %5317 = vrcp.f32 %v4058_v21  ;;  %v3801_v21 = vld [vmem:[#allocation4 + $0xd8] sm:$0xff] }
 0x910   : > { %3967 = vperm.xlu2 %5191, %v5260_v63  }
 0x911   : > { %3962 = vperm.xlu1 %5190, %v5262_v9   ;;  %v5308_v9 = vpop.eup %5307 }
 0x912   : > { %3957 = vperm.xlu0 %5189, %v5264_v16   ;;  %v8108_v35 = vpop.permute.xlu2 %3684  ;;  %v5310_v16 = vpop.eup %5309 }
 0x918   : > { %3982 = vperm.xlu2 %5191, %v5266_v54   ;;  %v5312_v54 = vpop.eup %5311 }
 0x919   : > { %3977 = vperm.xlu1 %5190, %v5268_v61  }
 0x91a   : > { %3972 = vperm.xlu0 %5189, %v5270_v10   ;;  %v8110_v17 = vpop.permute.xlu2 %3689  ;;  %v5314_v10 = vpop.eup %5313 }
 0x91b   : > { %v5316_v60 = vpop.eup %5315 }
 0x91c   : > { %v5318_v56 = vpop.eup %5317 }
 0x920   : > { %3997 = vperm.xlu2 %5191, %v5272_v3   ;;  %v4061_v3 = vld [vmem:[#allocation3 + $0x1f8] sm:$0xff] }
 0x921   : > { %3992 = vperm.xlu1 %5190, %v5274_v44   ;;  %5319 = vrcp.f32 %v4061_v3 }
 0x922   : > { %3987 = vperm.xlu0 %5189, %v5276_v0   ;;  %v8112_v27 = vpop.permute.xlu2 %3704 }
 0x928   : > { %4012 = vperm.xlu2 %5191, %v5278_v46  }
 0x929   : > { %4007 = vperm.xlu1 %5190, %v5280_v14   ;;  %v5320_v14 = vpop.eup %5319 }
 0x92a   : > { %4002 = vperm.xlu0 %5189, %v5282_v32   ;;  %v8114_v49 = vpop.permute.xlu2 %3719 }
 0x92b   : > { %v8116_v15 = vpop.permute.xlu1 %3674 }
 0x92c   : > { %v8118_v11 = vpop.permute.xlu0 %3664 }
 0x930   : > { %4027 = vperm.xlu2 %5191, %v5284_v20  }
 0x931   : > { %4022 = vperm.xlu1 %5190, %v5286_v6  }
 0x932   : > { %4017 = vperm.xlu0 %5189, %v5288_v23   ;;  %v8120_v28 = vpop.permute.xlu2 %3734 }
 0x933   : > { %v8122_v58 = vpop.permute.xlu1 %3679 }
 0x934   : > { %v8124_v19 = vpop.permute.xlu0 %3669 }
 0x938   : > { %4106 = vperm.xlu2 %5191, %v5290_v13  }
 0x939   : > { %4101 = vperm.xlu1 %5190, %v5292_v59   ;;  %v3797_v59 = vld [vmem:[#allocation4 + $0xb8] sm:$0xff] }
 0x93a   : > { %4096 = vperm.xlu0 %5189, %v5294_v2   ;;  %v3814_v62 = vpop.permute.xlu2 %3813  ;;  %v3796_v2 = vld [vmem:[#allocation4 + $0xb0] sm:$0xff] }
 0x93b   : > { %v8126_v38 = vpop.permute.xlu1 %3699  ;;  %v3887_v34 = vmul.f32 %v3814_v62, %v3791_v30 }
 0x93c   : > { %v8128_v36 = vpop.permute.xlu0 %3694 }
 0x940   : > { %4121 = vperm.xlu2 %5191, %v5296_v53  }
 0x941   : > { %4116 = vperm.xlu1 %5190, %v5298_v29  }
 0x942   : > { %4111 = vperm.xlu0 %5189, %v5300_v8   ;;  %v3829_v25 = vpop.permute.xlu2 %3828  ;;  %v3800_v8 = vld [vmem:[#allocation4 + $0xd0] sm:$0xff] }
 0x943   : > { %v8130_v22 = vpop.permute.xlu1 %3714  ;;  %v3890_v23 = vmul.f32 %v3829_v25, %v3794_v41  ;;  %v3936_v41 = vld [vmem:[#allocation4 + $0x110] sm:$0xff] }
 0x944   : > { %v8132_v1 = vpop.permute.xlu0 %3709 }
 0x948   : > { %4136 = vperm.xlu2 %5191, %v5302_v43  }
 0x949   : > { %4131 = vperm.xlu1 %5190, %v5304_v52  }
 0x94a   : > { %4126 = vperm.xlu0 %5189, %v5306_v24   ;;  %v3844_v40 = vpop.permute.xlu2 %3843 }
 0x94b   : > { %v8134_v50 = vpop.permute.xlu1 %3729  ;;  %v3893_v53 = vmul.f32 %v3844_v40, %v3797_v59  ;;  %v3939_v59 = vld [vmem:[#allocation4 + $0x128] sm:$0xff] }
 0x94c   : > { %v8136_v63 = vpop.permute.xlu0 %3724 }
 0x950   : > { %4151 = vperm.xlu2 %5191, %v5308_v9  }
 0x951   : > { %4146 = vperm.xlu1 %5190, %v5310_v16  }
 0x952   : > { %4141 = vperm.xlu0 %5189, %v5312_v54   ;;  %v3859_v39 = vpop.permute.xlu2 %3858 }
 0x953   : > { %v3809_v61 = vpop.permute.xlu1 %3808  ;;  %v3896_v52 = vmul.f32 %v3859_v39, %v3800_v8  ;;  %v3942_v8 = vld [vmem:[#allocation4 + $0x140] sm:$0xff] }
 0x954   : > { %v8138_v26 = vpop.permute.xlu0 %3739  ;;  %v3886_v31 = vmul.f32 %v3809_v61, %v3790_v37 }
 0x958   : > { %4166 = vperm.xlu2 %5191, %v5314_v10  }
 0x959   : > { %4161 = vperm.xlu1 %5190, %v5316_v60   ;;  %v3934_v60 = vld [vmem:[#allocation4 + $0x100] sm:$0xff] }
 0x95a   : > { %4156 = vperm.xlu0 %5189, %v5318_v56   ;;  %v3874_v44 = vpop.permute.xlu2 %3873  ;;  %v3805_v56 = vld [vmem:[#allocation4 + $0xf8] sm:$0xff] }
 0x95b   : > { %v3824_v0 = vpop.permute.xlu1 %3823  ;;  %v3899_v54 = vmul.f32 %v3874_v44, %v3803_v45  ;;  %v3945_v45 = vld [vmem:[#allocation4 + $0x158] sm:$0xff] }
 0x95c   : > { %v3819_v46 = vpop.permute.xlu0 %3818  ;;  %v3889_v51 = vmul.f32 %v3824_v0, %v3793_v5  ;;  %v3804_v0 = vld [vmem:[#allocation4 + $0xf0] sm:$0xff]  ;;  %v3935_v5 = vld [vmem:[#allocation4 + $0x108] sm:$0xff] }
 0x95d   : > { %v3888_v13 = vmul.f32 %v3819_v46, %v3792_v18 }
 0x960   : > { %4208 = vrot.lane.b32.xlu2 %v3887_v34, %s5419_s20 }
 0x961   : > { %4206 = vrot.lane.b32.xlu1 %v3886_v31, %s5419_s20 }
 0x962   : > { %4171 = vperm.xlu0 %5189, %v5320_v14   ;;  %v3953_v32 = vpop.permute.xlu2 %3952  ;;  %v3937_v14 = vld [vmem:[#allocation4 + $0x118] sm:$0xff] }
 0x963   : > { %v3839_v20 = vpop.permute.xlu1 %3838  ;;  %v4030_v37 = vmul.f32 %v3953_v32, %v3934_v60  ;;  %v3948_v60 = vld [vmem:[#allocation4 + $0x170] sm:$0xff] }
 0x964   : > { %v3834_v6 = vpop.permute.xlu0 %3833  ;;  %v3892_v7 = vmul.f32 %v3839_v20, %v3796_v2  ;;  %v3938_v2 = vld [vmem:[#allocation4 + $0x120] sm:$0xff] }
 0x965   : > { %v3891_v29 = vmul.f32 %v3834_v6, %v3795_v12 }
 0x968   : > { %4214 = vrot.lane.b32.xlu2 %v3890_v23, %s5419_s20 }
 0x969   : > { %4212 = vrot.lane.b32.xlu1 %v3889_v51, %s5419_s20  ;;  %v3940_v51 = vld [vmem:[#allocation4 + $0x130] sm:$0xff] }
 0x96a   : > { %4210 = vrot.lane.b32.xlu0 %v3888_v13, %s5419_s20  ;;  %v3968_v4 = vpop.permute.xlu2 %3967 }
 0x96b   : > { %v3854_v57 = vpop.permute.xlu1 %3853  ;;  %v4033_v6 = vmul.f32 %v3968_v4, %v3937_v14  ;;  %v4079_v14 = vld [vmem:[#allocation4 + $0x188] sm:$0xff] }
 0x96c   : > { %v3849_v62 = vpop.permute.xlu0 %3848  ;;  %v3895_v33 = vmul.f32 %v3854_v57, %v3799_v42  ;;  %v3941_v42 = vld [vmem:[#allocation4 + $0x138] sm:$0xff] }
 0x96d   : > { %v3894_v24 = vmul.f32 %v3849_v62, %v3798_v48 }
 0x970   : > { %4220 = vrot.lane.b32.xlu2 %v3893_v53, %s5419_s20 }
 0x971   : > { %4218 = vrot.lane.b32.xlu1 %v3892_v7, %s5419_s20  ;;  %v3943_v7 = vld [vmem:[#allocation4 + $0x148] sm:$0xff] }
 0x972   : > { %4216 = vrot.lane.b32.xlu0 %v3891_v29, %s5419_s20  ;;  %v3983_v55 = vpop.permute.xlu2 %3982 }
 0x973   : > { %v3869_v25 = vpop.permute.xlu1 %3868  ;;  %v4036_v62 = vmul.f32 %v3983_v55, %v3940_v51  ;;  %v4083_v51 = vld [vmem:[#allocation4 + $0x1a8] sm:$0xff] }
 0x974   : > { %v3864_v43 = vpop.permute.xlu0 %3863  ;;  %v3898_v61 = vmul.f32 %v3869_v25, %v3802_v47  ;;  %v3944_v47 = vld [vmem:[#allocation4 + $0x150] sm:$0xff] }
 0x975   : > { %v3897_v10 = vmul.f32 %v3864_v43, %v3801_v21 }
 0x978   : > { %4226 = vrot.lane.b32.xlu2 %v3896_v52, %s5419_s20 }
 0x979   : > { %4224 = vrot.lane.b32.xlu1 %v3895_v33, %s5419_s20  ;;  %v3946_v33 = vld [vmem:[#allocation4 + $0x160] sm:$0xff] }
 0x97a   : > { %4222 = vrot.lane.b32.xlu0 %v3894_v24, %s5419_s20  ;;  %v3998_v40 = vpop.permute.xlu2 %3997 }
 0x97b   : > { %v3884_v9 = vpop.permute.xlu1 %3883  ;;  %v4039_v43 = vmul.f32 %v3998_v40, %v3943_v7 }
 0x97c   : > { %v3879_v16 = vpop.permute.xlu0 %3878  ;;  %v3901_v46 = vmul.f32 %v3884_v9, %v3805_v56  ;;  %v3947_v56 = vld [vmem:[#allocation4 + $0x168] sm:$0xff] }
 0x97d   : > { %v3900_v34 = vmul.f32 %v3879_v16, %v3804_v0 }
 0x980   : > { %4232 = vrot.lane.b32.xlu2 %v3899_v54, %s5419_s20 }
 0x981   : > { %4230 = vrot.lane.b32.xlu1 %v3898_v61, %s5419_s20  ;;  %v3949_v61 = vld [vmem:[#allocation4 + $0x178] sm:$0xff] }
 0x982   : > { %4228 = vrot.lane.b32.xlu0 %v3897_v10, %s5419_s20  ;;  %v4013_v39 = vpop.permute.xlu2 %4012 }
 0x983   : > { %v3963_v3 = vpop.permute.xlu1 %3962  ;;  %v4042_v16 = vmul.f32 %v4013_v39, %v3946_v33 }
 0x984   : > { %v3958_v30 = vpop.permute.xlu0 %3957  ;;  %v4032_v18 = vmul.f32 %v3963_v3, %v3936_v41  ;;  %v4078_v41 = vld [vmem:[#allocation4 + $0x180] sm:$0xff] }
 0x985   : > { %v4031_v23 = vmul.f32 %v3958_v30, %v3935_v5 }
 0x988   : > { %4270 = vrot.lane.b32.xlu2 %v4030_v37, %s5420_s8 }
 0x989   : > { %4236 = vrot.lane.b32.xlu1 %v3901_v46, %s5419_s20  ;;  %v4080_v46 = vld [vmem:[#allocation4 + $0x190] sm:$0xff] }
 0x98a   : > { %4234 = vrot.lane.b32.xlu0 %v3900_v34, %s5419_s20  ;;  %v4028_v44 = vpop.permute.xlu2 %4027 }
 0x98b   : > { %v3978_v31 = vpop.permute.xlu1 %3977  ;;  %v4045_v30 = vmul.f32 %v4028_v44, %v3949_v61 }
 0x98c   : > { %v3973_v20 = vpop.permute.xlu0 %3972  ;;  %v4035_v12 = vmul.f32 %v3978_v31, %v3939_v59 }
 0x98d   : > { %v4034_v53 = vmul.f32 %v3973_v20, %v3938_v2  ;;  %v3647_v20 = vld [vmem:[#allocation4 + $0x8] sm:$0xff] }
 0x98e   : > { %v3743_v44 = vmul.f32 %v8124_v19, %v3647_v20  ;;  %v4090_v20 = vld [vmem:[#allocation4 + $0x1e0] sm:$0xff] }
 0x990   : > { %4276 = vrot.lane.b32.xlu2 %v4033_v6, %s5420_s8 }
 0x991   : > { %4274 = vrot.lane.b32.xlu1 %v4032_v18, %s5420_s8 }
 0x992   : > { %4272 = vrot.lane.b32.xlu0 %v4031_v23, %s5420_s8  ;;  %v4107_v32 = vpop.permute.xlu2 %4106 }
 0x993   : > { %v3993_v13 = vpop.permute.xlu1 %3992  ;;  %v4176_v5 = vmul.f32 %v4107_v32, %v4080_v46  ;;  %v4081_v32 = vld [vmem:[#allocation4 + $0x198] sm:$0xff]  ;;  %v4092_v46 = vld [vmem:[#allocation4 + $0x1f0] sm:$0xff] }
 0x994   : > { %v3988_v57 = vpop.permute.xlu0 %3987  ;;  %v4038_v48 = vmul.f32 %v3993_v13, %v3942_v8  ;;  %v4086_v8 = vld [vmem:[#allocation4 + $0x1c0] sm:$0xff] }
 0x995   : > { %v4037_v52 = vmul.f32 %v3988_v57, %v3941_v42  ;;  %v4082_v57 = vld [vmem:[#allocation4 + $0x1a0] sm:$0xff] }
 0x998   : > { %4282 = vrot.lane.b32.xlu2 %v4036_v62, %s5420_s8  ;;  %v3650_v62 = vld [vmem:[#allocation4 + $0x20] sm:$0xff] }
 0x999   : > { %4280 = vrot.lane.b32.xlu1 %v4035_v12, %s5420_s8  ;;  %v3746_v19 = vmul.f32 %v8108_v35, %v3650_v62  ;;  %v3652_v62 = vld [vmem:[#allocation4 + $0x30] sm:$0xff] }
 0x99a   : > { %4278 = vrot.lane.b32.xlu0 %v4034_v53, %s5420_s8  ;;  %v4122_v4 = vpop.permute.xlu2 %4121 }
 0x99b   : > { %v4008_v29 = vpop.permute.xlu1 %4007  ;;  %v4179_v12 = vmul.f32 %v4122_v4, %v4083_v51  ;;  %v3653_v4 = vld [vmem:[#allocation4 + $0x38] sm:$0xff] }
 0x99c   : > { %v4003_v25 = vpop.permute.xlu0 %4002  ;;  %v4041_v21 = vmul.f32 %v4008_v29, %v3945_v45  ;;  %v3749_v35 = vmul.f32 %v8126_v38, %v3653_v4 }
 0x99d   : > { %v4040_v54 = vmul.f32 %v4003_v25, %v3944_v47  ;;  %v4089_v47 = vld [vmem:[#allocation4 + $0x1d8] sm:$0xff] }
 0x9a0   : > { %4288 = vrot.lane.b32.xlu2 %v4039_v43, %s5420_s8  ;;  %v4085_v43 = vld [vmem:[#allocation4 + $0x1b8] sm:$0xff] }
 0x9a1   : > { %4286 = vrot.lane.b32.xlu1 %v4038_v48, %s5420_s8 }
 0x9a2   : > { %4284 = vrot.lane.b32.xlu0 %v4037_v52, %s5420_s8  ;;  %v4137_v55 = vpop.permute.xlu2 %4136  ;;  %v4084_v52 = vld [vmem:[#allocation4 + $0x1b0] sm:$0xff] }
 0x9a3   : > { %v4023_v24 = vpop.permute.xlu1 %4022  ;;  %v4182_v33 = vmul.f32 %v4137_v55, %v4086_v8  ;;  %v3656_v55 = vld [vmem:[#allocation4 + $0x50] sm:$0xff]  ;;  %v3655_v8 = vld [vmem:[#allocation4 + $0x48] sm:$0xff] }
 0x9a4   : > { %v4018_v9 = vpop.permute.xlu0 %4017  ;;  %v4044_v0 = vmul.f32 %v4023_v24, %v3948_v60  ;;  %v3752_v38 = vmul.f32 %v8130_v22, %v3656_v55 }
 0x9a5   : > { %v4043_v37 = vmul.f32 %v4018_v9, %v3947_v56 }
 0x9a8   : > { %4294 = vrot.lane.b32.xlu2 %v4042_v16, %s5420_s8 }
 0x9a9   : > { %4292 = vrot.lane.b32.xlu1 %v4041_v21, %s5420_s8 }
 0x9aa   : > { %4290 = vrot.lane.b32.xlu0 %v4040_v54, %s5420_s8  ;;  %v8169_v40 = vpop.permute.xlu2 %4151  ;;  %v4088_v54 = vld [vmem:[#allocation4 + $0x1d0] sm:$0xff] }
 0x9ab   : > { %v4102_v10 = vpop.permute.xlu1 %4101  ;;  %v4185_v60 = vmul.f32 %v8169_v40, %v4089_v47  ;;  %v4091_v40 = vld [vmem:[#allocation4 + $0x1e8] sm:$0xff] }
 0x9ac   : > { %v4097_v3 = vpop.permute.xlu0 %4096  ;;  %v4175_v6 = vmul.f32 %v4102_v10, %v4079_v14  ;;  %v4087_v10 = vld [vmem:[#allocation4 + $0x1c8] sm:$0xff] }
 0x9ad   : > { %v4174_v18 = vmul.f32 %v4097_v3, %v4078_v41  ;;  %v3646_v3 = vld [vmem:[#allocation4] sm:$0xff] }
 0x9b0   : > { %4300 = vrot.lane.b32.xlu2 %v4045_v30, %s5420_s8 }
 0x9b1   : > { %4298 = vrot.lane.b32.xlu1 %v4044_v0, %s5420_s8  ;;  %v3742_v0 = vmul.f32 %v8118_v11, %v3646_v3 }
 0x9b2   : > { %4296 = vrot.lane.b32.xlu0 %v4043_v37, %s5420_s8  ;;  %v8174_v39 = vpop.permute.xlu2 %4166 }
 0x9b3   : > { %v4117_v34 = vpop.permute.xlu1 %4116  ;;  %v4188_v22 = vmul.f32 %v8174_v39, %v4092_v46  ;;  %v3648_v46 = vld [vmem:[#allocation4 + $0x10] sm:$0xff] }
 0x9b4   : > { %v4112_v31 = vpop.permute.xlu0 %4111  ;;  %v4178_v53 = vmul.f32 %v4117_v34, %v4082_v57 }
 0x9b5   : > { %v4177_v7 = vmul.f32 %v4112_v31, %v4081_v32  ;;  %v4093_v32 = vld [vmem:[#allocation4 + $0x1f8] sm:$0xff] }
 0x9b8   : > { %4338 = vrot.lane.b32.xlu2 %v4176_v5, %s5421_s9  ;;  %v3659_v5 = vld [vmem:[#allocation4 + $0x68] sm:$0xff] }
 0x9b9   : > { %4336 = vrot.lane.b32.xlu1 %v4175_v6, %s5421_s9  ;;  %v3649_v6 = vld [vmem:[#allocation4 + $0x18] sm:$0xff]  ;;  %v3755_v11 = vmul.f32 %v8134_v50, %v3659_v5  ;;  %v3748_v50 = vmul.f32 %v8128_v36, %v3652_v62 }
 0x9ba   : > { %4334 = vrot.lane.b32.xlu0 %v4174_v18, %s5421_s9  ;;  %v4209_v23 = vpop.permute.xlu2 %4208 }
 0x9bb   : > { %v8181_v13 = vsel %vm1402_vm4, %v3743_v44, %v4209_v23  ;;  %v4132_v59 = vpop.permute.xlu1 %4131  ;;  %v3745_v23 = vmul.f32 %v8122_v58, %v3649_v6 }
 0x9bc   : > { %v4127_v2 = vpop.permute.xlu0 %4126  ;;  %v4181_v24 = vmul.f32 %v4132_v59, %v4085_v43 }
 0x9bd   : > { %v4180_v45 = vmul.f32 %v4127_v2, %v4084_v52 }
 0x9c0   : > { %4344 = vrot.lane.b32.xlu2 %v4179_v12, %s5421_s9 }
 0x9c1   : > { %4342 = vrot.lane.b32.xlu1 %v4178_v53, %s5421_s9 }
 0x9c2   : > { %4340 = vrot.lane.b32.xlu0 %v4177_v7, %s5421_s9  ;;  %v4215_v29 = vpop.permute.xlu2 %4214 }
 0x9c3   : > { %v8188_v25 = vsel %vm1402_vm4, %v3746_v19, %v4215_v29  ;;  %v4147_v42 = vpop.permute.xlu1 %4146 }
 0x9c4   : > { %v4142_v48 = vpop.permute.xlu0 %4141  ;;  %v4184_v56 = vmul.f32 %v4147_v42, %v4088_v54  ;;  %v3751_v42 = vmul.f32 %v8132_v1, %v3655_v8  ;;  %v3661_v1 = vld [vmem:[#allocation4 + $0x78] sm:$0xff] }
 0x9c5   : > { %v4183_v30 = vmul.f32 %v4142_v48, %v4087_v10  ;;  %v3757_v54 = vmul.f32 %v8138_v26, %v3661_v1 }
 0x9c8   : > { %4350 = vrot.lane.b32.xlu2 %v4182_v33, %s5421_s9  ;;  %v3658_v33 = vld [vmem:[#allocation4 + $0x60] sm:$0xff] }
 0x9c9   : > { %4348 = vrot.lane.b32.xlu1 %v4181_v24, %s5421_s9  ;;  %v3754_v24 = vmul.f32 %v8136_v63, %v3658_v33 }
 0x9ca   : > { %4346 = vrot.lane.b32.xlu0 %v4180_v45, %s5421_s9  ;;  %v4221_v9 = vpop.permute.xlu2 %4220 }
 0x9cb   : > { %v8195_v16 = vsel %vm1402_vm4, %v3749_v35, %v4221_v9  ;;  %v4162_v21 = vpop.permute.xlu1 %4161 }
 0x9cc   : > { %v4157_v61 = vpop.permute.xlu0 %4156  ;;  %v4187_v18 = vmul.f32 %v4162_v21, %v4091_v40  ;;  %v3744_v40 = vmul.f32 %v8116_v15, %v3648_v46 }
 0x9cd   : > { %v4186_v44 = vmul.f32 %v4157_v61, %v4090_v20 }
 0x9d0   : > { %4356 = vrot.lane.b32.xlu2 %v4185_v60, %s5421_s9 }
 0x9d1   : > { %4354 = vrot.lane.b32.xlu1 %v4184_v56, %s5421_s9 }
 0x9d2   : > { %4352 = vrot.lane.b32.xlu0 %v4183_v30, %s5421_s9  ;;  %v4227_v37 = vpop.permute.xlu2 %4226 }
 0x9d3   : > { %v8204_v34 = vsel %vm1402_vm4, %v3752_v38, %v4227_v37  ;;  %v4207_v14 = vpop.permute.xlu1 %4206 }
 0x9d4   : > { %v4382_v31 = vsel %vm1402_vm4, %v3742_v0, %v4207_v14  ;;  %v4172_v41 = vpop.permute.xlu0 %4171 }
 0x9d5   : > { %v4189_v12 = vmul.f32 %v4172_v41, %v4093_v32 }
 0x9d8   : > { %4362 = vrot.lane.b32.xlu2 %v4188_v22, %s5421_s9 }
 0x9d9   : > { %4360 = vrot.lane.b32.xlu1 %v4187_v18, %s5421_s9  ;;  %v3651_v18 = vld [vmem:[#allocation4 + $0x28] sm:$0xff] }
 0x9da   : > { %4358 = vrot.lane.b32.xlu0 %v4186_v44, %s5421_s9  ;;  %v4233_v51 = vpop.permute.xlu2 %4232 }
 0x9db   : > { %v8214_v59 = vsel %vm1402_vm4, %v3755_v11, %v4233_v51  ;;  %v4213_v57 = vpop.permute.xlu1 %4212 }
 0x9dc   : > { %v4385_v39 = vsel %vm1402_vm4, %v3745_v23, %v4213_v57  ;;  %v4211_v2 = vpop.permute.xlu0 %4210  ;;  %v3747_v23 = vmul.f32 %v8110_v17, %v3651_v18 }
 0x9dd   : > { %v4384_v41 = vsel %vm1402_vm4, %v3744_v40, %v4211_v2  ;;  %v3660_v40 = vld [vmem:[#allocation4 + $0x70] sm:$0xff] }
 0x9e2   : > { %4364 = vrot.lane.b32.xlu0 %v4189_v12, %s5421_s9  ;;  %v4271_v53 = vpop.permute.xlu2 %4270  ;;  %v3654_v12 = vld [vmem:[#allocation4 + $0x40] sm:$0xff] }
 0x9e3   : > { %v8220_v58 = vsel %vm4398_vm2, %v4382_v31, %v4271_v53  ;;  %v4219_v7 = vpop.permute.xlu1 %4218  ;;  %v8252_v31 = vld [vmem:[%s8368_s4] ss:$0 sm:$0xff] }
 0x9e4   : > { %v4388_v19 = vsel %vm1402_vm4, %v3748_v50, %v4219_v7  ;;  %v4217_v29 = vpop.permute.xlu0 %4216 }
 0x9e5   : > { %v4387_v57 = vsel %vm1402_vm4, %v3747_v23, %v4217_v29 }
 0x9ea   : > { %v4277_v43 = vpop.permute.xlu2 %4276 }
 0x9eb   : > { %v8225_v48 = vsel %vm4398_vm2, %v4385_v39, %v4277_v43  ;;  %v4225_v52 = vpop.permute.xlu1 %4224 }
 0x9ec   : > { %v4391_v36 = vsel %vm1402_vm4, %v3751_v42, %v4225_v52  ;;  %v4223_v4 = vpop.permute.xlu0 %4222 }
 0x9f2   : > { %v4283_v45 = vpop.permute.xlu2 %4282 }
 0x9f3   : > { %v8230_v35 = vsel %vm4398_vm2, %v4388_v19, %v4283_v45  ;;  %v4231_v9 = vpop.permute.xlu1 %4230  ;;  %v3750_v19 = vmul.f32 %v8112_v27, %v3654_v12  ;;  %v3657_v45 = vld [vmem:[#allocation4 + $0x58] sm:$0xff] }
 0x9f4   : > { %v4394_v47 = vsel %vm1402_vm4, %v3754_v24, %v4231_v9  ;;  %v4229_v21 = vpop.permute.xlu0 %4228 }
 0x9f5   : > { %v4390_v29 = vsel %vm1402_vm4, %v3750_v19, %v4223_v4  ;;  %v3753_v4 = vmul.f32 %v8114_v49, %v3657_v45 }
 0x9fa   : > { %v4289_v61 = vpop.permute.xlu2 %4288 }
 0x9fb   : > { %v8235_v10 = vsel %vm4398_vm2, %v4391_v36, %v4289_v61  ;;  %v4237_v55 = vpop.permute.xlu1 %4236  ;;  %v4393_v61 = vsel %vm1402_vm4, %v3753_v4, %v4229_v21 }
 0x9fc   : > { %v4397_v60 = vsel %vm1402_vm4, %v3757_v54, %v4237_v55  ;;  %v8238_v3 = vpop.permute.xlu0 %4234 }
 0xa02   : > { %v4295_v63 = vpop.permute.xlu2 %4294 }
 0xa03   : > { %v8241_v56 = vsel %vm4398_vm2, %v4394_v47, %v4295_v63  ;;  %v4275_v30 = vpop.permute.xlu1 %4274 }
 0xa04   : > { %v4273_v38 = vpop.permute.xlu0 %4272  ;;  %v4401_v20 = vsel %vm4398_vm2, %v4384_v41, %v4275_v30 }
 0xa05   : > { %v4400_v30 = vsel %vm4398_vm2, %v8181_v13, %v4273_v38  ;;  %v3756_v13 = vmul.f32 %v8120_v28, %v3660_v40 }
 0xa07   : > { %v4396_v23 = vsel %vm1402_vm4, %v3756_v13, %v8238_v3 }
 0xa0a   : > { %v4301_v0 = vpop.permute.xlu2 %4300 }
 0xa0b   : > { %v8244_v37 = vsel %vm4398_vm2, %v4397_v60, %v4301_v0  ;;  %v4281_v26 = vpop.permute.xlu1 %4280 }
 0xa0c   : > { %v8246_v14 = vpop.permute.xlu0 %4278  ;;  %v4404_v39 = vsel %vm4398_vm2, %v4387_v57, %v4281_v26 }
 0xa0d   : > { %v4403_v28 = vsel %vm4398_vm2, %v8188_v25, %v8246_v14 }
 0xa12   : > { %v4339_v5 = vpop.permute.xlu2 %4338 }
 0xa13   : > { %v4418_v22 = vsel %vm4415_vm9, %v4401_v20, %v4339_v5  ;;  %v4287_v6 = vpop.permute.xlu1 %4286 }
 0xa14   : > { %v4438_v44 = vadd.f32 %v8252_v31, %v4418_v22  ;;  %v8258_v11 = vpop.permute.xlu0 %4284  ;;  %v4407_v43 = vsel %vm4398_vm2, %v4390_v29, %v4287_v6 }
 0xa16   : > { %v4470_v15 = vmin.f32 %v4438_v44, 0.0  ;;  %vm4454_vm10 = vcmp.gt.f32.partialorder %v4438_v44, 0.0 }
 0xa18   : > { %v4488_v51 = vmul.f32 1.442695, %v4470_v15 }
 0xa1a   : > { %5321 = vpow2.f32 %v4488_v51  ;;  %v4345_v2 = vpop.permute.xlu2 %4344 }
 0xa1b   : > { %v4421_v32 = vsel %vm4415_vm9, %v4404_v39, %v4345_v2  ;;  %v4293_v62 = vpop.permute.xlu1 %4292 }
 0xa1c   : > { %v4441_v50 = vadd.f32 %v8252_v31, %v4421_v32  ;;  %v8265_v53 = vpop.permute.xlu0 %4290  ;;  %v4410_v60 = vsel %vm4398_vm2, %v4393_v61, %v4293_v62 }
 0xa1e   : > { %v4473_v7 = vmin.f32 %v4441_v50, 0.0  ;;  %vm4457_vm11 = vcmp.gt.f32.partialorder %v4441_v50, 0.0 }
 0xa20   : > { %v5322_v17 = vpop.eup %5321  ;;  %v4494_v8 = vmul.f32 1.442695, %v4473_v7 }
 0xa21   : > { %v4729_v42 = vadd.f32 -1.0, %v5322_v17 }
 0xa22   : > { %5323 = vpow2.f32 %v4494_v8  ;;  %v4351_v52 = vpop.permute.xlu2 %4350 }
 0xa23   : > { %v4534_v36 = vsel %vm4454_vm10, %v4438_v44, %v4729_v42  ;;  %v4424_v33 = vsel %vm4415_vm9, %v4407_v43, %v4351_v52  ;;  %v4299_v24 = vpop.permute.xlu1 %4298 }
 0xa24   : > { %4550 = vst [vmem:[%s5555_s7 + $0x10] sm:$0xff] %v4534_v36  ;;  %v4444_v9 = vadd.f32 %v8252_v31, %v4424_v33  ;;  %v8273_v47 = vpop.permute.xlu0 %4296  ;;  %v4413_v39 = vsel %vm4398_vm2, %v4396_v23, %v4299_v24  ;;  %v4406_v36 = vsel %vm4398_vm2, %v8195_v16, %v8258_v11 }
 0xa26   : > { %v4476_v27 = vmin.f32 %v4444_v9, 0.0  ;;  %vm4460_vm12 = vcmp.gt.f32.partialorder %v4444_v9, 0.0 }
 0xa28   : > { %v5324_v1 = vpop.eup %5323  ;;  %v4500_v54 = vmul.f32 1.442695, %v4476_v27 }
 0xa29   : > { %v4732_v55 = vadd.f32 -1.0, %v5324_v1 }
 0xa2a   : > { %5325 = vpow2.f32 %v4500_v54  ;;  %v4357_v63 = vpop.permute.xlu2 %4356 }
 0xa2b   : > { %v4537_v0 = vsel %vm4457_vm11, %v4441_v50, %v4732_v55  ;;  %v4427_v26 = vsel %vm4415_vm9, %v4410_v60, %v4357_v63  ;;  %v4337_v46 = vpop.permute.xlu1 %4336 }
 0xa2c   : > { %4553 = vst [vmem:[%s5555_s7 + $0x28] sm:$0xff] %v4537_v0  ;;  %v4447_v49 = vadd.f32 %v8252_v31, %v4427_v26  ;;  %v4417_v41 = vsel %vm4415_vm9, %v4400_v30, %v4337_v46  ;;  %v4335_v21 = vpop.permute.xlu0 %4334 }
 0xa2d   : > { %v4437_v20 = vadd.f32 %v8252_v31, %v4417_v41  ;;  %v4416_v5 = vsel %vm4415_vm9, %v8220_v58, %v4335_v21  ;;  %v4409_v21 = vsel %vm4398_vm2, %v8204_v34, %v8265_v53 }
 0xa2e   : > { %v4479_v22 = vmin.f32 %v4447_v49, 0.0  ;;  %v4436_v6 = vadd.f32 %v8252_v31, %v4416_v5  ;;  %vm4463_vm4 = vcmp.gt.f32.partialorder %v4447_v49, 0.0 }
 0xa2f   : > { %v4469_v38 = vmin.f32 %v4437_v20, 0.0  ;;  %vm4453_vm13 = vcmp.gt.f32.partialorder %v4437_v20, 0.0 }
 0xa30   : > { %v5326_v18 = vpop.eup %5325  ;;  %v4506_v44 = vmul.f32 1.442695, %v4479_v22  ;;  %v4468_v15 = vmin.f32 %v4436_v6, 0.0  ;;  %vm4452_vm14 = vcmp.gt.f32.partialorder %v4436_v6, 0.0 }
 0xa31   : > { %v4735_v51 = vadd.f32 -1.0, %v5326_v18  ;;  %v4486_v57 = vmul.f32 1.442695, %v4469_v38 }
 0xa32   : > { %5327 = vpow2.f32 %v4506_v44  ;;  %v4484_v58 = vmul.f32 1.442695, %v4468_v15  ;;  %v4363_v2 = vpop.permute.xlu2 %4362 }
 0xa33   : > { %v4540_v32 = vsel %vm4460_vm12, %v4444_v9, %v4735_v51  ;;  %5329 = vpow2.f32 %v4486_v57  ;;  %v4430_v62 = vsel %vm4415_vm9, %v4413_v39, %v4363_v2  ;;  %v4343_v12 = vpop.permute.xlu1 %4342 }
 0xa34   : > { %4556 = vst [vmem:[%s5555_s7 + $0x40] sm:$0xff] %v4540_v32  ;;  %5331 = vpow2.f32 %v4484_v58  ;;  %v4450_v3 = vadd.f32 %v8252_v31, %v4430_v62  ;;  %v4420_v50 = vsel %vm4415_vm9, %v4403_v28, %v4343_v12  ;;  %v4341_v7 = vpop.permute.xlu0 %4340  ;;  %v4412_v32 = vsel %vm4398_vm2, %v8214_v59, %v8273_v47 }
 0xa35   : > { %v4440_v19 = vadd.f32 %v8252_v31, %v4420_v50  ;;  %v4419_v17 = vsel %vm4415_vm9, %v8225_v48, %v4341_v7 }
 0xa36   : > { %v4482_v8 = vmin.f32 %v4450_v3, 0.0  ;;  %v4439_v25 = vadd.f32 %v8252_v31, %v4419_v17  ;;  %vm4466_vm15 = vcmp.gt.f32.partialorder %v4450_v3, 0.0 }
 0xa37   : > { %v4472_v14 = vmin.f32 %v4440_v19, 0.0  ;;  %vm4456_vm0 = vcmp.gt.f32.partialorder %v4440_v19, 0.0 }
 0xa38   : > { %v5328_v29 = vpop.eup %5327  ;;  %v4512_v42 = vmul.f32 1.442695, %v4482_v8  ;;  %v4471_v43 = vmin.f32 %v4439_v25, 0.0  ;;  %vm4455_vm1 = vcmp.gt.f32.partialorder %v4439_v25, 0.0 }
 0xa39   : > { %v5330_v52 = vpop.eup %5329  ;;  %v4738_v33 = vadd.f32 -1.0, %v5328_v29  ;;  %v4492_v24 = vmul.f32 1.442695, %v4472_v14 }
 0xa3a   : > { %v5332_v45 = vpop.eup %5331  ;;  %v4728_v9 = vadd.f32 -1.0, %v5330_v52  ;;  %5333 = vpow2.f32 %v4512_v42  ;;  %v4490_v48 = vmul.f32 1.442695, %v4471_v43 }
 0xa3b   : > { %v4543_v27 = vsel %vm4463_vm4, %v4447_v49, %v4738_v33  ;;  %v4727_v4 = vadd.f32 -1.0, %v5332_v45  ;;  %5335 = vpow2.f32 %v4492_v24  ;;  %v4349_v1 = vpop.permute.xlu1 %4348 }
 0xa3c   : > { %4559 = vst [vmem:[%s5555_s7 + $0x58] sm:$0xff] %v4543_v27  ;;  %v4533_v54 = vsel %vm4453_vm13, %v4437_v20, %v4728_v9  ;;  %5337 = vpow2.f32 %v4490_v48  ;;  %v4423_v16 = vsel %vm4415_vm9, %v4406_v36, %v4349_v1  ;;  %v4347_v11 = vpop.permute.xlu0 %4346 }
 0xa3d   : > { %4549 = vst [vmem:[%s5555_s7 + $0x8] sm:$0xff] %v4533_v54  ;;  %v4532_v61 = vsel %vm4452_vm14, %v4436_v6, %v4727_v4  ;;  %v4443_v55 = vadd.f32 %v8252_v31, %v4423_v16  ;;  %v4422_v60 = vsel %vm4415_vm9, %v8230_v35, %v4347_v11 }
 0xa3e   : > { %4548 = vst [vmem:[%s5555_s7] sm:$0xff] %v4532_v61  ;;  %v4442_v63 = vadd.f32 %v8252_v31, %v4422_v60 }
 0xa3f   : > { %v4475_v30 = vmin.f32 %v4443_v55, 0.0  ;;  %vm4459_vm3 = vcmp.gt.f32.partialorder %v4443_v55, 0.0 }
 0xa40   : > { %v5334_v0 = vpop.eup %5333  ;;  %v4474_v26 = vmin.f32 %v4442_v63, 0.0  ;;  %vm4458_vm5 = vcmp.gt.f32.partialorder %v4442_v63, 0.0 }
 0xa41   : > { %v5336_v46 = vpop.eup %5335  ;;  %v4741_v40 = vadd.f32 -1.0, %v5334_v0  ;;  %v4498_v49 = vmul.f32 1.442695, %v4475_v30 }
 0xa42   : > { %v5338_v41 = vpop.eup %5337  ;;  %v4731_v20 = vadd.f32 -1.0, %v5336_v46  ;;  %v4496_v5 = vmul.f32 1.442695, %v4474_v26 }
 0xa43   : > { %v4546_v35 = vsel %vm4466_vm15, %v4450_v3, %v4741_v40  ;;  %v4730_v22 = vadd.f32 -1.0, %v5338_v41  ;;  %5339 = vpow2.f32 %v4498_v49  ;;  %v4355_v6 = vpop.permute.xlu1 %4354 }
 0xa44   : > { %4562 = vst [vmem:[%s5555_s7 + $0x70] sm:$0xff] %v4546_v35  ;;  %v4536_v13 = vsel %vm4456_vm0, %v4440_v19, %v4731_v20  ;;  %5341 = vpow2.f32 %v4496_v5  ;;  %v4426_v38 = vsel %vm4415_vm9, %v4409_v21, %v4355_v6  ;;  %v4353_v18 = vpop.permute.xlu0 %4352 }
 0xa45   : > { %4552 = vst [vmem:[%s5555_s7 + $0x20] sm:$0xff] %v4536_v13  ;;  %v4535_v44 = vsel %vm4455_vm1, %v4439_v25, %v4730_v22  ;;  %v4446_v34 = vadd.f32 %v8252_v31, %v4426_v38  ;;  %v4425_v53 = vsel %vm4415_vm9, %v8235_v10, %v4353_v18 }
 0xa46   : > { %4551 = vst [vmem:[%s5555_s7 + $0x18] sm:$0xff] %v4535_v44  ;;  %v4445_v15 = vadd.f32 %v8252_v31, %v4425_v53 }
 0xa47   : > { %v4478_v23 = vmin.f32 %v4446_v34, 0.0  ;;  %vm4462_vm6 = vcmp.gt.f32.partialorder %v4446_v34, 0.0 }
 0xa48   : > { %v4477_v51 = vmin.f32 %v4445_v15, 0.0  ;;  %vm4461_vm7 = vcmp.gt.f32.partialorder %v4445_v15, 0.0 }
 0xa49   : > { %v5340_v57 = vpop.eup %5339  ;;  %v4504_v39 = vmul.f32 1.442695, %v4478_v23 }
 0xa4a   : > { %v5342_v58 = vpop.eup %5341  ;;  %v4734_v2 = vadd.f32 -1.0, %v5340_v57  ;;  %v4502_v28 = vmul.f32 1.442695, %v4477_v51 }
 0xa4b   : > { %v4733_v62 = vadd.f32 -1.0, %v5342_v58  ;;  %5343 = vpow2.f32 %v4504_v39  ;;  %v4361_v10 = vpop.permute.xlu1 %4360 }
 0xa4c   : > { %v4539_v12 = vsel %vm4459_vm3, %v4443_v55, %v4734_v2  ;;  %5345 = vpow2.f32 %v4502_v28  ;;  %v4429_v3 = vsel %vm4415_vm9, %v4412_v32, %v4361_v10  ;;  %v4359_v50 = vpop.permute.xlu0 %4358 }
 0xa4d   : > { %4555 = vst [vmem:[%s5555_s7 + $0x38] sm:$0xff] %v4539_v12  ;;  %v4538_v7 = vsel %vm4458_vm5, %v4442_v63, %v4733_v62  ;;  %v4449_v19 = vadd.f32 %v8252_v31, %v4429_v3  ;;  %v4428_v17 = vsel %vm4415_vm9, %v8241_v56, %v4359_v50 }
 0xa4e   : > { %4554 = vst [vmem:[%s5555_s7 + $0x30] sm:$0xff] %v4538_v7  ;;  %v4448_v59 = vadd.f32 %v8252_v31, %v4428_v17 }
 0xa4f   : > { %v4481_v47 = vmin.f32 %v4449_v19, 0.0  ;;  %vm4465_vm8 = vcmp.gt.f32.partialorder %v4449_v19, 0.0 }
 0xa50   : > { %v4480_v8 = vmin.f32 %v4448_v59, 0.0  ;;  %vm4464_vm2 = vcmp.gt.f32.partialorder %v4448_v59, 0.0 }
 0xa51   : > { %v5344_v25 = vpop.eup %5343  ;;  %v4510_v14 = vmul.f32 1.442695, %v4481_v47 }
 0xa52   : > { %v5346_v29 = vpop.eup %5345  ;;  %v4737_v42 = vadd.f32 -1.0, %v5344_v25  ;;  %v4508_v43 = vmul.f32 1.442695, %v4480_v8 }
 0xa53   : > { %v4736_v52 = vadd.f32 -1.0, %v5346_v29  ;;  %5347 = vpow2.f32 %v4510_v14 }
 0xa54   : > { %v4542_v36 = vsel %vm4462_vm6, %v4446_v34, %v4737_v42  ;;  %5349 = vpow2.f32 %v4508_v43  ;;  %v4365_v33 = vpop.permute.xlu0 %4364 }
 0xa55   : > { %4558 = vst [vmem:[%s5555_s7 + $0x50] sm:$0xff] %v4542_v36  ;;  %v4541_v56 = vsel %vm4461_vm7, %v4445_v15, %v4736_v52  ;;  %v4431_v24 = vsel %vm4415_vm9, %v8244_v37, %v4365_v33 }
 0xa56   : > { %4557 = vst [vmem:[%s5555_s7 + $0x48] sm:$0xff] %v4541_v56  ;;  %v4451_v45 = vadd.f32 %v8252_v31, %v4431_v24 }
 0xa58   : > { %v4483_v9 = vmin.f32 %v4451_v45, 0.0  ;;  %vm4467_vm9 = vcmp.gt.f32.partialorder %v4451_v45, 0.0 }
 0xa59   : > { %v5348_v48 = vpop.eup %5347 }
 0xa5a   : > { %v5350_v27 = vpop.eup %5349  ;;  %v4740_v4 = vadd.f32 -1.0, %v5348_v48  ;;  %v4514_v1 = vmul.f32 1.442695, %v4483_v9 }
 0xa5b   : > { %v4739_v54 = vadd.f32 -1.0, %v5350_v27 }
 0xa5c   : > { %v4545_v16 = vsel %vm4465_vm8, %v4449_v19, %v4740_v4  ;;  %5351 = vpow2.f32 %v4514_v1 }
 0xa5d   : > { %4561 = vst [vmem:[%s5555_s7 + $0x68] sm:$0xff] %v4545_v16  ;;  %v4544_v11 = vsel %vm4464_vm2, %v4448_v59, %v4739_v54 }
 0xa5e   : > { %4560 = vst [vmem:[%s5555_s7 + $0x60] sm:$0xff] %v4544_v11 }
 0xa62   : > { %v5352_v61 = vpop.eup %5351 }
 0xa63   : > { %v4742_v55 = vadd.f32 -1.0, %v5352_v61 }
 0xa65   : > { %v4547_v37 = vsel %vm4467_vm9, %v4451_v45, %v4742_v55 }
 0xa66   : > { %4563 = vst [vmem:[%s5555_s7 + $0x78] sm:$0xff] %v4547_v37 }
 0xa67 PF: > { %s15_s24 = sadd.s32 1, %s5407_s24   ;;  %s8629_s18 = smov %s5387_s19 }
 0xa68   : > { %p12_p1 = scmp.ge.s32.totalorder %s15_s24, 6   ;;  %s8630_s19 = smov %s5503_s6 }
 0xa69   : > { %s8631_s20 = smov %s5399_s22  ;;  %s8632_s21 = smov %s5403_s23 }
 0xa6a   : > { %s8633_s22 = smov %s8636_s25  ;;  %s8634_s23 = smov %s8640_s26 }
 0xa6b   :  { %14 = sbr.rel (!%p12_p1) target bundleno = 4 (0x4), region = 142 }

</bundles_post_ra>
